<compile_context>
chip_gen: v5e
topology: v5e:2x2
jax: 0.10.0
libtpu: 0.0.40
codegen_flags: <defaults>
</compile_context>

<pallas_src>
import functools

import jax
import jax.numpy as jnp
import numpy as np
from jax import lax
from jax.experimental import pallas as pl
from jax.experimental.pallas import tpu as pltpu

LANE = 128   # channel axis padded to a multiple of the TPU lane width
K = 3        # ResidualBlock uses 3x3 convs with padding=1


def _round_up(x, m):
    return (x + m - 1) // m * m


def _choose_row_tile(H, W, CP, N, budget_bytes=16 << 20):
    """Largest divisor of H whose per-step VMEM working set fits the budget,
    then split further (if possible) so the grid has >= 4 steps to pipeline."""
    Wp = W + 2 * (K - 1)

    def resident(th):
        return (2 * (th + 4) * Wp * CP * 4          # double-buffered input slab (f32)
                + 2 * th * W * CP * 4               # double-buffered output block (f32)
                + 3 * (th + 2) * (W + 2) * CP * 4)  # conv1 acc + masked y1 + conv2 acc

    th = 1
    for cand in range(H, 0, -1):
        if H % cand == 0 and resident(cand) <= budget_bytes:
            th = cand
            break
    min_steps = 4
    if N * (H // th) < min_steps:
        need_r = -(-min_steps // max(N, 1))         # ceil(min_steps / N)
        for cand in range(th, 0, -1):
            if H % cand == 0 and H // cand >= need_r:
                th = cand
                break
    return th


# ----------------------------------------------------------------------------
# Fused ResidualBlock kernel: one (batch n, row-tile r) slab per grid step.
#   x_hbm  : (N, H+4, W+4, CP) f32  full input in HBM (pl.ANY), 2-px zero halo
#   w1_ref : (9, CP, CP)       bf16 conv1 weight per tap, BN1 scale folded in
#   b1_ref : (1, CP)           f32  BN1 folded bias
#   w2_ref : (9, CP, CP)       bf16 conv2 weight per tap, BN2 scale folded in
#   b2_ref : (1, CP)           f32  BN2 folded bias
#   o_ref  : (1, TH, W, CP)    f32  output row tile
#   xbuf   : (2, TH+4, W+4, CP) f32 VMEM double buffer for the input slab
#   sem    : DMA semaphores (2,)
# ----------------------------------------------------------------------------
def _residual_block_kernel(x_hbm, w1_ref, b1_ref, w2_ref, b2_ref, o_ref,
                           xbuf, sem, *, H, W, TH, CP):
    n = pl.program_id(0)
    r = pl.program_id(1)
    num_r = pl.num_programs(1)
    halo = K - 1                     # 2
    rows = TH + 2 * halo             # input slab rows

    def slab_copy(row_tile, slot):
        # rows [row_tile*TH, row_tile*TH + TH + 4) of the 2-px padded image n
        return pltpu.make_async_copy(
            x_hbm.at[n, pl.ds(row_tile * TH, rows)],
            xbuf.at[slot],
            sem.at[slot])

    slot = r % 2
    # Prime the pipeline on the first row tile handled for this image.
    @pl.when(r == 0)
    def _():
        slab_copy(r, slot).start()

    # Wait for the current slab (issued above at r==0, else prefetched last step).
    slab_copy(r, slot).wait()

    # Prefetch the next row tile's slab while we compute this one.
    @pl.when(r + 1 < num_r)
    def _():
        slab_copy(r + 1, 1 - slot).start()

    xs = xbuf[slot]                          # (rows, W+4, CP) f32
    xb = xs.astype(jnp.bfloat16)             # one bf16 cast shared by all 9 taps

    # ---- conv1 (+ folded BN1) + ReLU over the (TH+2, W+2) halo region ----------
    # TODO(synk): on v6e/v7x, pairing taps into a 256-deep contraction and/or using
    # flattened contiguous row-window slices would cut relayouts / MXU underfill;
    # kept the simple per-tap K=128 scheme (native for v5e) pending measurement.
    m1 = (TH + 2) * (W + 2)
    acc1 = jnp.zeros((m1, CP), jnp.float32)
    for dy in range(K):
        for dx in range(K):
            patch = xb[dy:dy + TH + 2, dx:dx + W + 2, :].reshape(m1, CP)
            acc1 = acc1 + jnp.dot(patch, w1_ref[dy * K + dx],
                                  preferred_element_type=jnp.float32)
    y1 = jnp.maximum(acc1 + b1_ref[...], 0.0).reshape(TH + 2, W + 2, CP)

    # conv2 has padding=1: its input is conv1's output zero-padded by one pixel.
    # Halo positions that fall outside the real image are exactly that zero ring,
    # so mask them in-place (no VMEM staging buffer, no zero fill, no reload).
    li = lax.broadcasted_iota(jnp.int32, (TH + 2, W + 2, 1), 0)
    lj = lax.broadcasted_iota(jnp.int32, (TH + 2, W + 2, 1), 1)
    g_row = r * TH - 1 + li                        # global conv1 output row
    valid = (g_row >= 0) & (g_row < H) & (lj >= 1) & (lj <= W)
    y1 = jnp.where(valid, y1, 0.0).astype(jnp.bfloat16)

    # ---- conv2 (+ folded BN2) + residual + ReLU over (TH, W) -------------------
    m2 = TH * W
    acc2 = jnp.zeros((m2, CP), jnp.float32)
    for dy in range(K):
        for dx in range(K):
            patch = y1[dy:dy + TH, dx:dx + W, :].reshape(m2, CP)
            acc2 = acc2 + jnp.dot(patch, w2_ref[dy * K + dx],
                                  preferred_element_type=jnp.float32)
    resid = xs[halo:halo + TH, halo:halo + W, :].reshape(m2, CP)   # original x, f32
    out = jnp.maximum(acc2 + b2_ref[...] + resid, 0.0)
    o_ref[0] = out.reshape(TH, W, CP).astype(o_ref.dtype)


# ----------------------------------------------------------------------------
# Wrapper (NCHW in / NCHW out, like PyTorch).
# ----------------------------------------------------------------------------
def residual_block_forward(x_nchw, params, row_tile=None):
    w1, b1, w2, b2 = params["w1"], params["b1"], params["w2"], params["b2"]
    CP = w1.shape[-1]
    N, C, H, W = x_nchw.shape
    halo = K - 1

    TH = row_tile if row_tile is not None else _choose_row_tile(H, W, CP, N)
    assert H % TH == 0, "row tile must divide H"
    R = H // TH
    Wp = W + 2 * halo

    # NHWC, +2 spatial halo (conv1 'same' pad + conv2 halo), lane-pad channels to CP.
    # TODO(synk): for very small C the CP channel pad inflates input HBM traffic;
    # feeding raw C and padding in-kernel (or a packed K*K*C<=128 contraction, i.e.
    # mini im2col) would remove it.  TODO(synk): bf16 HBM input/output would halve
    # activation traffic if the accuracy budget allows.
    x = jnp.transpose(x_nchw, (0, 2, 3, 1))
    x = jnp.pad(x, ((0, 0), (halo, halo), (halo, halo), (0, CP - C)))

    kernel = functools.partial(_residual_block_kernel, H=H, W=W, TH=TH, CP=CP)

    flops = 2 * K * K * CP * CP * N * R * ((TH + 2) * (W + 2) + TH * W)
    bytes_accessed = (N * R * (TH + 2 * halo) * Wp * CP * 4
                      + (w1.size + w2.size) * 2 + (b1.size + b2.size) * 4
                      + N * H * W * CP * 4)

    # TODO(synk): weight/bias BlockSpecs could use pipeline_mode=pl.Buffered(1)
    # (constant index) to save one pipeline buffer each; left default for safety.
    out = pl.pallas_call(
        kernel,
        out_shape=jax.ShapeDtypeStruct((N, H, W, CP), jnp.float32),
        grid=(N, R),
        in_specs=[
            pl.BlockSpec(memory_space=pl.ANY),                       # x stays in HBM
            pl.BlockSpec((K * K, CP, CP), lambda n, r: (0, 0, 0)),   # folded conv1 w
            pl.BlockSpec((1, CP), lambda n, r: (0, 0)),              # folded BN1 bias
            pl.BlockSpec((K * K, CP, CP), lambda n, r: (0, 0, 0)),   # folded conv2 w
            pl.BlockSpec((1, CP), lambda n, r: (0, 0)),              # folded BN2 bias
        ],
        out_specs=pl.BlockSpec((1, TH, W, CP), lambda n, r: (n, r, 0, 0)),
        scratch_shapes=[
            pltpu.VMEM((2, TH + 2 * halo, Wp, CP), jnp.float32),     # dbl-buf slab
            pltpu.SemaphoreType.DMA((2,)),
        ],
        compiler_params=pltpu.CompilerParams(
            dimension_semantics=("parallel", "arbitrary"),
            vmem_limit_bytes=48 * 1024 * 1024),
        cost_estimate=pl.CostEstimate(flops=flops, transcendentals=0,
                                      bytes_accessed=bytes_accessed),
    )(x, w1, b1, w2, b2)

    out = out[..., :C]                                               # drop lane pad
    return jnp.transpose(out, (0, 3, 1, 2))                          # NHWC -> NCHW


# ----------------------------------------------------------------------------
# Deterministic synthetic parameters + BN folding (eps=0.001 as in the module).
# TODO(synk): BatchNorm uses running statistics (inference mode); training-mode
# batch statistics are not implemented in-kernel.
# ----------------------------------------------------------------------------
def _make_bn(key, c):
    k1, k2, k3, k4 = jax.random.split(key, 4)
    gamma = 1.0 + 0.1 * jax.random.normal(k1, (c,), jnp.float32)
    beta = 0.1 * jax.random.normal(k2, (c,), jnp.float32)
    rmean = 0.1 * jax.random.normal(k3, (c,), jnp.float32)
    rvar = 1.0 + 0.1 * jnp.abs(jax.random.normal(k4, (c,), jnp.float32))
    return gamma, beta, rmean, rvar


def _fold(conv_w_oihw, bn, eps, cp):
    """Fold BN scale into conv weights; pad channels to cp; per-tap bf16 layout."""
    gamma, beta, rmean, rvar = bn
    cout, cin, k, _ = conv_w_oihw.shape
    scale = gamma / jnp.sqrt(rvar + eps)                      # (cout,)
    w = jnp.transpose(conv_w_oihw, (2, 3, 1, 0)) * scale      # (Kh,Kw,Cin,Cout)
    bias = beta - scale * rmean                               # (cout,)
    w = jnp.pad(w, ((0, 0), (0, 0), (0, cp - cin), (0, cp - cout)))
    bias = jnp.pad(bias, (0, cp - cout))
    return (w.reshape(k * k, cp, cp).astype(jnp.bfloat16),
            bias.reshape(1, cp).astype(jnp.float32))


def init_residual_block_params(key, channels):
    cp = max(LANE, _round_up(channels, LANE))
    k1, k2, k3, k4 = jax.random.split(key, 4)
    w1 = 0.1 * jax.random.normal(k1, (channels, channels, K, K), jnp.float32)  # OIHW
    bn1 = _make_bn(k2, channels)
    w2 = 0.1 * jax.random.normal(k3, (channels, channels, K, K), jnp.float32)
    bn2 = _make_bn(k4, channels)
    w1f, b1f = _fold(w1, bn1, 0.001, cp)
    w2f, b2f = _fold(w2, bn2, 0.001, cp)
    params = {"w1": w1f, "b1": b1f, "w2": w2f, "b2": b2f}
    raw = {"w1": w1, "bn1": bn1, "w2": w2, "bn2": bn2}
    return params, raw


# ----------------------------------------------------------------------------
# Pure-JAX reference (f32) for a correctness sanity check.
# ----------------------------------------------------------------------------
def _reference_forward(x_nchw, raw):
    def conv(x, w):
        return jax.lax.conv_general_dilated(
            x, w, window_strides=(1, 1), padding=((1, 1), (1, 1)),
            dimension_numbers=("NCHW", "OIHW", "NCHW"))

    def bn(x, p, eps):
        gamma, beta, rmean, rvar = p
        s = gamma / jnp.sqrt(rvar + eps)
        return x * s[None, :, None, None] + (beta - s * rmean)[None, :, None, None]

    y = jax.nn.relu(bn(conv(x_nchw, raw["w1"]), raw["bn1"], 0.001))
    y = bn(conv(y, raw["w2"]), raw["bn2"], 0.001)
    return jax.nn.relu(y + x_nchw)


if __name__ == "__main__":
    key = jax.random.PRNGKey(0)
    k_params, k_x = jax.random.split(key)

    N, C, H, W = 2, 4, 16, 16
    params, raw = init_residual_block_params(k_params, C)
    x = jax.random.normal(k_x, (N, C, H, W), jnp.float32)

    fwd = jax.jit(residual_block_forward)
    out = jax.block_until_ready(fwd(x, params))
    assert out.shape == (N, C, H, W)

    ref = jax.block_until_ready(_reference_forward(x, raw))
    np.testing.assert_allclose(np.asarray(out), np.asarray(ref), atol=5e-2, rtol=5e-2)

    print("KERNEL_OK")
</pallas_src>

<mosaic_0001>
module attributes {stable_mosaic.version = 11 : i64} {
  func.func @_residual_block_kernel(%arg0: i32, %arg1: i32, %arg2: memref<2x20x20x128xf32, #tpu.memory_space<any>>, %arg3: memref<9x128x128xbf16, #tpu.memory_space<vmem>>, %arg4: memref<1x128xf32, #tpu.memory_space<vmem>>, %arg5: memref<9x128x128xbf16, #tpu.memory_space<vmem>>, %arg6: memref<1x128xf32, #tpu.memory_space<vmem>>, %arg7: memref<1x8x16x128xf32, #tpu.memory_space<vmem>>, %arg8: memref<2x12x20x128xf32, #tpu.memory_space<vmem>>, %arg9: memref<2x!tpu.dma_semaphore, #tpu.memory_space<semaphore_mem>>) attributes {dimension_semantics = [#tpu.dimension_semantics<parallel>, #tpu.dimension_semantics<arbitrary>], iteration_bounds = array<i64: 2, 2>, scalar_prefetch = 0 : i64, scratch_operands = 2 : i64, tpu.core_type = #tpu.core_type<tc>, window_params = [{}, {pipeline_mode = #tpu.pipeline_mode<synchronous>, transform_indices = @transform_1, window_bounds = array<i64: 9, 128, 128>}, {pipeline_mode = #tpu.pipeline_mode<synchronous>, transform_indices = @transform_2, window_bounds = array<i64: 1, 128>}, {pipeline_mode = #tpu.pipeline_mode<synchronous>, transform_indices = @transform_3, window_bounds = array<i64: 9, 128, 128>}, {pipeline_mode = #tpu.pipeline_mode<synchronous>, transform_indices = @transform_4, window_bounds = array<i64: 1, 128>}, {transform_indices = @transform_5, window_bounds = array<i64: 1, 8, 16, 128>}]} {
    %c2_i32 = arith.constant 2 : i32
    %c0_i32 = arith.constant 0 : i32
    %0 = arith.cmpi eq, %c2_i32, %c0_i32 : i32
    %c1_i32 = arith.constant 1 : i32
    %1 = arith.select %0, %c1_i32, %c2_i32 : i32
    %2 = arith.remsi %arg1, %1 : i32
    %c0_i32_0 = arith.constant 0 : i32
    %3 = arith.cmpi ne, %2, %c0_i32_0 : i32
    %c0_i32_1 = arith.constant 0 : i32
    %4 = arith.cmpi slt, %2, %c0_i32_1 : i32
    %c0_i32_2 = arith.constant 0 : i32
    %5 = arith.cmpi slt, %1, %c0_i32_2 : i32
    %6 = arith.xori %4, %5 : i1
    %7 = arith.andi %6, %3 : i1
    %8 = arith.addi %2, %1 : i32
    %9 = arith.select %7, %8, %2 : i32
    %c0_i32_3 = arith.constant 0 : i32
    %10 = arith.cmpi eq, %arg1, %c0_i32_3 : i32
    %11 = arith.extui %10 : i1 to i32
    %c0_i32_4 = arith.constant 0 : i32
    %12 = arith.cmpi ne, %11, %c0_i32_4 : i32
    scf.if %12 {
      %c8_i32_96 = arith.constant 8 : i32
      %178 = arith.muli %arg1, %c8_i32_96 : i32
      %c0_i32_97 = arith.constant 0 : i32
      %c0_i32_98 = arith.constant 0 : i32
      %179 = tpu.memref_slice %arg2[%arg0, %178, %c0_i32_97, %c0_i32_98] : memref<2x20x20x128xf32, #tpu.memory_space<any>> -> memref<1x12x20x128xf32, #tpu.memory_space<any>>
      %180 = tpu.memref_squeeze %179 : memref<1x12x20x128xf32, #tpu.memory_space<any>> -> memref<12x20x128xf32, #tpu.memory_space<any>>
      %c0_i32_99 = arith.constant 0 : i32
      %c0_i32_100 = arith.constant 0 : i32
      %c0_i32_101 = arith.constant 0 : i32
      %181 = tpu.memref_slice %arg8[%9, %c0_i32_99, %c0_i32_100, %c0_i32_101] : memref<2x12x20x128xf32, #tpu.memory_space<vmem>> -> memref<1x12x20x128xf32, #tpu.memory_space<vmem>>
      %182 = tpu.memref_squeeze %181 : memref<1x12x20x128xf32, #tpu.memory_space<vmem>> -> memref<12x20x128xf32, #tpu.memory_space<vmem>>
      %183 = tpu.memref_slice %arg9[%9] : memref<2x!tpu.dma_semaphore, #tpu.memory_space<semaphore_mem>> -> memref<1x!tpu.dma_semaphore, #tpu.memory_space<semaphore_mem>>
      %184 = tpu.memref_squeeze %183 : memref<1x!tpu.dma_semaphore, #tpu.memory_space<semaphore_mem>> -> memref<!tpu.dma_semaphore, #tpu.memory_space<semaphore_mem>>
      tpu.enqueue_dma source(%180 : memref<12x20x128xf32, #tpu.memory_space<any>>) target(%182 : memref<12x20x128xf32, #tpu.memory_space<vmem>>) target_semaphore(%184 : memref<!tpu.dma_semaphore, #tpu.memory_space<semaphore_mem>>)
    } else {
    }
    %c8_i32 = arith.constant 8 : i32
    %13 = arith.muli %arg1, %c8_i32 : i32
    %c0_i32_5 = arith.constant 0 : i32
    %c0_i32_6 = arith.constant 0 : i32
    %14 = tpu.memref_slice %arg2[%arg0, %13, %c0_i32_5, %c0_i32_6] : memref<2x20x20x128xf32, #tpu.memory_space<any>> -> memref<1x12x20x128xf32, #tpu.memory_space<any>>
    %15 = tpu.memref_squeeze %14 : memref<1x12x20x128xf32, #tpu.memory_space<any>> -> memref<12x20x128xf32, #tpu.memory_space<any>>
    %c0_i32_7 = arith.constant 0 : i32
    %c0_i32_8 = arith.constant 0 : i32
    %c0_i32_9 = arith.constant 0 : i32
    %16 = tpu.memref_slice %arg8[%9, %c0_i32_7, %c0_i32_8, %c0_i32_9] : memref<2x12x20x128xf32, #tpu.memory_space<vmem>> -> memref<1x12x20x128xf32, #tpu.memory_space<vmem>>
    %17 = tpu.memref_squeeze %16 : memref<1x12x20x128xf32, #tpu.memory_space<vmem>> -> memref<12x20x128xf32, #tpu.memory_space<vmem>>
    %18 = tpu.memref_slice %arg9[%9] : memref<2x!tpu.dma_semaphore, #tpu.memory_space<semaphore_mem>> -> memref<1x!tpu.dma_semaphore, #tpu.memory_space<semaphore_mem>>
    %19 = tpu.memref_squeeze %18 : memref<1x!tpu.dma_semaphore, #tpu.memory_space<semaphore_mem>> -> memref<!tpu.dma_semaphore, #tpu.memory_space<semaphore_mem>>
    tpu.wait_dma2 semaphore(%19 : memref<!tpu.dma_semaphore, #tpu.memory_space<semaphore_mem>>) src(%15 : memref<12x20x128xf32, #tpu.memory_space<any>>) dst(%17 : memref<12x20x128xf32, #tpu.memory_space<vmem>>)
    %c1_i32_10 = arith.constant 1 : i32
    %20 = arith.addi %arg1, %c1_i32_10 : i32
    %c2_i32_11 = arith.constant 2 : i32
    %21 = arith.cmpi slt, %20, %c2_i32_11 : i32
    %22 = arith.extui %21 : i1 to i32
    %c0_i32_12 = arith.constant 0 : i32
    %23 = arith.cmpi ne, %22, %c0_i32_12 : i32
    scf.if %23 {
      %c1_i32_96 = arith.constant 1 : i32
      %178 = arith.addi %arg1, %c1_i32_96 : i32
      %c1_i32_97 = arith.constant 1 : i32
      %179 = arith.subi %c1_i32_97, %9 : i32
      %c8_i32_98 = arith.constant 8 : i32
      %180 = arith.muli %178, %c8_i32_98 : i32
      %c0_i32_99 = arith.constant 0 : i32
      %c0_i32_100 = arith.constant 0 : i32
      %181 = tpu.memref_slice %arg2[%arg0, %180, %c0_i32_99, %c0_i32_100] : memref<2x20x20x128xf32, #tpu.memory_space<any>> -> memref<1x12x20x128xf32, #tpu.memory_space<any>>
      %182 = tpu.memref_squeeze %181 : memref<1x12x20x128xf32, #tpu.memory_space<any>> -> memref<12x20x128xf32, #tpu.memory_space<any>>
      %c0_i32_101 = arith.constant 0 : i32
      %c0_i32_102 = arith.constant 0 : i32
      %c0_i32_103 = arith.constant 0 : i32
      %183 = tpu.memref_slice %arg8[%179, %c0_i32_101, %c0_i32_102, %c0_i32_103] : memref<2x12x20x128xf32, #tpu.memory_space<vmem>> -> memref<1x12x20x128xf32, #tpu.memory_space<vmem>>
      %184 = tpu.memref_squeeze %183 : memref<1x12x20x128xf32, #tpu.memory_space<vmem>> -> memref<12x20x128xf32, #tpu.memory_space<vmem>>
      %185 = tpu.memref_slice %arg9[%179] : memref<2x!tpu.dma_semaphore, #tpu.memory_space<semaphore_mem>> -> memref<1x!tpu.dma_semaphore, #tpu.memory_space<semaphore_mem>>
      %186 = tpu.memref_squeeze %185 : memref<1x!tpu.dma_semaphore, #tpu.memory_space<semaphore_mem>> -> memref<!tpu.dma_semaphore, #tpu.memory_space<semaphore_mem>>
      tpu.enqueue_dma source(%182 : memref<12x20x128xf32, #tpu.memory_space<any>>) target(%184 : memref<12x20x128xf32, #tpu.memory_space<vmem>>) target_semaphore(%186 : memref<!tpu.dma_semaphore, #tpu.memory_space<semaphore_mem>>)
    } else {
    }
    %24 = arith.index_cast %9 : i32 to index
    %c0 = arith.constant 0 : index
    %c0_13 = arith.constant 0 : index
    %c0_14 = arith.constant 0 : index
    %25 = vector.load %arg8[%24, %c0, %c0_13, %c0_14] : memref<2x12x20x128xf32, #tpu.memory_space<vmem>>, vector<1x12x20x128xf32>
    %26 = vector.shape_cast %25 : vector<1x12x20x128xf32> to vector<12x20x128xf32>
    %27 = arith.truncf %26 : vector<12x20x128xf32> to vector<12x20x128xbf16>
    %cst = arith.constant 0.000000e+00 : f32
    %28 = vector.broadcast %cst : f32 to vector<180x128xf32>
    %29 = vector.extract_strided_slice %27 {offsets = [0, 0, 0], sizes = [10, 18, 128], strides = [1, 1, 1]} : vector<12x20x128xbf16> to vector<10x18x128xbf16>
    %30 = vector.shape_cast %29 : vector<10x18x128xbf16> to vector<180x128xbf16>
    %c0_15 = arith.constant 0 : index
    %c0_16 = arith.constant 0 : index
    %c0_17 = arith.constant 0 : index
    %31 = vector.load %arg3[%c0_15, %c0_16, %c0_17] : memref<9x128x128xbf16, #tpu.memory_space<vmem>>, vector<1x128x128xbf16>
    %32 = vector.shape_cast %31 : vector<1x128x128xbf16> to vector<128x128xbf16>
    %cst_18 = arith.constant dense<0.000000e+00> : vector<180x128xf32>
    %33 = tpu.matmul %30, %32, %cst_18 {dimension_numbers = #tpu.dot_dimension_numbers<[1], [0], [0], [1], [0, 0, 1, 1], [], []>} : vector<180x128xbf16>, vector<128x128xbf16>, vector<180x128xf32> -> vector<180x128xf32>
    %34 = arith.addf %28, %33 : vector<180x128xf32>
    %35 = vector.extract_strided_slice %27 {offsets = [0, 1, 0], sizes = [10, 18, 128], strides = [1, 1, 1]} : vector<12x20x128xbf16> to vector<10x18x128xbf16>
    %36 = vector.shape_cast %35 : vector<10x18x128xbf16> to vector<180x128xbf16>
    %c1 = arith.constant 1 : index
    %c0_19 = arith.constant 0 : index
    %c0_20 = arith.constant 0 : index
    %37 = vector.load %arg3[%c1, %c0_19, %c0_20] : memref<9x128x128xbf16, #tpu.memory_space<vmem>>, vector<1x128x128xbf16>
    %38 = vector.shape_cast %37 : vector<1x128x128xbf16> to vector<128x128xbf16>
    %cst_21 = arith.constant dense<0.000000e+00> : vector<180x128xf32>
    %39 = tpu.matmul %36, %38, %cst_21 {dimension_numbers = #tpu.dot_dimension_numbers<[1], [0], [0], [1], [0, 0, 1, 1], [], []>} : vector<180x128xbf16>, vector<128x128xbf16>, vector<180x128xf32> -> vector<180x128xf32>
    %40 = arith.addf %34, %39 : vector<180x128xf32>
    %41 = vector.extract_strided_slice %27 {offsets = [0, 2, 0], sizes = [10, 18, 128], strides = [1, 1, 1]} : vector<12x20x128xbf16> to vector<10x18x128xbf16>
    %42 = vector.shape_cast %41 : vector<10x18x128xbf16> to vector<180x128xbf16>
    %c2 = arith.constant 2 : index
    %c0_22 = arith.constant 0 : index
    %c0_23 = arith.constant 0 : index
    %43 = vector.load %arg3[%c2, %c0_22, %c0_23] : memref<9x128x128xbf16, #tpu.memory_space<vmem>>, vector<1x128x128xbf16>
    %44 = vector.shape_cast %43 : vector<1x128x128xbf16> to vector<128x128xbf16>
    %cst_24 = arith.constant dense<0.000000e+00> : vector<180x128xf32>
    %45 = tpu.matmul %42, %44, %cst_24 {dimension_numbers = #tpu.dot_dimension_numbers<[1], [0], [0], [1], [0, 0, 1, 1], [], []>} : vector<180x128xbf16>, vector<128x128xbf16>, vector<180x128xf32> -> vector<180x128xf32>
    %46 = arith.addf %40, %45 : vector<180x128xf32>
    %47 = vector.extract_strided_slice %27 {offsets = [1, 0, 0], sizes = [10, 18, 128], strides = [1, 1, 1]} : vector<12x20x128xbf16> to vector<10x18x128xbf16>
    %48 = vector.shape_cast %47 : vector<10x18x128xbf16> to vector<180x128xbf16>
    %c3 = arith.constant 3 : index
    %c0_25 = arith.constant 0 : index
    %c0_26 = arith.constant 0 : index
    %49 = vector.load %arg3[%c3, %c0_25, %c0_26] : memref<9x128x128xbf16, #tpu.memory_space<vmem>>, vector<1x128x128xbf16>
    %50 = vector.shape_cast %49 : vector<1x128x128xbf16> to vector<128x128xbf16>
    %cst_27 = arith.constant dense<0.000000e+00> : vector<180x128xf32>
    %51 = tpu.matmul %48, %50, %cst_27 {dimension_numbers = #tpu.dot_dimension_numbers<[1], [0], [0], [1], [0, 0, 1, 1], [], []>} : vector<180x128xbf16>, vector<128x128xbf16>, vector<180x128xf32> -> vector<180x128xf32>
    %52 = arith.addf %46, %51 : vector<180x128xf32>
    %53 = vector.extract_strided_slice %27 {offsets = [1, 1, 0], sizes = [10, 18, 128], strides = [1, 1, 1]} : vector<12x20x128xbf16> to vector<10x18x128xbf16>
    %54 = vector.shape_cast %53 : vector<10x18x128xbf16> to vector<180x128xbf16>
    %c4 = arith.constant 4 : index
    %c0_28 = arith.constant 0 : index
    %c0_29 = arith.constant 0 : index
    %55 = vector.load %arg3[%c4, %c0_28, %c0_29] : memref<9x128x128xbf16, #tpu.memory_space<vmem>>, vector<1x128x128xbf16>
    %56 = vector.shape_cast %55 : vector<1x128x128xbf16> to vector<128x128xbf16>
    %cst_30 = arith.constant dense<0.000000e+00> : vector<180x128xf32>
    %57 = tpu.matmul %54, %56, %cst_30 {dimension_numbers = #tpu.dot_dimension_numbers<[1], [0], [0], [1], [0, 0, 1, 1], [], []>} : vector<180x128xbf16>, vector<128x128xbf16>, vector<180x128xf32> -> vector<180x128xf32>
    %58 = arith.addf %52, %57 : vector<180x128xf32>
    %59 = vector.extract_strided_slice %27 {offsets = [1, 2, 0], sizes = [10, 18, 128], strides = [1, 1, 1]} : vector<12x20x128xbf16> to vector<10x18x128xbf16>
    %60 = vector.shape_cast %59 : vector<10x18x128xbf16> to vector<180x128xbf16>
    %c5 = arith.constant 5 : index
    %c0_31 = arith.constant 0 : index
    %c0_32 = arith.constant 0 : index
    %61 = vector.load %arg3[%c5, %c0_31, %c0_32] : memref<9x128x128xbf16, #tpu.memory_space<vmem>>, vector<1x128x128xbf16>
    %62 = vector.shape_cast %61 : vector<1x128x128xbf16> to vector<128x128xbf16>
    %cst_33 = arith.constant dense<0.000000e+00> : vector<180x128xf32>
    %63 = tpu.matmul %60, %62, %cst_33 {dimension_numbers = #tpu.dot_dimension_numbers<[1], [0], [0], [1], [0, 0, 1, 1], [], []>} : vector<180x128xbf16>, vector<128x128xbf16>, vector<180x128xf32> -> vector<180x128xf32>
    %64 = arith.addf %58, %63 : vector<180x128xf32>
    %65 = vector.extract_strided_slice %27 {offsets = [2, 0, 0], sizes = [10, 18, 128], strides = [1, 1, 1]} : vector<12x20x128xbf16> to vector<10x18x128xbf16>
    %66 = vector.shape_cast %65 : vector<10x18x128xbf16> to vector<180x128xbf16>
    %c6 = arith.constant 6 : index
    %c0_34 = arith.constant 0 : index
    %c0_35 = arith.constant 0 : index
    %67 = vector.load %arg3[%c6, %c0_34, %c0_35] : memref<9x128x128xbf16, #tpu.memory_space<vmem>>, vector<1x128x128xbf16>
    %68 = vector.shape_cast %67 : vector<1x128x128xbf16> to vector<128x128xbf16>
    %cst_36 = arith.constant dense<0.000000e+00> : vector<180x128xf32>
    %69 = tpu.matmul %66, %68, %cst_36 {dimension_numbers = #tpu.dot_dimension_numbers<[1], [0], [0], [1], [0, 0, 1, 1], [], []>} : vector<180x128xbf16>, vector<128x128xbf16>, vector<180x128xf32> -> vector<180x128xf32>
    %70 = arith.addf %64, %69 : vector<180x128xf32>
    %71 = vector.extract_strided_slice %27 {offsets = [2, 1, 0], sizes = [10, 18, 128], strides = [1, 1, 1]} : vector<12x20x128xbf16> to vector<10x18x128xbf16>
    %72 = vector.shape_cast %71 : vector<10x18x128xbf16> to vector<180x128xbf16>
    %c7 = arith.constant 7 : index
    %c0_37 = arith.constant 0 : index
    %c0_38 = arith.constant 0 : index
    %73 = vector.load %arg3[%c7, %c0_37, %c0_38] : memref<9x128x128xbf16, #tpu.memory_space<vmem>>, vector<1x128x128xbf16>
    %74 = vector.shape_cast %73 : vector<1x128x128xbf16> to vector<128x128xbf16>
    %cst_39 = arith.constant dense<0.000000e+00> : vector<180x128xf32>
    %75 = tpu.matmul %72, %74, %cst_39 {dimension_numbers = #tpu.dot_dimension_numbers<[1], [0], [0], [1], [0, 0, 1, 1], [], []>} : vector<180x128xbf16>, vector<128x128xbf16>, vector<180x128xf32> -> vector<180x128xf32>
    %76 = arith.addf %70, %75 : vector<180x128xf32>
    %77 = vector.extract_strided_slice %27 {offsets = [2, 2, 0], sizes = [10, 18, 128], strides = [1, 1, 1]} : vector<12x20x128xbf16> to vector<10x18x128xbf16>
    %78 = vector.shape_cast %77 : vector<10x18x128xbf16> to vector<180x128xbf16>
    %c8 = arith.constant 8 : index
    %c0_40 = arith.constant 0 : index
    %c0_41 = arith.constant 0 : index
    %79 = vector.load %arg3[%c8, %c0_40, %c0_41] : memref<9x128x128xbf16, #tpu.memory_space<vmem>>, vector<1x128x128xbf16>
    %80 = vector.shape_cast %79 : vector<1x128x128xbf16> to vector<128x128xbf16>
    %cst_42 = arith.constant dense<0.000000e+00> : vector<180x128xf32>
    %81 = tpu.matmul %78, %80, %cst_42 {dimension_numbers = #tpu.dot_dimension_numbers<[1], [0], [0], [1], [0, 0, 1, 1], [], []>} : vector<180x128xbf16>, vector<128x128xbf16>, vector<180x128xf32> -> vector<180x128xf32>
    %82 = arith.addf %76, %81 : vector<180x128xf32>
    %c0_43 = arith.constant 0 : index
    %c0_44 = arith.constant 0 : index
    %83 = vector.load %arg4[%c0_43, %c0_44] : memref<1x128xf32, #tpu.memory_space<vmem>>, vector<1x128xf32>
    %84 = vector.broadcast %83 : vector<1x128xf32> to vector<180x128xf32>
    %85 = arith.addf %82, %84 : vector<180x128xf32>
    %cst_45 = arith.constant 0.000000e+00 : f32
    %86 = vector.broadcast %cst_45 : f32 to vector<180x128xf32>
    %87 = arith.maximumf %85, %86 : vector<180x128xf32>
    %88 = vector.shape_cast %87 : vector<180x128xf32> to vector<10x18x128xf32>
    %89 = tpu.iota {dimensions = array<i32: 0>} : vector<10x18x1xi32>
    %90 = tpu.iota {dimensions = array<i32: 1>} : vector<10x18x1xi32>
    %c8_i32_46 = arith.constant 8 : i32
    %91 = arith.muli %arg1, %c8_i32_46 : i32
    %c1_i32_47 = arith.constant 1 : i32
    %92 = arith.subi %91, %c1_i32_47 : i32
    %93 = vector.broadcast %92 : i32 to vector<10x18x1xi32>
    %94 = arith.addi %93, %89 : vector<10x18x1xi32>
    %c0_i32_48 = arith.constant 0 : i32
    %95 = vector.broadcast %c0_i32_48 : i32 to vector<10x18x1xi32>
    %96 = arith.cmpi sge, %94, %95 : vector<10x18x1xi32>
    %c16_i32 = arith.constant 16 : i32
    %97 = vector.broadcast %c16_i32 : i32 to vector<10x18x1xi32>
    %98 = arith.cmpi slt, %94, %97 : vector<10x18x1xi32>
    %99 = arith.andi %96, %98 : vector<10x18x1xi1>
    %c1_i32_49 = arith.constant 1 : i32
    %100 = vector.broadcast %c1_i32_49 : i32 to vector<10x18x1xi32>
    %101 = arith.cmpi sge, %90, %100 : vector<10x18x1xi32>
    %102 = arith.andi %99, %101 : vector<10x18x1xi1>
    %c16_i32_50 = arith.constant 16 : i32
    %103 = vector.broadcast %c16_i32_50 : i32 to vector<10x18x1xi32>
    %104 = arith.cmpi sle, %90, %103 : vector<10x18x1xi32>
    %105 = arith.andi %102, %104 : vector<10x18x1xi1>
    %cst_51 = arith.constant 0.000000e+00 : f32
    %106 = vector.shape_cast %105 : vector<10x18x1xi1> to vector<10x18x1xi1>
    %107 = vector.broadcast %106 : vector<10x18x1xi1> to vector<10x18x128xi1>
    %108 = vector.broadcast %cst_51 : f32 to vector<10x18x128xf32>
    %109 = arith.select %107, %88, %108 : vector<10x18x128xi1>, vector<10x18x128xf32>
    %110 = arith.truncf %109 : vector<10x18x128xf32> to vector<10x18x128xbf16>
    %cst_52 = arith.constant 0.000000e+00 : f32
    %111 = vector.broadcast %cst_52 : f32 to vector<128x128xf32>
    %112 = vector.extract_strided_slice %110 {offsets = [0, 0, 0], sizes = [8, 16, 128], strides = [1, 1, 1]} : vector<10x18x128xbf16> to vector<8x16x128xbf16>
    %113 = vector.shape_cast %112 : vector<8x16x128xbf16> to vector<128x128xbf16>
    %c0_53 = arith.constant 0 : index
    %c0_54 = arith.constant 0 : index
    %c0_55 = arith.constant 0 : index
    %114 = vector.load %arg5[%c0_53, %c0_54, %c0_55] : memref<9x128x128xbf16, #tpu.memory_space<vmem>>, vector<1x128x128xbf16>
    %115 = vector.shape_cast %114 : vector<1x128x128xbf16> to vector<128x128xbf16>
    %cst_56 = arith.constant dense<0.000000e+00> : vector<128x128xf32>
    %116 = tpu.matmul %113, %115, %cst_56 {dimension_numbers = #tpu.dot_dimension_numbers<[1], [0], [0], [1], [0, 0, 1, 1], [], []>} : vector<128x128xbf16>, vector<128x128xbf16>, vector<128x128xf32> -> vector<128x128xf32>
    %117 = arith.addf %111, %116 : vector<128x128xf32>
    %118 = vector.extract_strided_slice %110 {offsets = [0, 1, 0], sizes = [8, 16, 128], strides = [1, 1, 1]} : vector<10x18x128xbf16> to vector<8x16x128xbf16>
    %119 = vector.shape_cast %118 : vector<8x16x128xbf16> to vector<128x128xbf16>
    %c1_57 = arith.constant 1 : index
    %c0_58 = arith.constant 0 : index
    %c0_59 = arith.constant 0 : index
    %120 = vector.load %arg5[%c1_57, %c0_58, %c0_59] : memref<9x128x128xbf16, #tpu.memory_space<vmem>>, vector<1x128x128xbf16>
    %121 = vector.shape_cast %120 : vector<1x128x128xbf16> to vector<128x128xbf16>
    %cst_60 = arith.constant dense<0.000000e+00> : vector<128x128xf32>
    %122 = tpu.matmul %119, %121, %cst_60 {dimension_numbers = #tpu.dot_dimension_numbers<[1], [0], [0], [1], [0, 0, 1, 1], [], []>} : vector<128x128xbf16>, vector<128x128xbf16>, vector<128x128xf32> -> vector<128x128xf32>
    %123 = arith.addf %117, %122 : vector<128x128xf32>
    %124 = vector.extract_strided_slice %110 {offsets = [0, 2, 0], sizes = [8, 16, 128], strides = [1, 1, 1]} : vector<10x18x128xbf16> to vector<8x16x128xbf16>
    %125 = vector.shape_cast %124 : vector<8x16x128xbf16> to vector<128x128xbf16>
    %c2_61 = arith.constant 2 : index
    %c0_62 = arith.constant 0 : index
    %c0_63 = arith.constant 0 : index
    %126 = vector.load %arg5[%c2_61, %c0_62, %c0_63] : memref<9x128x128xbf16, #tpu.memory_space<vmem>>, vector<1x128x128xbf16>
    %127 = vector.shape_cast %126 : vector<1x128x128xbf16> to vector<128x128xbf16>
    %cst_64 = arith.constant dense<0.000000e+00> : vector<128x128xf32>
    %128 = tpu.matmul %125, %127, %cst_64 {dimension_numbers = #tpu.dot_dimension_numbers<[1], [0], [0], [1], [0, 0, 1, 1], [], []>} : vector<128x128xbf16>, vector<128x128xbf16>, vector<128x128xf32> -> vector<128x128xf32>
    %129 = arith.addf %123, %128 : vector<128x128xf32>
    %130 = vector.extract_strided_slice %110 {offsets = [1, 0, 0], sizes = [8, 16, 128], strides = [1, 1, 1]} : vector<10x18x128xbf16> to vector<8x16x128xbf16>
    %131 = vector.shape_cast %130 : vector<8x16x128xbf16> to vector<128x128xbf16>
    %c3_65 = arith.constant 3 : index
    %c0_66 = arith.constant 0 : index
    %c0_67 = arith.constant 0 : index
    %132 = vector.load %arg5[%c3_65, %c0_66, %c0_67] : memref<9x128x128xbf16, #tpu.memory_space<vmem>>, vector<1x128x128xbf16>
    %133 = vector.shape_cast %132 : vector<1x128x128xbf16> to vector<128x128xbf16>
    %cst_68 = arith.constant dense<0.000000e+00> : vector<128x128xf32>
    %134 = tpu.matmul %131, %133, %cst_68 {dimension_numbers = #tpu.dot_dimension_numbers<[1], [0], [0], [1], [0, 0, 1, 1], [], []>} : vector<128x128xbf16>, vector<128x128xbf16>, vector<128x128xf32> -> vector<128x128xf32>
    %135 = arith.addf %129, %134 : vector<128x128xf32>
    %136 = vector.extract_strided_slice %110 {offsets = [1, 1, 0], sizes = [8, 16, 128], strides = [1, 1, 1]} : vector<10x18x128xbf16> to vector<8x16x128xbf16>
    %137 = vector.shape_cast %136 : vector<8x16x128xbf16> to vector<128x128xbf16>
    %c4_69 = arith.constant 4 : index
    %c0_70 = arith.constant 0 : index
    %c0_71 = arith.constant 0 : index
    %138 = vector.load %arg5[%c4_69, %c0_70, %c0_71] : memref<9x128x128xbf16, #tpu.memory_space<vmem>>, vector<1x128x128xbf16>
    %139 = vector.shape_cast %138 : vector<1x128x128xbf16> to vector<128x128xbf16>
    %cst_72 = arith.constant dense<0.000000e+00> : vector<128x128xf32>
    %140 = tpu.matmul %137, %139, %cst_72 {dimension_numbers = #tpu.dot_dimension_numbers<[1], [0], [0], [1], [0, 0, 1, 1], [], []>} : vector<128x128xbf16>, vector<128x128xbf16>, vector<128x128xf32> -> vector<128x128xf32>
    %141 = arith.addf %135, %140 : vector<128x128xf32>
    %142 = vector.extract_strided_slice %110 {offsets = [1, 2, 0], sizes = [8, 16, 128], strides = [1, 1, 1]} : vector<10x18x128xbf16> to vector<8x16x128xbf16>
    %143 = vector.shape_cast %142 : vector<8x16x128xbf16> to vector<128x128xbf16>
    %c5_73 = arith.constant 5 : index
    %c0_74 = arith.constant 0 : index
    %c0_75 = arith.constant 0 : index
    %144 = vector.load %arg5[%c5_73, %c0_74, %c0_75] : memref<9x128x128xbf16, #tpu.memory_space<vmem>>, vector<1x128x128xbf16>
    %145 = vector.shape_cast %144 : vector<1x128x128xbf16> to vector<128x128xbf16>
    %cst_76 = arith.constant dense<0.000000e+00> : vector<128x128xf32>
    %146 = tpu.matmul %143, %145, %cst_76 {dimension_numbers = #tpu.dot_dimension_numbers<[1], [0], [0], [1], [0, 0, 1, 1], [], []>} : vector<128x128xbf16>, vector<128x128xbf16>, vector<128x128xf32> -> vector<128x128xf32>
    %147 = arith.addf %141, %146 : vector<128x128xf32>
    %148 = vector.extract_strided_slice %110 {offsets = [2, 0, 0], sizes = [8, 16, 128], strides = [1, 1, 1]} : vector<10x18x128xbf16> to vector<8x16x128xbf16>
    %149 = vector.shape_cast %148 : vector<8x16x128xbf16> to vector<128x128xbf16>
    %c6_77 = arith.constant 6 : index
    %c0_78 = arith.constant 0 : index
    %c0_79 = arith.constant 0 : index
    %150 = vector.load %arg5[%c6_77, %c0_78, %c0_79] : memref<9x128x128xbf16, #tpu.memory_space<vmem>>, vector<1x128x128xbf16>
    %151 = vector.shape_cast %150 : vector<1x128x128xbf16> to vector<128x128xbf16>
    %cst_80 = arith.constant dense<0.000000e+00> : vector<128x128xf32>
    %152 = tpu.matmul %149, %151, %cst_80 {dimension_numbers = #tpu.dot_dimension_numbers<[1], [0], [0], [1], [0, 0, 1, 1], [], []>} : vector<128x128xbf16>, vector<128x128xbf16>, vector<128x128xf32> -> vector<128x128xf32>
    %153 = arith.addf %147, %152 : vector<128x128xf32>
    %154 = vector.extract_strided_slice %110 {offsets = [2, 1, 0], sizes = [8, 16, 128], strides = [1, 1, 1]} : vector<10x18x128xbf16> to vector<8x16x128xbf16>
    %155 = vector.shape_cast %154 : vector<8x16x128xbf16> to vector<128x128xbf16>
    %c7_81 = arith.constant 7 : index
    %c0_82 = arith.constant 0 : index
    %c0_83 = arith.constant 0 : index
    %156 = vector.load %arg5[%c7_81, %c0_82, %c0_83] : memref<9x128x128xbf16, #tpu.memory_space<vmem>>, vector<1x128x128xbf16>
    %157 = vector.shape_cast %156 : vector<1x128x128xbf16> to vector<128x128xbf16>
    %cst_84 = arith.constant dense<0.000000e+00> : vector<128x128xf32>
    %158 = tpu.matmul %155, %157, %cst_84 {dimension_numbers = #tpu.dot_dimension_numbers<[1], [0], [0], [1], [0, 0, 1, 1], [], []>} : vector<128x128xbf16>, vector<128x128xbf16>, vector<128x128xf32> -> vector<128x128xf32>
    %159 = arith.addf %153, %158 : vector<128x128xf32>
    %160 = vector.extract_strided_slice %110 {offsets = [2, 2, 0], sizes = [8, 16, 128], strides = [1, 1, 1]} : vector<10x18x128xbf16> to vector<8x16x128xbf16>
    %161 = vector.shape_cast %160 : vector<8x16x128xbf16> to vector<128x128xbf16>
    %c8_85 = arith.constant 8 : index
    %c0_86 = arith.constant 0 : index
    %c0_87 = arith.constant 0 : index
    %162 = vector.load %arg5[%c8_85, %c0_86, %c0_87] : memref<9x128x128xbf16, #tpu.memory_space<vmem>>, vector<1x128x128xbf16>
    %163 = vector.shape_cast %162 : vector<1x128x128xbf16> to vector<128x128xbf16>
    %cst_88 = arith.constant dense<0.000000e+00> : vector<128x128xf32>
    %164 = tpu.matmul %161, %163, %cst_88 {dimension_numbers = #tpu.dot_dimension_numbers<[1], [0], [0], [1], [0, 0, 1, 1], [], []>} : vector<128x128xbf16>, vector<128x128xbf16>, vector<128x128xf32> -> vector<128x128xf32>
    %165 = arith.addf %159, %164 : vector<128x128xf32>
    %166 = vector.extract_strided_slice %26 {offsets = [2, 2, 0], sizes = [8, 16, 128], strides = [1, 1, 1]} : vector<12x20x128xf32> to vector<8x16x128xf32>
    %167 = vector.shape_cast %166 : vector<8x16x128xf32> to vector<128x128xf32>
    %c0_89 = arith.constant 0 : index
    %c0_90 = arith.constant 0 : index
    %168 = vector.load %arg6[%c0_89, %c0_90] : memref<1x128xf32, #tpu.memory_space<vmem>>, vector<1x128xf32>
    %169 = vector.broadcast %168 : vector<1x128xf32> to vector<128x128xf32>
    %170 = arith.addf %165, %169 : vector<128x128xf32>
    %171 = arith.addf %170, %167 : vector<128x128xf32>
    %cst_91 = arith.constant 0.000000e+00 : f32
    %172 = vector.broadcast %cst_91 : f32 to vector<128x128xf32>
    %173 = arith.maximumf %171, %172 : vector<128x128xf32>
    %174 = vector.shape_cast %173 : vector<128x128xf32> to vector<8x16x128xf32>
    %c0_92 = arith.constant 0 : index
    %c0_93 = arith.constant 0 : index
    %c0_94 = arith.constant 0 : index
    %c0_95 = arith.constant 0 : index
    %175 = vector.load %arg7[%c0_92, %c0_93, %c0_94, %c0_95] : memref<1x8x16x128xf32, #tpu.memory_space<vmem>>, vector<1x8x16x128xf32>
    %176 = vector.shape_cast %175 : vector<1x8x16x128xf32> to vector<8x16x128xf32>
    %177 = vector.shape_cast %174 : vector<8x16x128xf32> to vector<1x8x16x128xf32>
    tpu.vector_store %arg7[%c0_92, %c0_93, %c0_94, %c0_95], %177 {strides = array<i32>} : memref<1x8x16x128xf32, #tpu.memory_space<vmem>>, vector<1x8x16x128xf32>,
    return
  }
  func.func @transform_1(%arg0: i32, %arg1: i32) -> (i32, i32, i32) {
    %c0_i32 = arith.constant 0 : i32
    %c0_i32_0 = arith.constant 0 : i32
    %c0_i32_1 = arith.constant 0 : i32
    %c0_i32_2 = arith.constant 0 : i32
    return %c0_i32, %c0_i32_0, %c0_i32_1 : i32, i32, i32
  }
  func.func @transform_2(%arg0: i32, %arg1: i32) -> (i32, i32) {
    %c0_i32 = arith.constant 0 : i32
    %c0_i32_0 = arith.constant 0 : i32
    %c0_i32_1 = arith.constant 0 : i32
    return %c0_i32, %c0_i32_0 : i32, i32
  }
  func.func @transform_3(%arg0: i32, %arg1: i32) -> (i32, i32, i32) {
    %c0_i32 = arith.constant 0 : i32
    %c0_i32_0 = arith.constant 0 : i32
    %c0_i32_1 = arith.constant 0 : i32
    %c0_i32_2 = arith.constant 0 : i32
    return %c0_i32, %c0_i32_0, %c0_i32_1 : i32, i32, i32
  }
  func.func @transform_4(%arg0: i32, %arg1: i32) -> (i32, i32) {
    %c0_i32 = arith.constant 0 : i32
    %c0_i32_0 = arith.constant 0 : i32
    %c0_i32_1 = arith.constant 0 : i32
    return %c0_i32, %c0_i32_0 : i32, i32
  }
  func.func @transform_5(%arg0: i32, %arg1: i32) -> (i32, i32, i32, i32) {
    %c0_i32 = arith.constant 0 : i32
    %c0_i32_0 = arith.constant 0 : i32
    %c0_i32_1 = arith.constant 0 : i32
    return %arg0, %arg1, %c0_i32, %c0_i32_0 : i32, i32, i32, i32
  }
}

</mosaic_0001>

<bundles_post_ra>
// kernel: residual_block_forward.1
= control target key start
LH: loop header
LB: loop body
LE: loop exit
PB: predicated region body
PF: predicated region fallthrough
CT: control target
= control target key end

     0   :  { %s8492_s18 = smov 0   ;;  %s8494_s19 = smov 0   ;;  %s13384_s0 = inlined_call_operand.vmem [shape: f32[2,20,20,128], index: 0, kind: input, shape index: {}]   ;;  %s13385_s1 = inlined_call_operand.vmem [shape: bf16[9,128,128], index: 1, kind: input, shape index: {}]   ;;  %s13386_s2 = inlined_call_operand.vmem [shape: f32[1,128], index: 2, kind: input, shape index: {}]   ;;  %s13387_s3 = inlined_call_operand.vmem [shape: bf16[9,128,128], index: 3, kind: input, shape index: {}]   ;;  %s13388_s4 = inlined_call_operand.vmem [shape: f32[1,128], index: 4, kind: input, shape index: {}]   ;;  %s13389_s5 = inlined_call_operand.vmem [shape: f32[2,16,16,128], index: 5, kind: output, shape index: {}]  }
   0x1   :  { %s8496_s20 = smov 0   ;;  %s8498_s21 = smov 0  }
   0x2   :  { %s8500_s22 = smov 0  }
   0x3 LB: > { %s24_s23 = sadd.s32 1, %s8452_s20  ;;  %s27_s24 = sadd.s32 1, %s8456_s21  ;;  %s8460_s22 = sphi %s8500_s22, %s15_s22   ;;  %s8456_s21 = sphi %s8498_s21, %s14937_s21   ;;  %s8452_s20 = sphi %s8496_s20, %s14936_s20   ;;  %s8448_s19 = sphi %s8494_s19, %s14935_s19   ;;  %s8444_s18 = sphi %s8492_s18, %s14934_s18  }
   0x4   : > { %p25_p0 = scmp.ge.s32.totalorder %s24_s23, 2  ;;  %p7153_p1 = scmp.ge.s32.totalorder %s8460_s22, 1 }
   0x5   : > { %p167_p2 = scmp.lt.s32.totalorder %s8460_s22, 5 }
   0x6   : > { %s14939_s23 = smov (%p25_p0, %s24_s23), 0  ;;  %s14941_s24 = smov (!%p25_p0, %s27_s24), %s8456_s21 }
   0x7   : > { %p168_p3 = pnand %p7153_p1, %p167_p2  ;;  %p29_p4 = scmp.ge.s32.totalorder %s14941_s24, 2 }
   0x9   : > { %s14943_s24 = smov (%p29_p4, %s14941_s24), 0  ;;  %171 = sbr.rel (%p168_p3) target bundleno = 2808 (0xaf8), region = 36 }
   0xe   : > { %s8527_s25 = sshll.u32 %s8444_s18, 3  ;;  %p194_p5 = scmp.lt.s32.totalorder %s8448_s19, 1 }
   0xf   : > { %p196_p6 = scmp.lt.s32.totalorder %s8527_s25, 15  ;;  %p204_p7 = scmp.lt.s32.totalorder %s8444_s18, 0 }
  0x10   : > { %s195_s26 = scalar_select %p194_p5, %s8448_s19, 1 }
  0x11   : > { %s197_s27 = scalar_select %p196_p6, %s8527_s25, 15 }
  0x12   : > { %s7156_s28 = sshll.u32 %s195_s26, 5  ;;  %s205_s29 = ssub.s32 0, %s8444_s18 }
  0x13   : > { %s7155_s30 = sshll.u32 %s197_s27, 1  ;;  %s7158_s6 = smin.u32 %s8444_s18, %s205_s29 }
  0x14   : > { %s200_s7 = sadd.s32 %s7156_s28, %s7155_s30  ;;  %s207_s8 = sand.u32 1, %s7158_s6  }
  0x15   : > { %s7157_s9 = sshll.u32 %s200_s7, 3  ;;  %s208_s10 = ssub.s32 0, %s207_s8 }
  0x16   : > { %s8539_s13 = scalar_lea.vmem %s13389_s5, %s7157_s9  ;;  %s14945_s10 = smov (!%p204_p7, %s208_s10), %s207_s8 }
  0x17   : > { %p7160_p8 = scmp.lt.s32.totalorder %s14945_s10, 0  ;;  %s214_s14 = sadd.s32 2, %s14945_s10 }
  0x18   : > { %p7161_p9 = scmp.ne.s32.totalorder %s8444_s18, 0 }
  0x19   : > { %s14947_s14 = smov (!%p7160_p8, %s214_s14), %s14945_s10  ;;  %s7163_s15 = smul.u32 (!%p7161_p9), 192, %s8444_s18 }
  0x1a   : > { %219 = sbr.rel (%p7161_p9) target bundleno = 69 (0x45), region = 40  ;;  %s227_s6 = scalar_lea.sflag (!%p7161_p9), [#allocation3], %s14947_s14 }
  0x1b   : > { %s222_s16 = smul.u32 (!%p7161_p9), 480, %s8448_s19 }
  0x1c   : > { %s225_s17 = smul.u32 (!%p7161_p9), 288, %s14947_s14 }
  0x1d   : > { %s223_s26 = sadd.s32 (!%p7161_p9), %s7163_s15, %s222_s16 }
  0x1e   : > { %s8550_s29 = scalar_lea.vmem (!%p7161_p9), %s13384_s0, %s223_s26  ;;  %s8555_s30 = scalar_lea.vmem (!%p7161_p9), [#allocation2], %s225_s17 }
  0x1f   : > { %v240_v0 = vld [vmem:[%s8550_s29] sm:$0xff]  ;;  %v242_v1 = vld [vmem:[%s8550_s29 + $0x8] sm:$0xff]  ;;  %v244_v2 = vld [vmem:[%s8550_s29 + $0x18] sm:$0xff] }
  0x20   : > { %241 = vst [vmem:[%s8555_s30] sm:$0xff] %v240_v0  ;;  %v246_v3 = vld [vmem:[%s8550_s29 + $0x20] sm:$0xff]  ;;  %v248_v4 = vld [vmem:[%s8550_s29 + $0x30] sm:$0xff]  ;;  %v250_v5 = vld [vmem:[%s8550_s29 + $0x38] sm:$0xff] }
  0x21   : > { %243 = vst [vmem:[%s8555_s30 + $0x8] sm:$0xff] %v242_v1  ;;  %v252_v6 = vld [vmem:[%s8550_s29 + $0x48] sm:$0xff]  ;;  %v254_v7 = vld [vmem:[%s8550_s29 + $0x50] sm:$0xff]  ;;  %v256_v8 = vld [vmem:[%s8550_s29 + $0x60] sm:$0xff] }
  0x22   : > { %245 = vst [vmem:[%s8555_s30 + $0x18] sm:$0xff] %v244_v2  ;;  %v258_v9 = vld [vmem:[%s8550_s29 + $0x68] sm:$0xff]  ;;  %v260_v10 = vld [vmem:[%s8550_s29 + $0x78] sm:$0xff]  ;;  %v262_v11 = vld [vmem:[%s8550_s29 + $0x80] sm:$0xff] }
  0x23   : > { %247 = vst [vmem:[%s8555_s30 + $0x20] sm:$0xff] %v246_v3  ;;  %v264_v12 = vld [vmem:[%s8550_s29 + $0x90] sm:$0xff]  ;;  %v266_v13 = vld [vmem:[%s8550_s29 + $0x98] sm:$0xff]  ;;  %v268_v14 = vld [vmem:[%s8550_s29 + $0xa8] sm:$0xff] }
  0x24   : > { %249 = vst [vmem:[%s8555_s30 + $0x30] sm:$0xff] %v248_v4  ;;  %v270_v15 = vld [vmem:[%s8550_s29 + $0xb0] sm:$0xff]  ;;  %v272_v16 = vld [vmem:[%s8550_s29 + $0xc0] sm:$0xff]  ;;  %v274_v17 = vld [vmem:[%s8550_s29 + $0xc8] sm:$0xff] }
  0x25   : > { %251 = vst [vmem:[%s8555_s30 + $0x38] sm:$0xff] %v250_v5  ;;  %v276_v18 = vld [vmem:[%s8550_s29 + $0xd8] sm:$0xff]  ;;  %v278_v19 = vld [vmem:[%s8550_s29 + $0xe0] sm:$0xff]  ;;  %v280_v20 = vld [vmem:[%s8550_s29 + $0xf0] sm:$0xff] }
  0x26   : > { %253 = vst [vmem:[%s8555_s30 + $0x48] sm:$0xff] %v252_v6  ;;  %v282_v21 = vld [vmem:[%s8550_s29 + $0xf8] sm:$0xff]  ;;  %v284_v22 = vld [vmem:[%s8550_s29 + $0x108] sm:$0xff]  ;;  %v286_v23 = vld [vmem:[%s8550_s29 + $0x110] sm:$0xff] }
  0x27   : > { %255 = vst [vmem:[%s8555_s30 + $0x50] sm:$0xff] %v254_v7  ;;  %v7164_v24 = vld [vmem:[%s8550_s29 + $0x10] sm:$0xf]  ;;  %v7166_v25 = vld [vmem:[%s8550_s29 + $0x28] sm:$0xf] }
  0x28   : > { %257 = vst [vmem:[%s8555_s30 + $0x60] sm:$0xff] %v256_v8  ;;  %v7168_v26 = vld [vmem:[%s8550_s29 + $0x40] sm:$0xf]  ;;  %v7170_v27 = vld [vmem:[%s8550_s29 + $0x58] sm:$0xf] }
  0x29   : > { %259 = vst [vmem:[%s8555_s30 + $0x68] sm:$0xff] %v258_v9  ;;  %v7172_v28 = vld [vmem:[%s8550_s29 + $0x70] sm:$0xf]  ;;  %v7174_v29 = vld [vmem:[%s8550_s29 + $0x88] sm:$0xf] }
  0x2a   : > { %261 = vst [vmem:[%s8555_s30 + $0x78] sm:$0xff] %v260_v10  ;;  %v7176_v30 = vld [vmem:[%s8550_s29 + $0xa0] sm:$0xf]  ;;  %v7178_v31 = vld [vmem:[%s8550_s29 + $0xb8] sm:$0xf] }
  0x2b   : > { %263 = vst [vmem:[%s8555_s30 + $0x80] sm:$0xff] %v262_v11  ;;  %v7180_v32 = vld [vmem:[%s8550_s29 + $0xd0] sm:$0xf]  ;;  %v7182_v33 = vld [vmem:[%s8550_s29 + $0xe8] sm:$0xf] }
  0x2c   : > { %265 = vst [vmem:[%s8555_s30 + $0x90] sm:$0xff] %v264_v12  ;;  %v7184_v34 = vld [vmem:[%s8550_s29 + $0x100] sm:$0xf]  ;;  %v7186_v35 = vld [vmem:[%s8550_s29 + $0x118] sm:$0xf] }
  0x2d   : > { %267 = vst [vmem:[%s8555_s30 + $0x98] sm:$0xff] %v266_v13 }
  0x2e   : > { %269 = vst [vmem:[%s8555_s30 + $0xa8] sm:$0xff] %v268_v14 }
  0x2f   : > { %271 = vst [vmem:[%s8555_s30 + $0xb0] sm:$0xff] %v270_v15 }
  0x30   : > { %273 = vst [vmem:[%s8555_s30 + $0xc0] sm:$0xff] %v272_v16 }
  0x31   : > { %275 = vst [vmem:[%s8555_s30 + $0xc8] sm:$0xff] %v274_v17 }
  0x32   : > { %277 = vst [vmem:[%s8555_s30 + $0xd8] sm:$0xff] %v276_v18 }
  0x33   : > { %279 = vst [vmem:[%s8555_s30 + $0xe0] sm:$0xff] %v278_v19 }
  0x34   : > { %281 = vst [vmem:[%s8555_s30 + $0xf0] sm:$0xff] %v280_v20 }
  0x35   : > { %283 = vst [vmem:[%s8555_s30 + $0xf8] sm:$0xff] %v282_v21 }
  0x36   : > { %285 = vst [vmem:[%s8555_s30 + $0x108] sm:$0xff] %v284_v22 }
  0x37   : > { %287 = vst [vmem:[%s8555_s30 + $0x110] sm:$0xff] %v286_v23 }
  0x38   : > { %7165 = vst [vmem:[%s8555_s30 + $0x10] sm:$0xf] %v7164_v24 }
  0x39   : > { %7167 = vst [vmem:[%s8555_s30 + $0x28] sm:$0xf] %v7166_v25 }
  0x3a   : > { %7169 = vst [vmem:[%s8555_s30 + $0x40] sm:$0xf] %v7168_v26 }
  0x3b   : > { %7171 = vst [vmem:[%s8555_s30 + $0x58] sm:$0xf] %v7170_v27 }
  0x3c   : > { %7173 = vst [vmem:[%s8555_s30 + $0x70] sm:$0xf] %v7172_v28 }
  0x3d   : > { %7175 = vst [vmem:[%s8555_s30 + $0x88] sm:$0xf] %v7174_v29 }
  0x3e   : > { %7177 = vst [vmem:[%s8555_s30 + $0xa0] sm:$0xf] %v7176_v30 }
  0x3f   : > { %7179 = vst [vmem:[%s8555_s30 + $0xb8] sm:$0xf] %v7178_v31 }
  0x40   : > { %7181 = vst [vmem:[%s8555_s30 + $0xd0] sm:$0xf] %v7180_v32 }
  0x41   : > { %7183 = vst [vmem:[%s8555_s30 + $0xe8] sm:$0xf] %v7182_v33 }
  0x42   : > { %7185 = vst [vmem:[%s8555_s30 + $0x100] sm:$0xf] %v7184_v34 }
  0x43   : > { %7187 = vst [vmem:[%s8555_s30 + $0x118] sm:$0xf] %v7186_v35 }
  0x44   : > { %325 = vsyncadd %s227_s6, 3840 }
  0x45 PF: > { %s327_s7 = smul.u32 288, %s14947_s14  ;;  %s329_s9 = scalar_lea.sflag [#allocation3], %s14947_s14 }
  0x47   : > { %s8628_s8 = scalar_lea.vmem [#allocation2], %s327_s7 }
  0x48   : > { %8440 = dma.done.wait %s329_s9, 3840 }
  0x49   : > { %8441 = vsyncadd %s329_s9, 4294963456  ;;  %s334_s10 = sadd.s32 1, %s8444_s18 }
  0x4a   : > { %p7189_p10 = scmp.ge.s32.totalorder %s334_s10, 2 }
  0x4b   : > { %s339_s11 = ssub.s32 (!%p7189_p10), 1, %s14947_s14  ;;  %s7089_s12 = smul.u32 (!%p7189_p10), 192, %s8444_s18 }
  0x4c   : > { %338 = sbr.rel (%p7189_p10) target bundleno = 119 (0x77), region = 66 }
  0x4d   : > { %s7090_s15 = smul.u32 (!%p7189_p10), 480, %s8448_s19  ;;  %s347_s19 = scalar_lea.sflag (!%p7189_p10), [#allocation3], %s339_s11 }
  0x4e   : > { %s345_s16 = smul.u32 (!%p7189_p10), 288, %s339_s11 }
  0x4f   : > { %s7091_s17 = sadd.s32 (!%p7189_p10), %s7090_s15, %s7089_s12 }
  0x50   : > { %s8640_s28 = scalar_lea.vmem (!%p7189_p10), %s13384_s0, %s7091_s17  ;;  %s8645_s18 = scalar_lea.vmem (!%p7189_p10), [#allocation2], %s345_s16 }
  0x51   : > { %v7190_v36 = vld [vmem:[%s8640_s28 + $0xc0] sm:$0xff]  ;;  %v7191_v37 = vld [vmem:[%s8640_s28 + $0xc8] sm:$0xff]  ;;  %v7192_v38 = vld [vmem:[%s8640_s28 + $0xd8] sm:$0xff] }
  0x52   : > { %361 = vst [vmem:[%s8645_s18] sm:$0xff] %v7190_v36  ;;  %v7193_v39 = vld [vmem:[%s8640_s28 + $0xe0] sm:$0xff]  ;;  %v7194_v40 = vld [vmem:[%s8640_s28 + $0xf0] sm:$0xff]  ;;  %v7195_v41 = vld [vmem:[%s8640_s28 + $0xf8] sm:$0xff] }
  0x53   : > { %363 = vst [vmem:[%s8645_s18 + $0x8] sm:$0xff] %v7191_v37  ;;  %v7196_v42 = vld [vmem:[%s8640_s28 + $0x108] sm:$0xff]  ;;  %v7197_v43 = vld [vmem:[%s8640_s28 + $0x110] sm:$0xff]  ;;  %v7198_v44 = vld [vmem:[%s8640_s28 + $0x120] sm:$0xff] }
  0x54   : > { %365 = vst [vmem:[%s8645_s18 + $0x18] sm:$0xff] %v7192_v38  ;;  %v7199_v45 = vld [vmem:[%s8640_s28 + $0x128] sm:$0xff]  ;;  %v7200_v46 = vld [vmem:[%s8640_s28 + $0x138] sm:$0xff]  ;;  %v7201_v47 = vld [vmem:[%s8640_s28 + $0x140] sm:$0xff] }
  0x55   : > { %367 = vst [vmem:[%s8645_s18 + $0x20] sm:$0xff] %v7193_v39  ;;  %v7202_v48 = vld [vmem:[%s8640_s28 + $0x150] sm:$0xff]  ;;  %v7203_v49 = vld [vmem:[%s8640_s28 + $0x158] sm:$0xff]  ;;  %v7204_v50 = vld [vmem:[%s8640_s28 + $0x168] sm:$0xff] }
  0x56   : > { %369 = vst [vmem:[%s8645_s18 + $0x30] sm:$0xff] %v7194_v40  ;;  %v7205_v51 = vld [vmem:[%s8640_s28 + $0x170] sm:$0xff]  ;;  %v7206_v52 = vld [vmem:[%s8640_s28 + $0x180] sm:$0xff]  ;;  %v7207_v53 = vld [vmem:[%s8640_s28 + $0x188] sm:$0xff] }
  0x57   : > { %371 = vst [vmem:[%s8645_s18 + $0x38] sm:$0xff] %v7195_v41  ;;  %v7208_v54 = vld [vmem:[%s8640_s28 + $0x198] sm:$0xff]  ;;  %v7209_v55 = vld [vmem:[%s8640_s28 + $0x1a0] sm:$0xff]  ;;  %v7210_v56 = vld [vmem:[%s8640_s28 + $0x1b0] sm:$0xff] }
  0x58   : > { %373 = vst [vmem:[%s8645_s18 + $0x48] sm:$0xff] %v7196_v42  ;;  %v7211_v57 = vld [vmem:[%s8640_s28 + $0x1b8] sm:$0xff]  ;;  %v7212_v58 = vld [vmem:[%s8640_s28 + $0x1c8] sm:$0xff]  ;;  %v7213_v59 = vld [vmem:[%s8640_s28 + $0x1d0] sm:$0xff] }
  0x59   : > { %375 = vst [vmem:[%s8645_s18 + $0x50] sm:$0xff] %v7197_v43  ;;  %v7214_v60 = vld [vmem:[%s8640_s28 + $0xd0] sm:$0xf]  ;;  %v7216_v61 = vld [vmem:[%s8640_s28 + $0xe8] sm:$0xf] }
  0x5a   : > { %377 = vst [vmem:[%s8645_s18 + $0x60] sm:$0xff] %v7198_v44  ;;  %v7218_v62 = vld [vmem:[%s8640_s28 + $0x100] sm:$0xf]  ;;  %v7220_v63 = vld [vmem:[%s8640_s28 + $0x118] sm:$0xf] }
  0x5b   : > { %379 = vst [vmem:[%s8645_s18 + $0x68] sm:$0xff] %v7199_v45  ;;  %v7222_v0 = vld [vmem:[%s8640_s28 + $0x130] sm:$0xf]  ;;  %v7224_v1 = vld [vmem:[%s8640_s28 + $0x148] sm:$0xf] }
  0x5c   : > { %381 = vst [vmem:[%s8645_s18 + $0x78] sm:$0xff] %v7200_v46  ;;  %v7226_v2 = vld [vmem:[%s8640_s28 + $0x160] sm:$0xf]  ;;  %v7228_v3 = vld [vmem:[%s8640_s28 + $0x178] sm:$0xf] }
  0x5d   : > { %383 = vst [vmem:[%s8645_s18 + $0x80] sm:$0xff] %v7201_v47  ;;  %v7230_v4 = vld [vmem:[%s8640_s28 + $0x190] sm:$0xf]  ;;  %v7232_v5 = vld [vmem:[%s8640_s28 + $0x1a8] sm:$0xf] }
  0x5e   : > { %385 = vst [vmem:[%s8645_s18 + $0x90] sm:$0xff] %v7202_v48  ;;  %v7234_v6 = vld [vmem:[%s8640_s28 + $0x1c0] sm:$0xf]  ;;  %v7236_v7 = vld [vmem:[%s8640_s28 + $0x1d8] sm:$0xf] }
  0x5f   : > { %387 = vst [vmem:[%s8645_s18 + $0x98] sm:$0xff] %v7203_v49 }
  0x60   : > { %389 = vst [vmem:[%s8645_s18 + $0xa8] sm:$0xff] %v7204_v50 }
  0x61   : > { %391 = vst [vmem:[%s8645_s18 + $0xb0] sm:$0xff] %v7205_v51 }
  0x62   : > { %393 = vst [vmem:[%s8645_s18 + $0xc0] sm:$0xff] %v7206_v52 }
  0x63   : > { %395 = vst [vmem:[%s8645_s18 + $0xc8] sm:$0xff] %v7207_v53 }
  0x64   : > { %397 = vst [vmem:[%s8645_s18 + $0xd8] sm:$0xff] %v7208_v54 }
  0x65   : > { %399 = vst [vmem:[%s8645_s18 + $0xe0] sm:$0xff] %v7209_v55 }
  0x66   : > { %401 = vst [vmem:[%s8645_s18 + $0xf0] sm:$0xff] %v7210_v56 }
  0x67   : > { %403 = vst [vmem:[%s8645_s18 + $0xf8] sm:$0xff] %v7211_v57 }
  0x68   : > { %405 = vst [vmem:[%s8645_s18 + $0x108] sm:$0xff] %v7212_v58 }
  0x69   : > { %407 = vst [vmem:[%s8645_s18 + $0x110] sm:$0xff] %v7213_v59 }
  0x6a   : > { %7215 = vst [vmem:[%s8645_s18 + $0x10] sm:$0xf] %v7214_v60 }
  0x6b   : > { %7217 = vst [vmem:[%s8645_s18 + $0x28] sm:$0xf] %v7216_v61 }
  0x6c   : > { %7219 = vst [vmem:[%s8645_s18 + $0x40] sm:$0xf] %v7218_v62 }
  0x6d   : > { %7221 = vst [vmem:[%s8645_s18 + $0x58] sm:$0xf] %v7220_v63 }
  0x6e   : > { %7223 = vst [vmem:[%s8645_s18 + $0x70] sm:$0xf] %v7222_v0 }
  0x6f   : > { %7225 = vst [vmem:[%s8645_s18 + $0x88] sm:$0xf] %v7224_v1 }
  0x70   : > { %7227 = vst [vmem:[%s8645_s18 + $0xa0] sm:$0xf] %v7226_v2 }
  0x71   : > { %7229 = vst [vmem:[%s8645_s18 + $0xb8] sm:$0xf] %v7228_v3 }
  0x72   : > { %7231 = vst [vmem:[%s8645_s18 + $0xd0] sm:$0xf] %v7230_v4 }
  0x73   : > { %7233 = vst [vmem:[%s8645_s18 + $0xe8] sm:$0xf] %v7232_v5 }
  0x74   : > { %7235 = vst [vmem:[%s8645_s18 + $0x100] sm:$0xf] %v7234_v6 }
  0x75   : > { %7237 = vst [vmem:[%s8645_s18 + $0x118] sm:$0xf] %v7236_v7 }
  0x76   : > { %445 = vsyncadd %s347_s19, 3840 }
  0x77 PF: > { %v8208_v8 = vld [vmem:[%s13385_s1 + $0x78] sm:$0xff]  ;;  %vm898_vm0 = vsmask.f32 256  ;;  %v8207_v9 = vld [vmem:[%s13385_s1 + $0x70] sm:$0xff]  ;;  %vm578_vm1 = vcmask 1040384   ;;  %vm582_vm2 = vcmask 1041409  }
  0x78   : > { %1889 = vmatpush.bf16.msra.mxu0 %v8208_v8  ;;  %vm899_vm3 = vsmask.f32 1284  ;;  %vm586_vm4 = vcmask 1042434   ;;  %vm901_vm5 = vsmask.f32 2312  ;;  %vm590_vm6 = vcmask 1043459  }
  0x79   : > { %vm900_vm7 = vmor %vm898_vm0, %vm899_vm3  ;;  %vm903_vm8 = vsmask.f32 3340  ;;  %v8206_v16 = vld [vmem:[%s13385_s1 + $0x68] sm:$0xff]  ;;  %vm905_vm10 = vsmask.f32 4368  ;;  %v8205_v32 = vld [vmem:[%s13385_s1 + $0x60] sm:$0xff] }
  0x7a   : > { %vm902_vm9 = vmor %vm900_vm7, %vm901_vm5  ;;  %vm907_vm12 = vsmask.f32 5396  ;;  %vm909_vm13 = vsmask.f32 6424  ;;  %vm911_vm3 = vsmask.f32 7452 }
  0x7b   : > { %vm904_vm11 = vmor %vm902_vm9, %vm903_vm8  ;;  %v13797_v36 = vmov 0  ;;  %v8204_v49 = vld [vmem:[%s13385_s1 + $0x58] sm:$0xff]  ;;  %v8203_v61 = vld [vmem:[%s13385_s1 + $0x50] sm:$0xff]  ;;  %s7762_s11 = sadd.s32 4294967295, %s8527_s25 }
  0x7c   : > { %v446_v10 = vld [vmem:[%s8628_s8] sm:$0xff]  ;;  %v447_v11 = vld [vmem:[%s8628_s8 + $0x8] sm:$0xff]  ;;  %v448_v12 = vld [vmem:[%s8628_s8 + $0x10] sm:$0xf]  ;;  %1890 = vmatpush.bf16.msra.mxu0 %v8207_v9 }
  0x7d   : > { %v8727_v13 = vpack.c.bf16 %v446_v10, %v446_v10  ;;  %v8729_v14 = vpack.c.bf16 %v447_v11, %v447_v11  ;;  %v8731_v15 = vpack.c.bf16 %v448_v12, %v448_v12  ;;  %vm906_vm14 = vmor %vm904_vm11, %vm905_vm10  ;;  %v449_v63 = vld [vmem:[%s8628_s8 + $0x18] sm:$0xff]  ;;  %v450_v0 = vld [vmem:[%s8628_s8 + $0x20] sm:$0xff] }
  0x7e   : > { %vm908_vm15 = vmor %vm906_vm14, %vm907_vm12  ;;  %v8202_v1 = vld [vmem:[%s13385_s1 + $0x48] sm:$0xff]  ;;  %v8829_v2 = vpack.c.bf16 %v449_v63, %v449_v63  ;;  %v8831_v3 = vpack.c.bf16 %v450_v0, %v450_v0  ;;  %v8201_v4 = vld [vmem:[%s13385_s1 + $0x40] sm:$0xff]  ;;  %vm5782_vm12 = vcmask 1042432   ;;  %vm5288_vm14 = vsmask.f32 3328 }
  0x7f   : > { %13794 = vst [vmem:[#allocation7_spill] sm:$0xff] %v8727_v13  ;;  %v548_v17 = vrot.slane %v8727_v13, 3  ;;  %v549_v18 = vrot.slane %v8729_v14, 3  ;;  %v550_v19 = vrot.slane %v8731_v15, 3  ;;  %vm910_vm0 = vmor %vm908_vm15, %vm909_vm13  ;;  %v451_v5 = vld [vmem:[%s8628_s8 + $0x28] sm:$0xf] }
  0x80   : > { %13795 = vst [vmem:[#allocation8_spill] sm:$0xff] %v8729_v14  ;;  %1891 = vmatpush.bf16.msra.mxu0 %v8206_v16  ;;  %vm8782_vm5 = vmor %vm910_vm0, %vm911_vm3  ;;  %v551_v6 = vrot.slane %v8829_v2, 3  ;;  %v552_v7 = vrot.slane %v8831_v3, 3  ;;  %v8844_v11 = vpack.c.bf16 %v451_v5, %v451_v5  ;;  %vm5783_vm13 = vcmask 1046532  }
  0x81   : > { %13796 = vst [vmem:[#allocation9_spill] sm:$0xff] %v8731_v15  ;;  %v8742_v20 = vsel %vm578_vm1, %v8727_v13, %v548_v17  ;;  %v583_v21 = vsel %vm582_vm2, %v8727_v13, %v548_v17  ;;  %v587_v22 = vsel %vm586_vm4, %v8727_v13, %v548_v17  ;;  %v591_v23 = vsel %vm590_vm6, %v8727_v13, %v548_v17 }
  0x82   : > { %v8750_v24 = vrot.slane %v583_v21, 1  ;;  %v8752_v25 = vrot.slane %v587_v22, 2  ;;  %v8754_v26 = vrot.slane %v591_v23, 3  ;;  %v8758_v27 = vsel %vm578_vm1, %v8729_v14, %v549_v18  ;;  %13800 = vst [vmem:[#allocation11_spill] sm:$0xff] %v8829_v2 }
  0x83   : > { %v597_v28 = vsel %vm582_vm2, %v8729_v14, %v549_v18  ;;  %v600_v29 = vsel %vm586_vm4, %v8729_v14, %v549_v18  ;;  %v603_v30 = vsel %vm590_vm6, %v8729_v14, %v549_v18  ;;  %v8770_v31 = vsel %vm578_vm1, %v8731_v15, %v550_v19  ;;  %13801 = vst [vmem:[#allocation12_spill] sm:$0xff] %v8831_v3 }
  0x84   : > { %v8776_v33 = vrot.slane %v597_v28, 1  ;;  %v8778_v34 = vrot.slane %v600_v29, 2  ;;  %v8780_v35 = vrot.slane %v603_v30, 3  ;;  %v13798_v36 = vsel %vm8782_vm5, 4294967295, %v13797_v36  ;;  %1892 = vmatpush.bf16.msra.mxu0 %v8205_v32  ;;  %13802 = vst [vmem:[#allocation13_spill] sm:$0xff] %v8844_v11 }
  0x85   : > { %13799 = vst [vmem:[#allocation10_spill] sm:$0xff] %v13798_v36  ;;  %v913_v37 = vshrl.u32 %v8742_v20, 16  ;;  %v918_v38 = vshll.u32 %v8750_v24, 16  ;;  %v921_v39 = vshrl.u32 %v8750_v24, 16  ;;  %v926_v40 = vshll.u32 %v8752_v25, 16 }
  0x86   : > { %v929_v41 = vshrl.u32 %v8752_v25, 16  ;;  %v934_v42 = vshll.u32 %v8754_v26, 16  ;;  %v937_v43 = vshrl.u32 %v8754_v26, 16  ;;  %v941_v44 = vshll.u32 %v8758_v27, 16 }
  0x87   : > { %v920_v45 = vsel %vm8782_vm5, %v913_v37, %v918_v38  ;;  %v928_v46 = vsel %vm8782_vm5, %v921_v39, %v926_v40  ;;  %v944_v47 = vshrl.u32 %v8758_v27, 16  ;;  %v949_v48 = vshll.u32 %v8776_v33, 16 }
  0x88   : > { %v936_v50 = vsel %vm8782_vm5, %v929_v41, %v934_v42  ;;  %v943_v51 = vsel %vm8782_vm5, %v937_v43, %v941_v44  ;;  %v952_v52 = vshrl.u32 %v8776_v33, 16  ;;  %v957_v53 = vshll.u32 %v8778_v34, 16  ;;  %1631 = vst [vmem:[#allocation1] ss:$9 sm:$0xff] %v920_v45  ;;  %1893 = vmatpush.bf16.msra.mxu0 %v8204_v49 }
  0x89   : > { %v951_v54 = vsel %vm8782_vm5, %v944_v47, %v949_v48  ;;  %v960_v55 = vshrl.u32 %v8778_v34, 16  ;;  %v965_v56 = vshll.u32 %v8780_v35, 16  ;;  %v968_v57 = vshrl.u32 %v8780_v35, 16  ;;  %1634 = vst [vmem:[#allocation1 + $0x1] ss:$9 sm:$0xff] %v928_v46  ;;  %v452_v46 = vld [vmem:[%s8628_s8 + $0x30] sm:$0xff] }
  0x8a   : > { %v959_v58 = vsel %vm8782_vm5, %v952_v52, %v957_v53  ;;  %v972_v59 = vshll.u32 %v8770_v31, 16  ;;  %1637 = vst [vmem:[#allocation1 + $0x2] ss:$9 sm:$0xff] %v936_v50  ;;  %v868_v8 = vsel %vm582_vm2, %v8731_v15, %v550_v19  ;;  %v975_v10 = vshrl.u32 %v8770_v31, 16 }
  0x8b   : > { %v967_v60 = vsel %vm8782_vm5, %v960_v55, %v965_v56  ;;  %1640 = vst [vmem:[#allocation1 + $0x3] ss:$9 sm:$0xff] %v943_v51  ;;  %v870_v9 = vrot.slane %v868_v8, 1  ;;  %v8848_v12 = vsel %vm578_vm1, %v8829_v2, %v551_v6  ;;  %v612_v16 = vsel %vm582_vm2, %v8829_v2, %v551_v6  ;;  %v453_v55 = vld [vmem:[%s8628_s8 + $0x38] sm:$0xff]  ;;  %v8200_v56 = vld [vmem:[%s13385_s1 + $0x38] sm:$0xff] }
  0x8c   : > { %v974_v62 = vsel %vm8782_vm5, %v968_v57, %v972_v59  ;;  %1643 = vst [vmem:[#allocation1 + $0x4] ss:$9 sm:$0xff] %v951_v54  ;;  %1894 = vmatpush.bf16.msra.mxu0 %v8203_v61  ;;  %v615_v17 = vsel %vm586_vm4, %v8829_v2, %v551_v6  ;;  %v618_v18 = vsel %vm590_vm6, %v8829_v2, %v551_v6  ;;  %v8856_v19 = vrot.slane %v612_v16, 1 }
  0x8d   : > { %1646 = vst [vmem:[#allocation1 + $0x5] ss:$9 sm:$0xff] %v959_v58  ;;  %v8858_v21 = vrot.slane %v615_v17, 2  ;;  %v8860_v22 = vrot.slane %v618_v18, 3  ;;  %v8864_v23 = vsel %vm578_vm1, %v8831_v3, %v552_v7  ;;  %v624_v29 = vsel %vm582_vm2, %v8831_v3, %v552_v7  ;;  %2126 = vmatpush.bf16.msra.mxu1 %v8200_v56  ;;  %8337 = vmatpush.bf16.msra.mxu3 %v8200_v56  ;;  %v456_v56 = vld [vmem:[%s8628_s8 + $0x50] sm:$0xff] }
  0x8e   : > { %1649 = vst [vmem:[#allocation1 + $0x6] ss:$9 sm:$0xff] %v967_v60  ;;  %v627_v30 = vsel %vm586_vm4, %v8831_v3, %v552_v7  ;;  %v630_v32 = vsel %vm590_vm6, %v8831_v3, %v552_v7  ;;  %v980_v37 = vshll.u32 %v870_v9, 16  ;;  %v8872_v38 = vrot.slane %v624_v29, 1  ;;  %v454_v29 = vld [vmem:[%s8628_s8 + $0x40] sm:$0xf] }
  0x8f   : > { %1652 = vst [vmem:[#allocation1 + $0x7] ss:$9 sm:$0xff] %v974_v62  ;;  %v8874_v39 = vrot.slane %v627_v30, 2  ;;  %v8876_v40 = vrot.slane %v630_v32, 3  ;;  %v983_v41 = vshrl.u32 %v8848_v12, 16  ;;  %v988_v43 = vshll.u32 %v8856_v19, 16 }
  0x90   : > { %1895 = vmatpush.bf16.msra.mxu0 %v8202_v1  ;;  %13803 = vst [vmem:[#allocation14_spill] sm:$0xff] %v8848_v12  ;;  %v982_v42 = vsel %vm8782_vm5, %v975_v10, %v980_v37  ;;  %v991_v44 = vshrl.u32 %v8856_v19, 16  ;;  %v996_v45 = vshll.u32 %v8858_v21, 16  ;;  %v999_v47 = vshrl.u32 %v8858_v21, 16 }
  0x91   : > { %13804 = vst [vmem:[#allocation15_spill] sm:$0xff] %v8856_v19  ;;  %v1004_v48 = vshll.u32 %v8860_v22, 16  ;;  %v1007_v49 = vshrl.u32 %v8860_v22, 16  ;;  %v1011_v50 = vshll.u32 %v8864_v23, 16  ;;  %v8891_v51 = vsel %vm8782_vm5, %v983_v41, %v988_v43 }
  0x92   : > { %13805 = vst [vmem:[#allocation16_spill] sm:$0xff] %v8858_v21  ;;  %v8895_v52 = vsel %vm8782_vm5, %v991_v44, %v996_v45  ;;  %v1014_v53 = vshrl.u32 %v8864_v23, 16  ;;  %v1019_v54 = vshll.u32 %v8872_v38, 16  ;;  %v1022_v59 = vshrl.u32 %v8872_v38, 16 }
  0x93   : > { %13806 = vst [vmem:[#allocation17_spill] sm:$0xff] %v8860_v22  ;;  %v8905_v57 = vsel %vm8782_vm5, %v999_v47, %v1004_v48  ;;  %v8909_v58 = vsel %vm8782_vm5, %v1007_v49, %v1011_v50  ;;  %v1027_v60 = vshll.u32 %v8874_v39, 16  ;;  %v1030_v62 = vshrl.u32 %v8874_v39, 16 }
  0x94   : > { %1896 = vmatpush.bf16.msra.mxu0 %v8201_v4  ;;  %13807 = vst [vmem:[#allocation18_spill] sm:$0xff] %v8864_v23  ;;  %v8916_v61 = vsel %vm8782_vm5, %v1014_v53, %v1019_v54  ;;  %v1035_v63 = vshll.u32 %v8876_v40, 16  ;;  %v8921_v0 = vpack.c.bf16 %v452_v46, %v452_v46  ;;  %v8928_v4 = vpack.c.bf16 %v453_v55, %v453_v55  ;;  %v455_v46 = vld [vmem:[%s8628_s8 + $0x48] sm:$0xff] }
  0x95   : > { %13808 = vst [vmem:[#allocation19_spill] sm:$0xff] %v8872_v38  ;;  %v8925_v1 = vsel %vm8782_vm5, %v1022_v59, %v1027_v60  ;;  %v553_v5 = vrot.slane %v8844_v11, 3  ;;  %v8976_v49 = vpack.c.bf16 %v454_v29, %v454_v29  ;;  %v9001_v29 = vpack.c.bf16 %v456_v56, %v456_v56 }
  0x96   : > { %v1653_v28 = vld [vmem:[#allocation1] sm:$0xff]  ;;  %13809 = vst [vmem:[#allocation20_spill] sm:$0xff] %v8874_v39  ;;  %v8933_v6 = vsel %vm8782_vm5, %v1030_v62, %v1035_v63  ;;  %v554_v7 = vrot.slane %v8921_v0, 3  ;;  %v555_v8 = vrot.slane %v8928_v4, 3  ;;  %v8987_v63 = vpack.c.bf16 %v455_v46, %v455_v46 }
  0x97   : > { %1897 = vmatmul.bf16.vlgmr.msra.gmra.mxu0 %v1653_v28  ;;  %13810 = vst [vmem:[#allocation21_spill] sm:$0xff] %v8876_v40  ;;  %v8941_v9 = vsel %vm578_vm1, %v8844_v11, %v553_v5  ;;  %v871_v10 = vsel %vm582_vm2, %v8844_v11, %v553_v5  ;;  %v1038_v28 = vshrl.u32 %v8876_v40, 16  ;;  %vm5289_vm3 = vsmask.f32 7440 }
  0x98   : > { %1655 = vst [vmem:[#allocation1] ss:$9 sm:$0xff] %v982_v42  ;;  %v639_v16 = vsel %vm582_vm2, %v8921_v0, %v554_v7  ;;  %v642_v17 = vsel %vm586_vm4, %v8921_v0, %v554_v7  ;;  %v645_v18 = vsel %vm590_vm6, %v8921_v0, %v554_v7  ;;  %v8957_v30 = vsel %vm578_vm1, %v8921_v0, %v554_v7 }
  0x99   : > { %13811 = vst [vmem:[#allocation22_spill] sm:$0xff] %v8891_v51  ;;  %v8959_v32 = vrot.slane %v639_v16, 1  ;;  %v8961_v37 = vrot.slane %v642_v17, 2  ;;  %v8963_v41 = vrot.slane %v645_v18, 3  ;;  %v651_v42 = vsel %vm582_vm2, %v8928_v4, %v555_v8 }
  0x9a   : > { %13812 = vst [vmem:[#allocation23_spill] sm:$0xff] %v8895_v52  ;;  %v654_v43 = vsel %vm586_vm4, %v8928_v4, %v555_v8  ;;  %v873_v44 = vrot.slane %v871_v10, 1  ;;  %v1042_v45 = vshll.u32 %v8941_v9, 16  ;;  %v8973_v47 = vsel %vm578_vm1, %v8928_v4, %v555_v8 }
  0x9b   : > { %13813 = vst [vmem:[#allocation24_spill] sm:$0xff] %v8905_v57  ;;  %v1045_v48 = vshrl.u32 %v8941_v9, 16  ;;  %v8978_v50 = vrot.slane %v651_v42, 1  ;;  %v1053_v54 = vshrl.u32 %v8957_v30, 16  ;;  %v1058_v55 = vshll.u32 %v8959_v32, 16 }
  0x9c   : > { %13814 = vst [vmem:[#allocation25_spill] sm:$0xff] %v8909_v58  ;;  %v1050_v53 = vshll.u32 %v873_v44, 16  ;;  %v8983_v59 = vrot.slane %v654_v43, 2  ;;  %v1061_v60 = vshrl.u32 %v8959_v32, 16  ;;  %v1066_v62 = vshll.u32 %v8961_v37, 16 }
  0x9d   : > { %1657 = vst [vmem:[#allocation1 + $0x1] ss:$9 sm:$0xff] %v8891_v51  ;;  %v8991_v5 = vsel %vm8782_vm5, %v1038_v28, %v1042_v45  ;;  %v1069_v7 = vshrl.u32 %v8961_v37, 16  ;;  %v1074_v10 = vshll.u32 %v8963_v41, 16  ;;  %v1077_v17 = vshrl.u32 %v8963_v41, 16 }
  0x9e   : > { %13815 = vst [vmem:[#allocation26_spill] sm:$0xff] %v8916_v61  ;;  %v8997_v16 = vsel %vm8782_vm5, %v1045_v48, %v1050_v53  ;;  %v1081_v18 = vshll.u32 %v8973_v47, 16  ;;  %v9005_v43 = vsel %vm8782_vm5, %v1053_v54, %v1058_v55  ;;  %v1084_v28 = vshrl.u32 %v8973_v47, 16  ;;  %v8199_v55 = vld [vmem:[%s13385_s1 + $0x30] sm:$0xff] }
  0x9f   : > { %1659 = vst [vmem:[#allocation1 + $0x2] ss:$9 sm:$0xff] %v8895_v52  ;;  %v1089_v44 = vshll.u32 %v8978_v50, 16  ;;  %v1092_v45 = vshrl.u32 %v8978_v50, 16  ;;  %v9012_v46 = vsel %vm8782_vm5, %v1061_v60, %v1066_v62  ;;  %v1097_v48 = vshll.u32 %v8983_v59, 16  ;;  %2127 = vmatpush.bf16.msra.mxu1 %v8199_v55  ;;  %8338 = vmatpush.bf16.msra.mxu3 %v8199_v55 }
  0xa0   : > { %13816 = vst [vmem:[#allocation27_spill] sm:$0xff] %v8921_v0  ;;  %v556_v53 = vrot.slane %v8976_v49, 3  ;;  %v557_v54 = vrot.slane %v8987_v63, 3  ;;  %v9023_v56 = vsel %vm8782_vm5, %v1069_v7, %v1074_v10  ;;  %v657_v60 = vsel %vm590_vm6, %v8928_v4, %v555_v8  ;;  %v8198_v8 = vld [vmem:[%s13385_s1 + $0x28] sm:$0xff]  ;;  %v459_v0 = vld [vmem:[%s8628_s8 + $0x68] sm:$0xff] }
  0xa1   : > { %13817 = vst [vmem:[#allocation28_spill] sm:$0xff] %v8925_v1  ;;  %v9030_v62 = vsel %vm8782_vm5, %v1077_v17, %v1081_v18  ;;  %v9039_v7 = vrot.slane %v9001_v29, 3  ;;  %v9046_v10 = vsel %vm8782_vm5, %v1092_v45, %v1097_v48  ;;  %v9049_v17 = vrot.slane %v657_v60, 3 }
  0xa2   : > { %1661 = vst [vmem:[#allocation1 + $0x3] ss:$9 sm:$0xff] %v8905_v57  ;;  %v666_v18 = vsel %vm582_vm2, %v8987_v63, %v557_v54  ;;  %v9061_v45 = vsel %vm578_vm1, %v8976_v49, %v556_v53  ;;  %v672_v48 = vsel %vm590_vm6, %v8987_v63, %v557_v54 }
  0xa3   : > { %13818 = vst [vmem:[#allocation29_spill] sm:$0xff] %v8928_v4  ;;  %v9066_v60 = vrot.slane %v666_v18, 1  ;;  %2128 = vmatpush.bf16.msra.mxu1 %v8198_v8  ;;  %8339 = vmatpush.bf16.msra.mxu3 %v8198_v8  ;;  %v1105_v18 = vshll.u32 %v9049_v17, 16  ;;  %v458_v8 = vld [vmem:[%s8628_s8 + $0x60] sm:$0xff] }
  0xa4   : > { %13819 = vst [vmem:[#allocation30_spill] sm:$0xff] %v8933_v6  ;;  %v9109_v52 = vpack.c.bf16 %v458_v8, %v458_v8 }
  0xa5   : > { %1663 = vst [vmem:[#allocation1 + $0x4] ss:$9 sm:$0xff] %v8909_v58 }
  0xa6   : > { %1665 = vst [vmem:[#allocation1 + $0x5] ss:$9 sm:$0xff] %v8916_v61  ;;  %v8196_v61 = vld [vmem:[%s13385_s1 + $0x18] sm:$0xff] }
  0xa7   : > { %13820 = vst [vmem:[#allocation31_spill] sm:$0xff] %v8941_v9 }
  0xa8   : > { %1667 = vst [vmem:[#allocation1 + $0x6] ss:$9 sm:$0xff] %v8925_v1 }
  0xa9   : > { %1669 = vst [vmem:[#allocation1 + $0x7] ss:$9 sm:$0xff] %v8933_v6 }
  0xaa   : > { %13821 = vst [vmem:[#allocation32_spill] sm:$0xff] %v8957_v30 }
  0xab   : > { %13822 = vst [vmem:[#allocation33_spill] sm:$0xff] %v8959_v32 }
  0xac   : > { %13823 = vst [vmem:[#allocation34_spill] sm:$0xff] %v8961_v37 }
  0xad   : > { %13824 = vst [vmem:[#allocation35_spill] sm:$0xff] %v8963_v41 }
  0xae   : > { %13825 = vst [vmem:[#allocation36_spill] sm:$0xff] %v8973_v47 }
  0xaf   : > { %13826 = vst [vmem:[#allocation37_spill] sm:$0xff] %v8976_v49 }
  0xb0   : > { %13827 = vst [vmem:[#allocation38_spill] sm:$0xff] %v8978_v50  ;;  %v1670_v42 = vld [vmem:[#allocation1] sm:$0xff] }
  0xb1   : > { %13828 = vst [vmem:[#allocation39_spill] sm:$0xff] %v8983_v59  ;;  %1902 = vmatmul.bf16.gmra.mxu0 %v1670_v42  ;;  %v9035_v42 = vsel %vm8782_vm5, %v1084_v28, %v1089_v44  ;;  %v874_v28 = vsel %vm582_vm2, %v8976_v49, %v556_v53  ;;  %v669_v44 = vsel %vm586_vm4, %v8987_v63, %v557_v54 }
  0xb2   : > { %13829 = vst [vmem:[#allocation40_spill] sm:$0xff] %v8987_v63  ;;  %v876_v55 = vrot.slane %v874_v28, 1  ;;  %v9074_v53 = vsel %vm578_vm1, %v8987_v63, %v557_v54  ;;  %v678_v28 = vsel %vm582_vm2, %v9001_v29, %v9039_v7  ;;  %v9091_v54 = vsel %vm578_vm1, %v9001_v29, %v9039_v7 }
  0xb3   : > { %13830 = vst [vmem:[#allocation41_spill] sm:$0xff] %v8991_v5  ;;  %v9094_v6 = vrot.slane %v678_v28, 1  ;;  %v1123_v1 = vshrl.u32 %v9074_v53, 16  ;;  %v1151_v63 = vshll.u32 %v9091_v54, 16 }
  0xb4   : > { %13831 = vst [vmem:[#allocation42_spill] sm:$0xff] %v8997_v16 }
  0xb5   : > { %13832 = vst [vmem:[#allocation43_spill] sm:$0xff] %v9001_v29 }
  0xb6   : > { %13833 = vst [vmem:[#allocation44_spill] sm:$0xff] %v9005_v43 }
  0xb7   : > { %13834 = vst [vmem:[#allocation45_spill] sm:$0xff] %v9012_v46 }
  0xb8   : > { %1672 = vst [vmem:[#allocation1] ss:$9 sm:$0xff] %v8991_v5  ;;  %v1120_v5 = vshll.u32 %v876_v55, 16  ;;  %v1131_v55 = vshrl.u32 %v9066_v60, 16 }
  0xb9   : > { %13835 = vst [vmem:[#allocation46_spill] sm:$0xff] %v9023_v56 }
  0xba   : > { %1674 = vst [vmem:[#allocation1 + $0x1] ss:$9 sm:$0xff] %v8997_v16  ;;  %v1112_v16 = vshll.u32 %v9061_v45, 16 }
  0xbb   : > { %13836 = vst [vmem:[#allocation47_spill] sm:$0xff] %v9030_v62 }
  0xbc   : > { %1676 = vst [vmem:[#allocation1 + $0x2] ss:$9 sm:$0xff] %v9005_v43  ;;  %v1108_v43 = vshrl.u32 %v9049_v17, 16 }
  0xbd   : > { %13837 = vst [vmem:[#allocation48_spill] sm:$0xff] %v9035_v42 }
  0xbe   : > { %1678 = vst [vmem:[#allocation1 + $0x3] ss:$9 sm:$0xff] %v9012_v46  ;;  %v9083_v46 = vrot.slane %v672_v48, 3  ;;  %v1128_v48 = vshll.u32 %v9066_v60, 16  ;;  %v9113_v51 = vsel %vm8782_vm5, %v1108_v43, %v1112_v16  ;;  %v1154_v16 = vshrl.u32 %v9091_v54, 16 }
  0xbf   : > { %13838 = vst [vmem:[#allocation49_spill] sm:$0xff] %v9046_v10  ;;  %v1159_v43 = vshll.u32 %v9094_v6, 16 }
  0xc0   : > { %1680 = vst [vmem:[#allocation1 + $0x4] ss:$9 sm:$0xff] %v9023_v56  ;;  %v9076_v56 = vrot.slane %v669_v44, 2  ;;  %v1115_v44 = vshrl.u32 %v9061_v45, 16  ;;  %v9125_v8 = vsel %vm8782_vm5, %v1123_v1, %v1128_v48  ;;  %v560_v1 = vrot.slane %v9109_v52, 3  ;;  %v8195_v48 = vld [vmem:[%s13385_s1 + $0x10] sm:$0xff] }
  0xc1   : > { %13839 = vst [vmem:[#allocation50_spill] sm:$0xff] %v9049_v17 }
  0xc2   : > { %1682 = vst [vmem:[#allocation1 + $0x5] ss:$9 sm:$0xff] %v9030_v62  ;;  %v1100_v62 = vshrl.u32 %v8983_v59, 16  ;;  %v1136_v28 = vshll.u32 %v9076_v56, 16  ;;  %v1139_v49 = vshrl.u32 %v9076_v56, 16 }
  0xc3   : > { %1684 = vst [vmem:[#allocation1 + $0x6] ss:$9 sm:$0xff] %v9035_v42  ;;  %v8197_v42 = vld [vmem:[%s13385_s1 + $0x20] sm:$0xff] }
  0xc4   : > { %13840 = vst [vmem:[#allocation51_spill] sm:$0xff] %v9061_v45  ;;  %2129 = vmatpush.bf16.msra.mxu1 %v8197_v42  ;;  %8340 = vmatpush.bf16.msra.mxu3 %v8197_v42  ;;  %v9105_v57 = vsel %vm8782_vm5, %v1100_v62, %v1105_v18  ;;  %v9119_v62 = vsel %vm8782_vm5, %v1115_v44, %v1120_v5  ;;  %v1147_v18 = vshrl.u32 %v9083_v46, 16 }
  0xc5   : > { %1686 = vst [vmem:[#allocation1 + $0x7] ss:$9 sm:$0xff] %v9046_v10  ;;  %v457_v10 = vld [vmem:[%s8628_s8 + $0x58] sm:$0xf]  ;;  %v9134_v5 = vsel %vm8782_vm5, %v1131_v55, %v1136_v28  ;;  %v681_v44 = vsel %vm586_vm4, %v9001_v29, %v9039_v7  ;;  %v684_v55 = vsel %vm590_vm6, %v9001_v29, %v9039_v7  ;;  %v693_v7 = vsel %vm582_vm2, %v9109_v52, %v560_v1 }
  0xc6   : > { %13841 = vst [vmem:[#allocation52_spill] sm:$0xff] %v9066_v60  ;;  %v9101_v58 = vpack.c.bf16 %v457_v10, %v457_v10  ;;  %v1144_v10 = vshll.u32 %v9083_v46, 16  ;;  %v9154_v28 = vsel %vm8782_vm5, %v1147_v18, %v1151_v63  ;;  %v8194_v63 = vld [vmem:[%s13385_s1 + $0x8] sm:$0xff]  ;;  %v696_v18 = vsel %vm586_vm4, %v9109_v52, %v560_v1 }
  0xc7   : > { %13842 = vst [vmem:[#allocation53_spill] sm:$0xff] %v9074_v53 }
  0xc8   : > { %13843 = vst [vmem:[#allocation54_spill] sm:$0xff] %v9076_v56  ;;  %2130 = vmatpush.bf16.msra.mxu1 %v8196_v61  ;;  %v559_v4 = vrot.slane %v9101_v58, 3  ;;  %8341 = vmatpush.bf16.msra.mxu3 %v8196_v61  ;;  %v9146_v61 = vsel %vm8782_vm5, %v1139_v49, %v1144_v10  ;;  %v9164_v49 = vrot.slane %v681_v44, 2 }
  0xc9   : > { %13844 = vst [vmem:[#allocation55_spill] sm:$0xff] %v9083_v46 }
  0xca   : > { %13845 = vst [vmem:[#allocation56_spill] sm:$0xff] %v9091_v54  ;;  %v877_v10 = vsel %vm582_vm2, %v9101_v58, %v559_v4 }
  0xcb   : > { %13846 = vst [vmem:[#allocation57_spill] sm:$0xff] %v9094_v6  ;;  %v879_v44 = vrot.slane %v877_v10, 1  ;;  %v1170_v10 = vshrl.u32 %v9164_v49, 16 }
  0xcc   : > { %13847 = vst [vmem:[#allocation58_spill] sm:$0xff] %v9101_v58  ;;  %v1687_v42 = vld [vmem:[#allocation1] sm:$0xff]  ;;  %2131 = vmatpush.bf16.msra.mxu1 %v8195_v48  ;;  %8342 = vmatpush.bf16.msra.mxu3 %v8195_v48 }
  0xcd   : > { %13848 = vst [vmem:[#allocation59_spill] sm:$0xff] %v9105_v57  ;;  %1907 = vmatmul.bf16.gmra.mxu0 %v1687_v42  ;;  %v9157_v42 = vpack.c.bf16 %v459_v0, %v459_v0  ;;  %v9172_v0 = vrot.slane %v684_v55, 3  ;;  %v9187_v55 = vrot.slane %v693_v7, 1 }
  0xce   : > { %13849 = vst [vmem:[#allocation60_spill] sm:$0xff] %v9109_v52 }
  0xcf   : > { %13850 = vst [vmem:[#allocation61_spill] sm:$0xff] %v9113_v51  ;;  %v561_v48 = vrot.slane %v9157_v42, 3  ;;  %v1175_v7 = vshll.u32 %v9172_v0, 16  ;;  %v1201_v3 = vshrl.u32 %v9187_v55, 16 }
  0xd0   : > { %13851 = vst [vmem:[#allocation62_spill] sm:$0xff] %v9119_v62  ;;  %2132 = vmatpush.bf16.msra.mxu1 %v8194_v63  ;;  %8343 = vmatpush.bf16.msra.mxu3 %v8194_v63  ;;  %v1198_v63 = vshll.u32 %v9187_v55, 16 }
  0xd1   : > { %13852 = vst [vmem:[#allocation63_spill] sm:$0xff] %v9125_v8 }
  0xd2   : > { %1689 = vst [vmem:[#allocation1] ss:$9 sm:$0xff] %v9105_v57 }
  0xd3   : > { %13853 = vst [vmem:[#allocation64_spill] sm:$0xff] %v9134_v5 }
  0xd4   : > { %1691 = vst [vmem:[#allocation1 + $0x1] ss:$9 sm:$0xff] %v9113_v51  ;;  %v9161_v51 = vsel %vm8782_vm5, %v1154_v16, %v1159_v43  ;;  %v9182_v16 = vsel %vm578_vm1, %v9101_v58, %v559_v4  ;;  %v699_v43 = vsel %vm590_vm6, %v9109_v52, %v560_v1  ;;  %v9196_v4 = vsel %vm578_vm1, %v9109_v52, %v560_v1 }
  0xd5   : > { %13854 = vst [vmem:[#allocation65_spill] sm:$0xff] %v9146_v61  ;;  %v1182_v57 = vshll.u32 %v9182_v16, 16  ;;  %v1185_v29 = vshrl.u32 %v9182_v16, 16  ;;  %v1190_v58 = vshll.u32 %v879_v44, 16  ;;  %v9209_v1 = vsel %vm578_vm1, %v9157_v42, %v561_v48 }
  0xd6   : > { %1693 = vst [vmem:[#allocation1 + $0x2] ss:$9 sm:$0xff] %v9119_v62  ;;  %v1178_v62 = vshrl.u32 %v9172_v0, 16  ;;  %v1193_v52 = vshrl.u32 %v9196_v4, 16  ;;  %v1224_v14 = vshrl.u32 %v9209_v1, 16 }
  0xd7   : > { %13855 = vst [vmem:[#allocation66_spill] sm:$0xff] %v9154_v28  ;;  %v9231_v2 = vsel %vm8782_vm5, %v1185_v29, %v1190_v58 }
  0xd8   : > { %1695 = vst [vmem:[#allocation1 + $0x3] ss:$9 sm:$0xff] %v9125_v8  ;;  %v9202_v8 = vrot.slane %v699_v43, 3  ;;  %v9219_v43 = vsel %vm8782_vm5, %v1170_v10, %v1175_v7  ;;  %v9225_v15 = vsel %vm8782_vm5, %v1178_v62, %v1182_v57  ;;  %v1221_v7 = vshll.u32 %v9209_v1, 16  ;;  %v462_v62 = vld [vmem:[%s8628_s8 + $0x80] sm:$0xff] }
  0xd9   : > { %13856 = vst [vmem:[#allocation67_spill] sm:$0xff] %v9157_v42 }
  0xda   : > { %13857 = vst [vmem:[#allocation68_spill] sm:$0xff] %v9161_v51  ;;  %v1217_v10 = vshrl.u32 %v9202_v8, 16 }
  0xdb   : > { %1697 = vst [vmem:[#allocation1 + $0x4] ss:$9 sm:$0xff] %v9134_v5  ;;  %v9198_v5 = vrot.slane %v696_v18, 2 }
  0xdc   : > { %13858 = vst [vmem:[#allocation69_spill] sm:$0xff] %v9164_v49 }
  0xdd   : > { %1699 = vst [vmem:[#allocation1 + $0x5] ss:$9 sm:$0xff] %v9146_v61  ;;  %v1162_v61 = vshrl.u32 %v9094_v6, 16  ;;  %v1206_v44 = vshll.u32 %v9198_v5, 16 }
  0xde   : > { %13859 = vst [vmem:[#allocation70_spill] sm:$0xff] %v9172_v0 }
  0xdf   : > { %1701 = vst [vmem:[#allocation1 + $0x6] ss:$9 sm:$0xff] %v9154_v28  ;;  %v1167_v28 = vshll.u32 %v9164_v49, 16  ;;  %v9243_v57 = vsel %vm8782_vm5, %v1201_v3, %v1206_v44  ;;  %v461_v3 = vld [vmem:[%s8628_s8 + $0x78] sm:$0xff]  ;;  %v463_v44 = vld [vmem:[%s8628_s8 + $0x88] sm:$0xf] }
  0xe0   : > { %1703 = vst [vmem:[#allocation1 + $0x7] ss:$9 sm:$0xff] %v9161_v51  ;;  %v8193_v51 = vld [vmem:[%s13385_s1] sm:$0xff]  ;;  %v9261_v29 = vpack.c.bf16 %v461_v3, %v461_v3  ;;  %v464_v3 = vld [vmem:[%s8628_s8 + $0x90] sm:$0xff] }
  0xe1   : > { %13860 = vst [vmem:[#allocation71_spill] sm:$0xff] %v9182_v16  ;;  %v9213_v18 = vsel %vm8782_vm5, %v1162_v61, %v1167_v28  ;;  %2133 = vmatpush.bf16.msra.mxu1 %v8193_v51  ;;  %8344 = vmatpush.bf16.msra.mxu3 %v8193_v51  ;;  %v1209_v61 = vshrl.u32 %v9198_v5, 16  ;;  %v1214_v28 = vshll.u32 %v9202_v8, 16  ;;  %v9238_v51 = vsel %vm8782_vm5, %v1193_v52, %v1198_v63 }
  0xe2   : > { %13861 = vst [vmem:[#allocation72_spill] sm:$0xff] %v9187_v55  ;;  %v9253_v52 = vsel %vm8782_vm5, %v1217_v10, %v1221_v7  ;;  %v705_v10 = vsel %vm582_vm2, %v9157_v42, %v561_v48 }
  0xe3   : > { %13862 = vst [vmem:[#allocation73_spill] sm:$0xff] %v9196_v4  ;;  %v9248_v58 = vsel %vm8782_vm5, %v1209_v61, %v1214_v28  ;;  %v9267_v61 = vpack.c.bf16 %v462_v62, %v462_v62  ;;  %v563_v28 = vrot.slane %v9261_v29, 3  ;;  %v9280_v62 = vrot.slane %v705_v10, 1 }
  0xe4   : > { %13863 = vst [vmem:[#allocation74_spill] sm:$0xff] %v9198_v5 }
  0xe5   : > { %13864 = vst [vmem:[#allocation75_spill] sm:$0xff] %v9202_v8  ;;  %v1229_v8 = vshll.u32 %v9280_v62, 16 }
  0xe6   : > { %13865 = vst [vmem:[#allocation76_spill] sm:$0xff] %v9209_v1 }
  0xe7   : > { %13866 = vst [vmem:[#allocation77_spill] sm:$0xff] %v9213_v18  ;;  %v1704_v11 = vld [vmem:[#allocation1] sm:$0xff] }
  0xe8   : > { %13867 = vst [vmem:[#allocation78_spill] sm:$0xff] %v9219_v43  ;;  %1912 = vmatmul.bf16.gmra.mxu0 %v1704_v11  ;;  %v460_v11 = vld [vmem:[%s8628_s8 + $0x70] sm:$0xf] }
  0xe9   : > { %13868 = vst [vmem:[#allocation79_spill] sm:$0xff] %v9225_v15  ;;  %v9264_v63 = vpack.c.bf16 %v460_v11, %v460_v11  ;;  %v711_v11 = vsel %vm590_vm6, %v9157_v42, %v561_v48 }
  0xea   : > { %13869 = vst [vmem:[#allocation80_spill] sm:$0xff] %v9231_v2 }
  0xeb   : > { %1706 = vst [vmem:[#allocation1] ss:$9 sm:$0xff] %v9213_v18  ;;  %v9289_v18 = vpack.c.bf16 %v464_v3, %v464_v3 }
  0xec   : > { %13870 = vst [vmem:[#allocation81_spill] sm:$0xff] %v9238_v51 }
  0xed   : > { %1708 = vst [vmem:[#allocation1 + $0x1] ss:$9 sm:$0xff] %v9219_v43  ;;  %v723_v43 = vsel %vm586_vm4, %v9261_v29, %v563_v28 }
  0xee   : > { %13871 = vst [vmem:[#allocation82_spill] sm:$0xff] %v9243_v57 }
  0xef   : > { %1710 = vst [vmem:[#allocation1 + $0x2] ss:$9 sm:$0xff] %v9225_v15  ;;  %v720_v15 = vsel %vm582_vm2, %v9261_v29, %v563_v28 }
  0xf0   : > { %13872 = vst [vmem:[#allocation83_spill] sm:$0xff] %v9248_v58  ;;  %v9306_v13 = vrot.slane %v720_v15, 1 }
  0xf1   : > { %1712 = vst [vmem:[#allocation1 + $0x3] ss:$9 sm:$0xff] %v9231_v2 }
  0xf2   : > { %13873 = vst [vmem:[#allocation84_spill] sm:$0xff] %v9253_v52 }
  0xf3   : > { %1714 = vst [vmem:[#allocation1 + $0x4] ss:$9 sm:$0xff] %v9238_v51  ;;  %v564_v51 = vrot.slane %v9267_v61, 3 }
  0xf4   : > { %1716 = vst [vmem:[#allocation1 + $0x5] ss:$9 sm:$0xff] %v9243_v57  ;;  %v9276_v57 = vpack.c.bf16 %v463_v44, %v463_v44  ;;  %v726_v44 = vsel %vm590_vm6, %v9261_v29, %v563_v28 }
  0xf5   : > { %1718 = vst [vmem:[#allocation1 + $0x6] ss:$9 sm:$0xff] %v9248_v58  ;;  %v562_v58 = vrot.slane %v9264_v63, 3  ;;  %v9312_v5 = vrot.slane %v726_v44, 3  ;;  %v732_v55 = vsel %vm582_vm2, %v9267_v61, %v564_v51 }
  0xf6   : > { %1720 = vst [vmem:[#allocation1 + $0x7] ss:$9 sm:$0xff] %v9253_v52  ;;  %v708_v52 = vsel %vm586_vm4, %v9157_v42, %v561_v48  ;;  %v565_v10 = vrot.slane %v9276_v57, 3  ;;  %v9304_v42 = vsel %vm578_vm1, %v9261_v29, %v563_v28  ;;  %v9320_v28 = vsel %vm8782_vm5, %v1224_v14, %v1229_v8 }
  0xf7   : > { %13874 = vst [vmem:[#allocation85_spill] sm:$0xff] %v9261_v29  ;;  %v9283_v2 = vrot.slane %v708_v52, 2  ;;  %v880_v48 = vsel %vm582_vm2, %v9264_v63, %v562_v58  ;;  %v9300_v52 = vsel %vm578_vm1, %v9264_v63, %v562_v58  ;;  %v1232_v58 = vshrl.u32 %v9280_v62, 16 }
  0xf8   : > { %13875 = vst [vmem:[#allocation86_spill] sm:$0xff] %v9264_v63  ;;  %v882_v3 = vrot.slane %v880_v48, 1  ;;  %v1252_v29 = vshll.u32 %v9300_v52, 16  ;;  %v1263_v8 = vshrl.u32 %v9304_v42, 16 }
  0xf9   : > { %13876 = vst [vmem:[#allocation87_spill] sm:$0xff] %v9267_v61  ;;  %v1237_v63 = vshll.u32 %v9283_v2, 16  ;;  %v1240_v15 = vshrl.u32 %v9283_v2, 16 }
  0xfa   : > { %13877 = vst [vmem:[#allocation88_spill] sm:$0xff] %v9276_v57  ;;  %v1260_v1 = vshll.u32 %v882_v3, 16 }
  0xfb   : > { %13878 = vst [vmem:[#allocation89_spill] sm:$0xff] %v9280_v62  ;;  %v9327_v44 = vsel %vm8782_vm5, %v1232_v58, %v1237_v63  ;;  %v1255_v62 = vshrl.u32 %v9300_v52, 16 }
  0xfc   : > { %13879 = vst [vmem:[#allocation90_spill] sm:$0xff] %v9283_v2  ;;  %v1268_v2 = vshll.u32 %v9306_v13, 16 }
  0xfd   : > { %v1721_v7 = vld [vmem:[#allocation1] sm:$0xff]  ;;  %13880 = vst [vmem:[#allocation91_spill] sm:$0xff] %v9289_v18  ;;  %v9346_v3 = vsel %vm8782_vm5, %v1255_v62, %v1260_v1  ;;  %v738_v1 = vsel %vm590_vm6, %v9267_v61, %v564_v51 }
  0xfe   : > { %1917 = vmatmul.bf16.gmra.mxu0 %v1721_v7  ;;  %v9291_v7 = vrot.slane %v711_v11, 3  ;;  %13882 = vst [vmem:[#allocation93_spill] sm:$0xff] %v9300_v52  ;;  %v9308_v11 = vrot.slane %v723_v43, 2 }
  0xff   : > { %13883 = vst [vmem:[#allocation94_spill] sm:$0xff] %v9304_v42 }
 0x100   : > { %13881 = vst [vmem:[#allocation92_spill] sm:$0xff] %v9291_v7  ;;  %v1245_v43 = vshll.u32 %v9291_v7, 16  ;;  %v1248_v48 = vshrl.u32 %v9291_v7, 16  ;;  %v1271_v7 = vshrl.u32 %v9306_v13, 16  ;;  %v1276_v58 = vshll.u32 %v9308_v11, 16 }
 0x101   : > { %13884 = vst [vmem:[#allocation95_spill] sm:$0xff] %v9306_v13 }
 0x102   : > { %13885 = vst [vmem:[#allocation96_spill] sm:$0xff] %v9308_v11  ;;  %v9334_v14 = vsel %vm8782_vm5, %v1240_v15, %v1245_v43  ;;  %v9342_v63 = vsel %vm8782_vm5, %v1248_v48, %v1252_v29  ;;  %v1279_v15 = vshrl.u32 %v9308_v11, 16  ;;  %v566_v43 = vrot.slane %v9289_v18, 3 }
 0x103   : > { %13886 = vst [vmem:[#allocation97_spill] sm:$0xff] %v9312_v5  ;;  %v9356_v29 = vsel %vm8782_vm5, %v1263_v8, %v1268_v2  ;;  %v1284_v48 = vshll.u32 %v9312_v5, 16  ;;  %v9364_v62 = vsel %vm8782_vm5, %v1271_v7, %v1276_v58  ;;  %v883_v7 = vsel %vm582_vm2, %v9276_v57, %v565_v10  ;;  %v465_v58 = vld [vmem:[%s8628_s8 + $0x98] sm:$0xff] }
 0x104   : > { %13887 = vst [vmem:[#allocation98_spill] sm:$0xff] %v9320_v28  ;;  %v9408_v13 = vsel %vm578_vm1, %v9289_v18, %v566_v43 }
 0x105   : > { %13888 = vst [vmem:[#allocation99_spill] sm:$0xff] %v9327_v44  ;;  %v9375_v2 = vsel %vm8782_vm5, %v1279_v15, %v1284_v48  ;;  %v9395_v48 = vsel %vm578_vm1, %v9276_v57, %v565_v10 }
 0x106   : > { %1723 = vst [vmem:[#allocation1] ss:$9 sm:$0xff] %v9320_v28  ;;  %v9371_v28 = vrot.slane %v732_v55, 1  ;;  %v747_v55 = vsel %vm582_vm2, %v9289_v18, %v566_v43 }
 0x107   : > { %13889 = vst [vmem:[#allocation100_spill] sm:$0xff] %v9334_v14 }
 0x108   : > { %1725 = vst [vmem:[#allocation1 + $0x1] ss:$9 sm:$0xff] %v9327_v44  ;;  %v735_v44 = vsel %vm586_vm4, %v9267_v61, %v564_v51  ;;  %v1302_v11 = vshrl.u32 %v9371_v28, 16 }
 0x109   : > { %13890 = vst [vmem:[#allocation101_spill] sm:$0xff] %v9342_v63  ;;  %v9378_v8 = vrot.slane %v735_v44, 2  ;;  %v1287_v44 = vshrl.u32 %v9312_v5, 16 }
 0x10a   : > { %13891 = vst [vmem:[#allocation102_spill] sm:$0xff] %v9346_v3 }
 0x10b   : > { %1727 = vst [vmem:[#allocation1 + $0x2] ss:$9 sm:$0xff] %v9334_v14  ;;  %v9369_v14 = vsel %vm578_vm1, %v9267_v61, %v564_v51  ;;  %v750_v51 = vsel %vm586_vm4, %v9289_v18, %v566_v43  ;;  %v9400_v61 = vpack.c.bf16 %v465_v58, %v465_v58  ;;  %v1307_v5 = vshll.u32 %v9378_v8, 16 }
 0x10c   : > { %13892 = vst [vmem:[#allocation103_spill] sm:$0xff] %v9356_v29  ;;  %v1291_v15 = vshll.u32 %v9369_v14, 16  ;;  %v9410_v10 = vrot.slane %v750_v51, 2  ;;  %v1325_v51 = vshrl.u32 %v9395_v48, 16 }
 0x10d   : > { %1729 = vst [vmem:[#allocation1 + $0x3] ss:$9 sm:$0xff] %v9342_v63  ;;  %v466_v63 = vld [vmem:[%s8628_s8 + $0xa0] sm:$0xf]  ;;  %v567_v4 = vrot.slane %v9400_v61, 3  ;;  %v9431_v16 = vsel %vm8782_vm5, %v1302_v11, %v1307_v5  ;;  %v753_v5 = vsel %vm590_vm6, %v9289_v18, %v566_v43 }
 0x10e   : > { %13893 = vst [vmem:[#allocation104_spill] sm:$0xff] %v9364_v62  ;;  %v9417_v58 = vsel %vm8782_vm5, %v1287_v44, %v1291_v15  ;;  %v9421_v42 = vpack.c.bf16 %v466_v63, %v466_v63  ;;  %v1333_v44 = vshrl.u32 %v9408_v13, 16 }
 0x10f   : > { %1731 = vst [vmem:[#allocation1 + $0x4] ss:$9 sm:$0xff] %v9346_v3  ;;  %v9384_v3 = vrot.slane %v738_v1, 3  ;;  %v1294_v1 = vshrl.u32 %v9369_v14, 16 }
 0x110   : > { %13894 = vst [vmem:[#allocation105_spill] sm:$0xff] %v9369_v14  ;;  %v467_v14 = vld [vmem:[%s8628_s8 + $0xa8] sm:$0xff] }
 0x111   : > { %13895 = vst [vmem:[#allocation106_spill] sm:$0xff] %v9371_v28  ;;  %v1315_v57 = vshll.u32 %v9384_v3, 16  ;;  %v9435_v63 = vpack.c.bf16 %v467_v14, %v467_v14  ;;  %v568_v14 = vrot.slane %v9421_v42, 3 }
 0x112   : > { %13896 = vst [vmem:[#allocation107_spill] sm:$0xff] %v9375_v2 }
 0x113   : > { %1733 = vst [vmem:[#allocation1 + $0x5] ss:$9 sm:$0xff] %v9356_v29  ;;  %v1299_v29 = vshll.u32 %v9371_v28, 16  ;;  %v1322_v28 = vshll.u32 %v9395_v48, 16 }
 0x114   : > { %13897 = vst [vmem:[#allocation108_spill] sm:$0xff] %v9378_v8 }
 0x115   : > { %1735 = vst [vmem:[#allocation1 + $0x6] ss:$9 sm:$0xff] %v9364_v62  ;;  %v885_v62 = vrot.slane %v883_v7, 1  ;;  %v1310_v7 = vshrl.u32 %v9378_v8, 16  ;;  %v9425_v52 = vsel %vm8782_vm5, %v1294_v1, %v1299_v29 }
 0x116   : > { %13898 = vst [vmem:[#allocation109_spill] sm:$0xff] %v9384_v3 }
 0x117   : > { %1737 = vst [vmem:[#allocation1 + $0x7] ss:$9 sm:$0xff] %v9375_v2  ;;  %v9402_v2 = vrot.slane %v747_v55, 1  ;;  %v1318_v55 = vshrl.u32 %v9384_v3, 16  ;;  %v1330_v8 = vshll.u32 %v885_v62, 16  ;;  %v9439_v29 = vsel %vm8782_vm5, %v1310_v7, %v1315_v57 }
 0x118   : > { %13899 = vst [vmem:[#allocation110_spill] sm:$0xff] %v9395_v48  ;;  %v1346_v62 = vshll.u32 %v9410_v10, 16  ;;  %v9465_v7 = vrot.slane %v753_v5, 3 }
 0x119   : > { %13900 = vst [vmem:[#allocation111_spill] sm:$0xff] %v9400_v61  ;;  %v1338_v15 = vshll.u32 %v9402_v2, 16  ;;  %v1341_v1 = vshrl.u32 %v9402_v2, 16  ;;  %v9448_v11 = vsel %vm8782_vm5, %v1318_v55, %v1322_v28  ;;  %v9453_v57 = vsel %vm8782_vm5, %v1325_v51, %v1330_v8 }
 0x11a   : > { %13901 = vst [vmem:[#allocation112_spill] sm:$0xff] %v9402_v2  ;;  %v569_v28 = vrot.slane %v9435_v63, 3  ;;  %v762_v8 = vsel %vm586_vm4, %v9400_v61, %v567_v4  ;;  %v765_v51 = vsel %vm590_vm6, %v9400_v61, %v567_v4 }
 0x11b   : > { %13902 = vst [vmem:[#allocation113_spill] sm:$0xff] %v9408_v13  ;;  %v9461_v43 = vsel %vm8782_vm5, %v1333_v44, %v1338_v15  ;;  %v9471_v55 = vsel %vm8782_vm5, %v1341_v1, %v1346_v62  ;;  %v9479_v44 = vsel %vm578_vm1, %v9400_v61, %v567_v4  ;;  %v9484_v5 = vrot.slane %v762_v8, 2  ;;  %v468_v62 = vld [vmem:[%s8628_s8 + $0xb0] sm:$0xff]  ;;  %v14005_v36 = vld [vmem:[#allocation108_spill] sm:$0xff] }
 0x11c   : > { %13903 = vst [vmem:[#allocation114_spill] sm:$0xff] %v9410_v10  ;;  %v886_v1 = vsel %vm582_vm2, %v9421_v42, %v568_v14  ;;  %v1361_v8 = vshll.u32 %v9479_v44, 16 }
 0x11d   : > { %13904 = vst [vmem:[#allocation115_spill] sm:$0xff] %v9417_v58 }
 0x11e   : > { %13905 = vst [vmem:[#allocation116_spill] sm:$0xff] %v9421_v42  ;;  %v1738_v3 = vld [vmem:[#allocation1] sm:$0xff] }
 0x11f   : > { %13906 = vst [vmem:[#allocation117_spill] sm:$0xff] %v9425_v52  ;;  %1922 = vmatmul.bf16.gmra.mxu0 %v1738_v3  ;;  %v759_v3 = vsel %vm582_vm2, %v9400_v61, %v567_v4  ;;  %v1349_v4 = vshrl.u32 %v9410_v10, 16  ;;  %v9513_v10 = vsel %vm578_vm1, %v9435_v63, %v569_v28 }
 0x120   : > { %13907 = vst [vmem:[#allocation118_spill] sm:$0xff] %v9431_v16  ;;  %v9481_v15 = vrot.slane %v759_v3, 1  ;;  %v1354_v3 = vshll.u32 %v9465_v7, 16 }
 0x121   : > { %13908 = vst [vmem:[#allocation119_spill] sm:$0xff] %v9435_v63 }
 0x122   : > { %13909 = vst [vmem:[#allocation120_spill] sm:$0xff] %v9439_v29  ;;  %v1372_v61 = vshrl.u32 %v9481_v15, 16 }
 0x123   : > { %1740 = vst [vmem:[#allocation1] ss:$9 sm:$0xff] %v9417_v58  ;;  %v9505_v58 = vpack.c.bf16 %v468_v62, %v468_v62 }
 0x124   : > { %13910 = vst [vmem:[#allocation121_spill] sm:$0xff] %v9448_v11 }
 0x125   : > { %1742 = vst [vmem:[#allocation1 + $0x1] ss:$9 sm:$0xff] %v9425_v52  ;;  %v469_v52 = vld [vmem:[%s8628_s8 + $0xb8] sm:$0xf]  ;;  %v570_v13 = vrot.slane %v9505_v58, 3 }
 0x126   : > { %13911 = vst [vmem:[#allocation122_spill] sm:$0xff] %v9453_v57 }
 0x127   : > { %1744 = vst [vmem:[#allocation1 + $0x2] ss:$9 sm:$0xff] %v9431_v16  ;;  %v888_v16 = vrot.slane %v886_v1, 1  ;;  %v1380_v1 = vshrl.u32 %v9484_v5, 16 }
 0x128   : > { %13912 = vst [vmem:[#allocation123_spill] sm:$0xff] %v9461_v43 }
 0x129   : > { %1746 = vst [vmem:[#allocation1 + $0x3] ss:$9 sm:$0xff] %v9439_v29  ;;  %v1357_v29 = vshrl.u32 %v9465_v7, 16 }
 0x12a   : > { %13913 = vst [vmem:[#allocation124_spill] sm:$0xff] %v9465_v7  ;;  %v1377_v7 = vshll.u32 %v9484_v5, 16 }
 0x12b   : > { %13914 = vst [vmem:[#allocation125_spill] sm:$0xff] %v9471_v55 }
 0x12c   : > { %1748 = vst [vmem:[#allocation1 + $0x4] ss:$9 sm:$0xff] %v9448_v11  ;;  %v9490_v11 = vrot.slane %v765_v51, 3  ;;  %v1369_v51 = vshll.u32 %v9481_v15, 16 }
 0x12d   : > { %1750 = vst [vmem:[#allocation1 + $0x5] ss:$9 sm:$0xff] %v9453_v57  ;;  %v774_v57 = vsel %vm582_vm2, %v9435_v63, %v569_v28 }
 0x12e   : > { %13915 = vst [vmem:[#allocation126_spill] sm:$0xff] %v9479_v44  ;;  %v9507_v18 = vrot.slane %v774_v57, 1  ;;  %v9523_v57 = vsel %vm8782_vm5, %v1357_v29, %v1361_v8  ;;  %v1388_v62 = vshrl.u32 %v9490_v11, 16  ;;  %v9537_v29 = vsel %vm8782_vm5, %v1372_v61, %v1377_v7 }
 0x12f   : > { %13916 = vst [vmem:[#allocation127_spill] sm:$0xff] %v9481_v15  ;;  %v1403_v8 = vshrl.u32 %v9513_v10, 16  ;;  %v780_v61 = vsel %vm590_vm6, %v9435_v63, %v569_v28 }
 0x130   : > { %1752 = vst [vmem:[#allocation1 + $0x6] ss:$9 sm:$0xff] %v9461_v43  ;;  %v9500_v43 = vsel %vm578_vm1, %v9421_v42, %v568_v14  ;;  %v9517_v14 = vsel %vm8782_vm5, %v1349_v4, %v1354_v3  ;;  %v1385_v42 = vshll.u32 %v9490_v11, 16  ;;  %v1400_v3 = vshll.u32 %v888_v16, 16 }
 0x131   : > { %13917 = vst [vmem:[#allocation128_spill] sm:$0xff] %v9484_v5  ;;  %v1392_v15 = vshll.u32 %v9500_v43, 16  ;;  %v1395_v4 = vshrl.u32 %v9500_v43, 16 }
 0x132   : > { %1754 = vst [vmem:[#allocation1 + $0x7] ss:$9 sm:$0xff] %v9471_v55  ;;  %v1364_v55 = vshrl.u32 %v9479_v44, 16  ;;  %v9527_v44 = vpack.c.bf16 %v469_v52, %v469_v52  ;;  %v1408_v52 = vshll.u32 %v9507_v18, 16  ;;  %v9546_v16 = vsel %vm8782_vm5, %v1380_v1, %v1385_v42  ;;  %v470_v42 = vld [vmem:[%s8628_s8 + $0xc0] sm:$0xff] }
 0x133   : > { %13918 = vst [vmem:[#allocation129_spill] sm:$0xff] %v9490_v11  ;;  %v9553_v7 = vsel %vm8782_vm5, %v1388_v62, %v1392_v15  ;;  %v9572_v62 = vrot.slane %v780_v61, 3 }
 0x134   : > { %13919 = vst [vmem:[#allocation130_spill] sm:$0xff] %v9500_v43  ;;  %v9531_v2 = vsel %vm8782_vm5, %v1364_v55, %v1369_v51  ;;  %v777_v55 = vsel %vm586_vm4, %v9435_v63, %v569_v28  ;;  %v9558_v51 = vsel %vm8782_vm5, %v1395_v4, %v1400_v3  ;;  %v571_v1 = vrot.slane %v9527_v44, 3 }
 0x135   : > { %13920 = vst [vmem:[#allocation131_spill] sm:$0xff] %v9505_v58  ;;  %v786_v28 = vsel %vm582_vm2, %v9505_v58, %v570_v13  ;;  %v9569_v15 = vsel %vm8782_vm5, %v1403_v8, %v1408_v52  ;;  %v789_v4 = vsel %vm586_vm4, %v9505_v58, %v570_v13  ;;  %v792_v3 = vsel %vm590_vm6, %v9505_v58, %v570_v13 }
 0x136   : > { %13921 = vst [vmem:[#allocation132_spill] sm:$0xff] %v9507_v18  ;;  %v9585_v8 = vsel %vm578_vm1, %v9505_v58, %v570_v13  ;;  %v9587_v52 = vrot.slane %v786_v28, 1  ;;  %v9590_v61 = vrot.slane %v789_v4, 2  ;;  %v1424_v13 = vshll.u32 %v9572_v62, 16 }
 0x137   : > { %13922 = vst [vmem:[#allocation133_spill] sm:$0xff] %v9513_v10  ;;  %v1427_v28 = vshrl.u32 %v9572_v62, 16  ;;  %v1431_v4 = vshll.u32 %v9585_v8, 16  ;;  %v1434_v58 = vshrl.u32 %v9585_v8, 16 }
 0x138   : > { %13923 = vst [vmem:[#allocation134_spill] sm:$0xff] %v9517_v14 }
 0x139   : > { %13924 = vst [vmem:[#allocation135_spill] sm:$0xff] %v9523_v57  ;;  %v1755_v5 = vld [vmem:[#allocation1] sm:$0xff] }
 0x13a   : > { %13925 = vst [vmem:[#allocation136_spill] sm:$0xff] %v9527_v44  ;;  %1927 = vmatmul.bf16.gmra.mxu0 %v1755_v5  ;;  %v9563_v5 = vrot.slane %v777_v55, 2  ;;  %v471_v55 = vld [vmem:[%s8628_s8 + $0xc8] sm:$0xff] }
 0x13b   : > { %13926 = vst [vmem:[#allocation137_spill] sm:$0xff] %v9531_v2 }
 0x13c   : > { %13927 = vst [vmem:[#allocation138_spill] sm:$0xff] %v9537_v29 }
 0x13d   : > { %1757 = vst [vmem:[#allocation1] ss:$9 sm:$0xff] %v9517_v14 }
 0x13e   : > { %13928 = vst [vmem:[#allocation139_spill] sm:$0xff] %v9546_v16 }
 0x13f   : > { %1759 = vst [vmem:[#allocation1 + $0x1] ss:$9 sm:$0xff] %v9523_v57  ;;  %v9600_v57 = vpack.c.bf16 %v471_v55, %v471_v55 }
 0x140   : > { %13929 = vst [vmem:[#allocation140_spill] sm:$0xff] %v9553_v7 }
 0x141   : > { %1761 = vst [vmem:[#allocation1 + $0x2] ss:$9 sm:$0xff] %v9531_v2  ;;  %v9596_v2 = vrot.slane %v792_v3, 3  ;;  %v1439_v3 = vshll.u32 %v9587_v52, 16 }
 0x142   : > { %13930 = vst [vmem:[#allocation141_spill] sm:$0xff] %v9558_v51 }
 0x143   : > { %1763 = vst [vmem:[#allocation1 + $0x3] ss:$9 sm:$0xff] %v9537_v29  ;;  %v9581_v29 = vpack.c.bf16 %v470_v42, %v470_v42  ;;  %v1419_v42 = vshrl.u32 %v9563_v5, 16  ;;  %v9632_v10 = vsel %vm8782_vm5, %v1434_v58, %v1439_v3 }
 0x144   : > { %13931 = vst [vmem:[#allocation142_spill] sm:$0xff] %v9563_v5 }
 0x145   : > { %13932 = vst [vmem:[#allocation143_spill] sm:$0xff] %v9569_v15  ;;  %v572_v63 = vrot.slane %v9581_v29, 3 }
 0x146   : > { %1765 = vst [vmem:[#allocation1 + $0x4] ss:$9 sm:$0xff] %v9546_v16  ;;  %v1411_v16 = vshrl.u32 %v9507_v18, 16  ;;  %v9619_v18 = vsel %vm8782_vm5, %v1419_v42, %v1424_v13 }
 0x147   : > { %13933 = vst [vmem:[#allocation144_spill] sm:$0xff] %v9572_v62  ;;  %v1442_v62 = vshrl.u32 %v9587_v52, 16  ;;  %v804_v58 = vsel %vm586_vm4, %v9581_v29, %v572_v63 }
 0x148   : > { %1767 = vst [vmem:[#allocation1 + $0x5] ss:$9 sm:$0xff] %v9553_v7  ;;  %v889_v7 = vsel %vm582_vm2, %v9527_v44, %v571_v1 }
 0x149   : > { %1769 = vst [vmem:[#allocation1 + $0x6] ss:$9 sm:$0xff] %v9558_v51  ;;  %v1416_v51 = vshll.u32 %v9563_v5, 16  ;;  %v891_v14 = vrot.slane %v889_v7, 1  ;;  %v1447_v5 = vshll.u32 %v9590_v61, 16  ;;  %v1450_v7 = vshrl.u32 %v9590_v61, 16 }
 0x14a   : > { %13934 = vst [vmem:[#allocation145_spill] sm:$0xff] %v9581_v29 }
 0x14b   : > { %13935 = vst [vmem:[#allocation146_spill] sm:$0xff] %v9585_v8  ;;  %v9613_v55 = vsel %vm8782_vm5, %v1411_v16, %v1416_v51  ;;  %v1458_v8 = vshrl.u32 %v9596_v2, 16  ;;  %v1470_v13 = vshll.u32 %v891_v14, 16 }
 0x14c   : > { %13936 = vst [vmem:[#allocation147_spill] sm:$0xff] %v9587_v52  ;;  %v472_v52 = vld [vmem:[%s8628_s8 + $0xd0] sm:$0xf] }
 0x14d   : > { %1771 = vst [vmem:[#allocation1 + $0x7] ss:$9 sm:$0xff] %v9569_v15  ;;  %v9606_v15 = vsel %vm578_vm1, %v9527_v44, %v571_v1  ;;  %v1455_v1 = vshll.u32 %v9596_v2, 16  ;;  %v9625_v44 = vsel %vm8782_vm5, %v1427_v28, %v1431_v4  ;;  %v801_v28 = vsel %vm582_vm2, %v9581_v29, %v572_v63 }
 0x14e   : > { %13937 = vst [vmem:[#allocation148_spill] sm:$0xff] %v9590_v61  ;;  %v1462_v16 = vshll.u32 %v9606_v15, 16  ;;  %v1465_v42 = vshrl.u32 %v9606_v15, 16  ;;  %v573_v61 = vrot.slane %v9600_v57, 3  ;;  %v9641_v4 = vsel %vm8782_vm5, %v1442_v62, %v1447_v5 }
 0x14f   : > { %13938 = vst [vmem:[#allocation149_spill] sm:$0xff] %v9596_v2  ;;  %v9648_v14 = vsel %vm8782_vm5, %v1450_v7, %v1455_v1  ;;  %v9651_v3 = vpack.c.bf16 %v472_v52, %v472_v52  ;;  %v9660_v62 = vrot.slane %v801_v28, 1  ;;  %v9669_v52 = vsel %vm578_vm1, %v9581_v29, %v572_v63  ;;  %v474_v28 = vld [vmem:[%s8628_s8 + $0xe0] sm:$0xff] }
 0x150   : > { %13939 = vst [vmem:[#allocation150_spill] sm:$0xff] %v9600_v57  ;;  %v9657_v5 = vsel %vm8782_vm5, %v1458_v8, %v1462_v16  ;;  %v9664_v7 = vsel %vm8782_vm5, %v1465_v42, %v1470_v13  ;;  %v9671_v1 = vrot.slane %v804_v58, 2  ;;  %v813_v8 = vsel %vm582_vm2, %v9600_v57, %v573_v61  ;;  %v473_v16 = vld [vmem:[%s8628_s8 + $0xd8] sm:$0xff] }
 0x151   : > { %13940 = vst [vmem:[#allocation151_spill] sm:$0xff] %v9606_v15  ;;  %v816_v42 = vsel %vm586_vm4, %v9600_v57, %v573_v61  ;;  %v574_v13 = vrot.slane %v9651_v3, 3  ;;  %v9689_v58 = vsel %vm578_vm1, %v9600_v57, %v573_v61 }
 0x152   : > { %13941 = vst [vmem:[#allocation152_spill] sm:$0xff] %v9613_v55 }
 0x153   : > { %13942 = vst [vmem:[#allocation153_spill] sm:$0xff] %v9619_v18 }
 0x154   : > { %13943 = vst [vmem:[#allocation154_spill] sm:$0xff] %v9625_v44  ;;  %v1772_v51 = vld [vmem:[#allocation1] sm:$0xff] }
 0x155   : > { %13944 = vst [vmem:[#allocation155_spill] sm:$0xff] %v9632_v10  ;;  %1932 = vmatmul.bf16.gmra.mxu0 %v1772_v51 }
 0x156   : > { %1774 = vst [vmem:[#allocation1] ss:$9 sm:$0xff] %v9613_v55  ;;  %v807_v55 = vsel %vm590_vm6, %v9581_v29, %v572_v63  ;;  %v819_v63 = vsel %vm590_vm6, %v9600_v57, %v573_v61  ;;  %v1489_v29 = vshrl.u32 %v9671_v1, 16 }
 0x157   : > { %13945 = vst [vmem:[#allocation156_spill] sm:$0xff] %v9641_v4  ;;  %v9677_v51 = vrot.slane %v807_v55, 3  ;;  %v1473_v55 = vshrl.u32 %v9669_v52, 16 }
 0x158   : > { %1776 = vst [vmem:[#allocation1 + $0x1] ss:$9 sm:$0xff] %v9619_v18  ;;  %v1486_v18 = vshll.u32 %v9671_v1, 16 }
 0x159   : > { %13946 = vst [vmem:[#allocation157_spill] sm:$0xff] %v9648_v14  ;;  %v1494_v61 = vshll.u32 %v9677_v51, 16  ;;  %v1497_v57 = vshrl.u32 %v9677_v51, 16 }
 0x15a   : > { %1778 = vst [vmem:[#allocation1 + $0x2] ss:$9 sm:$0xff] %v9625_v44  ;;  %v1481_v44 = vshrl.u32 %v9660_v62, 16 }
 0x15b   : > { %13947 = vst [vmem:[#allocation158_spill] sm:$0xff] %v9651_v3  ;;  %v9728_v2 = vsel %vm8782_vm5, %v1489_v29, %v1494_v61  ;;  %v892_v29 = vsel %vm582_vm2, %v9651_v3, %v574_v13 }
 0x15c   : > { %13948 = vst [vmem:[#allocation159_spill] sm:$0xff] %v9657_v5 }
 0x15d   : > { %1780 = vst [vmem:[#allocation1 + $0x3] ss:$9 sm:$0xff] %v9632_v10  ;;  %v9695_v10 = vpack.c.bf16 %v473_v16, %v473_v16  ;;  %v9711_v16 = vsel %vm578_vm1, %v9651_v3, %v574_v13 }
 0x15e   : > { %13949 = vst [vmem:[#allocation160_spill] sm:$0xff] %v9660_v62 }
 0x15f   : > { %13950 = vst [vmem:[#allocation161_spill] sm:$0xff] %v9664_v7 }
 0x160   : > { %1782 = vst [vmem:[#allocation1 + $0x4] ss:$9 sm:$0xff] %v9641_v4  ;;  %v1478_v4 = vshll.u32 %v9660_v62, 16  ;;  %v575_v62 = vrot.slane %v9695_v10, 3 }
 0x161   : > { %13951 = vst [vmem:[#allocation162_spill] sm:$0xff] %v9669_v52  ;;  %v1501_v52 = vshll.u32 %v9689_v58, 16 }
 0x162   : > { %13952 = vst [vmem:[#allocation163_spill] sm:$0xff] %v9671_v1  ;;  %v831_v13 = vsel %vm586_vm4, %v9695_v10, %v575_v62 }
 0x163   : > { %1784 = vst [vmem:[#allocation1 + $0x5] ss:$9 sm:$0xff] %v9648_v14  ;;  %v9691_v14 = vrot.slane %v813_v8, 1  ;;  %v9705_v8 = vpack.c.bf16 %v474_v28, %v474_v28  ;;  %v9722_v28 = vsel %vm8782_vm5, %v1481_v44, %v1486_v18  ;;  %v9734_v43 = vsel %vm8782_vm5, %v1497_v57, %v1501_v52 }
 0x164   : > { %13953 = vst [vmem:[#allocation164_spill] sm:$0xff] %v9677_v51  ;;  %v1532_v44 = vshll.u32 %v9711_v16, 16  ;;  %v828_v57 = vsel %vm582_vm2, %v9695_v10, %v575_v62 }
 0x165   : > { %1786 = vst [vmem:[#allocation1 + $0x6] ss:$9 sm:$0xff] %v9657_v5  ;;  %v9697_v5 = vrot.slane %v816_v42, 2  ;;  %v9715_v42 = vsel %vm8782_vm5, %v1473_v55, %v1478_v4  ;;  %v1509_v1 = vshll.u32 %v9691_v14, 16  ;;  %v1512_v51 = vshrl.u32 %v9691_v14, 16 }
 0x166   : > { %1788 = vst [vmem:[#allocation1 + $0x7] ss:$9 sm:$0xff] %v9664_v7  ;;  %v9701_v7 = vrot.slane %v819_v63, 3  ;;  %v1504_v63 = vshrl.u32 %v9689_v58, 16 }
 0x167   : > { %13954 = vst [vmem:[#allocation165_spill] sm:$0xff] %v9689_v58  ;;  %v1517_v15 = vshll.u32 %v9697_v5, 16  ;;  %v1520_v4 = vshrl.u32 %v9697_v5, 16 }
 0x168   : > { %13955 = vst [vmem:[#allocation166_spill] sm:$0xff] %v9691_v14  ;;  %v1525_v55 = vshll.u32 %v9701_v7, 16  ;;  %v1528_v18 = vshrl.u32 %v9701_v7, 16  ;;  %v9743_v61 = vsel %vm8782_vm5, %v1504_v63, %v1509_v1  ;;  %v834_v63 = vsel %vm590_vm6, %v9695_v10, %v575_v62 }
 0x169   : > { %13956 = vst [vmem:[#allocation167_spill] sm:$0xff] %v9695_v10  ;;  %v9751_v52 = vsel %vm8782_vm5, %v1512_v51, %v1517_v15  ;;  %v475_v51 = vld [vmem:[%s8628_s8 + $0xe8] sm:$0xf] }
 0x16a   : > { %13957 = vst [vmem:[#allocation168_spill] sm:$0xff] %v9697_v5  ;;  %v576_v5 = vrot.slane %v9705_v8, 3  ;;  %v9758_v1 = vsel %vm8782_vm5, %v1520_v4, %v1525_v55  ;;  %v9765_v15 = vsel %vm8782_vm5, %v1528_v18, %v1532_v44  ;;  %v9774_v4 = vsel %vm578_vm1, %v9695_v10, %v575_v62 }
 0x16b   : > { %13958 = vst [vmem:[#allocation169_spill] sm:$0xff] %v9701_v7  ;;  %v9781_v18 = vrot.slane %v834_v63, 3  ;;  %v1543_v63 = vshrl.u32 %v9774_v4, 16 }
 0x16c   : > { %13959 = vst [vmem:[#allocation170_spill] sm:$0xff] %v9705_v8  ;;  %v840_v55 = vsel %vm582_vm2, %v9705_v8, %v576_v5  ;;  %v843_v44 = vsel %vm586_vm4, %v9705_v8, %v576_v5  ;;  %v846_v62 = vsel %vm590_vm6, %v9705_v8, %v576_v5 }
 0x16d   : > { %13960 = vst [vmem:[#allocation171_spill] sm:$0xff] %v9711_v16  ;;  %v1789_v58 = vld [vmem:[#allocation1] sm:$0xff]  ;;  %v1564_v3 = vshll.u32 %v9781_v18, 16 }
 0x16e   : > { %13961 = vst [vmem:[#allocation172_spill] sm:$0xff] %v9715_v42  ;;  %1937 = vmatmul.bf16.gmra.mxu0 %v1789_v58  ;;  %v9776_v58 = vrot.slane %v831_v13, 2 }
 0x16f   : > { %13962 = vst [vmem:[#allocation173_spill] sm:$0xff] %v9722_v28 }
 0x170   : > { %13963 = vst [vmem:[#allocation174_spill] sm:$0xff] %v9728_v2 }
 0x171   : > { %13964 = vst [vmem:[#allocation175_spill] sm:$0xff] %v9734_v43 }
 0x172   : > { %1791 = vst [vmem:[#allocation1] ss:$9 sm:$0xff] %v9715_v42  ;;  %v9803_v42 = vrot.slane %v846_v62, 3 }
 0x173   : > { %13965 = vst [vmem:[#allocation176_spill] sm:$0xff] %v9743_v61 }
 0x174   : > { %1793 = vst [vmem:[#allocation1 + $0x1] ss:$9 sm:$0xff] %v9722_v28  ;;  %v894_v28 = vrot.slane %v892_v29, 1  ;;  %v9786_v29 = vpack.c.bf16 %v475_v51, %v475_v51 }
 0x175   : > { %13966 = vst [vmem:[#allocation177_spill] sm:$0xff] %v9751_v52 }
 0x176   : > { %1795 = vst [vmem:[#allocation1 + $0x2] ss:$9 sm:$0xff] %v9728_v2  ;;  %v9769_v2 = vrot.slane %v828_v57, 1  ;;  %v1535_v57 = vshrl.u32 %v9711_v16, 16  ;;  %v1540_v13 = vshll.u32 %v894_v28, 16  ;;  %v1559_v28 = vshrl.u32 %v9776_v58, 16 }
 0x177   : > { %13967 = vst [vmem:[#allocation178_spill] sm:$0xff] %v9758_v1 }
 0x178   : > { %1797 = vst [vmem:[#allocation1 + $0x3] ss:$9 sm:$0xff] %v9734_v43  ;;  %v9799_v43 = vrot.slane %v843_v44, 2  ;;  %v1551_v51 = vshrl.u32 %v9769_v2, 16  ;;  %v577_v44 = vrot.slane %v9786_v29, 3 }
 0x179   : > { %13968 = vst [vmem:[#allocation179_spill] sm:$0xff] %v9765_v15 }
 0x17a   : > { %1799 = vst [vmem:[#allocation1 + $0x4] ss:$9 sm:$0xff] %v9743_v61  ;;  %v1548_v61 = vshll.u32 %v9769_v2, 16 }
 0x17b   : > { %13969 = vst [vmem:[#allocation180_spill] sm:$0xff] %v9769_v2 }
 0x17c   : > { %1801 = vst [vmem:[#allocation1 + $0x5] ss:$9 sm:$0xff] %v9751_v52  ;;  %v9793_v52 = vsel %vm578_vm1, %v9705_v8, %v576_v5  ;;  %v9809_v5 = vsel %vm8782_vm5, %v1535_v57, %v1540_v13  ;;  %v9816_v10 = vsel %vm8782_vm5, %v1543_v63, %v1548_v61  ;;  %v1587_v13 = vshll.u32 %v9799_v43, 16 }
 0x17d   : > { %13970 = vst [vmem:[#allocation181_spill] sm:$0xff] %v9774_v4  ;;  %v1571_v8 = vshll.u32 %v9793_v52, 16  ;;  %v1574_v62 = vshrl.u32 %v9793_v52, 16  ;;  %v9828_v4 = vsel %vm8782_vm5, %v1559_v28, %v1564_v3  ;;  %v1590_v61 = vshrl.u32 %v9799_v43, 16 }
 0x17e   : > { %13971 = vst [vmem:[#allocation182_spill] sm:$0xff] %v9776_v58  ;;  %v1595_v63 = vshll.u32 %v9803_v42, 16  ;;  %v9857_v28 = vsel %vm578_vm1, %v9786_v29, %v577_v44 }
 0x17f   : > { %1803 = vst [vmem:[#allocation1 + $0x6] ss:$9 sm:$0xff] %v9758_v1  ;;  %v9795_v1 = vrot.slane %v840_v55, 1  ;;  %v1567_v55 = vshrl.u32 %v9781_v18, 16 }
 0x180   : > { %13972 = vst [vmem:[#allocation183_spill] sm:$0xff] %v9781_v18 }
 0x181   : > { %1805 = vst [vmem:[#allocation1 + $0x7] ss:$9 sm:$0xff] %v9765_v15  ;;  %v1556_v15 = vshll.u32 %v9776_v58, 16  ;;  %v1579_v58 = vshll.u32 %v9795_v1, 16  ;;  %v1582_v57 = vshrl.u32 %v9795_v1, 16 }
 0x182   : > { %13973 = vst [vmem:[#allocation184_spill] sm:$0xff] %v9786_v29 }
 0x183   : > { %13974 = vst [vmem:[#allocation185_spill] sm:$0xff] %v9793_v52  ;;  %v9822_v2 = vsel %vm8782_vm5, %v1551_v51, %v1556_v15  ;;  %v9835_v52 = vsel %vm8782_vm5, %v1567_v55, %v1571_v8  ;;  %v895_v15 = vsel %vm582_vm2, %v9786_v29, %v577_v44  ;;  %v9842_v51 = vsel %vm8782_vm5, %v1574_v62, %v1579_v58 }
 0x184   : > { %13975 = vst [vmem:[#allocation186_spill] sm:$0xff] %v9795_v1  ;;  %v9847_v3 = vsel %vm8782_vm5, %v1582_v57, %v1587_v13  ;;  %v9852_v8 = vsel %vm8782_vm5, %v1590_v61, %v1595_v63  ;;  %v897_v58 = vrot.slane %v895_v15, 1  ;;  %v1598_v55 = vshrl.u32 %v9803_v42, 16 }
 0x185   : > { %13976 = vst [vmem:[#allocation187_spill] sm:$0xff] %v9799_v43  ;;  %v1602_v62 = vshll.u32 %v9857_v28, 16  ;;  %v1605_v57 = vshrl.u32 %v9857_v28, 16 }
 0x186   : > { %13977 = vst [vmem:[#allocation188_spill] sm:$0xff] %v9803_v42  ;;  %v1610_v13 = vshll.u32 %v897_v58, 16  ;;  %v13994_v58 = vld [vmem:[#allocation76_spill] sm:$0xff] }
 0x187   : > { %13978 = vst [vmem:[#allocation189_spill] sm:$0xff] %v9809_v5 }
 0x188   : > { %13979 = vst [vmem:[#allocation190_spill] sm:$0xff] %v9816_v10  ;;  %v1806_v18 = vld [vmem:[#allocation1] sm:$0xff]  ;;  %v9871_v44 = vsel %vm8782_vm5, %v1605_v57, %v1610_v13  ;;  %v13997_v57 = vld [vmem:[#allocation92_spill] sm:$0xff]  ;;  %v13998_v13 = vld [vmem:[#allocation93_spill] sm:$0xff] }
 0x189   : > { %13980 = vst [vmem:[#allocation191_spill] sm:$0xff] %v9822_v2  ;;  %1942 = vmatmul.bf16.gmra.mxu0 %v1806_v18  ;;  %v9867_v18 = vsel %vm8782_vm5, %v1598_v55, %v1602_v62  ;;  %v13995_v55 = vld [vmem:[#allocation89_spill] sm:$0xff]  ;;  %v13996_v62 = vld [vmem:[#allocation90_spill] sm:$0xff] }
 0x18a   : > { %13981 = vst [vmem:[#allocation192_spill] sm:$0xff] %v9828_v4 }
 0x18b   : > { %1808 = vst [vmem:[#allocation1] ss:$9 sm:$0xff] %v9809_v5  ;;  %v14014_v5 = vld [vmem:[#allocation130_spill] sm:$0xff] }
 0x18c   : > { %13982 = vst [vmem:[#allocation193_spill] sm:$0xff] %v9835_v52 }
 0x18d   : > { %1810 = vst [vmem:[#allocation1 + $0x1] ss:$9 sm:$0xff] %v9816_v10  ;;  %v14013_v10 = vld [vmem:[#allocation128_spill] sm:$0xff] }
 0x18e   : > { %13983 = vst [vmem:[#allocation194_spill] sm:$0xff] %v9842_v51 }
 0x18f   : > { %1812 = vst [vmem:[#allocation1 + $0x2] ss:$9 sm:$0xff] %v9822_v2  ;;  %v14012_v2 = vld [vmem:[#allocation127_spill] sm:$0xff] }
 0x190   : > { %13984 = vst [vmem:[#allocation195_spill] sm:$0xff] %v9847_v3 }
 0x191   : > { %1814 = vst [vmem:[#allocation1 + $0x3] ss:$9 sm:$0xff] %v9828_v4  ;;  %v14011_v4 = vld [vmem:[#allocation126_spill] sm:$0xff] }
 0x192   : > { %13985 = vst [vmem:[#allocation196_spill] sm:$0xff] %v9852_v8 }
 0x193   : > { %1816 = vst [vmem:[#allocation1 + $0x4] ss:$9 sm:$0xff] %v9835_v52  ;;  %v14010_v52 = vld [vmem:[#allocation124_spill] sm:$0xff] }
 0x194   : > { %13986 = vst [vmem:[#allocation197_spill] sm:$0xff] %v9857_v28 }
 0x195   : > { %1818 = vst [vmem:[#allocation1 + $0x5] ss:$9 sm:$0xff] %v9842_v51  ;;  %v14009_v51 = vld [vmem:[#allocation114_spill] sm:$0xff] }
 0x196   : > { %1820 = vst [vmem:[#allocation1 + $0x6] ss:$9 sm:$0xff] %v9847_v3 }
 0x197   : > { %1822 = vst [vmem:[#allocation1 + $0x7] ss:$9 sm:$0xff] %v9852_v8  ;;  %v14008_v8 = vld [vmem:[#allocation112_spill] sm:$0xff] }
 0x198   : > { %13987 = vst [vmem:[#allocation198_spill] sm:$0xff] %v9867_v18 }
 0x199   : > { %13988 = vst [vmem:[#allocation199_spill] sm:$0xff] %v9871_v44 }
 0x19e   : > { %v1823_v61 = vld [vmem:[#allocation1] sm:$0xff] }
 0x19f   : > { %1825 = vst [vmem:[#allocation1] ss:$9 sm:$0xff] %v9867_v18  ;;  %1947 = vmatmul.bf16.gmra.mxu0 %v1823_v61  ;;  %v13999_v61 = vld [vmem:[#allocation94_spill] sm:$0xff]  ;;  %v14006_v18 = vld [vmem:[#allocation109_spill] sm:$0xff] }
 0x1a0   : > { %1827 = vst [vmem:[#allocation1 + $0x1] ss:$9 sm:$0xff] %v9871_v44  ;;  %v14004_v44 = vld [vmem:[#allocation106_spill] sm:$0xff] }
 0x1a7   : > { %v1828_v63 = vld [vmem:[#allocation1] sm:$0xff] }
 0x1a8   : > { %1957 = vst [vmem:[#allocation1] ss:$9 sm:$0xff] %v8742_v20 }
 0x1a9   : > { %1959 = vst [vmem:[#allocation1 + $0x1] ss:$9 sm:$0xff] %v8750_v24 }
 0x1aa   : > { %1961 = vst [vmem:[#allocation1 + $0x2] ss:$9 sm:$0xff] %v8752_v25 }
 0x1ab   : > { %1963 = vst [vmem:[#allocation1 + $0x3] ss:$9 sm:$0xff] %v8754_v26  ;;  %v13989_v26 = vld [vmem:[#allocation71_spill] sm:$0xff] }
 0x1ac   : > { %1965 = vst [vmem:[#allocation1 + $0x4] ss:$9 sm:$0xff] %v8758_v27  ;;  %v13990_v27 = vld [vmem:[#allocation73_spill] sm:$0xff] }
 0x1ad   : > { %1967 = vst [vmem:[#allocation1 + $0x5] ss:$9 sm:$0xff] %v8776_v33  ;;  %v13992_v33 = vld [vmem:[#allocation74_spill] sm:$0xff] }
 0x1ae   : > { %1969 = vst [vmem:[#allocation1 + $0x6] ss:$9 sm:$0xff] %v8778_v34  ;;  %v13993_v34 = vld [vmem:[#allocation75_spill] sm:$0xff] }
 0x1af   : > { %1971 = vst [vmem:[#allocation1 + $0x7] ss:$9 sm:$0xff] %v8780_v35  ;;  %1952 = vmatmul.bf16.gmra.mxu0 %v1828_v63  ;;  %v14000_v63 = vld [vmem:[#allocation95_spill] sm:$0xff] }
 0x1b6   : > { %v1972_v15 = vld [vmem:[#allocation1] sm:$0xff] }
 0x1b7   : > { %1973 = vst [vmem:[#allocation1] ss:$9 sm:$0xff] %v8770_v31  ;;  %2134 = vmatmul.bf16.vlgmr.msra.gmra.mxu1 %v1972_v15  ;;  %v13991_v31 = vld [vmem:[#allocation72_spill] sm:$0xff] }
 0x1b8   : > { %1974 = vst [vmem:[#allocation1 + $0x1] ss:$9 sm:$0xff] %v8848_v12  ;;  %v14001_v15 = vld [vmem:[#allocation96_spill] sm:$0xff] }
 0x1b9   : > { %1975 = vst [vmem:[#allocation1 + $0x2] ss:$9 sm:$0xff] %v8856_v19 }
 0x1ba   : > { %1976 = vst [vmem:[#allocation1 + $0x3] ss:$9 sm:$0xff] %v8858_v21  ;;  %v14061_v21 = vld [vmem:[#allocation119_spill] sm:$0xff] }
 0x1bb   : > { %1977 = vst [vmem:[#allocation1 + $0x4] ss:$9 sm:$0xff] %v8860_v22 }
 0x1bc   : > { %1978 = vst [vmem:[#allocation1 + $0x5] ss:$9 sm:$0xff] %v8864_v23 }
 0x1bd   : > { %1979 = vst [vmem:[#allocation1 + $0x6] ss:$9 sm:$0xff] %v8872_v38 }
 0x1be   : > { %1980 = vst [vmem:[#allocation1 + $0x7] ss:$9 sm:$0xff] %v8874_v39 }
 0x1c5   : > { %v1981_v20 = vld [vmem:[#allocation1] sm:$0xff] }
 0x1c6   : > { %1982 = vst [vmem:[#allocation1] ss:$9 sm:$0xff] %v8876_v40 }
 0x1c7   : > { %1983 = vst [vmem:[#allocation1 + $0x1] ss:$9 sm:$0xff] %v8941_v9  ;;  %2139 = vmatmul.bf16.gmra.mxu1 %v1981_v20 }
 0x1c8   : > { %1984 = vst [vmem:[#allocation1 + $0x2] ss:$9 sm:$0xff] %v8957_v30  ;;  %v14055_v30 = vld [vmem:[#allocation111_spill] sm:$0xff] }
 0x1c9   : > { %1985 = vst [vmem:[#allocation1 + $0x3] ss:$9 sm:$0xff] %v8959_v32 }
 0x1ca   : > { %1986 = vst [vmem:[#allocation1 + $0x4] ss:$9 sm:$0xff] %v8961_v37 }
 0x1cb   : > { %1987 = vst [vmem:[#allocation1 + $0x5] ss:$9 sm:$0xff] %v8963_v41 }
 0x1cc   : > { %1988 = vst [vmem:[#allocation1 + $0x6] ss:$9 sm:$0xff] %v8973_v47 }
 0x1cd   : > { %1989 = vst [vmem:[#allocation1 + $0x7] ss:$9 sm:$0xff] %v8978_v50  ;;  %v14051_v50 = vld [vmem:[#allocation88_spill] sm:$0xff] }
 0x1d4   : > { %v1990_v24 = vld [vmem:[#allocation1] sm:$0xff] }
 0x1d5   : > { %1991 = vst [vmem:[#allocation1] ss:$9 sm:$0xff] %v8983_v59 }
 0x1d6   : > { %1992 = vst [vmem:[#allocation1 + $0x1] ss:$9 sm:$0xff] %v9049_v17 }
 0x1d7   : > { %1993 = vst [vmem:[#allocation1 + $0x2] ss:$9 sm:$0xff] %v9061_v45  ;;  %2144 = vmatmul.bf16.gmra.mxu1 %v1990_v24  ;;  %v14002_v24 = vld [vmem:[#allocation97_spill] sm:$0xff]  ;;  %v14050_v45 = vld [vmem:[#allocation86_spill] sm:$0xff] }
 0x1d8   : > { %1994 = vst [vmem:[#allocation1 + $0x3] ss:$9 sm:$0xff] %v9074_v53 }
 0x1d9   : > { %1995 = vst [vmem:[#allocation1 + $0x4] ss:$9 sm:$0xff] %v9066_v60 }
 0x1da   : > { %1996 = vst [vmem:[#allocation1 + $0x5] ss:$9 sm:$0xff] %v9076_v56  ;;  %v14049_v56 = vld [vmem:[#allocation85_spill] sm:$0xff] }
 0x1db   : > { %1997 = vst [vmem:[#allocation1 + $0x6] ss:$9 sm:$0xff] %v9083_v46 }
 0x1dc   : > { %1998 = vst [vmem:[#allocation1 + $0x7] ss:$9 sm:$0xff] %v9091_v54 }
 0x1e3   : > { %v1999_v25 = vld [vmem:[#allocation1] sm:$0xff] }
 0x1e4   : > { %2000 = vst [vmem:[#allocation1] ss:$9 sm:$0xff] %v9094_v6 }
 0x1e5   : > { %2001 = vst [vmem:[#allocation1 + $0x1] ss:$9 sm:$0xff] %v9164_v49 }
 0x1e6   : > { %2002 = vst [vmem:[#allocation1 + $0x2] ss:$9 sm:$0xff] %v9172_v0 }
 0x1e7   : > { %2003 = vst [vmem:[#allocation1 + $0x3] ss:$9 sm:$0xff] %v13989_v26  ;;  %2149 = vmatmul.bf16.gmra.mxu1 %v1999_v25  ;;  %v14003_v25 = vld [vmem:[#allocation105_spill] sm:$0xff] }
 0x1e8   : > { %2004 = vst [vmem:[#allocation1 + $0x4] ss:$9 sm:$0xff] %v13990_v27  ;;  %v14047_v27 = vld [vmem:[#allocation67_spill] sm:$0xff] }
 0x1e9   : > { %2005 = vst [vmem:[#allocation1 + $0x5] ss:$9 sm:$0xff] %v13991_v31 }
 0x1ea   : > { %2006 = vst [vmem:[#allocation1 + $0x6] ss:$9 sm:$0xff] %v13992_v33 }
 0x1eb   : > { %2007 = vst [vmem:[#allocation1 + $0x7] ss:$9 sm:$0xff] %v13993_v34 }
 0x1f2   : > { %v2008_v35 = vld [vmem:[#allocation1] sm:$0xff] }
 0x1f3   : > { %2009 = vst [vmem:[#allocation1] ss:$9 sm:$0xff] %v13994_v58 }
 0x1f4   : > { %2010 = vst [vmem:[#allocation1 + $0x1] ss:$9 sm:$0xff] %v13995_v55  ;;  %v14045_v55 = vld [vmem:[#allocation58_spill] sm:$0xff] }
 0x1f5   : > { %2011 = vst [vmem:[#allocation1 + $0x2] ss:$9 sm:$0xff] %v13996_v62 }
 0x1f6   : > { %2012 = vst [vmem:[#allocation1 + $0x3] ss:$9 sm:$0xff] %v13997_v57 }
 0x1f7   : > { %2013 = vst [vmem:[#allocation1 + $0x4] ss:$9 sm:$0xff] %v13998_v13  ;;  %2154 = vmatmul.bf16.gmra.mxu1 %v2008_v35  ;;  %v14007_v35 = vld [vmem:[#allocation113_spill] sm:$0xff] }
 0x1f8   : > { %2014 = vst [vmem:[#allocation1 + $0x5] ss:$9 sm:$0xff] %v13999_v61  ;;  %v14044_v13 = vld [vmem:[#allocation37_spill] sm:$0xff] }
 0x1f9   : > { %2015 = vst [vmem:[#allocation1 + $0x6] ss:$9 sm:$0xff] %v14000_v63 }
 0x1fa   : > { %2016 = vst [vmem:[#allocation1 + $0x7] ss:$9 sm:$0xff] %v14001_v15  ;;  %v14043_v15 = vld [vmem:[#allocation40_spill] sm:$0xff] }
 0x201   : > { %v2017_v20 = vld [vmem:[#allocation1] sm:$0xff] }
 0x202   : > { %2018 = vst [vmem:[#allocation1] ss:$9 sm:$0xff] %v14002_v24 }
 0x203   : > { %2019 = vst [vmem:[#allocation1 + $0x1] ss:$9 sm:$0xff] %v14003_v25 }
 0x204   : > { %2020 = vst [vmem:[#allocation1 + $0x2] ss:$9 sm:$0xff] %v14004_v44 }
 0x205   : > { %2021 = vst [vmem:[#allocation1 + $0x3] ss:$9 sm:$0xff] %v14005_v36 }
 0x206   : > { %2022 = vst [vmem:[#allocation1 + $0x4] ss:$9 sm:$0xff] %v14006_v18 }
 0x207   : > { %2023 = vst [vmem:[#allocation1 + $0x5] ss:$9 sm:$0xff] %v9395_v48  ;;  %2159 = vmatmul.bf16.gmra.mxu1 %v2017_v20  ;;  %v14015_v20 = vld [vmem:[#allocation133_spill] sm:$0xff]  ;;  %v14017_v48 = vld [vmem:[#allocation142_spill] sm:$0xff] }
 0x208   : > { %2024 = vst [vmem:[#allocation1 + $0x6] ss:$9 sm:$0xff] %v14007_v35 }
 0x209   : > { %2025 = vst [vmem:[#allocation1 + $0x7] ss:$9 sm:$0xff] %v14008_v8  ;;  %v14016_v8 = vld [vmem:[#allocation132_spill] sm:$0xff] }
 0x210   : > { %v2026_v3 = vld [vmem:[#allocation1] sm:$0xff] }
 0x211   : > { %2027 = vst [vmem:[#allocation1] ss:$9 sm:$0xff] %v14009_v51  ;;  %v14018_v51 = vld [vmem:[#allocation144_spill] sm:$0xff] }
 0x212   : > { %2028 = vst [vmem:[#allocation1 + $0x1] ss:$9 sm:$0xff] %v14010_v52  ;;  %v14019_v52 = vld [vmem:[#allocation146_spill] sm:$0xff] }
 0x213   : > { %2029 = vst [vmem:[#allocation1 + $0x2] ss:$9 sm:$0xff] %v14011_v4  ;;  %v14020_v4 = vld [vmem:[#allocation147_spill] sm:$0xff] }
 0x214   : > { %2030 = vst [vmem:[#allocation1 + $0x3] ss:$9 sm:$0xff] %v14012_v2  ;;  %v14021_v2 = vld [vmem:[#allocation148_spill] sm:$0xff] }
 0x215   : > { %2031 = vst [vmem:[#allocation1 + $0x4] ss:$9 sm:$0xff] %v14013_v10  ;;  %v14022_v10 = vld [vmem:[#allocation149_spill] sm:$0xff] }
 0x216   : > { %2032 = vst [vmem:[#allocation1 + $0x5] ss:$9 sm:$0xff] %v9490_v11  ;;  %v14023_v11 = vld [vmem:[#allocation151_spill] sm:$0xff] }
 0x217   : > { %2033 = vst [vmem:[#allocation1 + $0x6] ss:$9 sm:$0xff] %v14014_v5  ;;  %2164 = vmatmul.bf16.gmra.mxu1 %v2026_v3  ;;  %v14025_v5 = vld [vmem:[#allocation160_spill] sm:$0xff] }
 0x218   : > { %2034 = vst [vmem:[#allocation1 + $0x7] ss:$9 sm:$0xff] %v14015_v20  ;;  %v14024_v20 = vld [vmem:[#allocation162_spill] sm:$0xff] }
 0x21f   : > { %v2035_v35 = vld [vmem:[#allocation1] sm:$0xff] }
 0x220   : > { %2036 = vst [vmem:[#allocation1] ss:$9 sm:$0xff] %v14016_v8  ;;  %v14026_v8 = vld [vmem:[#allocation163_spill] sm:$0xff] }
 0x221   : > { %2037 = vst [vmem:[#allocation1 + $0x1] ss:$9 sm:$0xff] %v14017_v48  ;;  %v14027_v48 = vld [vmem:[#allocation164_spill] sm:$0xff] }
 0x222   : > { %2038 = vst [vmem:[#allocation1 + $0x2] ss:$9 sm:$0xff] %v14018_v51  ;;  %v14028_v51 = vld [vmem:[#allocation165_spill] sm:$0xff] }
 0x223   : > { %2039 = vst [vmem:[#allocation1 + $0x3] ss:$9 sm:$0xff] %v14019_v52 }
 0x224   : > { %2040 = vst [vmem:[#allocation1 + $0x4] ss:$9 sm:$0xff] %v14020_v4  ;;  %v14029_v4 = vld [vmem:[#allocation168_spill] sm:$0xff] }
 0x225   : > { %2041 = vst [vmem:[#allocation1 + $0x5] ss:$9 sm:$0xff] %v14021_v2 }
 0x226   : > { %2042 = vst [vmem:[#allocation1 + $0x6] ss:$9 sm:$0xff] %v14022_v10 }
 0x227   : > { %2043 = vst [vmem:[#allocation1 + $0x7] ss:$9 sm:$0xff] %v14023_v11  ;;  %2169 = vmatmul.bf16.gmra.mxu1 %v2035_v35  ;;  %v14030_v35 = vld [vmem:[#allocation181_spill] sm:$0xff] }
 0x22e   : > { %v2044_v3 = vld [vmem:[#allocation1] sm:$0xff] }
 0x22f   : > { %2045 = vst [vmem:[#allocation1] ss:$9 sm:$0xff] %v14024_v20  ;;  %v14040_v20 = vld [vmem:[#allocation12_spill] sm:$0xff] }
 0x230   : > { %2046 = vst [vmem:[#allocation1 + $0x1] ss:$9 sm:$0xff] %v14025_v5  ;;  %v14031_v5 = vld [vmem:[#allocation180_spill] sm:$0xff] }
 0x231   : > { %2047 = vst [vmem:[#allocation1 + $0x2] ss:$9 sm:$0xff] %v14026_v8  ;;  %v14032_v8 = vld [vmem:[#allocation182_spill] sm:$0xff] }
 0x232   : > { %2048 = vst [vmem:[#allocation1 + $0x3] ss:$9 sm:$0xff] %v14027_v48  ;;  %v14033_v48 = vld [vmem:[#allocation183_spill] sm:$0xff] }
 0x233   : > { %2049 = vst [vmem:[#allocation1 + $0x4] ss:$9 sm:$0xff] %v14028_v51  ;;  %v14034_v51 = vld [vmem:[#allocation185_spill] sm:$0xff] }
 0x234   : > { %2050 = vst [vmem:[#allocation1 + $0x5] ss:$9 sm:$0xff] %v9691_v14 }
 0x235   : > { %2051 = vst [vmem:[#allocation1 + $0x6] ss:$9 sm:$0xff] %v14029_v4  ;;  %v14039_v4 = vld [vmem:[#allocation13_spill] sm:$0xff] }
 0x236   : > { %2052 = vst [vmem:[#allocation1 + $0x7] ss:$9 sm:$0xff] %v9701_v7 }
 0x237   : > { %2174 = vmatmul.bf16.gmra.mxu1 %v2044_v3 }
 0x23d   : > { %v2053_v11 = vld [vmem:[#allocation1] sm:$0xff] }
 0x23e   : > { %2054 = vst [vmem:[#allocation1] ss:$9 sm:$0xff] %v9711_v16  ;;  %2179 = vmatmul.bf16.vlgmr.msra.gmra.mxu3 %v2053_v11  ;;  %v14035_v11 = vld [vmem:[#allocation8_spill] sm:$0xff] }
 0x23f   : > { %2055 = vst [vmem:[#allocation1 + $0x1] ss:$9 sm:$0xff] %v14030_v35 }
 0x240   : > { %2056 = vst [vmem:[#allocation1 + $0x2] ss:$9 sm:$0xff] %v14031_v5  ;;  %v14036_v5 = vld [vmem:[#allocation7_spill] sm:$0xff] }
 0x241   : > { %2057 = vst [vmem:[#allocation1 + $0x3] ss:$9 sm:$0xff] %v14032_v8 }
 0x242   : > { %2058 = vst [vmem:[#allocation1 + $0x4] ss:$9 sm:$0xff] %v14033_v48 }
 0x243   : > { %2059 = vst [vmem:[#allocation1 + $0x5] ss:$9 sm:$0xff] %v14034_v51 }
 0x244   : > { %2060 = vst [vmem:[#allocation1 + $0x6] ss:$9 sm:$0xff] %v9795_v1 }
 0x245   : > { %2061 = vst [vmem:[#allocation1 + $0x7] ss:$9 sm:$0xff] %v9799_v43  ;;  %v14037_v43 = vld [vmem:[#allocation11_spill] sm:$0xff] }
 0x24c   : > { %v2062_v7 = vld [vmem:[#allocation1] sm:$0xff] }
 0x24d   : > { %2063 = vst [vmem:[#allocation1] ss:$9 sm:$0xff] %v9803_v42 }
 0x24e   : > { %2064 = vst [vmem:[#allocation1 + $0x1] ss:$9 sm:$0xff] %v9857_v28  ;;  %2184 = vmatmul.bf16.gmra.mxu3 %v2062_v7 }
 0x24f   : > { %2195 = vst [vmem:[#allocation1 + $0x20] sm:$0xff] %v14035_v11  ;;  %v14038_v11 = vld [vmem:[#allocation9_spill] sm:$0xff] }
 0x255   : > { %v2065_v3 = vld [vmem:[#allocation1] sm:$0xff] }
 0x256   : > { %2194 = vst [vmem:[#allocation1] sm:$0xff] %v14036_v5  ;;  %v9967_v8 = vld [vmem:[#allocation1 + $0x20] ss:$4 sm:$0xff]  ;;  %v9969_v48 = vld [vmem:[#allocation1 + $0x21] ss:$4 sm:$0xff] }
 0x257   : > { %v9971_v51 = vld [vmem:[#allocation1 + $0x22] ss:$4 sm:$0xff]  ;;  %v9973_v1 = vld [vmem:[#allocation1 + $0x23] ss:$4 sm:$0xff] }
 0x258   : > { %2213 = vst [vmem:[#allocation1 + $0x20] sm:$0xff] %v14037_v43 }
 0x25d   : > { %v9976_v35 = vld [vmem:[#allocation1 + $0x1] ss:$4 sm:$0xff]  ;;  %v9978_v42 = vld [vmem:[#allocation1 + $0x2] ss:$4 sm:$0xff]  ;;  %v9980_v7 = vld [vmem:[#allocation1 + $0x3] ss:$4 sm:$0xff] }
 0x25e   : > { %2210 = vst [vmem:[#allocation1] sm:$0xff] %v14038_v11  ;;  %2189 = vmatmul.bf16.gmra.mxu3 %v2065_v3  ;;  %v14041_v11 = vld [vmem:[#allocation29_spill] sm:$0xff] }
 0x25f   : > { %v9983_v5 = vld [vmem:[#allocation1 + $0x21] ss:$4 sm:$0xff]  ;;  %v9985_v28 = vld [vmem:[#allocation1 + $0x22] ss:$4 sm:$0xff]  ;;  %v9987_v16 = vld [vmem:[#allocation1 + $0x23] ss:$4 sm:$0xff] }
 0x260   : > { %2218 = vst [vmem:[#allocation1 + $0x20] sm:$0xff] %v14039_v4  ;;  %v14042_v4 = vld [vmem:[#allocation27_spill] sm:$0xff] }
 0x265   : > { %v9990_v14 = vld [vmem:[#allocation1] ss:$4 sm:$0xff]  ;;  %v9992_v43 = vld [vmem:[#allocation1 + $0x1] ss:$4 sm:$0xff] }
 0x266   : > { %2217 = vst [vmem:[#allocation1] sm:$0xff] %v14040_v20 }
 0x267   : > { %v9995_v10 = vld [vmem:[#allocation1 + $0x20] ss:$4 sm:$0xff]  ;;  %v9997_v2 = vld [vmem:[#allocation1 + $0x21] ss:$4 sm:$0xff] }
 0x268   : > { %2226 = vst [vmem:[#allocation1 + $0x20] sm:$0xff] %v14041_v11 }
 0x26d   : > { %v10000_v3 = vld [vmem:[#allocation1] ss:$4 sm:$0xff]  ;;  %v10002_v52 = vld [vmem:[#allocation1 + $0x1] ss:$4 sm:$0xff]  ;;  %v10004_v18 = vld [vmem:[#allocation1 + $0x2] ss:$4 sm:$0xff] }
 0x26e   : > { %v10006_v36 = vld [vmem:[#allocation1 + $0x3] ss:$4 sm:$0xff] }
 0x26f   : > { %2225 = vst [vmem:[#allocation1] sm:$0xff] %v14042_v4  ;;  %v10009_v44 = vld [vmem:[#allocation1 + $0x20] ss:$4 sm:$0xff]  ;;  %v10011_v25 = vld [vmem:[#allocation1 + $0x21] ss:$4 sm:$0xff] }
 0x270   : > { %v10013_v20 = vld [vmem:[#allocation1 + $0x22] ss:$4 sm:$0xff]  ;;  %v10015_v24 = vld [vmem:[#allocation1 + $0x23] ss:$4 sm:$0xff] }
 0x271   : > { %2237 = vst [vmem:[#allocation1 + $0x20] sm:$0xff] %v14043_v15  ;;  %v14046_v15 = vld [vmem:[#allocation43_spill] sm:$0xff] }
 0x276   : > { %v10018_v11 = vld [vmem:[#allocation1 + $0x1] ss:$4 sm:$0xff]  ;;  %v10020_v63 = vld [vmem:[#allocation1 + $0x2] ss:$4 sm:$0xff]  ;;  %v10022_v61 = vld [vmem:[#allocation1 + $0x3] ss:$4 sm:$0xff] }
 0x277   : > { %2234 = vst [vmem:[#allocation1] sm:$0xff] %v14044_v13 }
 0x278   : > { %v10025_v57 = vld [vmem:[#allocation1 + $0x21] ss:$4 sm:$0xff]  ;;  %v10027_v4 = vld [vmem:[#allocation1 + $0x22] ss:$4 sm:$0xff]  ;;  %v10029_v62 = vld [vmem:[#allocation1 + $0x23] ss:$4 sm:$0xff] }
 0x279   : > { %2242 = vst [vmem:[#allocation1 + $0x20] sm:$0xff] %v14045_v55  ;;  %v14048_v55 = vld [vmem:[#allocation60_spill] sm:$0xff] }
 0x27e   : > { %v10032_v58 = vld [vmem:[#allocation1] ss:$4 sm:$0xff]  ;;  %v10034_v34 = vld [vmem:[#allocation1 + $0x1] ss:$4 sm:$0xff] }
 0x27f   : > { %2241 = vst [vmem:[#allocation1] sm:$0xff] %v14046_v15 }
 0x280   : > { %v10037_v33 = vld [vmem:[#allocation1 + $0x20] ss:$4 sm:$0xff]  ;;  %v10039_v31 = vld [vmem:[#allocation1 + $0x21] ss:$4 sm:$0xff] }
 0x281   : > { %2250 = vst [vmem:[#allocation1 + $0x20] sm:$0xff] %v14047_v27 }
 0x286   : > { %v10042_v13 = vld [vmem:[#allocation1] ss:$4 sm:$0xff]  ;;  %v10044_v26 = vld [vmem:[#allocation1 + $0x1] ss:$4 sm:$0xff]  ;;  %v10046_v0 = vld [vmem:[#allocation1 + $0x2] ss:$4 sm:$0xff] }
 0x287   : > { %v10048_v49 = vld [vmem:[#allocation1 + $0x3] ss:$4 sm:$0xff] }
 0x288   : > { %2249 = vst [vmem:[#allocation1] sm:$0xff] %v14048_v55  ;;  %v10051_v6 = vld [vmem:[#allocation1 + $0x20] ss:$4 sm:$0xff]  ;;  %v10053_v54 = vld [vmem:[#allocation1 + $0x21] ss:$4 sm:$0xff] }
 0x289   : > { %v10055_v15 = vld [vmem:[#allocation1 + $0x22] ss:$4 sm:$0xff]  ;;  %v10057_v46 = vld [vmem:[#allocation1 + $0x23] ss:$4 sm:$0xff] }
 0x28a   : > { %2261 = vst [vmem:[#allocation1 + $0x20] sm:$0xff] %v14049_v56  ;;  %v14052_v56 = vld [vmem:[#allocation87_spill] sm:$0xff] }
 0x28f   : > { %v10060_v27 = vld [vmem:[#allocation1 + $0x1] ss:$4 sm:$0xff]  ;;  %v10062_v60 = vld [vmem:[#allocation1 + $0x2] ss:$4 sm:$0xff]  ;;  %v10064_v53 = vld [vmem:[#allocation1 + $0x3] ss:$4 sm:$0xff] }
 0x290   : > { %2258 = vst [vmem:[#allocation1] sm:$0xff] %v14050_v45 }
 0x291   : > { %v10067_v17 = vld [vmem:[#allocation1 + $0x21] ss:$4 sm:$0xff]  ;;  %v10069_v55 = vld [vmem:[#allocation1 + $0x22] ss:$4 sm:$0xff]  ;;  %v10071_v59 = vld [vmem:[#allocation1 + $0x23] ss:$4 sm:$0xff] }
 0x292   : > { %2266 = vst [vmem:[#allocation1 + $0x20] sm:$0xff] %v14051_v50  ;;  %v14056_v50 = vld [vmem:[#allocation91_spill] sm:$0xff] }
 0x297   : > { %v10074_v47 = vld [vmem:[#allocation1] ss:$4 sm:$0xff]  ;;  %v10076_v41 = vld [vmem:[#allocation1 + $0x1] ss:$4 sm:$0xff] }
 0x298   : > { %2265 = vst [vmem:[#allocation1] sm:$0xff] %v14052_v56 }
 0x299   : > { %v10079_v37 = vld [vmem:[#allocation1 + $0x20] ss:$4 sm:$0xff]  ;;  %v10081_v32 = vld [vmem:[#allocation1 + $0x21] ss:$4 sm:$0xff] }
 0x29a   : > { %14053 = vst [vmem:[#allocation8_spill] sm:$0xff] %v10079_v37 }
 0x29b   : > { %14054 = vst [vmem:[#allocation7_spill] sm:$0xff] %v10081_v32  ;;  %v14065_v32 = vld [vmem:[#allocation116_spill] sm:$0xff] }
 0x29c   : > { %2274 = vst [vmem:[#allocation1 + $0x20] sm:$0xff] %v14055_v30 }
 0x29f   : > { %v10084_v45 = vld [vmem:[#allocation1] ss:$4 sm:$0xff]  ;;  %v10086_v9 = vld [vmem:[#allocation1 + $0x1] ss:$4 sm:$0xff]  ;;  %v10088_v40 = vld [vmem:[#allocation1 + $0x2] ss:$4 sm:$0xff] }
 0x2a0   : > { %v10090_v39 = vld [vmem:[#allocation1 + $0x3] ss:$4 sm:$0xff] }
 0x2a1   : > { %2273 = vst [vmem:[#allocation1] sm:$0xff] %v14056_v50 }
 0x2a3   : > { %v10093_v38 = vld [vmem:[#allocation1 + $0x20] ss:$4 sm:$0xff]  ;;  %v10095_v23 = vld [vmem:[#allocation1 + $0x21] ss:$4 sm:$0xff]  ;;  %v10097_v56 = vld [vmem:[#allocation1 + $0x22] ss:$4 sm:$0xff] }
 0x2a4   : > { %14057 = vst [vmem:[#allocation9_spill] sm:$0xff] %v10093_v38  ;;  %v10099_v22 = vld [vmem:[#allocation1 + $0x23] ss:$4 sm:$0xff] }
 0x2a5   : > { %14058 = vst [vmem:[#allocation200_spill] sm:$0xff] %v10095_v23  ;;  %v14069_v23 = vld [vmem:[#allocation136_spill] sm:$0xff] }
 0x2a6   : > { %14059 = vst [vmem:[#allocation201_spill] sm:$0xff] %v10097_v56 }
 0x2a7   : > { %14060 = vst [vmem:[#allocation202_spill] sm:$0xff] %v10099_v22 }
 0x2a8   : > { %2285 = vst [vmem:[#allocation1 + $0x20] sm:$0xff] %v14061_v21  ;;  %v10102_v30 = vld [vmem:[#allocation1 + $0x1] ss:$4 sm:$0xff]  ;;  %v10104_v19 = vld [vmem:[#allocation1 + $0x2] ss:$4 sm:$0xff] }
 0x2a9   : > { %14062 = vst [vmem:[#allocation203_spill] sm:$0xff] %v10102_v30  ;;  %v10106_v12 = vld [vmem:[#allocation1 + $0x3] ss:$4 sm:$0xff] }
 0x2aa   : > { %14063 = vst [vmem:[#allocation204_spill] sm:$0xff] %v10104_v19  ;;  %v14072_v21 = vld [vmem:[#allocation131_spill] sm:$0xff] }
 0x2ab   : > { %14064 = vst [vmem:[#allocation205_spill] sm:$0xff] %v10106_v12  ;;  %v14075_v12 = vld [vmem:[#allocation150_spill] sm:$0xff] }
 0x2ac   : > { %2282 = vst [vmem:[#allocation1] sm:$0xff] %v14065_v32 }
 0x2af   : > { %v10109_v37 = vld [vmem:[#allocation1 + $0x21] ss:$4 sm:$0xff]  ;;  %v10111_v50 = vld [vmem:[#allocation1 + $0x22] ss:$4 sm:$0xff]  ;;  %v10113_v38 = vld [vmem:[#allocation1 + $0x23] ss:$4 sm:$0xff] }
 0x2b0   : > { %14066 = vst [vmem:[#allocation206_spill] sm:$0xff] %v10109_v37 }
 0x2b1   : > { %14067 = vst [vmem:[#allocation207_spill] sm:$0xff] %v10111_v50 }
 0x2b2   : > { %14068 = vst [vmem:[#allocation208_spill] sm:$0xff] %v10113_v38 }
 0x2b3   : > { %2290 = vst [vmem:[#allocation1 + $0x20] sm:$0xff] %v14069_v23  ;;  %v10116_v56 = vld [vmem:[#allocation1] ss:$4 sm:$0xff]  ;;  %v10118_v22 = vld [vmem:[#allocation1 + $0x1] ss:$4 sm:$0xff] }
 0x2b4   : > { %14070 = vst [vmem:[#allocation209_spill] sm:$0xff] %v10116_v56  ;;  %v14080_v23 = vld [vmem:[#allocation145_spill] sm:$0xff] }
 0x2b5   : > { %14071 = vst [vmem:[#allocation210_spill] sm:$0xff] %v10118_v22 }
 0x2b6   : > { %2289 = vst [vmem:[#allocation1] sm:$0xff] %v14072_v21 }
 0x2ba   : > { %v10121_v30 = vld [vmem:[#allocation1 + $0x20] ss:$4 sm:$0xff]  ;;  %v10123_v19 = vld [vmem:[#allocation1 + $0x21] ss:$4 sm:$0xff] }
 0x2bb   : > { %14073 = vst [vmem:[#allocation211_spill] sm:$0xff] %v10121_v30 }
 0x2bc   : > { %14074 = vst [vmem:[#allocation212_spill] sm:$0xff] %v10123_v19  ;;  %v14085_v19 = vld [vmem:[#allocation167_spill] sm:$0xff] }
 0x2bd   : > { %2298 = vst [vmem:[#allocation1 + $0x20] sm:$0xff] %v14075_v12  ;;  %v10126_v32 = vld [vmem:[#allocation1] ss:$4 sm:$0xff]  ;;  %v10128_v37 = vld [vmem:[#allocation1 + $0x1] ss:$4 sm:$0xff] }
 0x2be   : > { %14076 = vst [vmem:[#allocation213_spill] sm:$0xff] %v10126_v32  ;;  %v10130_v50 = vld [vmem:[#allocation1 + $0x2] ss:$4 sm:$0xff]  ;;  %v10132_v38 = vld [vmem:[#allocation1 + $0x3] ss:$4 sm:$0xff] }
 0x2bf   : > { %14077 = vst [vmem:[#allocation214_spill] sm:$0xff] %v10128_v37 }
 0x2c0   : > { %14078 = vst [vmem:[#allocation215_spill] sm:$0xff] %v10130_v50  ;;  %v14088_v50 = vld [vmem:[#allocation158_spill] sm:$0xff] }
 0x2c1   : > { %14079 = vst [vmem:[#allocation216_spill] sm:$0xff] %v10132_v38 }
 0x2c2   : > { %2297 = vst [vmem:[#allocation1] sm:$0xff] %v14080_v23 }
 0x2c4   : > { %v10135_v56 = vld [vmem:[#allocation1 + $0x20] ss:$4 sm:$0xff]  ;;  %v10137_v22 = vld [vmem:[#allocation1 + $0x21] ss:$4 sm:$0xff]  ;;  %v10139_v21 = vld [vmem:[#allocation1 + $0x22] ss:$4 sm:$0xff] }
 0x2c5   : > { %14081 = vst [vmem:[#allocation217_spill] sm:$0xff] %v10135_v56  ;;  %v10141_v30 = vld [vmem:[#allocation1 + $0x23] ss:$4 sm:$0xff] }
 0x2c6   : > { %14082 = vst [vmem:[#allocation218_spill] sm:$0xff] %v10137_v22 }
 0x2c7   : > { %14083 = vst [vmem:[#allocation219_spill] sm:$0xff] %v10139_v21 }
 0x2c8   : > { %14084 = vst [vmem:[#allocation220_spill] sm:$0xff] %v10141_v30 }
 0x2c9   : > { %2309 = vst [vmem:[#allocation1 + $0x20] sm:$0xff] %v14085_v19  ;;  %v10144_v12 = vld [vmem:[#allocation1 + $0x1] ss:$4 sm:$0xff]  ;;  %v10146_v32 = vld [vmem:[#allocation1 + $0x2] ss:$4 sm:$0xff] }
 0x2ca   : > { %14086 = vst [vmem:[#allocation221_spill] sm:$0xff] %v10146_v32  ;;  %v10148_v37 = vld [vmem:[#allocation1 + $0x3] ss:$4 sm:$0xff] }
 0x2cb   : > { %14087 = vst [vmem:[#allocation222_spill] sm:$0xff] %v10148_v37  ;;  %v14091_v19 = vld [vmem:[#allocation170_spill] sm:$0xff] }
 0x2cc   : > { %2306 = vst [vmem:[#allocation1] sm:$0xff] %v14088_v50 }
 0x2d0   : > { %v10151_v38 = vld [vmem:[#allocation1 + $0x21] ss:$4 sm:$0xff]  ;;  %v10153_v23 = vld [vmem:[#allocation1 + $0x22] ss:$4 sm:$0xff]  ;;  %v10155_v56 = vld [vmem:[#allocation1 + $0x23] ss:$4 sm:$0xff] }
 0x2d1   : > { %14089 = vst [vmem:[#allocation223_spill] sm:$0xff] %v10151_v38 }
 0x2d2   : > { %14090 = vst [vmem:[#allocation224_spill] sm:$0xff] %v10153_v23 }
 0x2d3   : > { %2314 = vst [vmem:[#allocation1 + $0x20] sm:$0xff] %v9786_v29  ;;  %v10158_v21 = vld [vmem:[#allocation1] ss:$4 sm:$0xff]  ;;  %v10160_v30 = vld [vmem:[#allocation1 + $0x1] ss:$4 sm:$0xff] }
 0x2d4   : > { %2313 = vst [vmem:[#allocation1] sm:$0xff] %v14091_v19 }
 0x2da   : > { %v10163_v22 = vld [vmem:[#allocation1 + $0x20] ss:$4 sm:$0xff]  ;;  %v10165_v32 = vld [vmem:[#allocation1 + $0x21] ss:$4 sm:$0xff] }
 0x2db   : > { %v10167_v37 = vld [vmem:[#allocation1] ss:$4 sm:$0xff]  ;;  %v10169_v50 = vld [vmem:[#allocation1 + $0x1] ss:$4 sm:$0xff]  ;;  %v10171_v38 = vld [vmem:[#allocation1 + $0x2] ss:$4 sm:$0xff] }
 0x2dc   : > { %v10173_v23 = vld [vmem:[#allocation1 + $0x3] ss:$4 sm:$0xff] }
 0x2dd   : > { %2338 = vst [vmem:[#allocation1] ss:$9 sm:$0xff] %v9976_v35  ;;  %v14136_v35 = vld [vmem:[#allocation50_spill] sm:$0xff] }
 0x2de   : > { %2340 = vst [vmem:[#allocation1 + $0x1] ss:$9 sm:$0xff] %v9978_v42  ;;  %v14107_v42 = vld [vmem:[#allocation214_spill] sm:$0xff] }
 0x2df   : > { %2342 = vst [vmem:[#allocation1 + $0x2] ss:$9 sm:$0xff] %v9980_v7  ;;  %v14137_v7 = vld [vmem:[#allocation51_spill] sm:$0xff] }
 0x2e0   : > { %2344 = vst [vmem:[#allocation1 + $0x3] ss:$9 sm:$0xff] %v9967_v8 }
 0x2e1   : > { %2346 = vst [vmem:[#allocation1 + $0x4] ss:$9 sm:$0xff] %v9969_v48 }
 0x2e2   : > { %2348 = vst [vmem:[#allocation1 + $0x5] ss:$9 sm:$0xff] %v9971_v51  ;;  %v14111_v51 = vld [vmem:[#allocation212_spill] sm:$0xff] }
 0x2e3   : > { %2350 = vst [vmem:[#allocation1 + $0x6] ss:$9 sm:$0xff] %v9973_v1  ;;  %v14109_v1 = vld [vmem:[#allocation216_spill] sm:$0xff] }
 0x2e4   : > { %2352 = vst [vmem:[#allocation1 + $0x7] ss:$9 sm:$0xff] %v9990_v14  ;;  %v14105_v14 = vld [vmem:[#allocation208_spill] sm:$0xff] }
 0x2eb   : > { %v10183_v29 = vld [vmem:[#allocation1] sm:$0xff] }
 0x2ec   : > { %2354 = vst [vmem:[#allocation1] ss:$9 sm:$0xff] %v9992_v43 }
 0x2ed   : > { %2355 = vst [vmem:[#allocation1 + $0x1] ss:$9 sm:$0xff] %v9983_v5  ;;  %v14138_v5 = vld [vmem:[#allocation53_spill] sm:$0xff] }
 0x2ee   : > { %2356 = vst [vmem:[#allocation1 + $0x2] ss:$9 sm:$0xff] %v9985_v28  ;;  %v14112_v28 = vld [vmem:[#allocation221_spill] sm:$0xff] }
 0x2ef   : > { %2357 = vst [vmem:[#allocation1 + $0x3] ss:$9 sm:$0xff] %v9987_v16  ;;  %v14106_v16 = vld [vmem:[#allocation213_spill] sm:$0xff] }
 0x2f0   : > { %2358 = vst [vmem:[#allocation1 + $0x4] ss:$9 sm:$0xff] %v10000_v3  ;;  %v14140_v3 = vld [vmem:[#allocation54_spill] sm:$0xff] }
 0x2f1   : > { %2359 = vst [vmem:[#allocation1 + $0x5] ss:$9 sm:$0xff] %v10002_v52  ;;  %v14108_v52 = vld [vmem:[#allocation215_spill] sm:$0xff] }
 0x2f2   : > { %2360 = vst [vmem:[#allocation1 + $0x6] ss:$9 sm:$0xff] %v10004_v18  ;;  %v14113_v18 = vld [vmem:[#allocation222_spill] sm:$0xff] }
 0x2f3   : > { %2361 = vst [vmem:[#allocation1 + $0x7] ss:$9 sm:$0xff] %v10006_v36 }
 0x2fa   : > { %v10193_v48 = vld [vmem:[#allocation1] sm:$0xff] }
 0x2fb   : > { %2363 = vst [vmem:[#allocation1] ss:$9 sm:$0xff] %v9995_v10  ;;  %v14104_v10 = vld [vmem:[#allocation207_spill] sm:$0xff] }
 0x2fc   : > { %2364 = vst [vmem:[#allocation1 + $0x1] ss:$9 sm:$0xff] %v9997_v2 }
 0x2fd   : > { %2365 = vst [vmem:[#allocation1 + $0x2] ss:$9 sm:$0xff] %v10018_v11  ;;  %v14139_v11 = vld [vmem:[#allocation52_spill] sm:$0xff] }
 0x2fe   : > { %2366 = vst [vmem:[#allocation1 + $0x3] ss:$9 sm:$0xff] %v10020_v63  ;;  %v14132_v63 = vld [vmem:[#allocation35_spill] sm:$0xff] }
 0x2ff   : > { %2367 = vst [vmem:[#allocation1 + $0x4] ss:$9 sm:$0xff] %v10022_v61  ;;  %v14131_v61 = vld [vmem:[#allocation34_spill] sm:$0xff] }
 0x300   : > { %2368 = vst [vmem:[#allocation1 + $0x5] ss:$9 sm:$0xff] %v10009_v44  ;;  %v14114_v44 = vld [vmem:[#allocation217_spill] sm:$0xff] }
 0x301   : > { %2369 = vst [vmem:[#allocation1 + $0x6] ss:$9 sm:$0xff] %v10011_v25  ;;  %v14135_v25 = vld [vmem:[#allocation39_spill] sm:$0xff] }
 0x302   : > { %2370 = vst [vmem:[#allocation1 + $0x7] ss:$9 sm:$0xff] %v10013_v20 }
 0x309   : > { %v10203_v43 = vld [vmem:[#allocation1] sm:$0xff] }
 0x30a   : > { %2372 = vst [vmem:[#allocation1] ss:$9 sm:$0xff] %v10015_v24  ;;  %v14134_v24 = vld [vmem:[#allocation38_spill] sm:$0xff] }
 0x30b   : > { %2373 = vst [vmem:[#allocation1 + $0x1] ss:$9 sm:$0xff] %v10032_v58 }
 0x30c   : > { %2374 = vst [vmem:[#allocation1 + $0x2] ss:$9 sm:$0xff] %v10034_v34  ;;  %v14118_v34 = vld [vmem:[#allocation223_spill] sm:$0xff] }
 0x30d   : > { %2375 = vst [vmem:[#allocation1 + $0x3] ss:$9 sm:$0xff] %v10025_v57  ;;  %v14129_v57 = vld [vmem:[#allocation32_spill] sm:$0xff] }
 0x30e   : > { %2376 = vst [vmem:[#allocation1 + $0x4] ss:$9 sm:$0xff] %v10027_v4  ;;  %v14110_v4 = vld [vmem:[#allocation211_spill] sm:$0xff] }
 0x30f   : > { %2377 = vst [vmem:[#allocation1 + $0x5] ss:$9 sm:$0xff] %v10029_v62  ;;  %v14127_v62 = vld [vmem:[#allocation21_spill] sm:$0xff] }
 0x310   : > { %2378 = vst [vmem:[#allocation1 + $0x6] ss:$9 sm:$0xff] %v10042_v13  ;;  %v14130_v13 = vld [vmem:[#allocation33_spill] sm:$0xff] }
 0x311   : > { %2379 = vst [vmem:[#allocation1 + $0x7] ss:$9 sm:$0xff] %v10044_v26  ;;  %v14115_v26 = vld [vmem:[#allocation218_spill] sm:$0xff] }
 0x318   : > { %v10213_v36 = vld [vmem:[#allocation1] sm:$0xff] }
 0x319   : > { %2381 = vst [vmem:[#allocation1] ss:$9 sm:$0xff] %v10046_v0 }
 0x31a   : > { %2382 = vst [vmem:[#allocation1 + $0x1] ss:$9 sm:$0xff] %v10048_v49  ;;  %v14103_v49 = vld [vmem:[#allocation206_spill] sm:$0xff] }
 0x31b   : > { %2383 = vst [vmem:[#allocation1 + $0x2] ss:$9 sm:$0xff] %v10037_v33 }
 0x31c   : > { %2384 = vst [vmem:[#allocation1 + $0x3] ss:$9 sm:$0xff] %v10039_v31  ;;  %v14117_v31 = vld [vmem:[#allocation220_spill] sm:$0xff] }
 0x31d   : > { %2385 = vst [vmem:[#allocation1 + $0x4] ss:$9 sm:$0xff] %v10060_v27  ;;  %v14116_v27 = vld [vmem:[#allocation219_spill] sm:$0xff] }
 0x31e   : > { %2386 = vst [vmem:[#allocation1 + $0x5] ss:$9 sm:$0xff] %v10062_v60 }
 0x31f   : > { %2387 = vst [vmem:[#allocation1 + $0x6] ss:$9 sm:$0xff] %v10064_v53  ;;  %v14097_v53 = vld [vmem:[#allocation9_spill] sm:$0xff] }
 0x320   : > { %2388 = vst [vmem:[#allocation1 + $0x7] ss:$9 sm:$0xff] %v10051_v6  ;;  %v14092_v6 = vld [vmem:[#allocation8_spill] sm:$0xff] }
 0x327   : > { %v10223_v2 = vld [vmem:[#allocation1] sm:$0xff] }
 0x328   : > { %2390 = vst [vmem:[#allocation1] ss:$9 sm:$0xff] %v10053_v54  ;;  %v14102_v54 = vld [vmem:[#allocation210_spill] sm:$0xff] }
 0x329   : > { %2391 = vst [vmem:[#allocation1 + $0x1] ss:$9 sm:$0xff] %v10055_v15  ;;  %v14133_v15 = vld [vmem:[#allocation36_spill] sm:$0xff] }
 0x32a   : > { %2392 = vst [vmem:[#allocation1 + $0x2] ss:$9 sm:$0xff] %v10057_v46  ;;  %v14095_v46 = vld [vmem:[#allocation204_spill] sm:$0xff] }
 0x32b   : > { %2393 = vst [vmem:[#allocation1 + $0x3] ss:$9 sm:$0xff] %v10074_v47  ;;  %v14093_v47 = vld [vmem:[#allocation7_spill] sm:$0xff] }
 0x32c   : > { %2394 = vst [vmem:[#allocation1 + $0x4] ss:$9 sm:$0xff] %v10076_v41  ;;  %v14094_v41 = vld [vmem:[#allocation203_spill] sm:$0xff] }
 0x32d   : > { %2395 = vst [vmem:[#allocation1 + $0x5] ss:$9 sm:$0xff] %v10067_v17 }
 0x32e   : > { %2396 = vst [vmem:[#allocation1 + $0x6] ss:$9 sm:$0xff] %v10069_v55  ;;  %v14121_v55 = vld [vmem:[#allocation15_spill] sm:$0xff] }
 0x32f   : > { %2397 = vst [vmem:[#allocation1 + $0x7] ss:$9 sm:$0xff] %v10071_v59  ;;  %v14096_v59 = vld [vmem:[#allocation205_spill] sm:$0xff] }
 0x336   : > { %v10233_v60 = vld [vmem:[#allocation1] sm:$0xff] }
 0x337   : > { %2399 = vst [vmem:[#allocation1] ss:$9 sm:$0xff] %v10084_v45  ;;  %v14098_v45 = vld [vmem:[#allocation200_spill] sm:$0xff] }
 0x338   : > { %2400 = vst [vmem:[#allocation1 + $0x1] ss:$9 sm:$0xff] %v10086_v9  ;;  %v14099_v9 = vld [vmem:[#allocation201_spill] sm:$0xff] }
 0x339   : > { %2401 = vst [vmem:[#allocation1 + $0x2] ss:$9 sm:$0xff] %v10088_v40  ;;  %v14100_v40 = vld [vmem:[#allocation202_spill] sm:$0xff] }
 0x33a   : > { %2402 = vst [vmem:[#allocation1 + $0x3] ss:$9 sm:$0xff] %v10090_v39  ;;  %v14101_v39 = vld [vmem:[#allocation209_spill] sm:$0xff] }
 0x33b   : > { %2403 = vst [vmem:[#allocation1 + $0x4] ss:$9 sm:$0xff] %v14092_v6  ;;  %v14141_v6 = vld [vmem:[#allocation55_spill] sm:$0xff] }
 0x33c   : > { %2404 = vst [vmem:[#allocation1 + $0x5] ss:$9 sm:$0xff] %v14093_v47  ;;  %v14142_v47 = vld [vmem:[#allocation56_spill] sm:$0xff] }
 0x33d   : > { %2405 = vst [vmem:[#allocation1 + $0x6] ss:$9 sm:$0xff] %v14094_v41  ;;  %v14143_v41 = vld [vmem:[#allocation57_spill] sm:$0xff] }
 0x33e   : > { %2406 = vst [vmem:[#allocation1 + $0x7] ss:$9 sm:$0xff] %v14095_v46 }
 0x345   : > { %v10243_v17 = vld [vmem:[#allocation1] sm:$0xff] }
 0x346   : > { %2408 = vst [vmem:[#allocation1] ss:$9 sm:$0xff] %v14096_v59  ;;  %v14144_v59 = vld [vmem:[#allocation69_spill] sm:$0xff] }
 0x347   : > { %2409 = vst [vmem:[#allocation1 + $0x1] ss:$9 sm:$0xff] %v14097_v53  ;;  %v14145_v53 = vld [vmem:[#allocation70_spill] sm:$0xff] }
 0x348   : > { %2410 = vst [vmem:[#allocation1 + $0x2] ss:$9 sm:$0xff] %v14098_v45  ;;  %v14146_v45 = vld [vmem:[#allocation71_spill] sm:$0xff] }
 0x349   : > { %2411 = vst [vmem:[#allocation1 + $0x3] ss:$9 sm:$0xff] %v14099_v9  ;;  %v14147_v9 = vld [vmem:[#allocation73_spill] sm:$0xff] }
 0x34a   : > { %2412 = vst [vmem:[#allocation1 + $0x4] ss:$9 sm:$0xff] %v14100_v40  ;;  %v14148_v40 = vld [vmem:[#allocation72_spill] sm:$0xff] }
 0x34b   : > { %2413 = vst [vmem:[#allocation1 + $0x5] ss:$9 sm:$0xff] %v14101_v39  ;;  %v14149_v39 = vld [vmem:[#allocation74_spill] sm:$0xff] }
 0x34c   : > { %2414 = vst [vmem:[#allocation1 + $0x6] ss:$9 sm:$0xff] %v14102_v54  ;;  %v14150_v54 = vld [vmem:[#allocation75_spill] sm:$0xff] }
 0x34d   : > { %2415 = vst [vmem:[#allocation1 + $0x7] ss:$9 sm:$0xff] %v14103_v49  ;;  %v14151_v49 = vld [vmem:[#allocation76_spill] sm:$0xff] }
 0x354   : > { %v10253_v0 = vld [vmem:[#allocation1] sm:$0xff] }
 0x355   : > { %2417 = vst [vmem:[#allocation1] ss:$9 sm:$0xff] %v14104_v10 }
 0x356   : > { %2418 = vst [vmem:[#allocation1 + $0x1] ss:$9 sm:$0xff] %v14105_v14  ;;  %v14152_v14 = vld [vmem:[#allocation89_spill] sm:$0xff] }
 0x357   : > { %2419 = vst [vmem:[#allocation1 + $0x2] ss:$9 sm:$0xff] %v14106_v16  ;;  %v14153_v16 = vld [vmem:[#allocation90_spill] sm:$0xff] }
 0x358   : > { %2420 = vst [vmem:[#allocation1 + $0x3] ss:$9 sm:$0xff] %v14107_v42  ;;  %v14154_v42 = vld [vmem:[#allocation92_spill] sm:$0xff] }
 0x359   : > { %2421 = vst [vmem:[#allocation1 + $0x4] ss:$9 sm:$0xff] %v14108_v52  ;;  %v14155_v52 = vld [vmem:[#allocation93_spill] sm:$0xff] }
 0x35a   : > { %2422 = vst [vmem:[#allocation1 + $0x5] ss:$9 sm:$0xff] %v14109_v1  ;;  %v14156_v1 = vld [vmem:[#allocation94_spill] sm:$0xff] }
 0x35b   : > { %2423 = vst [vmem:[#allocation1 + $0x6] ss:$9 sm:$0xff] %v14110_v4  ;;  %v14157_v4 = vld [vmem:[#allocation95_spill] sm:$0xff] }
 0x35c   : > { %2424 = vst [vmem:[#allocation1 + $0x7] ss:$9 sm:$0xff] %v14111_v51  ;;  %v14158_v51 = vld [vmem:[#allocation96_spill] sm:$0xff] }
 0x363   : > { %v10263_v8 = vld [vmem:[#allocation1] sm:$0xff] }
 0x364   : > { %2426 = vst [vmem:[#allocation1] ss:$9 sm:$0xff] %v10144_v12  ;;  %v14119_v12 = vld [vmem:[#allocation224_spill] sm:$0xff] }
 0x365   : > { %2427 = vst [vmem:[#allocation1 + $0x1] ss:$9 sm:$0xff] %v14112_v28  ;;  %v14159_v28 = vld [vmem:[#allocation97_spill] sm:$0xff] }
 0x366   : > { %2428 = vst [vmem:[#allocation1 + $0x2] ss:$9 sm:$0xff] %v14113_v18 }
 0x367   : > { %2429 = vst [vmem:[#allocation1 + $0x3] ss:$9 sm:$0xff] %v14114_v44  ;;  %v14160_v44 = vld [vmem:[#allocation105_spill] sm:$0xff] }
 0x368   : > { %2430 = vst [vmem:[#allocation1 + $0x4] ss:$9 sm:$0xff] %v14115_v26  ;;  %v14161_v26 = vld [vmem:[#allocation106_spill] sm:$0xff] }
 0x369   : > { %2431 = vst [vmem:[#allocation1 + $0x5] ss:$9 sm:$0xff] %v14116_v27  ;;  %v14162_v27 = vld [vmem:[#allocation108_spill] sm:$0xff] }
 0x36a   : > { %2432 = vst [vmem:[#allocation1 + $0x6] ss:$9 sm:$0xff] %v14117_v31  ;;  %v14163_v31 = vld [vmem:[#allocation109_spill] sm:$0xff] }
 0x36b   : > { %2433 = vst [vmem:[#allocation1 + $0x7] ss:$9 sm:$0xff] %v10158_v21 }
 0x372   : > { %v10273_v33 = vld [vmem:[#allocation1] sm:$0xff] }
 0x373   : > { %2435 = vst [vmem:[#allocation1] ss:$9 sm:$0xff] %v10160_v30  ;;  %v14120_v30 = vld [vmem:[#allocation14_spill] sm:$0xff] }
 0x374   : > { %2436 = vst [vmem:[#allocation1 + $0x1] ss:$9 sm:$0xff] %v14118_v34  ;;  %v14164_v34 = vld [vmem:[#allocation110_spill] sm:$0xff] }
 0x375   : > { %2437 = vst [vmem:[#allocation1 + $0x2] ss:$9 sm:$0xff] %v14119_v12  ;;  %v14165_v12 = vld [vmem:[#allocation113_spill] sm:$0xff] }
 0x376   : > { %2438 = vst [vmem:[#allocation1 + $0x3] ss:$9 sm:$0xff] %v10155_v56  ;;  %v14122_v56 = vld [vmem:[#allocation16_spill] sm:$0xff] }
 0x377   : > { %2439 = vst [vmem:[#allocation1 + $0x4] ss:$9 sm:$0xff] %v10167_v37  ;;  %v14123_v37 = vld [vmem:[#allocation17_spill] sm:$0xff] }
 0x378   : > { %2440 = vst [vmem:[#allocation1 + $0x5] ss:$9 sm:$0xff] %v10169_v50  ;;  %v14124_v50 = vld [vmem:[#allocation18_spill] sm:$0xff] }
 0x379   : > { %2441 = vst [vmem:[#allocation1 + $0x6] ss:$9 sm:$0xff] %v10171_v38  ;;  %v14125_v38 = vld [vmem:[#allocation19_spill] sm:$0xff] }
 0x37a   : > { %2442 = vst [vmem:[#allocation1 + $0x7] ss:$9 sm:$0xff] %v10173_v23  ;;  %v14126_v23 = vld [vmem:[#allocation20_spill] sm:$0xff] }
 0x381   : > { %v10283_v58 = vld [vmem:[#allocation1] sm:$0xff] }
 0x382   : > { %2444 = vst [vmem:[#allocation1] ss:$9 sm:$0xff] %v10163_v22 }
 0x383   : > { %2445 = vst [vmem:[#allocation1 + $0x1] ss:$9 sm:$0xff] %v10165_v32  ;;  %v14128_v32 = vld [vmem:[#allocation31_spill] sm:$0xff] }
 0x38a   : > { %v10287_v21 = vld [vmem:[#allocation1] sm:$0xff] }
 0x38b   : > { %2648 = vst [vmem:[#allocation1] ss:$9 sm:$0xff] %v14120_v30  ;;  %v14166_v30 = vld [vmem:[#allocation112_spill] sm:$0xff] }
 0x38c   : > { %2650 = vst [vmem:[#allocation1 + $0x1] ss:$9 sm:$0xff] %v14121_v55  ;;  %v14167_v55 = vld [vmem:[#allocation114_spill] sm:$0xff] }
 0x38d   : > { %2652 = vst [vmem:[#allocation1 + $0x2] ss:$9 sm:$0xff] %v14122_v56 }
 0x38e   : > { %2654 = vst [vmem:[#allocation1 + $0x3] ss:$9 sm:$0xff] %v14123_v37  ;;  %v14168_v37 = vld [vmem:[#allocation124_spill] sm:$0xff] }
 0x38f   : > { %2656 = vst [vmem:[#allocation1 + $0x4] ss:$9 sm:$0xff] %v14124_v50  ;;  %v14169_v50 = vld [vmem:[#allocation126_spill] sm:$0xff] }
 0x390   : > { %2658 = vst [vmem:[#allocation1 + $0x5] ss:$9 sm:$0xff] %v14125_v38  ;;  %v14170_v38 = vld [vmem:[#allocation127_spill] sm:$0xff] }
 0x391   : > { %2660 = vst [vmem:[#allocation1 + $0x6] ss:$9 sm:$0xff] %v14126_v23  ;;  %v14171_v23 = vld [vmem:[#allocation128_spill] sm:$0xff] }
 0x392   : > { %2662 = vst [vmem:[#allocation1 + $0x7] ss:$9 sm:$0xff] %v14127_v62  ;;  %v14172_v62 = vld [vmem:[#allocation129_spill] sm:$0xff] }
 0x399   : > { %v10297_v22 = vld [vmem:[#allocation1] sm:$0xff] }
 0x39a   : > { %2664 = vst [vmem:[#allocation1] ss:$9 sm:$0xff] %v14128_v32  ;;  %v14173_v32 = vld [vmem:[#allocation130_spill] sm:$0xff] }
 0x39b   : > { %2665 = vst [vmem:[#allocation1 + $0x1] ss:$9 sm:$0xff] %v14129_v57  ;;  %v14339_v57 = vld [vmem:[#allocation85_spill] sm:$0xff] }
 0x39c   : > { %2666 = vst [vmem:[#allocation1 + $0x2] ss:$9 sm:$0xff] %v14130_v13 }
 0x39d   : > { %2667 = vst [vmem:[#allocation1 + $0x3] ss:$9 sm:$0xff] %v14131_v61 }
 0x39e   : > { %2668 = vst [vmem:[#allocation1 + $0x4] ss:$9 sm:$0xff] %v14132_v63 }
 0x39f   : > { %2669 = vst [vmem:[#allocation1 + $0x5] ss:$9 sm:$0xff] %v14133_v15 }
 0x3a0   : > { %2670 = vst [vmem:[#allocation1 + $0x6] ss:$9 sm:$0xff] %v14134_v24  ;;  %v8219_v24 = vld [vmem:[%s13385_s1 + $0xd0] sm:$0xff] }
 0x3a1   : > { %2671 = vst [vmem:[#allocation1 + $0x7] ss:$9 sm:$0xff] %v14135_v25  ;;  %v14331_v25 = vld [vmem:[#allocation87_spill] sm:$0xff] }
 0x3a8   : > { %v10307_v20 = vld [vmem:[#allocation1] sm:$0xff] }
 0x3a9   : > { %2673 = vst [vmem:[#allocation1] ss:$9 sm:$0xff] %v14136_v35 }
 0x3aa   : > { %2674 = vst [vmem:[#allocation1 + $0x1] ss:$9 sm:$0xff] %v14137_v7  ;;  %v8231_v7 = vld [vmem:[%s13385_s1 + $0x130] sm:$0xff] }
 0x3ab   : > { %2675 = vst [vmem:[#allocation1 + $0x2] ss:$9 sm:$0xff] %v14138_v5  ;;  %v14329_v5 = vld [vmem:[#allocation58_spill] sm:$0xff] }
 0x3ac   : > { %2676 = vst [vmem:[#allocation1 + $0x3] ss:$9 sm:$0xff] %v14139_v11  ;;  %v14328_v11 = vld [vmem:[#allocation86_spill] sm:$0xff] }
 0x3ad   : > { %2677 = vst [vmem:[#allocation1 + $0x4] ss:$9 sm:$0xff] %v14140_v3 }
 0x3ae   : > { %2678 = vst [vmem:[#allocation1 + $0x5] ss:$9 sm:$0xff] %v14141_v6 }
 0x3af   : > { %2679 = vst [vmem:[#allocation1 + $0x6] ss:$9 sm:$0xff] %v14142_v47  ;;  %v8223_v47 = vld [vmem:[%s13385_s1 + $0xf0] sm:$0xff] }
 0x3b0   : > { %2680 = vst [vmem:[#allocation1 + $0x7] ss:$9 sm:$0xff] %v14143_v41  ;;  %v14327_v41 = vld [vmem:[#allocation40_spill] sm:$0xff] }
 0x3b7   : > { %v10317_v46 = vld [vmem:[#allocation1] sm:$0xff] }
 0x3b8   : > { %2682 = vst [vmem:[#allocation1] ss:$9 sm:$0xff] %v14144_v59 }
 0x3b9   : > { %2683 = vst [vmem:[#allocation1 + $0x1] ss:$9 sm:$0xff] %v14145_v53  ;;  %v14279_v53 = vld [vmem:[#allocation154_spill] sm:$0xff] }
 0x3ba   : > { %2684 = vst [vmem:[#allocation1 + $0x2] ss:$9 sm:$0xff] %v14146_v45  ;;  %v14270_v45 = vld [vmem:[#allocation137_spill] sm:$0xff] }
 0x3bb   : > { %2685 = vst [vmem:[#allocation1 + $0x3] ss:$9 sm:$0xff] %v14147_v9  ;;  %v14261_v9 = vld [vmem:[#allocation118_spill] sm:$0xff] }
 0x3bc   : > { %2686 = vst [vmem:[#allocation1 + $0x4] ss:$9 sm:$0xff] %v14148_v40  ;;  %v14252_v40 = vld [vmem:[#allocation100_spill] sm:$0xff] }
 0x3bd   : > { %2687 = vst [vmem:[#allocation1 + $0x5] ss:$9 sm:$0xff] %v14149_v39  ;;  %v14244_v39 = vld [vmem:[#allocation79_spill] sm:$0xff] }
 0x3be   : > { %2688 = vst [vmem:[#allocation1 + $0x6] ss:$9 sm:$0xff] %v14150_v54  ;;  %v14236_v54 = vld [vmem:[#allocation62_spill] sm:$0xff] }
 0x3bf   : > { %2689 = vst [vmem:[#allocation1 + $0x7] ss:$9 sm:$0xff] %v14151_v49  ;;  %v14227_v49 = vld [vmem:[#allocation42_spill] sm:$0xff] }
 0x3c6   : > { %v10327_v10 = vld [vmem:[#allocation1] sm:$0xff] }
 0x3c7   : > { %2691 = vst [vmem:[#allocation1] ss:$9 sm:$0xff] %v14152_v14 }
 0x3c8   : > { %2692 = vst [vmem:[#allocation1 + $0x1] ss:$9 sm:$0xff] %v14153_v16  ;;  %v14223_v16 = vld [vmem:[#allocation26_spill] sm:$0xff] }
 0x3c9   : > { %2693 = vst [vmem:[#allocation1 + $0x2] ss:$9 sm:$0xff] %v14154_v42  ;;  %v14222_v42 = vld [vmem:[#allocation25_spill] sm:$0xff] }
 0x3ca   : > { %2694 = vst [vmem:[#allocation1 + $0x3] ss:$9 sm:$0xff] %v14155_v52  ;;  %v14219_v52 = vld [vmem:[#allocation22_spill] sm:$0xff] }
 0x3cb   : > { %2695 = vst [vmem:[#allocation1 + $0x4] ss:$9 sm:$0xff] %v14156_v1 }
 0x3cc   : > { %2696 = vst [vmem:[#allocation1 + $0x5] ss:$9 sm:$0xff] %v14157_v4 }
 0x3cd   : > { %2697 = vst [vmem:[#allocation1 + $0x6] ss:$9 sm:$0xff] %v14158_v51  ;;  %v14210_v51 = vld [vmem:[#allocation197_spill] sm:$0xff] }
 0x3ce   : > { %2698 = vst [vmem:[#allocation1 + $0x7] ss:$9 sm:$0xff] %v14159_v28 }
 0x3d5   : > { %v10337_v18 = vld [vmem:[#allocation1] sm:$0xff] }
 0x3d6   : > { %2700 = vst [vmem:[#allocation1] ss:$9 sm:$0xff] %v14160_v44 }
 0x3d7   : > { %2701 = vst [vmem:[#allocation1 + $0x1] ss:$9 sm:$0xff] %v14161_v26  ;;  %v14195_v26 = vld [vmem:[#allocation181_spill] sm:$0xff] }
 0x3d8   : > { %2702 = vst [vmem:[#allocation1 + $0x2] ss:$9 sm:$0xff] %v14162_v27 }
 0x3d9   : > { %2703 = vst [vmem:[#allocation1 + $0x3] ss:$9 sm:$0xff] %v14163_v31  ;;  %v14178_v31 = vld [vmem:[#allocation144_spill] sm:$0xff] }
 0x3da   : > { %2704 = vst [vmem:[#allocation1 + $0x4] ss:$9 sm:$0xff] %v14164_v34  ;;  %v14174_v34 = vld [vmem:[#allocation133_spill] sm:$0xff] }
 0x3db   : > { %2705 = vst [vmem:[#allocation1 + $0x5] ss:$9 sm:$0xff] %v14165_v12  ;;  %v14175_v12 = vld [vmem:[#allocation132_spill] sm:$0xff] }
 0x3dc   : > { %2706 = vst [vmem:[#allocation1 + $0x6] ss:$9 sm:$0xff] %v14166_v30 }
 0x3dd   : > { %2707 = vst [vmem:[#allocation1 + $0x7] ss:$9 sm:$0xff] %v14167_v55  ;;  %v14177_v55 = vld [vmem:[#allocation142_spill] sm:$0xff] }
 0x3e4   : > { %v10347_v56 = vld [vmem:[#allocation1] sm:$0xff] }
 0x3e5   : > { %2709 = vst [vmem:[#allocation1] ss:$9 sm:$0xff] %v14168_v37  ;;  %v14179_v37 = vld [vmem:[#allocation146_spill] sm:$0xff] }
 0x3e6   : > { %2710 = vst [vmem:[#allocation1 + $0x1] ss:$9 sm:$0xff] %v14169_v50  ;;  %v14186_v50 = vld [vmem:[#allocation160_spill] sm:$0xff] }
 0x3e7   : > { %2711 = vst [vmem:[#allocation1 + $0x2] ss:$9 sm:$0xff] %v14170_v38  ;;  %v14180_v38 = vld [vmem:[#allocation147_spill] sm:$0xff] }
 0x3e8   : > { %2712 = vst [vmem:[#allocation1 + $0x3] ss:$9 sm:$0xff] %v14171_v23  ;;  %v14181_v23 = vld [vmem:[#allocation148_spill] sm:$0xff] }
 0x3e9   : > { %2713 = vst [vmem:[#allocation1 + $0x4] ss:$9 sm:$0xff] %v14172_v62  ;;  %v14182_v62 = vld [vmem:[#allocation149_spill] sm:$0xff] }
 0x3ea   : > { %2714 = vst [vmem:[#allocation1 + $0x5] ss:$9 sm:$0xff] %v14173_v32  ;;  %v14183_v32 = vld [vmem:[#allocation151_spill] sm:$0xff] }
 0x3eb   : > { %2715 = vst [vmem:[#allocation1 + $0x6] ss:$9 sm:$0xff] %v14174_v34  ;;  %v14184_v34 = vld [vmem:[#allocation162_spill] sm:$0xff] }
 0x3ec   : > { %2716 = vst [vmem:[#allocation1 + $0x7] ss:$9 sm:$0xff] %v14175_v12 }
 0x3f3   : > { %v10357_v30 = vld [vmem:[#allocation1] sm:$0xff] }
 0x3f4   : > { %14176 = vst [vmem:[#allocation8_spill] sm:$0xff] %v10357_v30  ;;  %v14225_v30 = vld [vmem:[#allocation30_spill] sm:$0xff] }
 0x3f5   : > { %2718 = vst [vmem:[#allocation1] ss:$9 sm:$0xff] %v14177_v55  ;;  %v14187_v55 = vld [vmem:[#allocation163_spill] sm:$0xff] }
 0x3f6   : > { %2719 = vst [vmem:[#allocation1 + $0x1] ss:$9 sm:$0xff] %v14178_v31  ;;  %v14188_v31 = vld [vmem:[#allocation164_spill] sm:$0xff] }
 0x3f7   : > { %2720 = vst [vmem:[#allocation1 + $0x2] ss:$9 sm:$0xff] %v14179_v37  ;;  %v14189_v37 = vld [vmem:[#allocation165_spill] sm:$0xff] }
 0x3f8   : > { %2721 = vst [vmem:[#allocation1 + $0x3] ss:$9 sm:$0xff] %v14180_v38  ;;  %v14190_v38 = vld [vmem:[#allocation166_spill] sm:$0xff] }
 0x3f9   : > { %2722 = vst [vmem:[#allocation1 + $0x4] ss:$9 sm:$0xff] %v14181_v23  ;;  %v14191_v23 = vld [vmem:[#allocation168_spill] sm:$0xff] }
 0x3fa   : > { %2723 = vst [vmem:[#allocation1 + $0x5] ss:$9 sm:$0xff] %v14182_v62  ;;  %v14192_v62 = vld [vmem:[#allocation169_spill] sm:$0xff] }
 0x3fb   : > { %2724 = vst [vmem:[#allocation1 + $0x6] ss:$9 sm:$0xff] %v14183_v32  ;;  %v14193_v32 = vld [vmem:[#allocation171_spill] sm:$0xff] }
 0x3fc   : > { %2725 = vst [vmem:[#allocation1 + $0x7] ss:$9 sm:$0xff] %v14184_v34  ;;  %v476_v34 = vld [vmem:[%s8628_s8 + $0xf0] sm:$0xff] }
 0x403   : > { %v10367_v12 = vld [vmem:[#allocation1] sm:$0xff] }
 0x404   : > { %14185 = vst [vmem:[#allocation7_spill] sm:$0xff] %v10367_v12  ;;  %v14199_v12 = vld [vmem:[#allocation183_spill] sm:$0xff] }
 0x405   : > { %2727 = vst [vmem:[#allocation1] ss:$9 sm:$0xff] %v14186_v50  ;;  %v14196_v50 = vld [vmem:[#allocation180_spill] sm:$0xff] }
 0x406   : > { %2728 = vst [vmem:[#allocation1 + $0x1] ss:$9 sm:$0xff] %v14187_v55  ;;  %v10382_v55 = vpack.c.bf16 %v476_v34, %v476_v34 }
 0x407   : > { %2729 = vst [vmem:[#allocation1 + $0x2] ss:$9 sm:$0xff] %v14188_v31  ;;  %v14198_v31 = vld [vmem:[#allocation182_spill] sm:$0xff] }
 0x408   : > { %2730 = vst [vmem:[#allocation1 + $0x3] ss:$9 sm:$0xff] %v14189_v37  ;;  %v477_v37 = vld [vmem:[%s8628_s8 + $0xf8] sm:$0xff] }
 0x409   : > { %2731 = vst [vmem:[#allocation1 + $0x4] ss:$9 sm:$0xff] %v14190_v38  ;;  %v14200_v38 = vld [vmem:[#allocation185_spill] sm:$0xff] }
 0x40a   : > { %2732 = vst [vmem:[#allocation1 + $0x5] ss:$9 sm:$0xff] %v14191_v23  ;;  %v14201_v23 = vld [vmem:[#allocation186_spill] sm:$0xff] }
 0x40b   : > { %2733 = vst [vmem:[#allocation1 + $0x6] ss:$9 sm:$0xff] %v14192_v62  ;;  %v10389_v62 = vpack.c.bf16 %v477_v37, %v477_v37 }
 0x40c   : > { %2734 = vst [vmem:[#allocation1 + $0x7] ss:$9 sm:$0xff] %v14193_v32  ;;  %v2601_v32 = vrot.slane %v10382_v55, 3 }
 0x40d   : > { %14197 = vst [vmem:[#allocation204_spill] sm:$0xff] %v10382_v55  ;;  %v2602_v34 = vrot.slane %v10389_v62, 3 }
 0x40e   : > { %14202 = vst [vmem:[#allocation205_spill] sm:$0xff] %v10389_v62  ;;  %v10403_v37 = vsel %vm578_vm1, %v10382_v55, %v2601_v32 }
 0x40f   : > { %14205 = vst [vmem:[#allocation9_spill] sm:$0xff] %v10403_v37  ;;  %v2622_v28 = vsel %vm586_vm4, %v10389_v62, %v2602_v34 }
 0x410   : > { %v10427_v4 = vrot.slane %v2622_v28, 2 }
 0x412   : > { %14213 = vst [vmem:[#allocation207_spill] sm:$0xff] %v10427_v4 }
 0x413   : > { %v10378_v27 = vld [vmem:[#allocation1] sm:$0xff] }
 0x414   : > { %14194 = vst [vmem:[#allocation203_spill] sm:$0xff] %v10378_v27  ;;  %v14203_v27 = vld [vmem:[#allocation187_spill] sm:$0xff] }
 0x415   : > { %2736 = vst [vmem:[#allocation1] ss:$9 sm:$0xff] %v14195_v26  ;;  %v14204_v26 = vld [vmem:[#allocation188_spill] sm:$0xff] }
 0x416   : > { %2737 = vst [vmem:[#allocation1 + $0x1] ss:$9 sm:$0xff] %v14196_v50 }
 0x417   : > { %2738 = vst [vmem:[#allocation1 + $0x2] ss:$9 sm:$0xff] %v14198_v31  ;;  %v2607_v31 = vsel %vm582_vm2, %v10382_v55, %v2601_v32 }
 0x418   : > { %2739 = vst [vmem:[#allocation1 + $0x3] ss:$9 sm:$0xff] %v14199_v12  ;;  %v2610_v12 = vsel %vm586_vm4, %v10382_v55, %v2601_v32 }
 0x419   : > { %2740 = vst [vmem:[#allocation1 + $0x4] ss:$9 sm:$0xff] %v14200_v38  ;;  %v10405_v38 = vrot.slane %v2607_v31, 1  ;;  %v10422_v31 = vsel %vm578_vm1, %v10389_v62, %v2602_v34 }
 0x41a   : > { %2741 = vst [vmem:[#allocation1 + $0x5] ss:$9 sm:$0xff] %v14201_v23  ;;  %v2613_v23 = vsel %vm590_vm6, %v10382_v55, %v2601_v32  ;;  %v478_v32 = vld [vmem:[%s8628_s8 + $0x100] sm:$0xf] }
 0x41b   : > { %2742 = vst [vmem:[#allocation1 + $0x6] ss:$9 sm:$0xff] %v14203_v27  ;;  %v10407_v27 = vrot.slane %v2610_v12, 2  ;;  %v10413_v44 = vrot.slane %v2613_v23, 3  ;;  %v10431_v23 = vpack.c.bf16 %v478_v32, %v478_v32 }
 0x41c   : > { %2743 = vst [vmem:[#allocation1 + $0x7] ss:$9 sm:$0xff] %v14204_v26  ;;  %v2619_v26 = vsel %vm582_vm2, %v10389_v62, %v2602_v34 }
 0x41d   : > { %14206 = vst [vmem:[#allocation200_spill] sm:$0xff] %v10405_v38  ;;  %v10424_v12 = vrot.slane %v2619_v26, 1  ;;  %v2625_v26 = vsel %vm590_vm6, %v10389_v62, %v2602_v34  ;;  %v14220_v34 = vld [vmem:[#allocation23_spill] sm:$0xff] }
 0x41e   : > { %14207 = vst [vmem:[#allocation201_spill] sm:$0xff] %v10407_v27 }
 0x41f   : > { %14209 = vst [vmem:[#allocation209_spill] sm:$0xff] %v10413_v44 }
 0x420   : > { %14211 = vst [vmem:[#allocation210_spill] sm:$0xff] %v10422_v31 }
 0x421   : > { %14212 = vst [vmem:[#allocation206_spill] sm:$0xff] %v10424_v12 }
 0x422   : > { %14214 = vst [vmem:[#allocation208_spill] sm:$0xff] %v10431_v23 }
 0x423   : > { %v10411_v50 = vld [vmem:[#allocation1] sm:$0xff] }
 0x424   : > { %14208 = vst [vmem:[#allocation202_spill] sm:$0xff] %v10411_v50  ;;  %v10439_v50 = vrot.slane %v2625_v26, 3  ;;  %v14221_v26 = vld [vmem:[#allocation24_spill] sm:$0xff] }
 0x425   : > { %2745 = vst [vmem:[#allocation1] ss:$9 sm:$0xff] %v14210_v51  ;;  %v13755_v51 = vrot.slane %v10431_v23, 3 }
 0x426   : > { %2746 = vst [vmem:[#allocation1 + $0x1] ss:$9 sm:$0xff] %v10403_v37 }
 0x427   : > { %2748 = vst [vmem:[#allocation1 + $0x2] ss:$9 sm:$0xff] %v10405_v38  ;;  %v10445_v28 = vsel %vm578_vm1, %v10431_v23, %v13755_v51  ;;  %v14224_v51 = vld [vmem:[#allocation28_spill] sm:$0xff] }
 0x428   : > { %2750 = vst [vmem:[#allocation1 + $0x3] ss:$9 sm:$0xff] %v10407_v27 }
 0x429   : > { %2752 = vst [vmem:[#allocation1 + $0x4] ss:$9 sm:$0xff] %v10413_v44 }
 0x42a   : > { %2753 = vst [vmem:[#allocation1 + $0x5] ss:$9 sm:$0xff] %v10422_v31 }
 0x42b   : > { %2755 = vst [vmem:[#allocation1 + $0x6] ss:$9 sm:$0xff] %v10424_v12 }
 0x42c   : > { %2757 = vst [vmem:[#allocation1 + $0x7] ss:$9 sm:$0xff] %v10427_v4 }
 0x42d   : > { %14215 = vst [vmem:[#allocation213_spill] sm:$0xff] %v10439_v50 }
 0x42e   : > { %14216 = vst [vmem:[#allocation214_spill] sm:$0xff] %v10445_v28 }
 0x433   : > { %v10447_v32 = vld [vmem:[#allocation1] sm:$0xff] }
 0x434   : > { %14217 = vst [vmem:[#allocation215_spill] sm:$0xff] %v10447_v32  ;;  %v14226_v32 = vld [vmem:[#allocation41_spill] sm:$0xff] }
 0x435   : > { %2760 = vst [vmem:[#allocation1] ss:$9 sm:$0xff] %v10439_v50 }
 0x436   : > { %2761 = vst [vmem:[#allocation1 + $0x1] ss:$9 sm:$0xff] %v10445_v28 }
 0x43d   : > { %v10451_v1 = vld [vmem:[#allocation1] sm:$0xff] }
 0x43e   : > { %14218 = vst [vmem:[#allocation216_spill] sm:$0xff] %v10451_v1  ;;  %v14228_v1 = vld [vmem:[#allocation44_spill] sm:$0xff] }
 0x43f   : > { %2998 = vst [vmem:[#allocation1] ss:$9 sm:$0xff] %v14219_v52  ;;  %v14229_v52 = vld [vmem:[#allocation45_spill] sm:$0xff] }
 0x440   : > { %3000 = vst [vmem:[#allocation1 + $0x1] ss:$9 sm:$0xff] %v14220_v34  ;;  %v14230_v34 = vld [vmem:[#allocation46_spill] sm:$0xff] }
 0x441   : > { %3002 = vst [vmem:[#allocation1 + $0x2] ss:$9 sm:$0xff] %v14221_v26  ;;  %v14231_v26 = vld [vmem:[#allocation47_spill] sm:$0xff] }
 0x442   : > { %3004 = vst [vmem:[#allocation1 + $0x3] ss:$9 sm:$0xff] %v14222_v42  ;;  %v14232_v42 = vld [vmem:[#allocation48_spill] sm:$0xff] }
 0x443   : > { %3006 = vst [vmem:[#allocation1 + $0x4] ss:$9 sm:$0xff] %v14223_v16  ;;  %v14233_v16 = vld [vmem:[#allocation49_spill] sm:$0xff] }
 0x444   : > { %3008 = vst [vmem:[#allocation1 + $0x5] ss:$9 sm:$0xff] %v14224_v51  ;;  %v14234_v51 = vld [vmem:[#allocation59_spill] sm:$0xff] }
 0x445   : > { %3010 = vst [vmem:[#allocation1 + $0x6] ss:$9 sm:$0xff] %v14225_v30 }
 0x446   : > { %3012 = vst [vmem:[#allocation1 + $0x7] ss:$9 sm:$0xff] %v14226_v32  ;;  %v14235_v32 = vld [vmem:[#allocation61_spill] sm:$0xff] }
 0x44d   : > { %v10461_v14 = vld [vmem:[#allocation1] sm:$0xff] }
 0x44e   : > { %3014 = vst [vmem:[#allocation1] ss:$9 sm:$0xff] %v14227_v49  ;;  %v14237_v49 = vld [vmem:[#allocation63_spill] sm:$0xff] }
 0x44f   : > { %3015 = vst [vmem:[#allocation1 + $0x1] ss:$9 sm:$0xff] %v14228_v1  ;;  %v14238_v1 = vld [vmem:[#allocation64_spill] sm:$0xff] }
 0x450   : > { %3016 = vst [vmem:[#allocation1 + $0x2] ss:$9 sm:$0xff] %v14229_v52  ;;  %v14239_v52 = vld [vmem:[#allocation65_spill] sm:$0xff] }
 0x451   : > { %3017 = vst [vmem:[#allocation1 + $0x3] ss:$9 sm:$0xff] %v14230_v34  ;;  %v14240_v34 = vld [vmem:[#allocation66_spill] sm:$0xff] }
 0x452   : > { %3018 = vst [vmem:[#allocation1 + $0x4] ss:$9 sm:$0xff] %v14231_v26  ;;  %v14241_v26 = vld [vmem:[#allocation68_spill] sm:$0xff] }
 0x453   : > { %3019 = vst [vmem:[#allocation1 + $0x5] ss:$9 sm:$0xff] %v14232_v42  ;;  %v14242_v42 = vld [vmem:[#allocation77_spill] sm:$0xff] }
 0x454   : > { %3020 = vst [vmem:[#allocation1 + $0x6] ss:$9 sm:$0xff] %v14233_v16 }
 0x455   : > { %3021 = vst [vmem:[#allocation1 + $0x7] ss:$9 sm:$0xff] %v14234_v51  ;;  %v14243_v51 = vld [vmem:[#allocation78_spill] sm:$0xff] }
 0x45c   : > { %v10471_v30 = vld [vmem:[#allocation1] sm:$0xff] }
 0x45d   : > { %3023 = vst [vmem:[#allocation1] ss:$9 sm:$0xff] %v14235_v32  ;;  %v14245_v32 = vld [vmem:[#allocation80_spill] sm:$0xff] }
 0x45e   : > { %3024 = vst [vmem:[#allocation1 + $0x1] ss:$9 sm:$0xff] %v14236_v54  ;;  %v14246_v54 = vld [vmem:[#allocation81_spill] sm:$0xff] }
 0x45f   : > { %3025 = vst [vmem:[#allocation1 + $0x2] ss:$9 sm:$0xff] %v14237_v49  ;;  %v14247_v49 = vld [vmem:[#allocation82_spill] sm:$0xff] }
 0x460   : > { %3026 = vst [vmem:[#allocation1 + $0x3] ss:$9 sm:$0xff] %v14238_v1  ;;  %v14248_v1 = vld [vmem:[#allocation83_spill] sm:$0xff] }
 0x461   : > { %3027 = vst [vmem:[#allocation1 + $0x4] ss:$9 sm:$0xff] %v14239_v52  ;;  %v14249_v52 = vld [vmem:[#allocation84_spill] sm:$0xff] }
 0x462   : > { %3028 = vst [vmem:[#allocation1 + $0x5] ss:$9 sm:$0xff] %v14240_v34  ;;  %v14250_v34 = vld [vmem:[#allocation98_spill] sm:$0xff] }
 0x463   : > { %3029 = vst [vmem:[#allocation1 + $0x6] ss:$9 sm:$0xff] %v14241_v26 }
 0x464   : > { %3030 = vst [vmem:[#allocation1 + $0x7] ss:$9 sm:$0xff] %v14242_v42  ;;  %v14251_v42 = vld [vmem:[#allocation99_spill] sm:$0xff] }
 0x46b   : > { %v10481_v16 = vld [vmem:[#allocation1] sm:$0xff] }
 0x46c   : > { %3032 = vst [vmem:[#allocation1] ss:$9 sm:$0xff] %v14243_v51  ;;  %v14253_v51 = vld [vmem:[#allocation101_spill] sm:$0xff] }
 0x46d   : > { %3033 = vst [vmem:[#allocation1 + $0x1] ss:$9 sm:$0xff] %v14244_v39  ;;  %v14254_v39 = vld [vmem:[#allocation102_spill] sm:$0xff] }
 0x46e   : > { %3034 = vst [vmem:[#allocation1 + $0x2] ss:$9 sm:$0xff] %v14245_v32  ;;  %v14255_v32 = vld [vmem:[#allocation103_spill] sm:$0xff] }
 0x46f   : > { %3035 = vst [vmem:[#allocation1 + $0x3] ss:$9 sm:$0xff] %v14246_v54  ;;  %v14256_v54 = vld [vmem:[#allocation104_spill] sm:$0xff] }
 0x470   : > { %3036 = vst [vmem:[#allocation1 + $0x4] ss:$9 sm:$0xff] %v14247_v49  ;;  %v14257_v49 = vld [vmem:[#allocation107_spill] sm:$0xff] }
 0x471   : > { %3037 = vst [vmem:[#allocation1 + $0x5] ss:$9 sm:$0xff] %v14248_v1  ;;  %v14258_v1 = vld [vmem:[#allocation115_spill] sm:$0xff] }
 0x472   : > { %3038 = vst [vmem:[#allocation1 + $0x6] ss:$9 sm:$0xff] %v14249_v52 }
 0x473   : > { %3039 = vst [vmem:[#allocation1 + $0x7] ss:$9 sm:$0xff] %v14250_v34  ;;  %v14260_v34 = vld [vmem:[#allocation117_spill] sm:$0xff] }
 0x47a   : > { %v10491_v26 = vld [vmem:[#allocation1] sm:$0xff] }
 0x47b   : > { %3041 = vst [vmem:[#allocation1] ss:$9 sm:$0xff] %v14251_v42  ;;  %v14262_v42 = vld [vmem:[#allocation120_spill] sm:$0xff] }
 0x47c   : > { %3042 = vst [vmem:[#allocation1 + $0x1] ss:$9 sm:$0xff] %v14252_v40  ;;  %v14263_v40 = vld [vmem:[#allocation121_spill] sm:$0xff] }
 0x47d   : > { %3043 = vst [vmem:[#allocation1 + $0x2] ss:$9 sm:$0xff] %v14253_v51  ;;  %v14264_v51 = vld [vmem:[#allocation122_spill] sm:$0xff] }
 0x47e   : > { %3044 = vst [vmem:[#allocation1 + $0x3] ss:$9 sm:$0xff] %v14254_v39  ;;  %v14265_v39 = vld [vmem:[#allocation123_spill] sm:$0xff] }
 0x47f   : > { %3045 = vst [vmem:[#allocation1 + $0x4] ss:$9 sm:$0xff] %v14255_v32  ;;  %v14266_v32 = vld [vmem:[#allocation125_spill] sm:$0xff] }
 0x480   : > { %3046 = vst [vmem:[#allocation1 + $0x5] ss:$9 sm:$0xff] %v14256_v54  ;;  %v14267_v54 = vld [vmem:[#allocation134_spill] sm:$0xff] }
 0x481   : > { %3047 = vst [vmem:[#allocation1 + $0x6] ss:$9 sm:$0xff] %v14257_v49 }
 0x482   : > { %3048 = vst [vmem:[#allocation1 + $0x7] ss:$9 sm:$0xff] %v14258_v1  ;;  %v14269_v1 = vld [vmem:[#allocation135_spill] sm:$0xff] }
 0x489   : > { %v10501_v52 = vld [vmem:[#allocation1] sm:$0xff] }
 0x48a   : > { %14259 = vst [vmem:[#allocation211_spill] sm:$0xff] %v10501_v52 }
 0x48b   : > { %3050 = vst [vmem:[#allocation1] ss:$9 sm:$0xff] %v14260_v34  ;;  %v14271_v34 = vld [vmem:[#allocation138_spill] sm:$0xff] }
 0x48c   : > { %3051 = vst [vmem:[#allocation1 + $0x1] ss:$9 sm:$0xff] %v14261_v9  ;;  %v14272_v9 = vld [vmem:[#allocation139_spill] sm:$0xff] }
 0x48d   : > { %3052 = vst [vmem:[#allocation1 + $0x2] ss:$9 sm:$0xff] %v14262_v42  ;;  %v14273_v42 = vld [vmem:[#allocation140_spill] sm:$0xff] }
 0x48e   : > { %3053 = vst [vmem:[#allocation1 + $0x3] ss:$9 sm:$0xff] %v14263_v40  ;;  %v14274_v40 = vld [vmem:[#allocation141_spill] sm:$0xff] }
 0x48f   : > { %3054 = vst [vmem:[#allocation1 + $0x4] ss:$9 sm:$0xff] %v14264_v51  ;;  %v14275_v51 = vld [vmem:[#allocation143_spill] sm:$0xff] }
 0x490   : > { %3055 = vst [vmem:[#allocation1 + $0x5] ss:$9 sm:$0xff] %v14265_v39  ;;  %v14276_v39 = vld [vmem:[#allocation152_spill] sm:$0xff] }
 0x491   : > { %3056 = vst [vmem:[#allocation1 + $0x6] ss:$9 sm:$0xff] %v14266_v32 }
 0x492   : > { %3057 = vst [vmem:[#allocation1 + $0x7] ss:$9 sm:$0xff] %v14267_v54  ;;  %v14278_v54 = vld [vmem:[#allocation153_spill] sm:$0xff] }
 0x499   : > { %v10511_v49 = vld [vmem:[#allocation1] sm:$0xff] }
 0x49a   : > { %14268 = vst [vmem:[#allocation212_spill] sm:$0xff] %v10511_v49  ;;  %v2956_v49 = vshll.u32 %v10427_v4, 16 }
 0x49b   : > { %3059 = vst [vmem:[#allocation1] ss:$9 sm:$0xff] %v14269_v1  ;;  %v14280_v1 = vld [vmem:[#allocation155_spill] sm:$0xff] }
 0x49c   : > { %3060 = vst [vmem:[#allocation1 + $0x1] ss:$9 sm:$0xff] %v14270_v45  ;;  %v14281_v45 = vld [vmem:[#allocation156_spill] sm:$0xff] }
 0x49d   : > { %3061 = vst [vmem:[#allocation1 + $0x2] ss:$9 sm:$0xff] %v14271_v34  ;;  %v14282_v34 = vld [vmem:[#allocation157_spill] sm:$0xff] }
 0x49e   : > { %3062 = vst [vmem:[#allocation1 + $0x3] ss:$9 sm:$0xff] %v14272_v9  ;;  %v14283_v9 = vld [vmem:[#allocation159_spill] sm:$0xff] }
 0x49f   : > { %3063 = vst [vmem:[#allocation1 + $0x4] ss:$9 sm:$0xff] %v14273_v42  ;;  %v14284_v42 = vld [vmem:[#allocation161_spill] sm:$0xff] }
 0x4a0   : > { %3064 = vst [vmem:[#allocation1 + $0x5] ss:$9 sm:$0xff] %v14274_v40  ;;  %v14285_v40 = vld [vmem:[#allocation172_spill] sm:$0xff] }
 0x4a1   : > { %3065 = vst [vmem:[#allocation1 + $0x6] ss:$9 sm:$0xff] %v14275_v51 }
 0x4a2   : > { %3066 = vst [vmem:[#allocation1 + $0x7] ss:$9 sm:$0xff] %v14276_v39  ;;  %v14287_v39 = vld [vmem:[#allocation173_spill] sm:$0xff] }
 0x4a9   : > { %v10521_v32 = vld [vmem:[#allocation1] sm:$0xff] }
 0x4aa   : > { %14277 = vst [vmem:[#allocation221_spill] sm:$0xff] %v10521_v32  ;;  %v14288_v32 = vld [vmem:[#allocation174_spill] sm:$0xff] }
 0x4ab   : > { %3068 = vst [vmem:[#allocation1] ss:$9 sm:$0xff] %v14278_v54  ;;  %v14289_v54 = vld [vmem:[#allocation175_spill] sm:$0xff] }
 0x4ac   : > { %3069 = vst [vmem:[#allocation1 + $0x1] ss:$9 sm:$0xff] %v14279_v53  ;;  %v14290_v53 = vld [vmem:[#allocation176_spill] sm:$0xff] }
 0x4ad   : > { %3070 = vst [vmem:[#allocation1 + $0x2] ss:$9 sm:$0xff] %v14280_v1  ;;  %v14291_v1 = vld [vmem:[#allocation177_spill] sm:$0xff] }
 0x4ae   : > { %3071 = vst [vmem:[#allocation1 + $0x3] ss:$9 sm:$0xff] %v14281_v45  ;;  %v14292_v45 = vld [vmem:[#allocation178_spill] sm:$0xff] }
 0x4af   : > { %3072 = vst [vmem:[#allocation1 + $0x4] ss:$9 sm:$0xff] %v14282_v34  ;;  %v14293_v34 = vld [vmem:[#allocation179_spill] sm:$0xff] }
 0x4b0   : > { %3073 = vst [vmem:[#allocation1 + $0x5] ss:$9 sm:$0xff] %v14283_v9  ;;  %v14294_v9 = vld [vmem:[#allocation189_spill] sm:$0xff] }
 0x4b1   : > { %3074 = vst [vmem:[#allocation1 + $0x6] ss:$9 sm:$0xff] %v14284_v42 }
 0x4b2   : > { %3075 = vst [vmem:[#allocation1 + $0x7] ss:$9 sm:$0xff] %v14285_v40  ;;  %v14296_v40 = vld [vmem:[#allocation190_spill] sm:$0xff] }
 0x4b9   : > { %v10531_v51 = vld [vmem:[#allocation1] sm:$0xff] }
 0x4ba   : > { %14286 = vst [vmem:[#allocation222_spill] sm:$0xff] %v10531_v51  ;;  %v14297_v51 = vld [vmem:[#allocation191_spill] sm:$0xff] }
 0x4bb   : > { %3077 = vst [vmem:[#allocation1] ss:$9 sm:$0xff] %v14287_v39  ;;  %v14298_v39 = vld [vmem:[#allocation192_spill] sm:$0xff] }
 0x4bc   : > { %3078 = vst [vmem:[#allocation1 + $0x1] ss:$9 sm:$0xff] %v14288_v32  ;;  %v14299_v32 = vld [vmem:[#allocation193_spill] sm:$0xff] }
 0x4bd   : > { %3079 = vst [vmem:[#allocation1 + $0x2] ss:$9 sm:$0xff] %v14289_v54  ;;  %v14300_v54 = vld [vmem:[#allocation194_spill] sm:$0xff] }
 0x4be   : > { %3080 = vst [vmem:[#allocation1 + $0x3] ss:$9 sm:$0xff] %v14290_v53  ;;  %v14301_v53 = vld [vmem:[#allocation195_spill] sm:$0xff] }
 0x4bf   : > { %3081 = vst [vmem:[#allocation1 + $0x4] ss:$9 sm:$0xff] %v14291_v1  ;;  %v14302_v1 = vld [vmem:[#allocation196_spill] sm:$0xff] }
 0x4c0   : > { %3082 = vst [vmem:[#allocation1 + $0x5] ss:$9 sm:$0xff] %v14292_v45  ;;  %v14303_v45 = vld [vmem:[#allocation198_spill] sm:$0xff] }
 0x4c1   : > { %3083 = vst [vmem:[#allocation1 + $0x6] ss:$9 sm:$0xff] %v14293_v34  ;;  %v2921_v34 = vshll.u32 %v10405_v38, 16 }
 0x4c2   : > { %3084 = vst [vmem:[#allocation1 + $0x7] ss:$9 sm:$0xff] %v14294_v9  ;;  %v2917_v9 = vshrl.u32 %v10403_v37, 16  ;;  %v2949_v37 = vshll.u32 %v10424_v12, 16 }
 0x4c9   : > { %v10541_v42 = vld [vmem:[#allocation1] sm:$0xff] }
 0x4ca   : > { %14295 = vst [vmem:[#allocation217_spill] sm:$0xff] %v10541_v42  ;;  %v14321_v42 = vld [vmem:[#allocation27_spill] sm:$0xff] }
 0x4cb   : > { %3086 = vst [vmem:[#allocation1] ss:$9 sm:$0xff] %v14296_v40  ;;  %v2924_v40 = vshrl.u32 %v10405_v38, 16 }
 0x4cc   : > { %3087 = vst [vmem:[#allocation1 + $0x1] ss:$9 sm:$0xff] %v14297_v51  ;;  %v2928_v51 = vshll.u32 %v10407_v27, 16 }
 0x4cd   : > { %3088 = vst [vmem:[#allocation1 + $0x2] ss:$9 sm:$0xff] %v14298_v39  ;;  %v2931_v39 = vshrl.u32 %v10407_v27, 16  ;;  %v2952_v27 = vshrl.u32 %v10424_v12, 16 }
 0x4ce   : > { %3089 = vst [vmem:[#allocation1 + $0x3] ss:$9 sm:$0xff] %v14299_v32  ;;  %v2935_v32 = vshll.u32 %v10413_v44, 16  ;;  %v10567_v38 = vsel %vm8782_vm5, %v2924_v40, %v2928_v51  ;;  %v14311_v51 = vrot.slane %v10431_v23, 3 }
 0x4cf   : > { %3090 = vst [vmem:[#allocation1 + $0x4] ss:$9 sm:$0xff] %v14300_v54  ;;  %v2938_v54 = vshrl.u32 %v10413_v44, 16 }
 0x4d0   : > { %3091 = vst [vmem:[#allocation1 + $0x5] ss:$9 sm:$0xff] %v14301_v53  ;;  %v2942_v53 = vshll.u32 %v10422_v31, 16  ;;  %v10575_v44 = vsel %vm8782_vm5, %v2931_v39, %v2935_v32  ;;  %v2914_v12 = vsel %vm582_vm2, %v10431_v23, %v14311_v51  ;;  %v10596_v32 = vsel %vm8782_vm5, %v2952_v27, %v2956_v49  ;;  %v8215_v27 = vld [vmem:[%s13385_s1 + $0xb0] sm:$0xff] }
 0x4d1   : > { %3092 = vst [vmem:[#allocation1 + $0x6] ss:$9 sm:$0xff] %v14302_v1  ;;  %v10561_v1 = vsel %vm8782_vm5, %v2917_v9, %v2921_v34  ;;  %v2959_v9 = vshrl.u32 %v10427_v4, 16  ;;  %v2963_v34 = vshll.u32 %v10439_v50, 16  ;;  %v2970_v49 = vshll.u32 %v10445_v28, 16  ;;  %v14325_v4 = vld [vmem:[#allocation29_spill] sm:$0xff] }
 0x4d2   : > { %3093 = vst [vmem:[#allocation1 + $0x7] ss:$9 sm:$0xff] %v14303_v45  ;;  %v2945_v45 = vshrl.u32 %v10422_v31, 16  ;;  %v14309_v31 = vld [vmem:[#allocation199_spill] sm:$0xff]  ;;  %v10582_v40 = vsel %vm8782_vm5, %v2938_v54, %v2942_v53  ;;  %v8216_v53 = vld [vmem:[%s13385_s1 + $0xb8] sm:$0xff] }
 0x4d3   : > { %14305 = vst [vmem:[#allocation218_spill] sm:$0xff] %v10561_v1  ;;  %v10604_v54 = vsel %vm8782_vm5, %v2959_v9, %v2963_v34  ;;  %8345 = vmatpush.bf16.msrb.mxu3 %v8216_v53  ;;  %2507 = vmatpush.bf16.msra.mxu2 %v8216_v53  ;;  %v2973_v9 = vshrl.u32 %v10445_v28, 16 }
 0x4d4   : > { %14306 = vst [vmem:[#allocation219_spill] sm:$0xff] %v10567_v38  ;;  %v10591_v39 = vsel %vm8782_vm5, %v2945_v45, %v2949_v37  ;;  %v2916_v45 = vrot.slane %v2914_v12, 1  ;;  %v2966_v37 = vshrl.u32 %v10439_v50, 16  ;;  %v8214_v12 = vld [vmem:[%s13385_s1 + $0xa8] sm:$0xff] }
 0x4d5   : > { %14308 = vst [vmem:[#allocation223_spill] sm:$0xff] %v10575_v44 }
 0x4d6   : > { %14310 = vst [vmem:[#allocation224_spill] sm:$0xff] %v10582_v40  ;;  %v2978_v34 = vshll.u32 %v2916_v45, 16  ;;  %v10621_v51 = vsel %vm8782_vm5, %v2966_v37, %v2970_v49  ;;  %v8213_v45 = vld [vmem:[%s13385_s1 + $0xa0] sm:$0xff]  ;;  %v8212_v37 = vld [vmem:[%s13385_s1 + $0x98] sm:$0xff]  ;;  %v8211_v49 = vld [vmem:[%s13385_s1 + $0x90] sm:$0xff] }
 0x4d7   : > { %14312 = vst [vmem:[#allocation14_spill] sm:$0xff] %v10591_v39  ;;  %8346 = vmatpush.bf16.msrb.mxu3 %v8215_v27  ;;  %2508 = vmatpush.bf16.msra.mxu2 %v8215_v27  ;;  %v14318_v27 = vld [vmem:[#allocation12_spill] sm:$0xff] }
 0x4d8   : > { %14313 = vst [vmem:[#allocation15_spill] sm:$0xff] %v10596_v32  ;;  %v10625_v53 = vsel %vm8782_vm5, %v2973_v9, %v2978_v34 }
 0x4d9   : > { %v10571_v59 = vld [vmem:[#allocation1] sm:$0xff]  ;;  %14314 = vst [vmem:[#allocation16_spill] sm:$0xff] %v10604_v54 }
 0x4da   : > { %14307 = vst [vmem:[#allocation220_spill] sm:$0xff] %v10571_v59 }
 0x4db   : > { %3095 = vst [vmem:[#allocation1] ss:$9 sm:$0xff] %v14309_v31  ;;  %8347 = vmatpush.bf16.msrb.mxu3 %v8214_v12  ;;  %2509 = vmatpush.bf16.msra.mxu2 %v8214_v12  ;;  %v14324_v31 = vld [vmem:[#allocation43_spill] sm:$0xff] }
 0x4dc   : > { %3097 = vst [vmem:[#allocation1 + $0x1] ss:$9 sm:$0xff] %v10561_v1 }
 0x4dd   : > { %3099 = vst [vmem:[#allocation1 + $0x2] ss:$9 sm:$0xff] %v10567_v38 }
 0x4de   : > { %3101 = vst [vmem:[#allocation1 + $0x3] ss:$9 sm:$0xff] %v10575_v44  ;;  %v14322_v44 = vld [vmem:[#allocation37_spill] sm:$0xff] }
 0x4df   : > { %3103 = vst [vmem:[#allocation1 + $0x4] ss:$9 sm:$0xff] %v10582_v40  ;;  %8348 = vmatpush.bf16.msrb.mxu3 %v8213_v45  ;;  %2510 = vmatpush.bf16.msra.mxu2 %v8213_v45  ;;  %v14320_v45 = vld [vmem:[#allocation11_spill] sm:$0xff] }
 0x4e0   : > { %3105 = vst [vmem:[#allocation1 + $0x5] ss:$9 sm:$0xff] %v10591_v39 }
 0x4e1   : > { %3107 = vst [vmem:[#allocation1 + $0x6] ss:$9 sm:$0xff] %v10596_v32 }
 0x4e2   : > { %3109 = vst [vmem:[#allocation1 + $0x7] ss:$9 sm:$0xff] %v10604_v54 }
 0x4e3   : > { %14315 = vst [vmem:[#allocation17_spill] sm:$0xff] %v10621_v51  ;;  %8349 = vmatpush.bf16.msrb.mxu3 %v8212_v37  ;;  %2511 = vmatpush.bf16.msra.mxu2 %v8212_v37  ;;  %v8210_v37 = vld [vmem:[%s13385_s1 + $0x88] sm:$0xff] }
 0x4e4   : > { %14316 = vst [vmem:[#allocation18_spill] sm:$0xff] %v10625_v53 }
 0x4e7   : > { %8350 = vmatpush.bf16.msrb.mxu3 %v8211_v49  ;;  %2512 = vmatpush.bf16.msra.mxu2 %v8211_v49 }
 0x4e9   : > { %v10627_v54 = vld [vmem:[#allocation1] sm:$0xff] }
 0x4ea   : > { %14317 = vst [vmem:[#allocation19_spill] sm:$0xff] %v10627_v54  ;;  %v14326_v54 = vld [vmem:[#allocation60_spill] sm:$0xff] }
 0x4eb   : > { %3112 = vst [vmem:[#allocation1] ss:$9 sm:$0xff] %v10621_v51  ;;  %8351 = vmatpush.bf16.msrb.mxu3 %v8210_v37  ;;  %2513 = vmatpush.bf16.msra.mxu2 %v8210_v37  ;;  %v8209_v51 = vld [vmem:[%s13385_s1 + $0x80] sm:$0xff]  ;;  %v14323_v37 = vld [vmem:[#allocation13_spill] sm:$0xff] }
 0x4ec   : > { %3114 = vst [vmem:[#allocation1 + $0x1] ss:$9 sm:$0xff] %v10625_v53 }
 0x4ed   : > { %3268 = vst [vmem:[#allocation1 + $0x20] sm:$0xff] %v14318_v27 }
 0x4ef   : > { %8352 = vmatpush.bf16.msrb.mxu3 %v8209_v51  ;;  %2514 = vmatpush.bf16.msra.mxu2 %v8209_v51 }
 0x4f2   : > { %2560 = vmatmul.bf16.vlgmr.msrb.gmra.mxu3 %v10273_v33  ;;  %2515 = vmatmul.bf16.vlgmr.msra.gmra.mxu2 %v10183_v29 }
 0x4f3   : > { %v10641_v9 = vld [vmem:[#allocation1] sm:$0xff] }
 0x4f4   : > { %14319 = vst [vmem:[#allocation20_spill] sm:$0xff] %v10641_v9  ;;  %v10643_v34 = vld [vmem:[#allocation1 + $0x20] ss:$4 sm:$0xff]  ;;  %v10645_v12 = vld [vmem:[#allocation1 + $0x21] ss:$4 sm:$0xff] }
 0x4f5   : > { %v10647_v53 = vld [vmem:[#allocation1 + $0x22] ss:$4 sm:$0xff]  ;;  %v10649_v27 = vld [vmem:[#allocation1 + $0x23] ss:$4 sm:$0xff]  ;;  %3267 = vst [vmem:[#allocation1] sm:$0xff] %v14320_v45 }
 0x4f6   : > { %3286 = vst [vmem:[#allocation1 + $0x20] sm:$0xff] %v14321_v42 }
 0x4fc   : > { %v10659_v32 = vld [vmem:[#allocation1 + $0x1] ss:$4 sm:$0xff]  ;;  %v10661_v39 = vld [vmem:[#allocation1 + $0x2] ss:$4 sm:$0xff]  ;;  %v10663_v40 = vld [vmem:[#allocation1 + $0x3] ss:$4 sm:$0xff] }
 0x4fd   : > { %v10665_v49 = vld [vmem:[#allocation1 + $0x21] ss:$4 sm:$0xff]  ;;  %v10667_v45 = vld [vmem:[#allocation1 + $0x22] ss:$4 sm:$0xff]  ;;  %v10669_v42 = vld [vmem:[#allocation1 + $0x23] ss:$4 sm:$0xff] }
 0x4fe   : > { %3291 = vst [vmem:[#allocation1 + $0x20] sm:$0xff] %v14322_v44 }
 0x4ff   : > { %3283 = vst [vmem:[#allocation1] sm:$0xff] %v14323_v37 }
 0x502   : > { %2565 = vmatmul.bf16.gmra.mxu3 %v10283_v58  ;;  %2520 = vmatmul.bf16.gmra.mxu2 %v10193_v48  ;;  %v8222_v48 = vld [vmem:[%s13385_s1 + $0xe8] sm:$0xff]  ;;  %v8232_v58 = vld [vmem:[%s13385_s1 + $0x138] sm:$0xff] }
 0x503   : > { %3176 = vmatpush.bf16.msrb.mxu0 %v8232_v58  ;;  %v8230_v58 = vld [vmem:[%s13385_s1 + $0x128] sm:$0xff] }
 0x505   : > { %v10675_v38 = vld [vmem:[#allocation1 + $0x20] ss:$4 sm:$0xff]  ;;  %v10677_v1 = vld [vmem:[#allocation1 + $0x21] ss:$4 sm:$0xff] }
 0x506   : > { %3299 = vst [vmem:[#allocation1 + $0x20] sm:$0xff] %v14324_v31  ;;  %v10680_v28 = vld [vmem:[#allocation1] ss:$4 sm:$0xff]  ;;  %v10682_v50 = vld [vmem:[#allocation1 + $0x1] ss:$4 sm:$0xff] }
 0x507   : > { %3290 = vst [vmem:[#allocation1] sm:$0xff] %v14325_v4  ;;  %v8224_v31 = vld [vmem:[%s13385_s1 + $0xf8] sm:$0xff]  ;;  %3177 = vmatpush.bf16.msrb.mxu0 %v8231_v7  ;;  %v14332_v7 = vld [vmem:[#allocation67_spill] sm:$0xff] }
 0x508   : > { %2823 = vmatpush.bf16.msra.mxu3 %v8224_v31 }
 0x50b   : > { %3178 = vmatpush.bf16.msrb.mxu0 %v8230_v58  ;;  %v8218_v58 = vld [vmem:[%s13385_s1 + $0xc8] sm:$0xff] }
 0x50c   : > { %2824 = vmatpush.bf16.msra.mxu3 %v8223_v47 }
 0x50d   : > { %v10685_v51 = vld [vmem:[#allocation1 + $0x20] ss:$4 sm:$0xff]  ;;  %v10687_v44 = vld [vmem:[#allocation1 + $0x21] ss:$4 sm:$0xff]  ;;  %v10689_v37 = vld [vmem:[#allocation1 + $0x22] ss:$4 sm:$0xff] }
 0x50e   : > { %v10691_v33 = vld [vmem:[#allocation1 + $0x23] ss:$4 sm:$0xff]  ;;  %v10693_v29 = vld [vmem:[#allocation1] ss:$4 sm:$0xff]  ;;  %v10695_v9 = vld [vmem:[#allocation1 + $0x1] ss:$4 sm:$0xff] }
 0x50f   : > { %3310 = vst [vmem:[#allocation1 + $0x20] sm:$0xff] %v14326_v54  ;;  %v10701_v59 = vld [vmem:[#allocation1 + $0x2] ss:$4 sm:$0xff]  ;;  %v10703_v4 = vld [vmem:[#allocation1 + $0x3] ss:$4 sm:$0xff] }
 0x510   : > { %3298 = vst [vmem:[#allocation1] sm:$0xff] %v14327_v41  ;;  %2825 = vmatpush.bf16.msra.mxu3 %v8222_v48  ;;  %v8220_v48 = vld [vmem:[%s13385_s1 + $0xd8] sm:$0xff] }
 0x512   : > { %2570 = vmatmul.bf16.gmra.mxu3 %v10287_v21  ;;  %2525 = vmatmul.bf16.gmra.mxu2 %v10203_v43  ;;  %v8229_v21 = vld [vmem:[%s13385_s1 + $0x120] sm:$0xff] }
 0x513   : > { %3179 = vmatpush.bf16.msrb.mxu0 %v8229_v21 }
 0x516   : > { %v10711_v54 = vld [vmem:[#allocation1 + $0x21] ss:$4 sm:$0xff]  ;;  %v10713_v6 = vld [vmem:[#allocation1 + $0x22] ss:$4 sm:$0xff]  ;;  %v10715_v3 = vld [vmem:[#allocation1 + $0x23] ss:$4 sm:$0xff] }
 0x517   : > { %3315 = vst [vmem:[#allocation1 + $0x20] sm:$0xff] %v14328_v11  ;;  %v10724_v31 = vld [vmem:[#allocation1 + $0x1] ss:$4 sm:$0xff]  ;;  %v10726_v41 = vld [vmem:[#allocation1 + $0x2] ss:$4 sm:$0xff] }
 0x518   : > { %v10728_v47 = vld [vmem:[#allocation1 + $0x3] ss:$4 sm:$0xff] }
 0x519   : > { %3307 = vst [vmem:[#allocation1] sm:$0xff] %v14329_v5  ;;  %v8221_v11 = vld [vmem:[%s13385_s1 + $0xe0] sm:$0xff] }
 0x51a   : > { %2826 = vmatpush.bf16.msra.mxu3 %v8221_v11 }
 0x51e   : > { %v10737_v52 = vld [vmem:[#allocation1 + $0x20] ss:$4 sm:$0xff]  ;;  %v10739_v35 = vld [vmem:[#allocation1 + $0x21] ss:$4 sm:$0xff]  ;;  %2827 = vmatpush.bf16.msra.mxu3 %v8220_v48 }
 0x51f   : > { %14330 = vst [vmem:[#allocation21_spill] sm:$0xff] %v10739_v35 }
 0x520   : > { %3323 = vst [vmem:[#allocation1 + $0x20] sm:$0xff] %v14331_v25  ;;  %v10749_v5 = vld [vmem:[#allocation1] ss:$4 sm:$0xff]  ;;  %v10751_v11 = vld [vmem:[#allocation1 + $0x1] ss:$4 sm:$0xff]  ;;  %v10755_v25 = vpop.f32.mrf.mxu0 }
 0x521   : > { %3314 = vst [vmem:[#allocation1] sm:$0xff] %v14332_v7  ;;  %v8228_v7 = vld [vmem:[%s13385_s1 + $0x118] sm:$0xff] }
 0x522   : > { %14333 = vst [vmem:[#allocation31_spill] sm:$0xff] %v10755_v25  ;;  %2828 = vmatpush.bf16.msra.mxu3 %v8219_v24  ;;  %v14338_v25 = vld [vmem:[#allocation91_spill] sm:$0xff]  ;;  %3180 = vmatpush.bf16.msrb.mxu0 %v8228_v7 }
 0x523   : > { %2530 = vmatmul.bf16.gmra.mxu2 %v10213_v36 }
 0x526   : > { %2829 = vmatpush.bf16.msra.mxu3 %v8218_v58 }
 0x527   : > { %v10763_v15 = vld [vmem:[#allocation1 + $0x20] ss:$4 sm:$0xff]  ;;  %v10765_v63 = vld [vmem:[#allocation1 + $0x21] ss:$4 sm:$0xff]  ;;  %v10767_v43 = vld [vmem:[#allocation1 + $0x22] ss:$4 sm:$0xff] }
 0x528   : > { %14334 = vst [vmem:[#allocation22_spill] sm:$0xff] %v10763_v15  ;;  %v10769_v48 = vld [vmem:[#allocation1 + $0x23] ss:$4 sm:$0xff]  ;;  %v10778_v24 = vld [vmem:[#allocation1] ss:$4 sm:$0xff] }
 0x529   : > { %14335 = vst [vmem:[#allocation23_spill] sm:$0xff] %v10765_v63  ;;  %v10780_v21 = vld [vmem:[#allocation1 + $0x1] ss:$4 sm:$0xff]  ;;  %v10782_v61 = vld [vmem:[#allocation1 + $0x2] ss:$4 sm:$0xff] }
 0x52a   : > { %14336 = vst [vmem:[#allocation24_spill] sm:$0xff] %v10767_v43  ;;  %v10784_v13 = vld [vmem:[#allocation1 + $0x3] ss:$4 sm:$0xff]  ;;  %v10793_v43 = vpop.f32.mrf.mxu0 }
 0x52b   : > { %14337 = vst [vmem:[#allocation25_spill] sm:$0xff] %v10769_v48  ;;  %v8217_v48 = vld [vmem:[%s13385_s1 + $0xc0] sm:$0xff]  ;;  %v14344_v15 = vld [vmem:[#allocation116_spill] sm:$0xff] }
 0x52c   : > { %3334 = vst [vmem:[#allocation1 + $0x20] sm:$0xff] %v14338_v25  ;;  %v8227_v25 = vld [vmem:[%s13385_s1 + $0x110] sm:$0xff]  ;;  %2830 = vmatpush.bf16.msra.mxu3 %v8217_v48 }
 0x52d   : > { %3322 = vst [vmem:[#allocation1] sm:$0xff] %v14339_v57  ;;  %3181 = vmatpush.bf16.msrb.mxu0 %v8227_v25  ;;  %v8226_v57 = vld [vmem:[%s13385_s1 + $0x108] sm:$0xff] }
 0x52e   : > { %14340 = vst [vmem:[#allocation26_spill] sm:$0xff] %v10793_v43  ;;  %v14347_v43 = vld [vmem:[#allocation88_spill] sm:$0xff] }
 0x52f   : > { %2831 = vmatmul.bf16.vlgmr.msra.gmra.mxu3 %v10297_v22  ;;  %v8240_v22 = vld [vmem:[%s13385_s1 + $0x178] sm:$0xff] }
 0x530   : > { %3580 = vmatpush.bf16.msrb.mxu1 %v8240_v22 }
 0x531   : > { %3182 = vmatpush.bf16.msrb.mxu0 %v8226_v57 }
 0x533   : > { %v10795_v58 = vld [vmem:[#allocation1 + $0x21] ss:$4 sm:$0xff]  ;;  %v10797_v7 = vld [vmem:[#allocation1 + $0x22] ss:$4 sm:$0xff]  ;;  %v10799_v63 = vld [vmem:[#allocation1 + $0x23] ss:$4 sm:$0xff]  ;;  %2535 = vmatmul.bf16.gmra.mxu2 %v10223_v2 }
 0x534   : > { %14341 = vst [vmem:[#allocation28_spill] sm:$0xff] %v10795_v58  ;;  %v10807_v35 = vld [vmem:[#allocation1 + $0x1] ss:$4 sm:$0xff]  ;;  %v10809_v48 = vld [vmem:[#allocation1 + $0x2] ss:$4 sm:$0xff] }
 0x535   : > { %14342 = vst [vmem:[#allocation30_spill] sm:$0xff] %v10797_v7  ;;  %v10811_v25 = vld [vmem:[#allocation1 + $0x3] ss:$4 sm:$0xff]  ;;  %v10824_v7 = vpop.f32.mrf.mxu0 }
 0x536   : > { %14343 = vst [vmem:[#allocation41_spill] sm:$0xff] %v10799_v63  ;;  %v14351_v58 = vld [vmem:[#allocation131_spill] sm:$0xff]  ;;  %v14366_v2 = vld [vmem:[#allocation158_spill] sm:$0xff] }
 0x537   : > { %3339 = vst [vmem:[#allocation1 + $0x20] sm:$0xff] %v14344_v15  ;;  %v8225_v15 = vld [vmem:[%s13385_s1 + $0x100] sm:$0xff] }
 0x538   : > { %14345 = vst [vmem:[#allocation42_spill] sm:$0xff] %v10809_v48  ;;  %3183 = vmatpush.bf16.msrb.mxu0 %v8225_v15 }
 0x539   : > { %14346 = vst [vmem:[#allocation12_spill] sm:$0xff] %v10811_v25  ;;  %v14352_v25 = vld [vmem:[#allocation111_spill] sm:$0xff] }
 0x53a   : > { %3331 = vst [vmem:[#allocation1] sm:$0xff] %v14347_v43 }
 0x53b   : > { %14350 = vst [vmem:[#allocation225_spill] sm:$0xff] %v10824_v7  ;;  %3184 = vmatmul.bf16.vlgmr.msrb.gmra.mxu0 %v10461_v14 }
 0x53d   : > { %v10844_v14 = vpop.f32.mrf.mxu0 }
 0x53e   : > { %v10820_v36 = vld [vmem:[#allocation1 + $0x20] ss:$4 sm:$0xff]  ;;  %v10822_v63 = vld [vmem:[#allocation1 + $0x21] ss:$4 sm:$0xff]  ;;  %14358 = vst [vmem:[#allocation230_spill] sm:$0xff] %v10844_v14 }
 0x53f   : > { %14348 = vst [vmem:[#allocation11_spill] sm:$0xff] %v10820_v36  ;;  %2836 = vmatmul.bf16.gmra.mxu3 %v10307_v20 }
 0x540   : > { %14349 = vst [vmem:[#allocation13_spill] sm:$0xff] %v10822_v63 }
 0x541   : > { %3347 = vst [vmem:[#allocation1 + $0x20] sm:$0xff] %v14351_v58  ;;  %v10828_v57 = vld [vmem:[#allocation1] ss:$4 sm:$0xff]  ;;  %v10830_v43 = vld [vmem:[#allocation1 + $0x1] ss:$4 sm:$0xff] }
 0x542   : > { %3338 = vst [vmem:[#allocation1] sm:$0xff] %v14352_v25  ;;  %v14357_v58 = vld [vmem:[#allocation145_spill] sm:$0xff] }
 0x543   : > { %2540 = vmatmul.bf16.gmra.mxu2 %v10233_v60 }
 0x548   : > { %v10833_v48 = vld [vmem:[#allocation1 + $0x20] ss:$4 sm:$0xff]  ;;  %v10835_v22 = vld [vmem:[#allocation1 + $0x21] ss:$4 sm:$0xff]  ;;  %v10837_v15 = vld [vmem:[#allocation1 + $0x22] ss:$4 sm:$0xff] }
 0x549   : > { %14353 = vst [vmem:[#allocation226_spill] sm:$0xff] %v10833_v48  ;;  %v10839_v36 = vld [vmem:[#allocation1 + $0x23] ss:$4 sm:$0xff]  ;;  %v10846_v7 = vld [vmem:[#allocation1] ss:$4 sm:$0xff] }
 0x54a   : > { %14354 = vst [vmem:[#allocation227_spill] sm:$0xff] %v10835_v22  ;;  %v10848_v63 = vld [vmem:[#allocation1 + $0x1] ss:$4 sm:$0xff]  ;;  %v10850_v25 = vld [vmem:[#allocation1 + $0x2] ss:$4 sm:$0xff] }
 0x54b   : > { %14355 = vst [vmem:[#allocation228_spill] sm:$0xff] %v10837_v15  ;;  %v10852_v48 = vld [vmem:[#allocation1 + $0x3] ss:$4 sm:$0xff]  ;;  %3189 = vmatmul.bf16.gmra.mxu0 %v10471_v30 }
 0x54c   : > { %14356 = vst [vmem:[#allocation229_spill] sm:$0xff] %v10839_v36  ;;  %v14362_v22 = vld [vmem:[#allocation119_spill] sm:$0xff] }
 0x54d   : > { %3358 = vst [vmem:[#allocation1 + $0x20] sm:$0xff] %v14357_v58 }
 0x54e   : > { %14359 = vst [vmem:[#allocation231_spill] sm:$0xff] %v10848_v63 }
 0x54f   : > { %14360 = vst [vmem:[#allocation232_spill] sm:$0xff] %v10850_v25  ;;  %v10869_v25 = vpop.f32.mrf.mxu0  ;;  %2841 = vmatmul.bf16.gmra.mxu3 %v10317_v46 }
 0x550   : > { %14361 = vst [vmem:[#allocation233_spill] sm:$0xff] %v10852_v48  ;;  %v14368_v48 = vld [vmem:[#allocation136_spill] sm:$0xff] }
 0x551   : > { %3346 = vst [vmem:[#allocation1] sm:$0xff] %v14362_v22 }
 0x552   : > { %14367 = vst [vmem:[#allocation237_spill] sm:$0xff] %v10869_v25 }
 0x553   : > { %2545 = vmatmul.bf16.gmra.mxu2 %v10243_v17 }
 0x554   : > { %v10855_v15 = vld [vmem:[#allocation1 + $0x21] ss:$4 sm:$0xff]  ;;  %v10857_v36 = vld [vmem:[#allocation1 + $0x22] ss:$4 sm:$0xff]  ;;  %v10859_v20 = vld [vmem:[#allocation1 + $0x23] ss:$4 sm:$0xff] }
 0x555   : > { %14363 = vst [vmem:[#allocation234_spill] sm:$0xff] %v10855_v15 }
 0x556   : > { %14364 = vst [vmem:[#allocation235_spill] sm:$0xff] %v10857_v36 }
 0x557   : > { %14365 = vst [vmem:[#allocation236_spill] sm:$0xff] %v10859_v20  ;;  %v14371_v20 = vld [vmem:[#allocation150_spill] sm:$0xff]  ;;  %v10884_v36 = vpop.f32.mrf.mxu0 }
 0x558   : > { %3363 = vst [vmem:[#allocation1 + $0x20] sm:$0xff] %v14366_v2  ;;  %v10863_v14 = vld [vmem:[#allocation1 + $0x1] ss:$4 sm:$0xff]  ;;  %v10865_v58 = vld [vmem:[#allocation1 + $0x2] ss:$4 sm:$0xff] }
 0x559   : > { %v10867_v63 = vld [vmem:[#allocation1 + $0x3] ss:$4 sm:$0xff]  ;;  %14372 = vst [vmem:[#allocation240_spill] sm:$0xff] %v10884_v36 }
 0x55a   : > { %3355 = vst [vmem:[#allocation1] sm:$0xff] %v14368_v48  ;;  %v14378_v36 = vld [vmem:[#allocation167_spill] sm:$0xff] }
 0x55b   : > { %3194 = vmatmul.bf16.gmra.mxu0 %v10481_v16 }
 0x55f   : > { %v10872_v22 = vld [vmem:[#allocation1 + $0x20] ss:$4 sm:$0xff]  ;;  %v10874_v15 = vld [vmem:[#allocation1 + $0x21] ss:$4 sm:$0xff]  ;;  %2846 = vmatmul.bf16.gmra.mxu3 %v10327_v10 }
 0x560   : > { %14369 = vst [vmem:[#allocation238_spill] sm:$0xff] %v10872_v22 }
 0x561   : > { %14370 = vst [vmem:[#allocation239_spill] sm:$0xff] %v10874_v15  ;;  %v10879_v30 = vld [vmem:[#allocation1] ss:$4 sm:$0xff]  ;;  %v10881_v2 = vld [vmem:[#allocation1 + $0x1] ss:$4 sm:$0xff] }
 0x562   : > { %3371 = vst [vmem:[#allocation1 + $0x20] sm:$0xff] %v14091_v19 }
 0x563   : > { %3362 = vst [vmem:[#allocation1] sm:$0xff] %v14371_v20  ;;  %2550 = vmatmul.bf16.gmra.mxu2 %v10253_v0 }
 0x569   : > { %v10886_v25 = vld [vmem:[#allocation1 + $0x20] ss:$4 sm:$0xff]  ;;  %v10888_v48 = vld [vmem:[#allocation1 + $0x21] ss:$4 sm:$0xff]  ;;  %v10890_v22 = vld [vmem:[#allocation1 + $0x22] ss:$4 sm:$0xff] }
 0x56a   : > { %14373 = vst [vmem:[#allocation241_spill] sm:$0xff] %v10886_v25  ;;  %v10892_v15 = vld [vmem:[#allocation1 + $0x23] ss:$4 sm:$0xff]  ;;  %v10896_v60 = vld [vmem:[#allocation1] ss:$4 sm:$0xff]  ;;  %v10905_v25 = vpop.f32.mrf.mxu0 }
 0x56b   : > { %14374 = vst [vmem:[#allocation242_spill] sm:$0xff] %v10888_v48  ;;  %v10898_v46 = vld [vmem:[#allocation1 + $0x1] ss:$4 sm:$0xff]  ;;  %v10900_v19 = vld [vmem:[#allocation1 + $0x2] ss:$4 sm:$0xff] }
 0x56c   : > { %14375 = vst [vmem:[#allocation243_spill] sm:$0xff] %v10890_v22  ;;  %v10902_v20 = vld [vmem:[#allocation1 + $0x3] ss:$4 sm:$0xff] }
 0x56d   : > { %14376 = vst [vmem:[#allocation244_spill] sm:$0xff] %v10892_v15 }
 0x56e   : > { %3382 = vst [vmem:[#allocation1 + $0x20] sm:$0xff] %v10382_v55 }
 0x56f   : > { %14377 = vst [vmem:[#allocation245_spill] sm:$0xff] %v10902_v20  ;;  %2851 = vmatmul.bf16.gmra.mxu3 %v10337_v18 }
 0x570   : > { %3370 = vst [vmem:[#allocation1] sm:$0xff] %v14378_v36  ;;  %v14382_v36 = vld [vmem:[#allocation184_spill] sm:$0xff] }
 0x571   : > { %14379 = vst [vmem:[#allocation246_spill] sm:$0xff] %v10905_v25 }
 0x572   : > { %v10923_v25 = vpop.f32.mrf.mxu0  ;;  %3199 = vmatmul.bf16.gmra.mxu0 %v10491_v26 }
 0x573   : > { %14383 = vst [vmem:[#allocation249_spill] sm:$0xff] %v10923_v25  ;;  %2555 = vmatmul.bf16.gmra.mxu2 %v10263_v8 }
 0x575   : > { %v10909_v15 = vld [vmem:[#allocation1 + $0x21] ss:$4 sm:$0xff]  ;;  %v10911_v16 = vld [vmem:[#allocation1 + $0x22] ss:$4 sm:$0xff]  ;;  %v10913_v55 = vld [vmem:[#allocation1 + $0x23] ss:$4 sm:$0xff] }
 0x576   : > { %14380 = vst [vmem:[#allocation247_spill] sm:$0xff] %v10911_v16 }
 0x577   : > { %14381 = vst [vmem:[#allocation248_spill] sm:$0xff] %v10913_v55  ;;  %v10916_v22 = vld [vmem:[#allocation1 + $0x1] ss:$4 sm:$0xff]  ;;  %v10918_v48 = vld [vmem:[#allocation1 + $0x2] ss:$4 sm:$0xff] }
 0x578   : > { %3387 = vst [vmem:[#allocation1 + $0x20] sm:$0xff] %v10431_v23  ;;  %v10920_v20 = vld [vmem:[#allocation1 + $0x3] ss:$4 sm:$0xff] }
 0x579   : > { %3379 = vst [vmem:[#allocation1] sm:$0xff] %v14382_v36 }
 0x57f   : > { %v10933_v23 = vld [vmem:[#allocation1 + $0x20] ss:$4 sm:$0xff]  ;;  %v10935_v55 = vld [vmem:[#allocation1 + $0x21] ss:$4 sm:$0xff]  ;;  %2856 = vmatmul.bf16.gmra.mxu3 %v10347_v56 }
 0x580   : > { %v10926_v17 = vld [vmem:[#allocation1] ss:$4 sm:$0xff]  ;;  %v10928_v10 = vld [vmem:[#allocation1 + $0x1] ss:$4 sm:$0xff] }
 0x581   : > { %3386 = vst [vmem:[#allocation1] sm:$0xff] %v10389_v62  ;;  %v14393_v56 = vld [vmem:[#allocation41_spill] sm:$0xff]  ;;  %v14552_v62 = vld [vmem:[#allocation47_spill] sm:$0xff] }
 0x588   : > { %v10937_v16 = vld [vmem:[#allocation1] ss:$4 sm:$0xff]  ;;  %v10939_v36 = vld [vmem:[#allocation1 + $0x1] ss:$4 sm:$0xff]  ;;  %v10941_v25 = vld [vmem:[#allocation1 + $0x2] ss:$4 sm:$0xff] }
 0x589   : > { %v10943_v26 = vld [vmem:[#allocation1 + $0x3] ss:$4 sm:$0xff] }
 0x58a   : > { %3411 = vst [vmem:[#allocation1] ss:$9 sm:$0xff] %v10659_v32  ;;  %v14399_v32 = vld [vmem:[#allocation226_spill] sm:$0xff] }
 0x58b   : > { %3413 = vst [vmem:[#allocation1 + $0x1] ss:$9 sm:$0xff] %v10661_v39 }
 0x58c   : > { %3415 = vst [vmem:[#allocation1 + $0x2] ss:$9 sm:$0xff] %v10663_v40  ;;  %v14398_v40 = vld [vmem:[#allocation13_spill] sm:$0xff] }
 0x58d   : > { %3417 = vst [vmem:[#allocation1 + $0x3] ss:$9 sm:$0xff] %v10643_v34  ;;  %v14403_v34 = vld [vmem:[#allocation234_spill] sm:$0xff] }
 0x58e   : > { %3419 = vst [vmem:[#allocation1 + $0x4] ss:$9 sm:$0xff] %v10645_v12 }
 0x58f   : > { %3421 = vst [vmem:[#allocation1 + $0x5] ss:$9 sm:$0xff] %v10647_v53  ;;  %v14401_v53 = vld [vmem:[#allocation228_spill] sm:$0xff] }
 0x590   : > { %3423 = vst [vmem:[#allocation1 + $0x6] ss:$9 sm:$0xff] %v10649_v27  ;;  %v14404_v27 = vld [vmem:[#allocation235_spill] sm:$0xff] }
 0x591   : > { %3425 = vst [vmem:[#allocation1 + $0x7] ss:$9 sm:$0xff] %v10680_v28  ;;  %v14395_v28 = vld [vmem:[#allocation232_spill] sm:$0xff] }
 0x598   : > { %v10955_v0 = vld [vmem:[#allocation1] sm:$0xff] }
 0x599   : > { %3427 = vst [vmem:[#allocation1] ss:$9 sm:$0xff] %v10682_v50 }
 0x59a   : > { %3428 = vst [vmem:[#allocation1 + $0x1] ss:$9 sm:$0xff] %v10665_v49  ;;  %v14405_v49 = vld [vmem:[#allocation236_spill] sm:$0xff] }
 0x59b   : > { %3429 = vst [vmem:[#allocation1 + $0x2] ss:$9 sm:$0xff] %v10667_v45  ;;  %v14407_v45 = vld [vmem:[#allocation238_spill] sm:$0xff] }
 0x59c   : > { %3430 = vst [vmem:[#allocation1 + $0x3] ss:$9 sm:$0xff] %v10669_v42  ;;  %v14397_v42 = vld [vmem:[#allocation11_spill] sm:$0xff] }
 0x59d   : > { %3431 = vst [vmem:[#allocation1 + $0x4] ss:$9 sm:$0xff] %v10693_v29  ;;  %v14410_v29 = vld [vmem:[#allocation242_spill] sm:$0xff] }
 0x59e   : > { %3432 = vst [vmem:[#allocation1 + $0x5] ss:$9 sm:$0xff] %v10695_v9  ;;  %v14402_v9 = vld [vmem:[#allocation229_spill] sm:$0xff] }
 0x59f   : > { %3433 = vst [vmem:[#allocation1 + $0x6] ss:$9 sm:$0xff] %v10701_v59  ;;  %v14385_v59 = vld [vmem:[#allocation42_spill] sm:$0xff] }
 0x5a0   : > { %3434 = vst [vmem:[#allocation1 + $0x7] ss:$9 sm:$0xff] %v10703_v4  ;;  %v14388_v4 = vld [vmem:[#allocation23_spill] sm:$0xff] }
 0x5a7   : > { %v10965_v18 = vld [vmem:[#allocation1] sm:$0xff] }
 0x5a8   : > { %3436 = vst [vmem:[#allocation1] ss:$9 sm:$0xff] %v10675_v38  ;;  %v14394_v38 = vld [vmem:[#allocation231_spill] sm:$0xff] }
 0x5a9   : > { %3437 = vst [vmem:[#allocation1 + $0x1] ss:$9 sm:$0xff] %v10677_v1 }
 0x5aa   : > { %3438 = vst [vmem:[#allocation1 + $0x2] ss:$9 sm:$0xff] %v10724_v31  ;;  %v14411_v31 = vld [vmem:[#allocation243_spill] sm:$0xff] }
 0x5ab   : > { %3439 = vst [vmem:[#allocation1 + $0x3] ss:$9 sm:$0xff] %v10726_v41 }
 0x5ac   : > { %3440 = vst [vmem:[#allocation1 + $0x4] ss:$9 sm:$0xff] %v10728_v47 }
 0x5ad   : > { %3441 = vst [vmem:[#allocation1 + $0x5] ss:$9 sm:$0xff] %v10685_v51  ;;  %v14408_v51 = vld [vmem:[#allocation239_spill] sm:$0xff] }
 0x5ae   : > { %3442 = vst [vmem:[#allocation1 + $0x6] ss:$9 sm:$0xff] %v10687_v44  ;;  %v14389_v44 = vld [vmem:[#allocation24_spill] sm:$0xff] }
 0x5af   : > { %3443 = vst [vmem:[#allocation1 + $0x7] ss:$9 sm:$0xff] %v10689_v37 }
 0x5b6   : > { %v10975_v8 = vld [vmem:[#allocation1] sm:$0xff] }
 0x5b7   : > { %3445 = vst [vmem:[#allocation1] ss:$9 sm:$0xff] %v10691_v33  ;;  %v14409_v33 = vld [vmem:[#allocation241_spill] sm:$0xff] }
 0x5b8   : > { %3446 = vst [vmem:[#allocation1 + $0x1] ss:$9 sm:$0xff] %v10749_v5  ;;  %v14384_v5 = vld [vmem:[#allocation21_spill] sm:$0xff] }
 0x5b9   : > { %3447 = vst [vmem:[#allocation1 + $0x2] ss:$9 sm:$0xff] %v10751_v11  ;;  %v14413_v11 = vld [vmem:[#allocation247_spill] sm:$0xff] }
 0x5ba   : > { %3448 = vst [vmem:[#allocation1 + $0x3] ss:$9 sm:$0xff] %v10711_v54  ;;  %v14400_v54 = vld [vmem:[#allocation227_spill] sm:$0xff] }
 0x5bb   : > { %3449 = vst [vmem:[#allocation1 + $0x4] ss:$9 sm:$0xff] %v10713_v6  ;;  %v14386_v6 = vld [vmem:[#allocation12_spill] sm:$0xff] }
 0x5bc   : > { %3450 = vst [vmem:[#allocation1 + $0x5] ss:$9 sm:$0xff] %v10715_v3  ;;  %v14387_v3 = vld [vmem:[#allocation22_spill] sm:$0xff] }
 0x5bd   : > { %3451 = vst [vmem:[#allocation1 + $0x6] ss:$9 sm:$0xff] %v10778_v24 }
 0x5be   : > { %3452 = vst [vmem:[#allocation1 + $0x7] ss:$9 sm:$0xff] %v10780_v21 }
 0x5c5   : > { %v10985_v41 = vld [vmem:[#allocation1] sm:$0xff] }
 0x5c6   : > { %3454 = vst [vmem:[#allocation1] ss:$9 sm:$0xff] %v10782_v61  ;;  %v14390_v61 = vld [vmem:[#allocation25_spill] sm:$0xff] }
 0x5c7   : > { %3455 = vst [vmem:[#allocation1 + $0x1] ss:$9 sm:$0xff] %v10784_v13  ;;  %v14391_v13 = vld [vmem:[#allocation28_spill] sm:$0xff] }
 0x5c8   : > { %3456 = vst [vmem:[#allocation1 + $0x2] ss:$9 sm:$0xff] %v10737_v52  ;;  %v14396_v52 = vld [vmem:[#allocation233_spill] sm:$0xff] }
 0x5c9   : > { %3457 = vst [vmem:[#allocation1 + $0x3] ss:$9 sm:$0xff] %v14384_v5  ;;  %v14429_v5 = vld [vmem:[#allocation55_spill] sm:$0xff] }
 0x5ca   : > { %3458 = vst [vmem:[#allocation1 + $0x4] ss:$9 sm:$0xff] %v10807_v35  ;;  %v14392_v35 = vld [vmem:[#allocation30_spill] sm:$0xff] }
 0x5cb   : > { %3459 = vst [vmem:[#allocation1 + $0x5] ss:$9 sm:$0xff] %v14385_v59  ;;  %v8236_v59 = vld [vmem:[%s13385_s1 + $0x158] sm:$0xff] }
 0x5cc   : > { %3460 = vst [vmem:[#allocation1 + $0x6] ss:$9 sm:$0xff] %v14386_v6  ;;  %v14430_v6 = vld [vmem:[#allocation56_spill] sm:$0xff] }
 0x5cd   : > { %3461 = vst [vmem:[#allocation1 + $0x7] ss:$9 sm:$0xff] %v14387_v3  ;;  %v14431_v3 = vld [vmem:[#allocation57_spill] sm:$0xff] }
 0x5d4   : > { %v10995_v1 = vld [vmem:[#allocation1] sm:$0xff] }
 0x5d5   : > { %3463 = vst [vmem:[#allocation1] ss:$9 sm:$0xff] %v14388_v4 }
 0x5d6   : > { %3464 = vst [vmem:[#allocation1 + $0x1] ss:$9 sm:$0xff] %v14389_v44  ;;  %v14432_v44 = vld [vmem:[#allocation69_spill] sm:$0xff] }
 0x5d7   : > { %3465 = vst [vmem:[#allocation1 + $0x2] ss:$9 sm:$0xff] %v14390_v61  ;;  %v8235_v61 = vld [vmem:[%s13385_s1 + $0x150] sm:$0xff] }
 0x5d8   : > { %3466 = vst [vmem:[#allocation1 + $0x3] ss:$9 sm:$0xff] %v10828_v57  ;;  %v11064_v57 = vpop.f32.mrf.mxu0 }
 0x5d9   : > { %3467 = vst [vmem:[#allocation1 + $0x4] ss:$9 sm:$0xff] %v10830_v43  ;;  %v14414_v43 = vld [vmem:[#allocation248_spill] sm:$0xff] }
 0x5da   : > { %3468 = vst [vmem:[#allocation1 + $0x5] ss:$9 sm:$0xff] %v14391_v13 }
 0x5db   : > { %3469 = vst [vmem:[#allocation1 + $0x6] ss:$9 sm:$0xff] %v14392_v35  ;;  %v8234_v35 = vld [vmem:[%s13385_s1 + $0x148] sm:$0xff] }
 0x5dc   : > { %3470 = vst [vmem:[#allocation1 + $0x7] ss:$9 sm:$0xff] %v14393_v56 }
 0x5e3   : > { %v11005_v50 = vld [vmem:[#allocation1] sm:$0xff] }
 0x5e4   : > { %3472 = vst [vmem:[#allocation1] ss:$9 sm:$0xff] %v10846_v7  ;;  %v14416_v7 = vld [vmem:[#allocation33_spill] sm:$0xff] }
 0x5e5   : > { %3473 = vst [vmem:[#allocation1 + $0x1] ss:$9 sm:$0xff] %v14394_v38 }
 0x5e6   : > { %3474 = vst [vmem:[#allocation1 + $0x2] ss:$9 sm:$0xff] %v14395_v28  ;;  %v14435_v28 = vld [vmem:[#allocation212_spill] sm:$0xff] }
 0x5e7   : > { %3475 = vst [vmem:[#allocation1 + $0x3] ss:$9 sm:$0xff] %v14396_v52  ;;  %v14436_v52 = vld [vmem:[#allocation70_spill] sm:$0xff] }
 0x5e8   : > { %3476 = vst [vmem:[#allocation1 + $0x4] ss:$9 sm:$0xff] %v14397_v42  ;;  %v14437_v42 = vld [vmem:[#allocation71_spill] sm:$0xff] }
 0x5e9   : > { %3477 = vst [vmem:[#allocation1 + $0x5] ss:$9 sm:$0xff] %v14398_v40  ;;  %v8233_v40 = vld [vmem:[%s13385_s1 + $0x140] sm:$0xff] }
 0x5ea   : > { %3478 = vst [vmem:[#allocation1 + $0x6] ss:$9 sm:$0xff] %v10863_v14  ;;  %v8238_v14 = vld [vmem:[%s13385_s1 + $0x168] sm:$0xff] }
 0x5eb   : > { %3479 = vst [vmem:[#allocation1 + $0x7] ss:$9 sm:$0xff] %v10865_v58  ;;  %v14415_v58 = vld [vmem:[#allocation32_spill] sm:$0xff] }
 0x5f2   : > { %v11015_v39 = vld [vmem:[#allocation1] sm:$0xff] }
 0x5f3   : > { %3481 = vst [vmem:[#allocation1] ss:$9 sm:$0xff] %v10867_v63  ;;  %v14406_v63 = vld [vmem:[#allocation245_spill] sm:$0xff] }
 0x5f4   : > { %3482 = vst [vmem:[#allocation1 + $0x1] ss:$9 sm:$0xff] %v14399_v32  ;;  %v14438_v32 = vld [vmem:[#allocation73_spill] sm:$0xff] }
 0x5f5   : > { %3483 = vst [vmem:[#allocation1 + $0x2] ss:$9 sm:$0xff] %v14400_v54  ;;  %v14439_v54 = vld [vmem:[#allocation72_spill] sm:$0xff] }
 0x5f6   : > { %3484 = vst [vmem:[#allocation1 + $0x3] ss:$9 sm:$0xff] %v14401_v53 }
 0x5f7   : > { %3485 = vst [vmem:[#allocation1 + $0x4] ss:$9 sm:$0xff] %v14402_v9  ;;  %v14440_v9 = vld [vmem:[#allocation74_spill] sm:$0xff] }
 0x5f8   : > { %3486 = vst [vmem:[#allocation1 + $0x5] ss:$9 sm:$0xff] %v10879_v30 }
 0x5f9   : > { %3487 = vst [vmem:[#allocation1 + $0x6] ss:$9 sm:$0xff] %v10881_v2  ;;  %v14424_v2 = vld [vmem:[#allocation211_spill] sm:$0xff] }
 0x5fa   : > { %3488 = vst [vmem:[#allocation1 + $0x7] ss:$9 sm:$0xff] %v14403_v34  ;;  %v14441_v34 = vld [vmem:[#allocation75_spill] sm:$0xff] }
 0x601   : > { %v11025_v12 = vld [vmem:[#allocation1] sm:$0xff] }
 0x602   : > { %3490 = vst [vmem:[#allocation1] ss:$9 sm:$0xff] %v14404_v27  ;;  %v11124_v27 = vpop.f32.mrf.mxu3 }
 0x603   : > { %3491 = vst [vmem:[#allocation1 + $0x1] ss:$9 sm:$0xff] %v14405_v49  ;;  %v14442_v49 = vld [vmem:[#allocation76_spill] sm:$0xff] }
 0x604   : > { %3492 = vst [vmem:[#allocation1 + $0x2] ss:$9 sm:$0xff] %v10896_v60  ;;  %v14425_v60 = vld [vmem:[#allocation51_spill] sm:$0xff] }
 0x605   : > { %3493 = vst [vmem:[#allocation1 + $0x3] ss:$9 sm:$0xff] %v10898_v46  ;;  %v8237_v46 = vld [vmem:[%s13385_s1 + $0x160] sm:$0xff] }
 0x606   : > { %3494 = vst [vmem:[#allocation1 + $0x4] ss:$9 sm:$0xff] %v10900_v19  ;;  %v14412_v19 = vld [vmem:[#allocation244_spill] sm:$0xff] }
 0x607   : > { %3495 = vst [vmem:[#allocation1 + $0x5] ss:$9 sm:$0xff] %v14406_v63  ;;  %v14443_v63 = vld [vmem:[#allocation89_spill] sm:$0xff] }
 0x608   : > { %3496 = vst [vmem:[#allocation1 + $0x6] ss:$9 sm:$0xff] %v14407_v45 }
 0x609   : > { %3497 = vst [vmem:[#allocation1 + $0x7] ss:$9 sm:$0xff] %v14408_v51 }
 0x610   : > { %v11035_v37 = vld [vmem:[#allocation1] sm:$0xff] }
 0x611   : > { %3499 = vst [vmem:[#allocation1] ss:$9 sm:$0xff] %v10916_v22  ;;  %v14420_v22 = vld [vmem:[#allocation38_spill] sm:$0xff] }
 0x612   : > { %3500 = vst [vmem:[#allocation1 + $0x1] ss:$9 sm:$0xff] %v10918_v48  ;;  %v14417_v48 = vld [vmem:[#allocation34_spill] sm:$0xff] }
 0x613   : > { %3501 = vst [vmem:[#allocation1 + $0x2] ss:$9 sm:$0xff] %v10920_v20  ;;  %v11077_v20 = vpop.f32.mrf.mxu0  ;;  %3204 = vmatmul.bf16.gmra.mxu0 %v14424_v2 }
 0x614   : > { %3502 = vst [vmem:[#allocation1 + $0x3] ss:$9 sm:$0xff] %v14409_v33  ;;  %v11133_v33 = vpop.f32.mrf.mxu3 }
 0x615   : > { %3503 = vst [vmem:[#allocation1 + $0x4] ss:$9 sm:$0xff] %v14410_v29  ;;  %v14446_v29 = vld [vmem:[#allocation8_spill] sm:$0xff] }
 0x616   : > { %3504 = vst [vmem:[#allocation1 + $0x5] ss:$9 sm:$0xff] %v14411_v31  ;;  %2861 = vmatmul.bf16.gmra.mxu3 %v14446_v29  ;;  %v14476_v29 = vld [vmem:[#allocation217_spill] sm:$0xff] }
 0x617   : > { %3505 = vst [vmem:[#allocation1 + $0x6] ss:$9 sm:$0xff] %v14412_v19  ;;  %v14447_v19 = vld [vmem:[#allocation90_spill] sm:$0xff] }
 0x618   : > { %3506 = vst [vmem:[#allocation1 + $0x7] ss:$9 sm:$0xff] %v10926_v17  ;;  %v14427_v17 = vld [vmem:[#allocation52_spill] sm:$0xff] }
 0x619   : > { %14423 = vst [vmem:[#allocation21_spill] sm:$0xff] %v11077_v20 }
 0x61a   : > { %14445 = vst [vmem:[#allocation23_spill] sm:$0xff] %v11133_v33 }
 0x61b   : > { %v11097_v4 = vpop.f32.mrf.mxu0 }
 0x61f   : > { %v11045_v47 = vld [vmem:[#allocation1] sm:$0xff] }
 0x620   : > { %3508 = vst [vmem:[#allocation1] ss:$9 sm:$0xff] %v10928_v10  ;;  %v11088_v10 = vpop.f32.mrf.mxu1 }
 0x621   : > { %3509 = vst [vmem:[#allocation1 + $0x1] ss:$9 sm:$0xff] %v10909_v15  ;;  %v14421_v15 = vld [vmem:[#allocation39_spill] sm:$0xff] }
 0x622   : > { %3510 = vst [vmem:[#allocation1 + $0x2] ss:$9 sm:$0xff] %v14413_v11 }
 0x623   : > { %3511 = vst [vmem:[#allocation1 + $0x3] ss:$9 sm:$0xff] %v14414_v43  ;;  %v11110_v38 = vpop.f32.mrf.mxu0  ;;  %3209 = vmatmul.bf16.gmra.mxu0 %v14435_v28  ;;  %v14449_v43 = vld [vmem:[#allocation221_spill] sm:$0xff] }
 0x624   : > { %3512 = vst [vmem:[#allocation1 + $0x4] ss:$9 sm:$0xff] %v10937_v16  ;;  %v14426_v16 = vld [vmem:[#allocation53_spill] sm:$0xff] }
 0x625   : > { %3513 = vst [vmem:[#allocation1 + $0x5] ss:$9 sm:$0xff] %v10939_v36  ;;  %v14418_v36 = vld [vmem:[#allocation35_spill] sm:$0xff] }
 0x626   : > { %3514 = vst [vmem:[#allocation1 + $0x6] ss:$9 sm:$0xff] %v10941_v25  ;;  %v14419_v25 = vld [vmem:[#allocation36_spill] sm:$0xff] }
 0x627   : > { %3515 = vst [vmem:[#allocation1 + $0x7] ss:$9 sm:$0xff] %v10943_v26  ;;  %v14428_v26 = vld [vmem:[#allocation54_spill] sm:$0xff] }
 0x628   : > { %v11103_v13 = vpop.f32.mrf.mxu1  ;;  %14434 = vst [vmem:[#allocation12_spill] sm:$0xff] %v11110_v38 }
 0x629   : > { %14433 = vst [vmem:[#allocation42_spill] sm:$0xff] %v11103_v13 }
 0x62b   : > { %v11129_v45 = vpop.f32.mrf.mxu0 }
 0x62e   : > { %v11055_v24 = vld [vmem:[#allocation1] sm:$0xff] }
 0x62f   : > { %3517 = vst [vmem:[#allocation1] ss:$9 sm:$0xff] %v10933_v23  ;;  %v14422_v23 = vld [vmem:[#allocation50_spill] sm:$0xff] }
 0x630   : > { %3518 = vst [vmem:[#allocation1 + $0x1] ss:$9 sm:$0xff] %v10935_v55  ;;  %v8239_v55 = vld [vmem:[%s13385_s1 + $0x170] sm:$0xff]  ;;  %v11120_v53 = vpop.f32.mrf.mxu1 }
 0x631   : > { %3581 = vmatpush.bf16.msrb.mxu1 %v8239_v55 }
 0x633   : > { %v11139_v11 = vpop.f32.mrf.mxu0  ;;  %3214 = vmatmul.bf16.gmra.mxu0 %v14449_v43  ;;  %v14479_v43 = vld [vmem:[#allocation133_spill] sm:$0xff] }
 0x634   : > { %14448 = vst [vmem:[#allocation24_spill] sm:$0xff] %v11139_v11 }
 0x635   : > { %3582 = vmatpush.bf16.msrb.mxu1 %v8238_v14 }
 0x637   : > { %v11059_v21 = vld [vmem:[#allocation1] sm:$0xff] }
 0x638   : > { %3721 = vst [vmem:[#allocation1] ss:$9 sm:$0xff] %v14415_v58  ;;  %v11131_v51 = vpop.f32.mrf.mxu1  ;;  %v14450_v58 = vld [vmem:[#allocation92_spill] sm:$0xff] }
 0x639   : > { %3723 = vst [vmem:[#allocation1 + $0x1] ss:$9 sm:$0xff] %v14416_v7  ;;  %3583 = vmatpush.bf16.msrb.mxu1 %v8237_v46  ;;  %v14452_v7 = vld [vmem:[#allocation94_spill] sm:$0xff]  ;;  %v14459_v46 = vld [vmem:[#allocation7_spill] sm:$0xff] }
 0x63a   : > { %3725 = vst [vmem:[#allocation1 + $0x2] ss:$9 sm:$0xff] %v14417_v48  ;;  %v14453_v48 = vld [vmem:[#allocation95_spill] sm:$0xff] }
 0x63b   : > { %3727 = vst [vmem:[#allocation1 + $0x3] ss:$9 sm:$0xff] %v14418_v36  ;;  %v11154_v55 = vpop.f32.mrf.mxu0 }
 0x63c   : > { %3729 = vst [vmem:[#allocation1 + $0x4] ss:$9 sm:$0xff] %v14419_v25  ;;  %v14454_v25 = vld [vmem:[#allocation96_spill] sm:$0xff] }
 0x63d   : > { %3731 = vst [vmem:[#allocation1 + $0x5] ss:$9 sm:$0xff] %v14420_v22  ;;  %3584 = vmatpush.bf16.msrb.mxu1 %v8236_v59  ;;  %v14455_v22 = vld [vmem:[#allocation97_spill] sm:$0xff] }
 0x63e   : > { %3733 = vst [vmem:[#allocation1 + $0x6] ss:$9 sm:$0xff] %v14421_v15  ;;  %v11150_v15 = vpop.f32.mrf.mxu3  ;;  %v14464_v59 = vld [vmem:[#allocation109_spill] sm:$0xff] }
 0x63f   : > { %3735 = vst [vmem:[#allocation1 + $0x7] ss:$9 sm:$0xff] %v14422_v23  ;;  %v14456_v23 = vld [vmem:[#allocation105_spill] sm:$0xff] }
 0x640   : > { %14444 = vst [vmem:[#allocation22_spill] sm:$0xff] %v11131_v51  ;;  %v11146_v36 = vpop.f32.mrf.mxu1 }
 0x641   : > { %3585 = vmatpush.bf16.msrb.mxu1 %v8235_v61  ;;  %v14468_v61 = vld [vmem:[#allocation114_spill] sm:$0xff] }
 0x645   : > { %3586 = vmatpush.bf16.msrb.mxu1 %v8234_v35  ;;  %v14469_v35 = vld [vmem:[#allocation124_spill] sm:$0xff] }
 0x646   : > { %v11080_v30 = vld [vmem:[#allocation1] sm:$0xff] }
 0x647   : > { %3737 = vst [vmem:[#allocation1] ss:$9 sm:$0xff] %v14425_v60  ;;  %v11160_v60 = vpop.f32.mrf.mxu3  ;;  %2866 = vmatmul.bf16.gmra.mxu3 %v14459_v46  ;;  %v14483_v46 = vld [vmem:[#allocation144_spill] sm:$0xff] }
 0x648   : > { %3738 = vst [vmem:[#allocation1 + $0x1] ss:$9 sm:$0xff] %v14426_v16  ;;  %v11156_v14 = vpop.f32.mrf.mxu1  ;;  %v14460_v16 = vld [vmem:[#allocation106_spill] sm:$0xff] }
 0x649   : > { %3739 = vst [vmem:[#allocation1 + $0x2] ss:$9 sm:$0xff] %v14427_v17  ;;  %3587 = vmatpush.bf16.msrb.mxu1 %v8233_v40  ;;  %v14461_v17 = vld [vmem:[#allocation108_spill] sm:$0xff] }
 0x64a   : > { %3740 = vst [vmem:[#allocation1 + $0x3] ss:$9 sm:$0xff] %v14428_v26  ;;  %v11165_v26 = vpop.f32.mrf.mxu0 }
 0x64b   : > { %3741 = vst [vmem:[#allocation1 + $0x4] ss:$9 sm:$0xff] %v14429_v5  ;;  %v14463_v5 = vld [vmem:[#allocation222_spill] sm:$0xff] }
 0x64c   : > { %3742 = vst [vmem:[#allocation1 + $0x5] ss:$9 sm:$0xff] %v14430_v6  ;;  %3588 = vmatmul.bf16.vlgmr.msrb.gmra.mxu1 %v10955_v0  ;;  %v14451_v0 = vld [vmem:[#allocation93_spill] sm:$0xff]  ;;  %3219 = vmatmul.bf16.gmra.mxu0 %v14463_v5  ;;  %v14486_v5 = vld [vmem:[#allocation202_spill] sm:$0xff] }
 0x64d   : > { %3743 = vst [vmem:[#allocation1 + $0x6] ss:$9 sm:$0xff] %v14431_v3  ;;  %v14466_v6 = vld [vmem:[#allocation113_spill] sm:$0xff]  ;;  %v14467_v3 = vld [vmem:[#allocation112_spill] sm:$0xff] }
 0x64e   : > { %3744 = vst [vmem:[#allocation1 + $0x7] ss:$9 sm:$0xff] %v14432_v44 }
 0x64f   : > { %14457 = vst [vmem:[#allocation25_spill] sm:$0xff] %v11156_v14  ;;  %v11176_v28 = vpop.f32.mrf.mxu3 }
 0x650   : > { %14458 = vst [vmem:[#allocation28_spill] sm:$0xff] %v11160_v60  ;;  %v11172_v44 = vpop.f32.mrf.mxu1 }
 0x651   : > { %14462 = vst [vmem:[#allocation30_spill] sm:$0xff] %v11165_v26 }
 0x655   : > { %v11108_v56 = vld [vmem:[#allocation1] sm:$0xff] }
 0x656   : > { %3746 = vst [vmem:[#allocation1] ss:$9 sm:$0xff] %v14436_v52  ;;  %v11179_v52 = vpop.f32.mrf.mxu0 }
 0x657   : > { %3747 = vst [vmem:[#allocation1 + $0x1] ss:$9 sm:$0xff] %v14437_v42 }
 0x658   : > { %3748 = vst [vmem:[#allocation1 + $0x2] ss:$9 sm:$0xff] %v14438_v32  ;;  %v11181_v42 = vpop.f32.mrf.mxu1  ;;  %v14471_v32 = vld [vmem:[#allocation126_spill] sm:$0xff] }
 0x659   : > { %3749 = vst [vmem:[#allocation1 + $0x3] ss:$9 sm:$0xff] %v14439_v54  ;;  %v2192_v54 = vpop.f32.mrf.mxu3 }
 0x65a   : > { %3750 = vst [vmem:[#allocation1 + $0x4] ss:$9 sm:$0xff] %v14440_v9  ;;  %v14472_v9 = vld [vmem:[#allocation203_spill] sm:$0xff] }
 0x65b   : > { %3751 = vst [vmem:[#allocation1 + $0x5] ss:$9 sm:$0xff] %v14441_v34  ;;  %2871 = vmatmul.bf16.gmra.mxu3 %v14472_v9  ;;  %v14473_v34 = vld [vmem:[#allocation127_spill] sm:$0xff] }
 0x65c   : > { %3752 = vst [vmem:[#allocation1 + $0x6] ss:$9 sm:$0xff] %v14442_v49  ;;  %3593 = vmatmul.bf16.gmra.mxu1 %v10965_v18  ;;  %v14465_v18 = vld [vmem:[#allocation110_spill] sm:$0xff]  ;;  %v14474_v49 = vld [vmem:[#allocation128_spill] sm:$0xff] }
 0x65d   : > { %3753 = vst [vmem:[#allocation1 + $0x7] ss:$9 sm:$0xff] %v14443_v63 }
 0x65e   : > { %14470 = vst [vmem:[#allocation41_spill] sm:$0xff] %v11181_v42  ;;  %v11189_v63 = vpop.f32.mrf.mxu0  ;;  %3224 = vmatmul.bf16.gmra.mxu0 %v14476_v29  ;;  %v8247_v29 = vld [vmem:[%s13385_s1 + $0x1b0] sm:$0xff] }
 0x65f   : > { %14475 = vst [vmem:[#allocation231_spill] sm:$0xff] %v11189_v63 }
 0x664   : > { %v11136_v31 = vld [vmem:[#allocation1] sm:$0xff] }
 0x665   : > { %3755 = vst [vmem:[#allocation1] ss:$9 sm:$0xff] %v14447_v19  ;;  %v14478_v19 = vld [vmem:[#allocation130_spill] sm:$0xff] }
 0x666   : > { %3756 = vst [vmem:[#allocation1 + $0x1] ss:$9 sm:$0xff] %v14450_v58  ;;  %v14480_v58 = vld [vmem:[#allocation132_spill] sm:$0xff] }
 0x667   : > { %3757 = vst [vmem:[#allocation1 + $0x2] ss:$9 sm:$0xff] %v14451_v0  ;;  %v11196_v0 = vpop.f32.mrf.mxu1 }
 0x668   : > { %3758 = vst [vmem:[#allocation1 + $0x3] ss:$9 sm:$0xff] %v14452_v7  ;;  %v14481_v7 = vld [vmem:[#allocation142_spill] sm:$0xff] }
 0x669   : > { %3759 = vst [vmem:[#allocation1 + $0x4] ss:$9 sm:$0xff] %v14453_v48  ;;  %v11199_v48 = vpop.f32.mrf.mxu3 }
 0x66a   : > { %3760 = vst [vmem:[#allocation1 + $0x5] ss:$9 sm:$0xff] %v14454_v25  ;;  %v11202_v25 = vpop.f32.mrf.mxu0 }
 0x66b   : > { %3761 = vst [vmem:[#allocation1 + $0x6] ss:$9 sm:$0xff] %v14455_v22 }
 0x66c   : > { %3762 = vst [vmem:[#allocation1 + $0x7] ss:$9 sm:$0xff] %v14456_v23  ;;  %3598 = vmatmul.bf16.gmra.mxu1 %v10975_v8  ;;  %v14477_v8 = vld [vmem:[#allocation129_spill] sm:$0xff] }
 0x66f   : > { %v11206_v23 = vpop.f32.mrf.mxu1 }
 0x670   : > { %14482 = vst [vmem:[#allocation232_spill] sm:$0xff] %v11206_v23 }
 0x673   : > { %v11158_v2 = vld [vmem:[#allocation1] sm:$0xff] }
 0x674   : > { %3764 = vst [vmem:[#allocation1] ss:$9 sm:$0xff] %v14460_v16  ;;  %v14484_v16 = vld [vmem:[#allocation146_spill] sm:$0xff] }
 0x675   : > { %3765 = vst [vmem:[#allocation1 + $0x1] ss:$9 sm:$0xff] %v14461_v17  ;;  %v11210_v17 = vpop.f32.mrf.mxu3  ;;  %2876 = vmatmul.bf16.gmra.mxu3 %v14486_v5  ;;  %v14501_v5 = vld [vmem:[#allocation166_spill] sm:$0xff] }
 0x676   : > { %3766 = vst [vmem:[#allocation1 + $0x2] ss:$9 sm:$0xff] %v14464_v59  ;;  %v14487_v59 = vld [vmem:[#allocation147_spill] sm:$0xff] }
 0x677   : > { %3767 = vst [vmem:[#allocation1 + $0x3] ss:$9 sm:$0xff] %v14465_v18  ;;  %v14488_v18 = vld [vmem:[#allocation148_spill] sm:$0xff]  ;;  %v11222_v54 = vpop.f32.mrf.mxu1 }
 0x678   : > { %3768 = vst [vmem:[#allocation1 + $0x4] ss:$9 sm:$0xff] %v14466_v6  ;;  %v11215_v6 = vpop.f32.mrf.mxu0 }
 0x679   : > { %3769 = vst [vmem:[#allocation1 + $0x5] ss:$9 sm:$0xff] %v14467_v3  ;;  %v14491_v3 = vld [vmem:[#allocation149_spill] sm:$0xff] }
 0x67a   : > { %3770 = vst [vmem:[#allocation1 + $0x6] ss:$9 sm:$0xff] %v14468_v61  ;;  %v14492_v61 = vld [vmem:[#allocation151_spill] sm:$0xff] }
 0x67b   : > { %3771 = vst [vmem:[#allocation1 + $0x7] ss:$9 sm:$0xff] %v14469_v35  ;;  %v14493_v35 = vld [vmem:[#allocation162_spill] sm:$0xff] }
 0x67c   : > { %3603 = vmatmul.bf16.gmra.mxu1 %v10985_v41  ;;  %14485 = vst [vmem:[#allocation233_spill] sm:$0xff] %v11210_v17  ;;  %v14490_v41 = vld [vmem:[#allocation220_spill] sm:$0xff]  ;;  %v14525_v17 = vld [vmem:[#allocation209_spill] sm:$0xff] }
 0x67d   : > { %14489 = vst [vmem:[#allocation11_spill] sm:$0xff] %v11215_v6  ;;  %3229 = vmatmul.bf16.gmra.mxu0 %v14490_v41  ;;  %v11224_v9 = vpop.f32.mrf.mxu3  ;;  %v14504_v41 = vld [vmem:[#allocation19_spill] sm:$0xff]  ;;  %v14528_v6 = vld [vmem:[#allocation206_spill] sm:$0xff] }
 0x682   : > { %v11183_v40 = vld [vmem:[#allocation1] sm:$0xff] }
 0x683   : > { %3773 = vst [vmem:[#allocation1] ss:$9 sm:$0xff] %v14471_v32  ;;  %v14494_v32 = vld [vmem:[#allocation160_spill] sm:$0xff] }
 0x684   : > { %3774 = vst [vmem:[#allocation1 + $0x1] ss:$9 sm:$0xff] %v14473_v34  ;;  %v8248_v34 = vld [vmem:[%s13385_s1 + $0x1b8] sm:$0xff] }
 0x685   : > { %3775 = vst [vmem:[#allocation1 + $0x2] ss:$9 sm:$0xff] %v14474_v49  ;;  %v11230_v49 = vpop.f32.mrf.mxu0  ;;  %3896 = vmatpush.bf16.msrb.mxu2 %v8248_v34 }
 0x686   : > { %3776 = vst [vmem:[#allocation1 + $0x3] ss:$9 sm:$0xff] %v14477_v8 }
 0x687   : > { %3777 = vst [vmem:[#allocation1 + $0x4] ss:$9 sm:$0xff] %v14478_v19  ;;  %v14495_v19 = vld [vmem:[#allocation163_spill] sm:$0xff] }
 0x688   : > { %3778 = vst [vmem:[#allocation1 + $0x5] ss:$9 sm:$0xff] %v14479_v43  ;;  %v11238_v43 = vpop.f32.mrf.mxu1 }
 0x689   : > { %3779 = vst [vmem:[#allocation1 + $0x6] ss:$9 sm:$0xff] %v14480_v58  ;;  %3897 = vmatpush.bf16.msrb.mxu2 %v8247_v29  ;;  %v14497_v58 = vld [vmem:[#allocation164_spill] sm:$0xff] }
 0x68a   : > { %3780 = vst [vmem:[#allocation1 + $0x7] ss:$9 sm:$0xff] %v14481_v7  ;;  %v14498_v7 = vld [vmem:[#allocation165_spill] sm:$0xff] }
 0x68b   : > { %14496 = vst [vmem:[#allocation13_spill] sm:$0xff] %v11238_v43 }
 0x68c   : > { %3608 = vmatmul.bf16.gmra.mxu1 %v10995_v1  ;;  %v8246_v1 = vld [vmem:[%s13385_s1 + $0x1a8] sm:$0xff] }
 0x68d   : > { %3898 = vmatpush.bf16.msrb.mxu2 %v8246_v1  ;;  %v11271_v1 = vpop.f32.mrf.mxu2 }
 0x690   : > { %v11259_v34 = vpop.f32.mrf.mxu1 }
 0x691   : > { %v11204_v22 = vld [vmem:[#allocation1] sm:$0xff] }
 0x692   : > { %3782 = vst [vmem:[#allocation1] ss:$9 sm:$0xff] %v14483_v46  ;;  %v11242_v46 = vpop.f32.mrf.mxu3 }
 0x693   : > { %3783 = vst [vmem:[#allocation1 + $0x1] ss:$9 sm:$0xff] %v14484_v16  ;;  %v14500_v16 = vld [vmem:[#allocation215_spill] sm:$0xff] }
 0x694   : > { %3784 = vst [vmem:[#allocation1 + $0x2] ss:$9 sm:$0xff] %v14487_v59  ;;  %2881 = vmatmul.bf16.gmra.mxu3 %v14500_v16  ;;  %v14502_v59 = vld [vmem:[#allocation168_spill] sm:$0xff] }
 0x695   : > { %3785 = vst [vmem:[#allocation1 + $0x3] ss:$9 sm:$0xff] %v14488_v18  ;;  %v11250_v18 = vpop.f32.mrf.mxu0  ;;  %3234 = vmatmul.bf16.gmra.mxu0 %v14504_v41  ;;  %v8243_v16 = vld [vmem:[%s13385_s1 + $0x190] sm:$0xff] }
 0x696   : > { %3786 = vst [vmem:[#allocation1 + $0x4] ss:$9 sm:$0xff] %v14491_v3  ;;  %v14505_v3 = vld [vmem:[#allocation169_spill] sm:$0xff] }
 0x697   : > { %3787 = vst [vmem:[#allocation1 + $0x5] ss:$9 sm:$0xff] %v14492_v61  ;;  %v14506_v61 = vld [vmem:[#allocation171_spill] sm:$0xff] }
 0x698   : > { %3788 = vst [vmem:[#allocation1 + $0x6] ss:$9 sm:$0xff] %v14493_v35  ;;  %v8245_v35 = vld [vmem:[%s13385_s1 + $0x1a0] sm:$0xff]  ;;  %v11278_v41 = vpop.f32.mrf.mxu1 }
 0x699   : > { %3789 = vst [vmem:[#allocation1 + $0x7] ss:$9 sm:$0xff] %v14494_v32  ;;  %v14507_v32 = vld [vmem:[#allocation181_spill] sm:$0xff]  ;;  %3899 = vmatpush.bf16.msrb.mxu2 %v8245_v35  ;;  %v8242_v35 = vld [vmem:[%s13385_s1 + $0x188] sm:$0xff] }
 0x69a   : > { %14499 = vst [vmem:[#allocation226_spill] sm:$0xff] %v11242_v46  ;;  %v11261_v29 = vpop.f32.mrf.mxu3  ;;  %v14516_v46 = vld [vmem:[#allocation20_spill] sm:$0xff] }
 0x69b   : > { %14503 = vst [vmem:[#allocation227_spill] sm:$0xff] %v11250_v18 }
 0x69c   : > { %3613 = vmatmul.bf16.gmra.mxu1 %v11005_v50  ;;  %14510 = vst [vmem:[#allocation228_spill] sm:$0xff] %v11278_v41  ;;  %v14512_v50 = vld [vmem:[#allocation185_spill] sm:$0xff] }
 0x6a0   : > { %v11235_v8 = vld [vmem:[#allocation1] sm:$0xff] }
 0x6a1   : > { %3791 = vst [vmem:[#allocation1] ss:$9 sm:$0xff] %v14495_v19  ;;  %v8244_v19 = vld [vmem:[%s13385_s1 + $0x198] sm:$0xff] }
 0x6a2   : > { %3792 = vst [vmem:[#allocation1 + $0x1] ss:$9 sm:$0xff] %v14497_v58  ;;  %v11267_v58 = vpop.f32.mrf.mxu0  ;;  %3900 = vmatpush.bf16.msrb.mxu2 %v8244_v19  ;;  %v14514_v19 = vld [vmem:[#allocation186_spill] sm:$0xff] }
 0x6a3   : > { %3793 = vst [vmem:[#allocation1 + $0x2] ss:$9 sm:$0xff] %v14498_v7 }
 0x6a4   : > { %3794 = vst [vmem:[#allocation1 + $0x3] ss:$9 sm:$0xff] %v14501_v5  ;;  %v14508_v5 = vld [vmem:[#allocation180_spill] sm:$0xff] }
 0x6a5   : > { %3795 = vst [vmem:[#allocation1 + $0x4] ss:$9 sm:$0xff] %v14502_v59  ;;  %v14509_v59 = vld [vmem:[#allocation182_spill] sm:$0xff] }
 0x6a6   : > { %3796 = vst [vmem:[#allocation1 + $0x5] ss:$9 sm:$0xff] %v14505_v3  ;;  %3901 = vmatpush.bf16.msrb.mxu2 %v8243_v16  ;;  %v14511_v3 = vld [vmem:[#allocation183_spill] sm:$0xff]  ;;  %v14517_v16 = vld [vmem:[#allocation188_spill] sm:$0xff] }
 0x6a7   : > { %3797 = vst [vmem:[#allocation1 + $0x6] ss:$9 sm:$0xff] %v14506_v61  ;;  %v2573_v61 = vpop.f32.mrf.mxu3 }
 0x6a8   : > { %3798 = vst [vmem:[#allocation1 + $0x7] ss:$9 sm:$0xff] %v14507_v32  ;;  %v14513_v32 = vld [vmem:[#allocation216_spill] sm:$0xff]  ;;  %v8241_v61 = vld [vmem:[%s13385_s1 + $0x180] sm:$0xff] }
 0x6a9   : > { %2886 = vmatmul.bf16.gmra.mxu3 %v14513_v32  ;;  %v11296_v32 = vpop.f32.mrf.mxu1 }
 0x6aa   : > { %3902 = vmatpush.bf16.msrb.mxu2 %v8242_v35  ;;  %v479_v35 = vld [vmem:[%s8628_s8 + $0x108] sm:$0xff] }
 0x6ab   : > { %v11311_v60 = vpack.c.bf16 %v479_v35, %v479_v35 }
 0x6ac   : > { %3618 = vmatmul.bf16.gmra.mxu1 %v11015_v39  ;;  %v480_v39 = vld [vmem:[%s8628_s8 + $0x110] sm:$0xff] }
 0x6ad   : > { %14522 = vst [vmem:[#allocation234_spill] sm:$0xff] %v11311_v60  ;;  %v3674_v63 = vrot.slane %v11311_v60, 3 }
 0x6ae   : > { %3903 = vmatpush.bf16.msrb.mxu2 %v8241_v61  ;;  %v14523_v61 = vld [vmem:[#allocation201_spill] sm:$0xff] }
 0x6af   : > { %v11269_v7 = vld [vmem:[#allocation1] sm:$0xff] }
 0x6b0   : > { %3800 = vst [vmem:[#allocation1] ss:$9 sm:$0xff] %v14508_v5  ;;  %v14515_v5 = vld [vmem:[#allocation187_spill] sm:$0xff] }
 0x6b1   : > { %3801 = vst [vmem:[#allocation1 + $0x1] ss:$9 sm:$0xff] %v14509_v59  ;;  %v1955_v59 = vpop.f32.mrf.mxu0  ;;  %3239 = vmatmul.bf16.gmra.mxu0 %v14516_v46  ;;  %3904 = vmatmul.bf16.vlgmr.msrb.gmra.mxu2 %v11080_v30  ;;  %v11314_v18 = vpop.f32.mrf.mxu1  ;;  %v14526_v30 = vld [vmem:[#allocation210_spill] sm:$0xff] }
 0x6b2   : > { %3802 = vst [vmem:[#allocation1 + $0x2] ss:$9 sm:$0xff] %v14511_v3  ;;  %v14518_v3 = vld [vmem:[#allocation197_spill] sm:$0xff] }
 0x6b3   : > { %3803 = vst [vmem:[#allocation1 + $0x3] ss:$9 sm:$0xff] %v14512_v50  ;;  %v11291_v50 = vpop.f32.mrf.mxu2  ;;  %v14520_v59 = vld [vmem:[#allocation9_spill] sm:$0xff] }
 0x6b4   : > { %3804 = vst [vmem:[#allocation1 + $0x4] ss:$9 sm:$0xff] %v14514_v19  ;;  %v11298_v19 = vpop.f32.mrf.mxu3 }
 0x6b5   : > { %3805 = vst [vmem:[#allocation1 + $0x5] ss:$9 sm:$0xff] %v14515_v5 }
 0x6b6   : > { %3806 = vst [vmem:[#allocation1 + $0x6] ss:$9 sm:$0xff] %v14517_v16 }
 0x6b7   : > { %3807 = vst [vmem:[#allocation1 + $0x7] ss:$9 sm:$0xff] %v14518_v3  ;;  %v14521_v3 = vld [vmem:[#allocation200_spill] sm:$0xff] }
 0x6b8   : > { %14519 = vst [vmem:[#allocation229_spill] sm:$0xff] %v11291_v50 }
 0x6b9   : > { %v11302_v46 = vpop.f32.mrf.mxu0  ;;  %14524 = vst [vmem:[#allocation235_spill] sm:$0xff] %v11314_v18  ;;  %v11334_v26 = vpop.f32.mrf.mxu1 }
 0x6bb   : > { %v11308_v16 = vpop.f32.mrf.mxu2 }
 0x6bc   : > { %v11319_v33 = vpop.f32.mrf.mxu3  ;;  %3623 = vmatmul.bf16.gmra.mxu1 %v11025_v12 }
 0x6bd   : > { %14527 = vst [vmem:[#allocation236_spill] sm:$0xff] %v11319_v33 }
 0x6be   : > { %v11305_v5 = vld [vmem:[#allocation1] sm:$0xff] }
 0x6bf   : > { %3809 = vst [vmem:[#allocation1] ss:$9 sm:$0xff] %v14520_v59  ;;  %v11322_v59 = vpack.c.bf16 %v480_v39, %v480_v39  ;;  %v3686_v39 = vsel %vm590_vm6, %v11311_v60, %v3674_v63 }
 0x6c0   : > { %3810 = vst [vmem:[#allocation1 + $0x1] ss:$9 sm:$0xff] %v14521_v3  ;;  %v14530_v3 = vld [vmem:[#allocation207_spill] sm:$0xff]  ;;  %v11358_v20 = vrot.slane %v3686_v39, 3 }
 0x6c1   : > { %3811 = vst [vmem:[#allocation1 + $0x2] ss:$9 sm:$0xff] %v14523_v61  ;;  %v11326_v35 = vpop.f32.mrf.mxu0  ;;  %v14532_v61 = vld [vmem:[#allocation213_spill] sm:$0xff]  ;;  %3909 = vmatmul.bf16.gmra.mxu2 %v11108_v56  ;;  %v481_v56 = vld [vmem:[%s8628_s8 + $0x118] sm:$0xf]  ;;  %v11377_v14 = vpop.f32.mrf.mxu1 }
 0x6c2   : > { %3812 = vst [vmem:[#allocation1 + $0x3] ss:$9 sm:$0xff] %v14525_v17  ;;  %v3675_v17 = vrot.slane %v11322_v59, 3 }
 0x6c3   : > { %3813 = vst [vmem:[#allocation1 + $0x4] ss:$9 sm:$0xff] %v14526_v30  ;;  %v11329_v18 = vpop.f32.mrf.mxu2  ;;  %v3680_v30 = vsel %vm582_vm2, %v11311_v60, %v3674_v63 }
 0x6c4   : > { %3814 = vst [vmem:[#allocation1 + $0x5] ss:$9 sm:$0xff] %v14528_v6  ;;  %v3683_v6 = vsel %vm586_vm4, %v11311_v60, %v3674_v63  ;;  %v11346_v41 = vrot.slane %v3680_v30, 1  ;;  %v3692_v43 = vsel %vm582_vm2, %v11322_v59, %v3675_v17  ;;  %v14534_v30 = vld [vmem:[#allocation214_spill] sm:$0xff] }
 0x6c5   : > { %14529 = vst [vmem:[#allocation245_spill] sm:$0xff] %v11322_v59  ;;  %v11350_v11 = vrot.slane %v3683_v6, 2  ;;  %v11369_v6 = vsel %vm578_vm1, %v11322_v59, %v3675_v17  ;;  %v11371_v42 = vrot.slane %v3692_v43, 1 }
 0x6c6   : > { %3815 = vst [vmem:[#allocation1 + $0x6] ss:$9 sm:$0xff] %v14530_v3  ;;  %v11340_v3 = vpop.f32.mrf.mxu3 }
 0x6c7   : > { %14531 = vst [vmem:[#allocation238_spill] sm:$0xff] %v11326_v35 }
 0x6c8   : > { %3816 = vst [vmem:[#allocation1 + $0x7] ss:$9 sm:$0xff] %v14532_v61  ;;  %v11344_v61 = vsel %vm578_vm1, %v11311_v60, %v3674_v63  ;;  %v3695_v63 = vsel %vm586_vm4, %v11322_v59, %v3675_v17  ;;  %v14551_v60 = vld [vmem:[#allocation46_spill] sm:$0xff] }
 0x6c9   : > { %14533 = vst [vmem:[#allocation239_spill] sm:$0xff] %v11329_v18  ;;  %v11356_v23 = vpop.f32.mrf.mxu0  ;;  %v11374_v39 = vrot.slane %v3695_v63, 2  ;;  %v3698_v63 = vsel %vm590_vm6, %v11322_v59, %v3675_v17  ;;  %v14548_v59 = vld [vmem:[#allocation44_spill] sm:$0xff] }
 0x6ca   : > { %14535 = vst [vmem:[#allocation241_spill] sm:$0xff] %v11369_v6  ;;  %v11394_v35 = vrot.slane %v3698_v63, 3 }
 0x6cb   : > { %v11364_v12 = vpop.f32.mrf.mxu2  ;;  %14536 = vst [vmem:[#allocation242_spill] sm:$0xff] %v11371_v42 }
 0x6cc   : > { %14537 = vst [vmem:[#allocation243_spill] sm:$0xff] %v11374_v39  ;;  %3628 = vmatmul.bf16.gmra.mxu1 %v11035_v37  ;;  %v14549_v37 = vld [vmem:[#allocation45_spill] sm:$0xff] }
 0x6cd   : > { %14538 = vst [vmem:[#allocation244_spill] sm:$0xff] %v11377_v14 }
 0x6ce   : > { %v11383_v18 = vpop.f32.mrf.mxu3  ;;  %14543 = vst [vmem:[#allocation34_spill] sm:$0xff] %v11394_v35 }
 0x6cf   : > { %v11354_v38 = vld [vmem:[#allocation1] sm:$0xff]  ;;  %14540 = vst [vmem:[#allocation248_spill] sm:$0xff] %v11383_v18 }
 0x6d0   : > { %3818 = vst [vmem:[#allocation1] ss:$9 sm:$0xff] %v14534_v30  ;;  %v11380_v30 = vpack.c.bf16 %v481_v56, %v481_v56  ;;  %v3589_v56 = vpop.f32.mrf.mxu1 }
 0x6d1   : > { %3819 = vst [vmem:[#allocation1 + $0x1] ss:$9 sm:$0xff] %v11344_v61  ;;  %v11387_v43 = vpop.f32.mrf.mxu0  ;;  %3914 = vmatmul.bf16.gmra.mxu2 %v11136_v31 }
 0x6d2   : > { %3821 = vst [vmem:[#allocation1 + $0x2] ss:$9 sm:$0xff] %v11346_v41  ;;  %v13778_v51 = vrot.slane %v11380_v30, 3 }
 0x6d3   : > { %3823 = vst [vmem:[#allocation1 + $0x3] ss:$9 sm:$0xff] %v11350_v11  ;;  %v11392_v14 = vpop.f32.mrf.mxu2 }
 0x6d4   : > { %3825 = vst [vmem:[#allocation1 + $0x4] ss:$9 sm:$0xff] %v11358_v20  ;;  %v11400_v18 = vsel %vm578_vm1, %v11380_v30, %v13778_v51 }
 0x6d5   : > { %14539 = vst [vmem:[#allocation247_spill] sm:$0xff] %v11380_v30  ;;  %v14553_v30 = vld [vmem:[#allocation48_spill] sm:$0xff] }
 0x6d6   : > { %3826 = vst [vmem:[#allocation1 + $0x5] ss:$9 sm:$0xff] %v11369_v6  ;;  %v11402_v33 = vpop.f32.mrf.mxu3  ;;  %v14565_v6 = vld [vmem:[#allocation65_spill] sm:$0xff] }
 0x6d7   : > { %3828 = vst [vmem:[#allocation1 + $0x6] ss:$9 sm:$0xff] %v11371_v42  ;;  %v14563_v42 = vld [vmem:[#allocation64_spill] sm:$0xff] }
 0x6d8   : > { %3830 = vst [vmem:[#allocation1 + $0x7] ss:$9 sm:$0xff] %v11374_v39 }
 0x6d9   : > { %14541 = vst [vmem:[#allocation32_spill] sm:$0xff] %v11387_v43  ;;  %v11409_v17 = vpop.f32.mrf.mxu0 }
 0x6da   : > { %14542 = vst [vmem:[#allocation33_spill] sm:$0xff] %v11392_v14  ;;  %v11414_v14 = vpop.f32.mrf.mxu1 }
 0x6db   : > { %14544 = vst [vmem:[#allocation35_spill] sm:$0xff] %v11400_v18  ;;  %v11412_v63 = vpop.f32.mrf.mxu2 }
 0x6dc   : > { %14545 = vst [vmem:[#allocation36_spill] sm:$0xff] %v11414_v14  ;;  %v14554_v14 = vld [vmem:[#allocation49_spill] sm:$0xff]  ;;  %3633 = vmatmul.bf16.gmra.mxu1 %v11045_v47  ;;  %v14560_v47 = vld [vmem:[#allocation62_spill] sm:$0xff] }
 0x6de   : > { %v11416_v51 = vpop.f32.mrf.mxu3 }
 0x6df   : > { %v11404_v50 = vld [vmem:[#allocation1] sm:$0xff]  ;;  %14546 = vst [vmem:[#allocation38_spill] sm:$0xff] %v11416_v51 }
 0x6e0   : > { %3833 = vst [vmem:[#allocation1] ss:$9 sm:$0xff] %v11394_v35  ;;  %v14555_v35 = vld [vmem:[#allocation59_spill] sm:$0xff] }
 0x6e1   : > { %3834 = vst [vmem:[#allocation1 + $0x1] ss:$9 sm:$0xff] %v11400_v18  ;;  %v11420_v13 = vpop.f32.mrf.mxu0  ;;  %3919 = vmatmul.bf16.gmra.mxu2 %v11158_v2 }
 0x6e2   : > { %14547 = vst [vmem:[#allocation39_spill] sm:$0xff] %v11420_v13  ;;  %v3594_v18 = vpop.f32.mrf.mxu1 }
 0x6e3   : > { %v11424_v31 = vpop.f32.mrf.mxu2 }
 0x6e4   : > { %14550 = vst [vmem:[#allocation50_spill] sm:$0xff] %v11424_v31  ;;  %v14558_v31 = vld [vmem:[#allocation31_spill] sm:$0xff] }
 0x6e6   : > { %v11430_v51 = vpop.f32.mrf.mxu3 }
 0x6e8   : > { %v11418_v43 = vld [vmem:[#allocation1] sm:$0xff] }
 0x6e9   : > { %4071 = vst [vmem:[#allocation1] ss:$9 sm:$0xff] %v14548_v59  ;;  %v14556_v59 = vld [vmem:[#allocation61_spill] sm:$0xff] }
 0x6ea   : > { %4073 = vst [vmem:[#allocation1 + $0x1] ss:$9 sm:$0xff] %v14549_v37  ;;  %v11436_v37 = vpop.f32.mrf.mxu0 }
 0x6eb   : > { %4075 = vst [vmem:[#allocation1 + $0x2] ss:$9 sm:$0xff] %v14551_v60  ;;  %v11438_v60 = vpop.f32.mrf.mxu2 }
 0x6ec   : > { %4077 = vst [vmem:[#allocation1 + $0x3] ss:$9 sm:$0xff] %v14552_v62  ;;  %v11440_v62 = vpop.f32.mrf.mxu1  ;;  %3638 = vmatmul.bf16.gmra.mxu1 %v11055_v24 }
 0x6ed   : > { %4079 = vst [vmem:[#allocation1 + $0x4] ss:$9 sm:$0xff] %v14553_v30  ;;  %v2136_v30 = vadd.f32 %v11088_v10, %v14558_v31  ;;  %v14566_v31 = vld [vmem:[#allocation66_spill] sm:$0xff] }
 0x6ee   : > { %4081 = vst [vmem:[#allocation1 + $0x5] ss:$9 sm:$0xff] %v14554_v14  ;;  %v11444_v14 = vpop.f32.mrf.mxu3 }
 0x6ef   : > { %4083 = vst [vmem:[#allocation1 + $0x6] ss:$9 sm:$0xff] %v14555_v35  ;;  %v2575_v35 = vadd.f32 %v11271_v1, %v2136_v30  ;;  %v14567_v1 = vld [vmem:[#allocation68_spill] sm:$0xff] }
 0x6f0   : > { %4085 = vst [vmem:[#allocation1 + $0x7] ss:$9 sm:$0xff] %v14556_v59  ;;  %v14562_v59 = vld [vmem:[#allocation63_spill] sm:$0xff] }
 0x6f1   : > { %14557 = vst [vmem:[#allocation211_spill] sm:$0xff] %v11440_v62  ;;  %v2891_v39 = vadd.f32 %v11298_v19, %v2575_v35  ;;  %v14569_v19 = vld [vmem:[#allocation78_spill] sm:$0xff]  ;;  %3924 = vmatmul.bf16.gmra.mxu2 %v11183_v40  ;;  %v14571_v35 = vld [vmem:[#allocation225_spill] sm:$0xff]  ;;  %v8254_v40 = vld [vmem:[%s13385_s1 + $0x1e8] sm:$0xff] }
 0x6f2   : > { %14559 = vst [vmem:[#allocation51_spill] sm:$0xff] %v11444_v14  ;;  %v11450_v2 = vpop.f32.mrf.mxu0 }
 0x6f3   : > { %14561 = vst [vmem:[#allocation53_spill] sm:$0xff] %v11450_v2  ;;  %v11455_v62 = vpop.f32.mrf.mxu2  ;;  %v3244_v10 = vadd.f32 %v11302_v46, %v2891_v39  ;;  %v8255_v39 = vld [vmem:[%s13385_s1 + $0x1f0] sm:$0xff]  ;;  %v14702_v2 = vld [vmem:[#allocation119_spill] sm:$0xff] }
 0x6f4   : > { %14564 = vst [vmem:[#allocation52_spill] sm:$0xff] %v11455_v62  ;;  %v11460_v14 = vpop.f32.mrf.mxu1  ;;  %v8253_v62 = vld [vmem:[%s13385_s1 + $0x1e0] sm:$0xff] }
 0x6f5   : > { %v11463_v30 = vadd.f32 %v3589_v56, %v3244_v10  ;;  %v2141_v10 = vadd.f32 %v11120_v53, %v14571_v35  ;;  %v14577_v35 = vld [vmem:[#allocation82_spill] sm:$0xff] }
 0x6f7   : > { %v11446_v13 = vld [vmem:[#allocation1] sm:$0xff] }
 0x6f8   : > { %4087 = vst [vmem:[#allocation1] ss:$9 sm:$0xff] %v14560_v47  ;;  %v14568_v47 = vld [vmem:[#allocation77_spill] sm:$0xff] }
 0x6f9   : > { %4088 = vst [vmem:[#allocation1 + $0x1] ss:$9 sm:$0xff] %v14562_v59  ;;  %v11466_v59 = vpop.f32.mrf.mxu3 }
 0x6fa   : > { %4089 = vst [vmem:[#allocation1 + $0x2] ss:$9 sm:$0xff] %v14563_v42  ;;  %v8256_v42 = vld [vmem:[%s13385_s1 + $0x1f8] sm:$0xff]  ;;  %v11474_v46 = vpop.f32.mrf.mxu0 }
 0x6fb   : > { %4090 = vst [vmem:[#allocation1 + $0x3] ss:$9 sm:$0xff] %v14565_v6  ;;  %4249 = vmatpush.bf16.msrb.mxu3 %v8256_v42  ;;  %v11476_v6 = vpop.f32.mrf.mxu2  ;;  %v14574_v42 = vld [vmem:[#allocation80_spill] sm:$0xff] }
 0x6fc   : > { %4091 = vst [vmem:[#allocation1 + $0x4] ss:$9 sm:$0xff] %v14566_v31  ;;  %v11481_v56 = vpop.f32.mrf.mxu1  ;;  %3643 = vmatmul.bf16.gmra.mxu1 %v11059_v21  ;;  %v14585_v21 = vld [vmem:[#allocation100_spill] sm:$0xff] }
 0x6fd   : > { %4092 = vst [vmem:[#allocation1 + $0x5] ss:$9 sm:$0xff] %v14567_v1  ;;  %v14573_v1 = vld [vmem:[#allocation79_spill] sm:$0xff] }
 0x6fe   : > { %4093 = vst [vmem:[#allocation1 + $0x6] ss:$9 sm:$0xff] %v14568_v47  ;;  %v2577_v47 = vadd.f32 %v11308_v16, %v2141_v10  ;;  %v14580_v10 = vld [vmem:[#allocation84_spill] sm:$0xff] }
 0x6ff   : > { %4094 = vst [vmem:[#allocation1 + $0x7] ss:$9 sm:$0xff] %v14569_v19  ;;  %4250 = vmatpush.bf16.msrb.mxu3 %v8255_v39  ;;  %v14576_v39 = vld [vmem:[#allocation81_spill] sm:$0xff] }
 0x700   : > { %14570 = vst [vmem:[#allocation54_spill] sm:$0xff] %v11481_v56  ;;  %v2893_v53 = vadd.f32 %v11340_v3, %v2577_v47  ;;  %v14582_v3 = vld [vmem:[#allocation99_spill] sm:$0xff] }
 0x701   : > { %v11487_v24 = vpop.f32.mrf.mxu3  ;;  %3929 = vmatmul.bf16.gmra.mxu2 %v11204_v22 }
 0x702   : > { %14572 = vst [vmem:[#allocation55_spill] sm:$0xff] %v11487_v24  ;;  %v11495_v19 = vpop.f32.mrf.mxu0  ;;  %v3246_v16 = vadd.f32 %v11356_v23, %v2893_v53 }
 0x703   : > { %14575 = vst [vmem:[#allocation56_spill] sm:$0xff] %v11495_v19  ;;  %4251 = vmatpush.bf16.msrb.mxu3 %v8254_v40  ;;  %v11500_v24 = vpop.f32.mrf.mxu2  ;;  %v14581_v40 = vld [vmem:[#allocation98_spill] sm:$0xff]  ;;  %v14590_v19 = vld [vmem:[#allocation103_spill] sm:$0xff] }
 0x704   : > { %14578 = vst [vmem:[#allocation57_spill] sm:$0xff] %v11500_v24  ;;  %v14588_v24 = vld [vmem:[#allocation102_spill] sm:$0xff] }
 0x706   : > { %v11485_v31 = vld [vmem:[#allocation1] sm:$0xff] }
 0x707   : > { %4096 = vst [vmem:[#allocation1] ss:$9 sm:$0xff] %v14573_v1  ;;  %v14579_v1 = vld [vmem:[#allocation83_spill] sm:$0xff]  ;;  %4252 = vmatpush.bf16.msrb.mxu3 %v8253_v62 }
 0x708   : > { %4097 = vst [vmem:[#allocation1 + $0x1] ss:$9 sm:$0xff] %v14574_v42  ;;  %v3604_v42 = vpop.f32.mrf.mxu1 }
 0x709   : > { %4098 = vst [vmem:[#allocation1 + $0x2] ss:$9 sm:$0xff] %v14576_v39  ;;  %v11509_v39 = vadd.f32 %v3594_v18, %v3246_v16  ;;  %v11512_v47 = vpop.f32.mrf.mxu3  ;;  %v8251_v18 = vld [vmem:[%s13385_s1 + $0x1d0] sm:$0xff]  ;;  %v14584_v16 = vld [vmem:[#allocation237_spill] sm:$0xff] }
 0x70a   : > { %4099 = vst [vmem:[#allocation1 + $0x3] ss:$9 sm:$0xff] %v14577_v35  ;;  %v8252_v35 = vld [vmem:[%s13385_s1 + $0x1d8] sm:$0xff]  ;;  %v11519_v23 = vpop.f32.mrf.mxu0 }
 0x70b   : > { %4100 = vst [vmem:[#allocation1 + $0x4] ss:$9 sm:$0xff] %v14579_v1  ;;  %4253 = vmatpush.bf16.msrb.mxu3 %v8252_v35  ;;  %v11521_v62 = vpop.f32.mrf.mxu2 }
 0x70c   : > { %4101 = vst [vmem:[#allocation1 + $0x5] ss:$9 sm:$0xff] %v14580_v10  ;;  %v2146_v10 = vadd.f32 %v11146_v36, %v14584_v16  ;;  %v14591_v16 = vld [vmem:[#allocation104_spill] sm:$0xff] }
 0x70d   : > { %4102 = vst [vmem:[#allocation1 + $0x6] ss:$9 sm:$0xff] %v14581_v40  ;;  %v8250_v40 = vld [vmem:[%s13385_s1 + $0x1c8] sm:$0xff] }
 0x70e   : > { %4103 = vst [vmem:[#allocation1 + $0x7] ss:$9 sm:$0xff] %v14582_v3  ;;  %v14587_v3 = vld [vmem:[#allocation101_spill] sm:$0xff]  ;;  %v2579_v35 = vadd.f32 %v11364_v12, %v2146_v10 }
 0x70f   : > { %4254 = vmatpush.bf16.msrb.mxu3 %v8251_v18 }
 0x710   : > { %v11526_v53 = vpop.f32.mrf.mxu1  ;;  %v2895_v36 = vadd.f32 %v11402_v33, %v2579_v35 }
 0x711   : > { %14583 = vst [vmem:[#allocation69_spill] sm:$0xff] %v11526_v53  ;;  %v11533_v22 = vpop.f32.mrf.mxu3  ;;  %3934 = vmatmul.bf16.gmra.mxu2 %v11235_v8  ;;  %v14601_v8 = vld [vmem:[#allocation121_spill] sm:$0xff] }
 0x712   : > { %14586 = vst [vmem:[#allocation212_spill] sm:$0xff] %v11533_v22  ;;  %v11541_v18 = vpop.f32.mrf.mxu0  ;;  %v8249_v22 = vld [vmem:[%s13385_s1 + $0x1c0] sm:$0xff]  ;;  %v3248_v12 = vadd.f32 %v11409_v17, %v2895_v36 }
 0x713   : > { %14589 = vst [vmem:[#allocation70_spill] sm:$0xff] %v11541_v18  ;;  %4255 = vmatpush.bf16.msrb.mxu3 %v8250_v40  ;;  %v14595_v40 = vld [vmem:[#allocation117_spill] sm:$0xff]  ;;  %v14604_v18 = vld [vmem:[#allocation123_spill] sm:$0xff] }
 0x714   : > { %v11556_v33 = vadd.f32 %v11460_v14, %v3248_v12  ;;  %v14599_v12 = vld [vmem:[#allocation120_spill] sm:$0xff] }
 0x715   : > { %v11528_v1 = vld [vmem:[#allocation1] sm:$0xff] }
 0x716   : > { %4105 = vst [vmem:[#allocation1] ss:$9 sm:$0xff] %v14585_v21  ;;  %v11546_v21 = vpop.f32.mrf.mxu2 }
 0x717   : > { %4106 = vst [vmem:[#allocation1 + $0x1] ss:$9 sm:$0xff] %v14587_v3  ;;  %v14593_v3 = vld [vmem:[#allocation107_spill] sm:$0xff]  ;;  %4256 = vmatpush.bf16.msrb.mxu3 %v8249_v22  ;;  %v14597_v22 = vld [vmem:[#allocation118_spill] sm:$0xff] }
 0x718   : > { %4107 = vst [vmem:[#allocation1 + $0x2] ss:$9 sm:$0xff] %v14588_v24  ;;  %v14594_v24 = vld [vmem:[#allocation115_spill] sm:$0xff]  ;;  %v3609_v10 = vpop.f32.mrf.mxu1 }
 0x719   : > { %4108 = vst [vmem:[#allocation1 + $0x3] ss:$9 sm:$0xff] %v14590_v19  ;;  %v11558_v19 = vpop.f32.mrf.mxu3 }
 0x71a   : > { %4109 = vst [vmem:[#allocation1 + $0x4] ss:$9 sm:$0xff] %v14591_v16  ;;  %4257 = vmatmul.bf16.vlgmr.msrb.gmra.mxu3 %v11446_v13  ;;  %v11562_v35 = vpop.f32.mrf.mxu0 }
 0x71b   : > { %14592 = vst [vmem:[#allocation71_spill] sm:$0xff] %v11546_v21 }
 0x71c   : > { %4110 = vst [vmem:[#allocation1 + $0x5] ss:$9 sm:$0xff] %v14593_v3  ;;  %v14598_v3 = vld [vmem:[#allocation246_spill] sm:$0xff] }
 0x71d   : > { %4111 = vst [vmem:[#allocation1 + $0x6] ss:$9 sm:$0xff] %v14594_v24  ;;  %v2151_v14 = vadd.f32 %v11172_v44, %v14598_v3  ;;  %v14607_v44 = vld [vmem:[#allocation134_spill] sm:$0xff] }
 0x71e   : > { %4112 = vst [vmem:[#allocation1 + $0x7] ss:$9 sm:$0xff] %v14595_v40  ;;  %v11564_v16 = vpop.f32.mrf.mxu2  ;;  %v14602_v40 = vld [vmem:[#allocation122_spill] sm:$0xff] }
 0x71f   : > { %v2581_v13 = vadd.f32 %v11412_v63, %v2151_v14 }
 0x720   : > { %v11568_v36 = vpop.f32.mrf.mxu1 }
 0x721   : > { %14596 = vst [vmem:[#allocation73_spill] sm:$0xff] %v11568_v36  ;;  %v11574_v24 = vpop.f32.mrf.mxu3  ;;  %v2897_v36 = vadd.f32 %v11430_v51, %v2581_v13  ;;  %3939 = vmatmul.bf16.gmra.mxu2 %v11269_v7 }
 0x722   : > { %14600 = vst [vmem:[#allocation72_spill] sm:$0xff] %v11574_v24  ;;  %v11579_v21 = vpop.f32.mrf.mxu0 }
 0x723   : > { %14603 = vst [vmem:[#allocation74_spill] sm:$0xff] %v11579_v21  ;;  %v3250_v3 = vadd.f32 %v11436_v37, %v2897_v36  ;;  %v14611_v36 = vld [vmem:[#allocation138_spill] sm:$0xff] }
 0x725   : > { %v11566_v17 = vld [vmem:[#allocation1] sm:$0xff]  ;;  %v11589_v63 = vadd.f32 %v3604_v42, %v3250_v3  ;;  %v2156_v42 = vadd.f32 %v11196_v0, %v11064_v57  ;;  %v14615_v3 = vld [vmem:[#allocation141_spill] sm:$0xff] }
 0x726   : > { %4114 = vst [vmem:[#allocation1] ss:$9 sm:$0xff] %v14597_v22  ;;  %v14605_v22 = vld [vmem:[#allocation125_spill] sm:$0xff]  ;;  %v11584_v53 = vpop.f32.mrf.mxu2 }
 0x727   : > { %4115 = vst [vmem:[#allocation1 + $0x1] ss:$9 sm:$0xff] %v14599_v12  ;;  %v14608_v12 = vld [vmem:[#allocation135_spill] sm:$0xff]  ;;  %v14620_v57 = vld [vmem:[#allocation153_spill] sm:$0xff] }
 0x728   : > { %4116 = vst [vmem:[#allocation1 + $0x2] ss:$9 sm:$0xff] %v14601_v8  ;;  %v3614_v8 = vpop.f32.mrf.mxu1 }
 0x729   : > { %4117 = vst [vmem:[#allocation1 + $0x3] ss:$9 sm:$0xff] %v14602_v40  ;;  %v11591_v14 = vpop.f32.mrf.mxu3  ;;  %v14609_v40 = vld [vmem:[#allocation137_spill] sm:$0xff] }
 0x72a   : > { %4118 = vst [vmem:[#allocation1 + $0x4] ss:$9 sm:$0xff] %v14604_v18  ;;  %4262 = vmatmul.bf16.gmra.mxu3 %v11485_v31  ;;  %v11595_v51 = vpop.f32.mrf.mxu0  ;;  %v14614_v31 = vld [vmem:[#allocation140_spill] sm:$0xff] }
 0x72b   : > { %4119 = vst [vmem:[#allocation1 + $0x5] ss:$9 sm:$0xff] %v14605_v22  ;;  %v14612_v22 = vld [vmem:[#allocation139_spill] sm:$0xff] }
 0x72c   : > { %14606 = vst [vmem:[#allocation75_spill] sm:$0xff] %v11584_v53 }
 0x72d   : > { %4120 = vst [vmem:[#allocation1 + $0x6] ss:$9 sm:$0xff] %v14607_v44  ;;  %v2583_v44 = vadd.f32 %v11438_v60, %v2156_v42 }
 0x72e   : > { %4121 = vst [vmem:[#allocation1 + $0x7] ss:$9 sm:$0xff] %v14608_v12  ;;  %v11597_v18 = vpop.f32.mrf.mxu2 }
 0x72f   : > { %v2899_v53 = vadd.f32 %v11466_v59, %v2583_v44 }
 0x730   : > { %v11602_v37 = vpop.f32.mrf.mxu1 }
 0x731   : > { %14610 = vst [vmem:[#allocation76_spill] sm:$0xff] %v11602_v37  ;;  %v11608_v7 = vpop.f32.mrf.mxu3  ;;  %v3252_v0 = vadd.f32 %v11474_v46, %v2899_v53  ;;  %3944 = vmatmul.bf16.gmra.mxu2 %v11305_v5  ;;  %v14622_v46 = vld [vmem:[#allocation155_spill] sm:$0xff]  ;;  %v2161_v5 = vadd.f32 %v11222_v54, %v11097_v4 }
 0x732   : > { %14613 = vst [vmem:[#allocation89_spill] sm:$0xff] %v11608_v7  ;;  %v11613_v12 = vpop.f32.mrf.mxu0 }
 0x733   : > { %14616 = vst [vmem:[#allocation8_spill] sm:$0xff] %v11613_v12 }
 0x735   : > { %v11599_v13 = vld [vmem:[#allocation1] sm:$0xff] }
 0x736   : > { %4123 = vst [vmem:[#allocation1] ss:$9 sm:$0xff] %v14609_v40  ;;  %v14617_v40 = vld [vmem:[#allocation143_spill] sm:$0xff]  ;;  %v11618_v21 = vpop.f32.mrf.mxu2 }
 0x737   : > { %4124 = vst [vmem:[#allocation1 + $0x1] ss:$9 sm:$0xff] %v14611_v36  ;;  %v14618_v36 = vld [vmem:[#allocation152_spill] sm:$0xff] }
 0x738   : > { %4125 = vst [vmem:[#allocation1 + $0x2] ss:$9 sm:$0xff] %v14612_v22  ;;  %v3619_v22 = vpop.f32.mrf.mxu1 }
 0x739   : > { %4126 = vst [vmem:[#allocation1 + $0x3] ss:$9 sm:$0xff] %v14614_v31  ;;  %v11622_v31 = vadd.f32 %v3609_v10, %v3252_v0  ;;  %v11624_v60 = vpop.f32.mrf.mxu3  ;;  %v14624_v10 = vld [vmem:[#allocation156_spill] sm:$0xff]  ;;  %v2585_v0 = vadd.f32 %v11476_v6, %v2161_v5 }
 0x73a   : > { %4127 = vst [vmem:[#allocation1 + $0x4] ss:$9 sm:$0xff] %v14615_v3  ;;  %4267 = vmatmul.bf16.gmra.mxu3 %v11528_v1  ;;  %v11628_v42 = vpop.f32.mrf.mxu0  ;;  %v14621_v3 = vld [vmem:[#allocation154_spill] sm:$0xff]  ;;  %v14625_v1 = vld [vmem:[#allocation157_spill] sm:$0xff] }
 0x73b   : > { %4128 = vst [vmem:[#allocation1 + $0x5] ss:$9 sm:$0xff] %v14617_v40 }
 0x73c   : > { %4129 = vst [vmem:[#allocation1 + $0x6] ss:$9 sm:$0xff] %v14618_v36 }
 0x73d   : > { %14619 = vst [vmem:[#allocation90_spill] sm:$0xff] %v11618_v21 }
 0x73e   : > { %4130 = vst [vmem:[#allocation1 + $0x7] ss:$9 sm:$0xff] %v14620_v57  ;;  %v3905_v44 = vpop.f32.mrf.mxu2  ;;  %v14627_v57 = vld [vmem:[#allocation159_spill] sm:$0xff] }
 0x73f   : > { %v11634_v40 = vadd.f32 %v3905_v44, %v11463_v30  ;;  %v14630_v44 = vld [vmem:[#allocation172_spill] sm:$0xff] }
 0x740   : > { %v11637_v53 = vpop.f32.mrf.mxu1 }
 0x741   : > { %14623 = vst [vmem:[#allocation221_spill] sm:$0xff] %v11637_v53  ;;  %v11643_v36 = vpop.f32.mrf.mxu3  ;;  %3949 = vmatmul.bf16.gmra.mxu2 %v11354_v38  ;;  %v14697_v53 = vld [vmem:[#allocation87_spill] sm:$0xff] }
 0x742   : > { %14626 = vst [vmem:[#allocation92_spill] sm:$0xff] %v11643_v36  ;;  %v11648_v30 = vpop.f32.mrf.mxu0 }
 0x743   : > { %14629 = vst [vmem:[#allocation93_spill] sm:$0xff] %v11648_v30 }
 0x745   : > { %v11630_v59 = vld [vmem:[#allocation1] sm:$0xff] }
 0x746   : > { %4132 = vst [vmem:[#allocation1] ss:$9 sm:$0xff] %v14621_v3  ;;  %v14628_v3 = vld [vmem:[#allocation161_spill] sm:$0xff]  ;;  %v11653_v21 = vpop.f32.mrf.mxu2 }
 0x747   : > { %4133 = vst [vmem:[#allocation1 + $0x1] ss:$9 sm:$0xff] %v14622_v46  ;;  %v2901_v46 = vadd.f32 %v11512_v47, %v2585_v0  ;;  %v14634_v0 = vld [vmem:[#allocation175_spill] sm:$0xff] }
 0x748   : > { %4134 = vst [vmem:[#allocation1 + $0x2] ss:$9 sm:$0xff] %v14624_v10  ;;  %v14631_v10 = vld [vmem:[#allocation173_spill] sm:$0xff]  ;;  %v3624_v54 = vpop.f32.mrf.mxu1 }
 0x749   : > { %4135 = vst [vmem:[#allocation1 + $0x3] ss:$9 sm:$0xff] %v14625_v1  ;;  %v3254_v4 = vadd.f32 %v11519_v23, %v2901_v46  ;;  %v2877_v6 = vpop.f32.mrf.mxu3  ;;  %v2166_v46 = vadd.f32 %v11259_v34, %v11129_v45 }
 0x74a   : > { %4136 = vst [vmem:[#allocation1 + $0x4] ss:$9 sm:$0xff] %v14627_v57  ;;  %4272 = vmatmul.bf16.gmra.mxu3 %v11566_v17  ;;  %v14633_v57 = vld [vmem:[#allocation174_spill] sm:$0xff]  ;;  %v14637_v17 = vld [vmem:[#allocation177_spill] sm:$0xff] }
 0x74b   : > { %4137 = vst [vmem:[#allocation1 + $0x5] ss:$9 sm:$0xff] %v14628_v3  ;;  %v11656_v1 = vadd.f32 %v3614_v8, %v3254_v4  ;;  %v3230_v3 = vpop.f32.mrf.mxu0  ;;  %v14635_v8 = vld [vmem:[#allocation176_spill] sm:$0xff]  ;;  %v14638_v4 = vld [vmem:[#allocation178_spill] sm:$0xff] }
 0x74c   : > { %4138 = vst [vmem:[#allocation1 + $0x6] ss:$9 sm:$0xff] %v14630_v44  ;;  %v2181_v44 = vadd.f32 %v11124_v27, %v11202_v25  ;;  %v2587_v27 = vadd.f32 %v11521_v62, %v2166_v46  ;;  %v14647_v46 = vld [vmem:[#allocation193_spill] sm:$0xff] }
 0x74d   : > { %4139 = vst [vmem:[#allocation1 + $0x7] ss:$9 sm:$0xff] %v14631_v10 }
 0x74e   : > { %14632 = vst [vmem:[#allocation94_spill] sm:$0xff] %v11653_v21  ;;  %v3910_v47 = vpop.f32.mrf.mxu2  ;;  %v2593_v10 = vadd.f32 %v11199_v48, %v2181_v44  ;;  %v14716_v21 = vld [vmem:[#allocation150_spill] sm:$0xff] }
 0x74f   : > { %v11667_v23 = vadd.f32 %v3910_v47, %v11509_v39  ;;  %v14640_v39 = vld [vmem:[#allocation189_spill] sm:$0xff]  ;;  %v14641_v47 = vld [vmem:[#allocation190_spill] sm:$0xff] }
 0x750   : > { %v11670_v38 = vpop.f32.mrf.mxu1  ;;  %v2909_v25 = vadd.f32 %v2877_v6, %v2593_v10  ;;  %v14646_v6 = vld [vmem:[#allocation192_spill] sm:$0xff] }
 0x751   : > { %14636 = vst [vmem:[#allocation95_spill] sm:$0xff] %v11670_v38  ;;  %3954 = vmatmul.bf16.gmra.mxu2 %v11404_v50  ;;  %v14694_v38 = vld [vmem:[#allocation86_spill] sm:$0xff] }
 0x753   : > { %v11687_v48 = vpop.f32.mrf.mxu0 }
 0x754   : > { %v11660_v5 = vld [vmem:[#allocation1] sm:$0xff]  ;;  %14644 = vst [vmem:[#allocation105_spill] sm:$0xff] %v11687_v48 }
 0x755   : > { %4141 = vst [vmem:[#allocation1] ss:$9 sm:$0xff] %v14633_v57  ;;  %v14639_v57 = vld [vmem:[#allocation179_spill] sm:$0xff] }
 0x756   : > { %4142 = vst [vmem:[#allocation1 + $0x1] ss:$9 sm:$0xff] %v14634_v0  ;;  %v2903_v0 = vadd.f32 %v11558_v19, %v2587_v27  ;;  %v11684_v30 = vpop.f32.mrf.mxu2  ;;  %v14645_v19 = vld [vmem:[#allocation191_spill] sm:$0xff] }
 0x757   : > { %4143 = vst [vmem:[#allocation1 + $0x2] ss:$9 sm:$0xff] %v14635_v8  ;;  %v3262_v8 = vadd.f32 %v3230_v3, %v2909_v25  ;;  %v14651_v25 = vld [vmem:[#allocation196_spill] sm:$0xff] }
 0x758   : > { %4144 = vst [vmem:[#allocation1 + $0x3] ss:$9 sm:$0xff] %v14637_v17  ;;  %v11682_v17 = vpop.f32.mrf.mxu3  ;;  %v3256_v45 = vadd.f32 %v11562_v35, %v2903_v0  ;;  %v11689_v34 = vpop.f32.mrf.mxu1  ;;  %v2186_v35 = vadd.f32 %v11150_v15, %v11230_v49 }
 0x759   : > { %4145 = vst [vmem:[#allocation1 + $0x4] ss:$9 sm:$0xff] %v14638_v4 }
 0x75a   : > { %4146 = vst [vmem:[#allocation1 + $0x5] ss:$9 sm:$0xff] %v14639_v57  ;;  %v11691_v44 = vadd.f32 %v3619_v22, %v3256_v45  ;;  %4277 = vmatmul.bf16.gmra.mxu3 %v11599_v13  ;;  %v14648_v22 = vld [vmem:[#allocation194_spill] sm:$0xff]  ;;  %v14650_v13 = vld [vmem:[#allocation195_spill] sm:$0xff]  ;;  %v2171_v57 = vadd.f32 %v11296_v32, %v11154_v55  ;;  %v2595_v27 = vadd.f32 %v11224_v9, %v2186_v35 }
 0x75b   : > { %4147 = vst [vmem:[#allocation1 + $0x6] ss:$9 sm:$0xff] %v14640_v39  ;;  %v3235_v39 = vpop.f32.mrf.mxu0  ;;  %v14658_v35 = vld [vmem:[#allocation219_spill] sm:$0xff] }
 0x75c   : > { %4148 = vst [vmem:[#allocation1 + $0x7] ss:$9 sm:$0xff] %v14641_v47  ;;  %v14652_v47 = vld [vmem:[#allocation198_spill] sm:$0xff]  ;;  %v2589_v15 = vadd.f32 %v11564_v16, %v2171_v57  ;;  %v2176_v57 = vadd.f32 %v11334_v26, %v11179_v52  ;;  %v3997_v26 = vshrl.u32 %v11346_v41, 16  ;;  %v4001_v52 = vshll.u32 %v11350_v11, 16 }
 0x75d   : > { %14642 = vst [vmem:[#allocation96_spill] sm:$0xff] %v11682_v17  ;;  %v14656_v16 = vld [vmem:[#allocation218_spill] sm:$0xff] }
 0x75e   : > { %14643 = vst [vmem:[#allocation97_spill] sm:$0xff] %v11684_v30  ;;  %v3915_v3 = vpop.f32.mrf.mxu2  ;;  %v2905_v0 = vadd.f32 %v11591_v14, %v2589_v15  ;;  %v3994_v15 = vshll.u32 %v11346_v41, 16  ;;  %v14704_v30 = vld [vmem:[#allocation116_spill] sm:$0xff] }
 0x75f   : > { %v11703_v10 = vadd.f32 %v3915_v3, %v11556_v33  ;;  %v14653_v33 = vld [vmem:[#allocation199_spill] sm:$0xff] }
 0x760   : > { %v2882_v50 = vpop.f32.mrf.mxu3  ;;  %v11706_v4 = vpop.f32.mrf.mxu1 }
 0x761   : > { %14649 = vst [vmem:[#allocation7_spill] sm:$0xff] %v11706_v4  ;;  %v2911_v49 = vadd.f32 %v2882_v50, %v2595_v27  ;;  %3959 = vmatmul.bf16.gmra.mxu2 %v11418_v43  ;;  %v14661_v43 = vld [vmem:[#allocation14_spill] sm:$0xff] }
 0x763   : > { %v11695_v62 = vld [vmem:[#allocation1] sm:$0xff]  ;;  %v3264_v45 = vadd.f32 %v3235_v39, %v2911_v49  ;;  %v11731_v14 = vpop.f32.mrf.mxu0 }
 0x764   : > { %4150 = vst [vmem:[#allocation1] ss:$9 sm:$0xff] %v14645_v19 }
 0x765   : > { %4151 = vst [vmem:[#allocation1 + $0x1] ss:$9 sm:$0xff] %v14646_v6  ;;  %v3258_v6 = vadd.f32 %v11595_v51, %v2905_v0  ;;  %v14659_v51 = vld [vmem:[#allocation223_spill] sm:$0xff] }
 0x766   : > { %4152 = vst [vmem:[#allocation1 + $0x2] ss:$9 sm:$0xff] %v14647_v46  ;;  %v11717_v19 = vpop.f32.mrf.mxu2 }
 0x767   : > { %4153 = vst [vmem:[#allocation1 + $0x3] ss:$9 sm:$0xff] %v14648_v22  ;;  %v11720_v32 = vadd.f32 %v3624_v54, %v3258_v6  ;;  %v14660_v22 = vld [vmem:[#allocation224_spill] sm:$0xff]  ;;  %v4004_v6 = vshrl.u32 %v11350_v11, 16 }
 0x768   : > { %4154 = vst [vmem:[#allocation1 + $0x4] ss:$9 sm:$0xff] %v14650_v13  ;;  %v3634_v55 = vpop.f32.mrf.mxu1  ;;  %v11724_v3 = vpop.f32.mrf.mxu3  ;;  %v14663_v13 = vld [vmem:[#allocation15_spill] sm:$0xff] }
 0x769   : > { %4155 = vst [vmem:[#allocation1 + $0x5] ss:$9 sm:$0xff] %v14651_v25  ;;  %v11722_v9 = vadd.f32 %v3634_v55, %v3262_v8  ;;  %v2191_v8 = vadd.f32 %v11176_v28, %v11267_v58  ;;  %v14664_v25 = vld [vmem:[#allocation16_spill] sm:$0xff]  ;;  %v2591_v28 = vadd.f32 %v11597_v18, %v2176_v57  ;;  %v4008_v55 = vshll.u32 %v11358_v20, 16  ;;  %v14670_v57 = vld [vmem:[#allocation243_spill] sm:$0xff] }
 0x76a   : > { %4156 = vst [vmem:[#allocation1 + $0x6] ss:$9 sm:$0xff] %v14652_v47  ;;  %4282 = vmatmul.bf16.gmra.mxu3 %v11630_v59  ;;  %v14665_v47 = vld [vmem:[#allocation17_spill] sm:$0xff] }
 0x76b   : > { %4157 = vst [vmem:[#allocation1 + $0x7] ss:$9 sm:$0xff] %v14653_v33  ;;  %v2597_v27 = vadd.f32 %v11261_v29, %v2191_v8  ;;  %v3240_v49 = vpop.f32.mrf.mxu0  ;;  %v2907_v33 = vadd.f32 %v11624_v60, %v2591_v28  ;;  %v14671_v28 = vld [vmem:[#allocation34_spill] sm:$0xff] }
 0x76c   : > { %14654 = vst [vmem:[#allocation106_spill] sm:$0xff] %v11717_v19 }
 0x76d   : > { %14655 = vst [vmem:[#allocation108_spill] sm:$0xff] %v11724_v3  ;;  %v3260_v18 = vadd.f32 %v11628_v42, %v2907_v33  ;;  %v4003_v42 = vsel %vm8782_vm5, %v3997_v26, %v4001_v52  ;;  %v8264_v52 = vld [vmem:[%s13385_s1 + $0x238] sm:$0xff] }
 0x76e   : > { %14657 = vst [vmem:[#allocation222_spill] sm:$0xff] %v11731_v14  ;;  %v3920_v54 = vpop.f32.mrf.mxu2  ;;  %4653 = vmatpush.bf16.msra.mxu0 %v8264_v52  ;;  %v14679_v52 = vld [vmem:[#allocation27_spill] sm:$0xff]  ;;  %v14690_v14 = vld [vmem:[#allocation60_spill] sm:$0xff]  ;;  %v14691_v3 = vld [vmem:[#allocation85_spill] sm:$0xff] }
 0x76f   : > { %v11739_v50 = vadd.f32 %v3920_v54, %v11589_v63  ;;  %v3990_v63 = vshrl.u32 %v11344_v61, 16 }
 0x770   : > { %v11742_v59 = vpop.f32.mrf.mxu1  ;;  %v2887_v39 = vpop.f32.mrf.mxu3 }
 0x771   : > { %14662 = vst [vmem:[#allocation109_spill] sm:$0xff] %v11742_v59  ;;  %v2913_v58 = vadd.f32 %v2887_v39, %v2597_v27  ;;  %v3996_v61 = vsel %vm8782_vm5, %v3990_v63, %v3994_v15  ;;  %v4029_v27 = vshll.u32 %v14670_v57, 16  ;;  %v4010_v39 = vsel %vm8782_vm5, %v4004_v6, %v4008_v55  ;;  %v14673_v15 = vld [vmem:[#allocation247_spill] sm:$0xff] }
 0x772   : > { %v11726_v46 = vld [vmem:[#allocation1] sm:$0xff] }
 0x773   : > { %4159 = vst [vmem:[#allocation1] ss:$9 sm:$0xff] %v14656_v16  ;;  %v3266_v0 = vadd.f32 %v3240_v49, %v2913_v58  ;;  %v14672_v58 = vld [vmem:[#allocation18_spill] sm:$0xff]  ;;  %v3242_v63 = vpop.f32.mrf.mxu0  ;;  %v14674_v49 = vrot.slane %v14673_v15, 3 }
 0x774   : > { %4160 = vst [vmem:[#allocation1 + $0x1] ss:$9 sm:$0xff] %v14658_v35  ;;  %v4011_v35 = vshrl.u32 %v11358_v20, 16 }
 0x775   : > { %4161 = vst [vmem:[#allocation1 + $0x2] ss:$9 sm:$0xff] %v14659_v51  ;;  %v14668_v51 = vld [vmem:[#allocation241_spill] sm:$0xff]  ;;  %v3987_v33 = vsel %vm582_vm2, %v14673_v15, %v14674_v49 }
 0x776   : > { %4162 = vst [vmem:[#allocation1 + $0x3] ss:$9 sm:$0xff] %v14660_v22  ;;  %v11756_v29 = vpop.f32.mrf.mxu2  ;;  %v4015_v60 = vshll.u32 %v14668_v51, 16  ;;  %v4018_v41 = vshrl.u32 %v14668_v51, 16  ;;  %v14669_v22 = vld [vmem:[#allocation242_spill] sm:$0xff] }
 0x777   : > { %4163 = vst [vmem:[#allocation1 + $0x4] ss:$9 sm:$0xff] %v14661_v43  ;;  %v4022_v8 = vshll.u32 %v14669_v22, 16  ;;  %v11768_v43 = vadd.f32 %v11689_v34, %v3260_v18  ;;  %v4036_v34 = vshll.u32 %v14671_v28, 16  ;;  %v8263_v18 = vld [vmem:[%s13385_s1 + $0x230] sm:$0xff] }
 0x778   : > { %4164 = vst [vmem:[#allocation1 + $0x5] ss:$9 sm:$0xff] %v14663_v13  ;;  %v3639_v54 = vpop.f32.mrf.mxu1  ;;  %v4025_v13 = vshrl.u32 %v14669_v22, 16  ;;  %4654 = vmatpush.bf16.msra.mxu0 %v8263_v18  ;;  %v8262_v22 = vld [vmem:[%s13385_s1 + $0x228] sm:$0xff] }
 0x779   : > { %4165 = vst [vmem:[#allocation1 + $0x6] ss:$9 sm:$0xff] %v14664_v25  ;;  %v11770_v11 = vadd.f32 %v3639_v54, %v3264_v45  ;;  %v2889_v25 = vpop.f32.mrf.mxu3  ;;  %v4017_v45 = vsel %vm8782_vm5, %v4011_v35, %v4015_v60  ;;  %v4024_v26 = vsel %vm8782_vm5, %v4018_v41, %v4022_v8  ;;  %v3989_v35 = vrot.slane %v3987_v33, 1  ;;  %v14676_v54 = vld [vmem:[#allocation35_spill] sm:$0xff] }
 0x77a   : > { %4166 = vst [vmem:[#allocation1 + $0x7] ss:$9 sm:$0xff] %v14665_v47  ;;  %v4032_v47 = vshrl.u32 %v14670_v57, 16  ;;  %4287 = vmatmul.bf16.gmra.mxu3 %v11660_v5  ;;  %v4031_v5 = vsel %vm8782_vm5, %v4025_v13, %v4029_v27  ;;  %v4039_v60 = vshrl.u32 %v14671_v28, 16  ;;  %v4043_v41 = vshll.u32 %v14676_v54, 16  ;;  %v8261_v57 = vld [vmem:[%s13385_s1 + $0x220] sm:$0xff] }
 0x77b   : > { %14666 = vst [vmem:[#allocation110_spill] sm:$0xff] %v11756_v29  ;;  %v4046_v8 = vshrl.u32 %v14676_v54, 16  ;;  %v8260_v28 = vld [vmem:[%s13385_s1 + $0x218] sm:$0xff] }
 0x77c   : > { %v4038_v55 = vsel %vm8782_vm5, %v4032_v47, %v4036_v34  ;;  %v4045_v13 = vsel %vm8782_vm5, %v4039_v60, %v4043_v41  ;;  %4655 = vmatpush.bf16.msra.mxu0 %v8262_v22  ;;  %v14678_v34 = vld [vmem:[#allocation29_spill] sm:$0xff]  ;;  %v14682_v41 = vld [vmem:[#allocation58_spill] sm:$0xff] }
 0x77e   : > { %v3925_v6 = vpop.f32.mrf.mxu2 }
 0x780   : > { %v11805_v51 = vpop.f32.mrf.mxu1  ;;  %4656 = vmatpush.bf16.msra.mxu0 %v8261_v57  ;;  %v8258_v57 = vld [vmem:[%s13385_s1 + $0x208] sm:$0xff] }
 0x781   : > { %v11776_v20 = vld [vmem:[#allocation1] sm:$0xff]  ;;  %14675 = vst [vmem:[#allocation113_spill] sm:$0xff] %v11805_v51 }
 0x782   : > { %4168 = vst [vmem:[#allocation1] ss:$9 sm:$0xff] %v14672_v58 }
 0x783   : > { %4170 = vst [vmem:[#allocation1 + $0x1] ss:$9 sm:$0xff] %v3996_v61  ;;  %v11803_v61 = vadd.f32 %v3925_v6, %v11622_v31 }
 0x784   : > { %4172 = vst [vmem:[#allocation1 + $0x2] ss:$9 sm:$0xff] %v4003_v42  ;;  %v4051_v42 = vshll.u32 %v3989_v35, 16  ;;  %4657 = vmatpush.bf16.msra.mxu0 %v8260_v28 }
 0x785   : > { %4174 = vst [vmem:[#allocation1 + $0x3] ss:$9 sm:$0xff] %v4010_v39 }
 0x786   : > { %4176 = vst [vmem:[#allocation1 + $0x4] ss:$9 sm:$0xff] %v4017_v45  ;;  %v11813_v31 = vpop.f32.mrf.mxu2  ;;  %v4053_v27 = vsel %vm8782_vm5, %v4046_v8, %v4051_v42  ;;  %v14683_v42 = vld [vmem:[#allocation37_spill] sm:$0xff]  ;;  %vm12468_vm5 = vmor %vm5782_vm12, %vm5783_vm13 }
 0x787   : > { %4178 = vst [vmem:[#allocation1 + $0x5] ss:$9 sm:$0xff] %v4024_v26 }
 0x788   : > { %4180 = vst [vmem:[#allocation1 + $0x6] ss:$9 sm:$0xff] %v4031_v5  ;;  %v3644_v25 = vpop.f32.mrf.mxu1 }
 0x789   : > { %4182 = vst [vmem:[#allocation1 + $0x7] ss:$9 sm:$0xff] %v4038_v55  ;;  %v11824_v47 = vadd.f32 %v3644_v25, %v3266_v0  ;;  %v8259_v0 = vld [vmem:[%s13385_s1 + $0x210] sm:$0xff] }
 0x78a   : > { %14677 = vst [vmem:[#allocation112_spill] sm:$0xff] %v11813_v31  ;;  %4292 = vmatmul.bf16.gmra.mxu3 %v11695_v62  ;;  %4658 = vmatpush.bf16.msra.mxu0 %v8259_v0  ;;  %v14701_v31 = vld [vmem:[#allocation91_spill] sm:$0xff] }
 0x78e   : > { %v3930_v58 = vpop.f32.mrf.mxu2  ;;  %4659 = vmatpush.bf16.msra.mxu0 %v8258_v57 }
 0x78f   : > { %v11832_v16 = vadd.f32 %v3930_v58, %v11656_v1  ;;  %v14680_v1 = vld [vmem:[#allocation40_spill] sm:$0xff]  ;;  %v14685_v58 = vld [vmem:[#allocation67_spill] sm:$0xff] }
 0x790   : > { %v11822_v39 = vld [vmem:[#allocation1] sm:$0xff]  ;;  %v3646_v45 = vpop.f32.mrf.mxu1 }
 0x791   : > { %4185 = vst [vmem:[#allocation1] ss:$9 sm:$0xff] %v4045_v13 }
 0x792   : > { %4187 = vst [vmem:[#allocation1 + $0x1] ss:$9 sm:$0xff] %v4053_v27 }
 0x793   : > { %4341 = vst [vmem:[#allocation1 + $0x20] sm:$0xff] %v14678_v34 }
 0x796   : > { %v11849_v5 = vpop.f32.mrf.mxu2 }
 0x797   : > { %14681 = vst [vmem:[#allocation114_spill] sm:$0xff] %v11849_v5  ;;  %v14698_v5 = vld [vmem:[#allocation111_spill] sm:$0xff] }
 0x799   : > { %v11837_v63 = vld [vmem:[#allocation1] sm:$0xff] }
 0x79a   : > { %v11839_v49 = vld [vmem:[#allocation1 + $0x20] ss:$4 sm:$0xff]  ;;  %v11841_v62 = vld [vmem:[#allocation1 + $0x21] ss:$4 sm:$0xff]  ;;  %v11843_v33 = vld [vmem:[#allocation1 + $0x22] ss:$4 sm:$0xff]  ;;  %4297 = vmatmul.bf16.gmra.mxu3 %v11726_v46 }
 0x79b   : > { %v11845_v26 = vld [vmem:[#allocation1 + $0x23] ss:$4 sm:$0xff]  ;;  %4340 = vst [vmem:[#allocation1] sm:$0xff] %v14679_v52 }
 0x79c   : > { %4359 = vst [vmem:[#allocation1 + $0x20] sm:$0xff] %v14680_v1 }
 0x79d   : > { %v4258_v8 = vpop.f32.mrf.mxu3 }
 0x79e   : > { %v3935_v22 = vpop.f32.mrf.mxu2  ;;  %v11870_v13 = vadd.f32 %v4258_v8, %v11634_v40  ;;  %v14688_v40 = vld [vmem:[#allocation43_spill] sm:$0xff] }
 0x79f   : > { %v11867_v46 = vadd.f32 %v3935_v22, %v11691_v44 }
 0x7a0   : > { %14684 = vst [vmem:[#allocation124_spill] sm:$0xff] %v11870_v13  ;;  %v14708_v13 = vld [vmem:[#allocation136_spill] sm:$0xff] }
 0x7a2   : > { %v11852_v6 = vld [vmem:[#allocation1 + $0x1] ss:$4 sm:$0xff]  ;;  %v11854_v55 = vld [vmem:[#allocation1 + $0x2] ss:$4 sm:$0xff]  ;;  %v11856_v18 = vld [vmem:[#allocation1 + $0x3] ss:$4 sm:$0xff] }
 0x7a3   : > { %v11858_v35 = vld [vmem:[#allocation1 + $0x21] ss:$4 sm:$0xff]  ;;  %v11860_v60 = vld [vmem:[#allocation1 + $0x22] ss:$4 sm:$0xff]  ;;  %v11862_v54 = vld [vmem:[#allocation1 + $0x23] ss:$4 sm:$0xff] }
 0x7a4   : > { %4364 = vst [vmem:[#allocation1 + $0x20] sm:$0xff] %v14682_v41 }
 0x7a5   : > { %4356 = vst [vmem:[#allocation1] sm:$0xff] %v14683_v42  ;;  %v11886_v0 = vpop.f32.mrf.mxu3 }
 0x7a6   : > { %v11884_v44 = vpop.f32.mrf.mxu2  ;;  %14687 = vst [vmem:[#allocation203_spill] sm:$0xff] %v11886_v0 }
 0x7a7   : > { %14686 = vst [vmem:[#allocation126_spill] sm:$0xff] %v11884_v44 }
 0x7aa   : > { %4302 = vmatmul.bf16.gmra.mxu3 %v11776_v20 }
 0x7ab   : > { %v11875_v27 = vld [vmem:[#allocation1 + $0x20] ss:$4 sm:$0xff]  ;;  %v11877_v25 = vld [vmem:[#allocation1 + $0x21] ss:$4 sm:$0xff] }
 0x7ac   : > { %v11879_v28 = vld [vmem:[#allocation1] ss:$4 sm:$0xff]  ;;  %v11881_v34 = vld [vmem:[#allocation1 + $0x1] ss:$4 sm:$0xff]  ;;  %4372 = vst [vmem:[#allocation1 + $0x20] sm:$0xff] %v14685_v58 }
 0x7ad   : > { %4363 = vst [vmem:[#allocation1] sm:$0xff] %v14688_v40  ;;  %v4263_v57 = vpop.f32.mrf.mxu3 }
 0x7ae   : > { %v3940_v42 = vpop.f32.mrf.mxu2  ;;  %v11910_v40 = vadd.f32 %v4263_v57, %v11667_v23  ;;  %v8257_v23 = vld [vmem:[%s13385_s1 + $0x200] sm:$0xff] }
 0x7af   : > { %v11907_v20 = vadd.f32 %v3940_v42, %v11720_v32  ;;  %4660 = vmatpush.bf16.msra.mxu0 %v8257_v23  ;;  %v14695_v42 = vld [vmem:[#allocation88_spill] sm:$0xff]  ;;  %v8272_v23 = vld [vmem:[%s13387_s3 + $0x38] sm:$0xff] }
 0x7b0   : > { %14689 = vst [vmem:[#allocation127_spill] sm:$0xff] %v11910_v40  ;;  %5725 = vmatpush.bf16.msra.mxu2 %v8272_v23 }
 0x7b3   : > { %v11890_v45 = vld [vmem:[#allocation1 + $0x20] ss:$4 sm:$0xff]  ;;  %v11892_v52 = vld [vmem:[#allocation1 + $0x21] ss:$4 sm:$0xff]  ;;  %v11894_v1 = vld [vmem:[#allocation1 + $0x22] ss:$4 sm:$0xff] }
 0x7b4   : > { %v11896_v41 = vld [vmem:[#allocation1] ss:$4 sm:$0xff]  ;;  %v11898_v22 = vld [vmem:[#allocation1 + $0x1] ss:$4 sm:$0xff]  ;;  %v11900_v8 = vld [vmem:[#allocation1 + $0x2] ss:$4 sm:$0xff] }
 0x7b5   : > { %v11902_v58 = vld [vmem:[#allocation1 + $0x3] ss:$4 sm:$0xff]  ;;  %v11916_v48 = vpop.f32.mrf.mxu3 }
 0x7b6   : > { %v11904_v51 = vld [vmem:[#allocation1 + $0x23] ss:$4 sm:$0xff]  ;;  %4371 = vst [vmem:[#allocation1] sm:$0xff] %v14690_v14  ;;  %v11914_v59 = vpop.f32.mrf.mxu2 }
 0x7b7   : > { %4383 = vst [vmem:[#allocation1 + $0x20] sm:$0xff] %v14691_v3 }
 0x7b8   : > { %14692 = vst [vmem:[#allocation128_spill] sm:$0xff] %v11914_v59 }
 0x7b9   : > { %14693 = vst [vmem:[#allocation217_spill] sm:$0xff] %v11916_v48 }
 0x7ba   : > { %4307 = vmatmul.bf16.gmra.mxu3 %v11822_v39 }
 0x7bd   : > { %v11918_v17 = vld [vmem:[#allocation1 + $0x1] ss:$4 sm:$0xff]  ;;  %v11920_v4 = vld [vmem:[#allocation1 + $0x2] ss:$4 sm:$0xff]  ;;  %v11922_v36 = vld [vmem:[#allocation1 + $0x3] ss:$4 sm:$0xff]  ;;  %v4268_v59 = vpop.f32.mrf.mxu3 }
 0x7be   : > { %4380 = vst [vmem:[#allocation1] sm:$0xff] %v14694_v38  ;;  %v11928_v32 = vld [vmem:[#allocation1 + $0x21] ss:$4 sm:$0xff]  ;;  %v11930_v14 = vld [vmem:[#allocation1 + $0x22] ss:$4 sm:$0xff]  ;;  %v3945_v57 = vpop.f32.mrf.mxu2  ;;  %v11944_v44 = vadd.f32 %v4268_v59, %v11703_v10 }
 0x7bf   : > { %v11932_v3 = vld [vmem:[#allocation1 + $0x23] ss:$4 sm:$0xff]  ;;  %v11941_v7 = vadd.f32 %v3945_v57, %v11768_v43 }
 0x7c0   : > { %4388 = vst [vmem:[#allocation1 + $0x20] sm:$0xff] %v14695_v42  ;;  %v8280_v59 = vld [vmem:[%s13387_s3 + $0x78] sm:$0xff] }
 0x7c1   : > { %14696 = vst [vmem:[#allocation129_spill] sm:$0xff] %v11944_v44  ;;  %5580 = vmatpush.bf16.msra.mxu1 %v8280_v59 }
 0x7c5   : > { %v11936_v12 = vld [vmem:[#allocation1] ss:$4 sm:$0xff]  ;;  %v11938_v38 = vld [vmem:[#allocation1 + $0x1] ss:$4 sm:$0xff]  ;;  %v11957_v43 = vpop.f32.mrf.mxu3 }
 0x7c6   : > { %4387 = vst [vmem:[#allocation1] sm:$0xff] %v14697_v53  ;;  %v11955_v37 = vpop.f32.mrf.mxu2 }
 0x7c7   : > { %v11950_v42 = vld [vmem:[#allocation1 + $0x20] ss:$4 sm:$0xff]  ;;  %v11952_v39 = vld [vmem:[#allocation1 + $0x21] ss:$4 sm:$0xff]  ;;  %14699 = vst [vmem:[#allocation130_spill] sm:$0xff] %v11955_v37 }
 0x7c8   : > { %4396 = vst [vmem:[#allocation1 + $0x20] sm:$0xff] %v14698_v5 }
 0x7c9   : > { %14700 = vst [vmem:[#allocation133_spill] sm:$0xff] %v11957_v43 }
 0x7ca   : > { %4312 = vmatmul.bf16.gmra.mxu3 %v11837_v63 }
 0x7cd   : > { %v11959_v57 = vld [vmem:[#allocation1] ss:$4 sm:$0xff]  ;;  %v11961_v10 = vld [vmem:[#allocation1 + $0x1] ss:$4 sm:$0xff]  ;;  %v11963_v53 = vld [vmem:[#allocation1 + $0x2] ss:$4 sm:$0xff]  ;;  %v4273_v19 = vpop.f32.mrf.mxu3 }
 0x7ce   : > { %v11968_v24 = vld [vmem:[#allocation1 + $0x3] ss:$4 sm:$0xff]  ;;  %v3950_v43 = vpop.f32.mrf.mxu2 }
 0x7cf   : > { %4395 = vst [vmem:[#allocation1] sm:$0xff] %v14701_v31  ;;  %v11971_v23 = vld [vmem:[#allocation1 + $0x20] ss:$4 sm:$0xff]  ;;  %v11973_v5 = vld [vmem:[#allocation1 + $0x21] ss:$4 sm:$0xff]  ;;  %v11982_v56 = vadd.f32 %v3950_v43, %v11722_v9  ;;  %v11985_v31 = vadd.f32 %v4273_v19, %v11739_v50 }
 0x7d0   : > { %v11975_v37 = vld [vmem:[#allocation1 + $0x22] ss:$4 sm:$0xff]  ;;  %v11977_v29 = vld [vmem:[#allocation1 + $0x23] ss:$4 sm:$0xff] }
 0x7d1   : > { %4407 = vst [vmem:[#allocation1 + $0x20] sm:$0xff] %v14702_v2 }
 0x7d2   : > { %14703 = vst [vmem:[#allocation132_spill] sm:$0xff] %v11985_v31  ;;  %v14713_v31 = vld [vmem:[#allocation131_spill] sm:$0xff] }
 0x7d5   : > { %v12003_v19 = vpop.f32.mrf.mxu3 }
 0x7d6   : > { %v11987_v44 = vld [vmem:[#allocation1 + $0x1] ss:$4 sm:$0xff]  ;;  %v11989_v48 = vld [vmem:[#allocation1 + $0x2] ss:$4 sm:$0xff]  ;;  %v11991_v59 = vld [vmem:[#allocation1 + $0x3] ss:$4 sm:$0xff]  ;;  %v12001_v9 = vpop.f32.mrf.mxu2 }
 0x7d7   : > { %4404 = vst [vmem:[#allocation1] sm:$0xff] %v14704_v30 }
 0x7d8   : > { %v11994_v40 = vld [vmem:[#allocation1 + $0x21] ss:$4 sm:$0xff]  ;;  %v11996_v2 = vld [vmem:[#allocation1 + $0x22] ss:$4 sm:$0xff]  ;;  %v11998_v63 = vld [vmem:[#allocation1 + $0x23] ss:$4 sm:$0xff] }
 0x7d9   : > { %14705 = vst [vmem:[#allocation142_spill] sm:$0xff] %v11994_v40 }
 0x7da   : > { %14706 = vst [vmem:[#allocation144_spill] sm:$0xff] %v11996_v2 }
 0x7db   : > { %14707 = vst [vmem:[#allocation146_spill] sm:$0xff] %v11998_v63 }
 0x7dc   : > { %4412 = vst [vmem:[#allocation1 + $0x20] sm:$0xff] %v14708_v13 }
 0x7dd   : > { %14709 = vst [vmem:[#allocation202_spill] sm:$0xff] %v12001_v9  ;;  %v4278_v63 = vpop.f32.mrf.mxu3 }
 0x7de   : > { %14710 = vst [vmem:[#allocation147_spill] sm:$0xff] %v12003_v19  ;;  %v12005_v50 = vld [vmem:[#allocation1] ss:$4 sm:$0xff]  ;;  %v12007_v43 = vld [vmem:[#allocation1 + $0x1] ss:$4 sm:$0xff]  ;;  %v3955_v2 = vpop.f32.mrf.mxu2  ;;  %v12019_v9 = vadd.f32 %v4278_v63, %v11803_v61 }
 0x7df   : > { %14711 = vst [vmem:[#allocation148_spill] sm:$0xff] %v12005_v50  ;;  %v12016_v13 = vadd.f32 %v3955_v2, %v11770_v11  ;;  %v14726_v61 = vld [vmem:[#allocation167_spill] sm:$0xff] }
 0x7e0   : > { %14712 = vst [vmem:[#allocation220_spill] sm:$0xff] %v12007_v43 }
 0x7e1   : > { %4411 = vst [vmem:[#allocation1] sm:$0xff] %v14713_v31 }
 0x7e2   : > { %14717 = vst [vmem:[#allocation162_spill] sm:$0xff] %v12019_v9 }
 0x7e3   : > { %v12010_v0 = vld [vmem:[#allocation1 + $0x20] ss:$4 sm:$0xff]  ;;  %v12012_v30 = vld [vmem:[#allocation1 + $0x21] ss:$4 sm:$0xff] }
 0x7e4   : > { %14714 = vst [vmem:[#allocation149_spill] sm:$0xff] %v12010_v0  ;;  %v14721_v0 = vld [vmem:[#allocation145_spill] sm:$0xff] }
 0x7e5   : > { %14715 = vst [vmem:[#allocation151_spill] sm:$0xff] %v12012_v30  ;;  %v12041_v63 = vpop.f32.mrf.mxu3 }
 0x7e6   : > { %4420 = vst [vmem:[#allocation1 + $0x20] sm:$0xff] %v14716_v21  ;;  %v12039_v2 = vpop.f32.mrf.mxu2 }
 0x7e7   : > { %14727 = vst [vmem:[#allocation19_spill] sm:$0xff] %v12039_v2 }
 0x7e8   : > { %v12021_v19 = vld [vmem:[#allocation1] ss:$4 sm:$0xff]  ;;  %v12023_v40 = vld [vmem:[#allocation1 + $0x1] ss:$4 sm:$0xff]  ;;  %v12025_v43 = vld [vmem:[#allocation1 + $0x2] ss:$4 sm:$0xff] }
 0x7e9   : > { %14718 = vst [vmem:[#allocation160_spill] sm:$0xff] %v12023_v40  ;;  %v12027_v31 = vld [vmem:[#allocation1 + $0x3] ss:$4 sm:$0xff] }
 0x7ea   : > { %14719 = vst [vmem:[#allocation163_spill] sm:$0xff] %v12025_v43 }
 0x7eb   : > { %14720 = vst [vmem:[#allocation164_spill] sm:$0xff] %v12027_v31 }
 0x7ec   : > { %4419 = vst [vmem:[#allocation1] sm:$0xff] %v14721_v0  ;;  %v14732_v0 = vld [vmem:[#allocation158_spill] sm:$0xff] }
 0x7ed   : > { %v12030_v30 = vld [vmem:[#allocation1 + $0x20] ss:$4 sm:$0xff]  ;;  %v12032_v21 = vld [vmem:[#allocation1 + $0x21] ss:$4 sm:$0xff]  ;;  %v12034_v50 = vld [vmem:[#allocation1 + $0x22] ss:$4 sm:$0xff]  ;;  %v4283_v2 = vpop.f32.mrf.mxu3 }
 0x7ee   : > { %14722 = vst [vmem:[#allocation165_spill] sm:$0xff] %v12030_v30  ;;  %v12036_v11 = vld [vmem:[#allocation1 + $0x23] ss:$4 sm:$0xff] }
 0x7ef   : > { %14723 = vst [vmem:[#allocation215_spill] sm:$0xff] %v12032_v21 }
 0x7f0   : > { %14724 = vst [vmem:[#allocation166_spill] sm:$0xff] %v12034_v50 }
 0x7f1   : > { %14725 = vst [vmem:[#allocation168_spill] sm:$0xff] %v12036_v11  ;;  %v14736_v11 = vld [vmem:[#allocation184_spill] sm:$0xff] }
 0x7f2   : > { %4431 = vst [vmem:[#allocation1 + $0x20] sm:$0xff] %v14726_v61  ;;  %v3960_v61 = vpop.f32.mrf.mxu2 }
 0x7f3   : > { %14728 = vst [vmem:[#allocation169_spill] sm:$0xff] %v12041_v63  ;;  %v12043_v9 = vld [vmem:[#allocation1 + $0x1] ss:$4 sm:$0xff]  ;;  %v12045_v43 = vld [vmem:[#allocation1 + $0x2] ss:$4 sm:$0xff]  ;;  %v12058_v63 = vadd.f32 %v3960_v61, %v11824_v47 }
 0x7f4   : > { %14729 = vst [vmem:[#allocation171_spill] sm:$0xff] %v12043_v9  ;;  %v12047_v31 = vld [vmem:[#allocation1 + $0x3] ss:$4 sm:$0xff]  ;;  %v12061_v9 = vadd.f32 %v4283_v2, %v11832_v16 }
 0x7f5   : > { %14730 = vst [vmem:[#allocation181_spill] sm:$0xff] %v12045_v43  ;;  %v14746_v2 = vld [vmem:[#allocation204_spill] sm:$0xff] }
 0x7f6   : > { %14731 = vst [vmem:[#allocation180_spill] sm:$0xff] %v12047_v31 }
 0x7f7   : > { %4428 = vst [vmem:[#allocation1] sm:$0xff] %v14732_v0  ;;  %v14738_v0 = vld [vmem:[#allocation170_spill] sm:$0xff] }
 0x7f8   : > { %14737 = vst [vmem:[#allocation216_spill] sm:$0xff] %v12061_v9 }
 0x7f9   : > { %v12050_v30 = vld [vmem:[#allocation1 + $0x21] ss:$4 sm:$0xff]  ;;  %v12052_v21 = vld [vmem:[#allocation1 + $0x22] ss:$4 sm:$0xff]  ;;  %v12054_v50 = vld [vmem:[#allocation1 + $0x23] ss:$4 sm:$0xff] }
 0x7fa   : > { %14733 = vst [vmem:[#allocation182_spill] sm:$0xff] %v12050_v30 }
 0x7fb   : > { %14734 = vst [vmem:[#allocation183_spill] sm:$0xff] %v12052_v21 }
 0x7fc   : > { %14735 = vst [vmem:[#allocation185_spill] sm:$0xff] %v12054_v50  ;;  %v14741_v50 = vld [vmem:[#allocation205_spill] sm:$0xff] }
 0x7fd   : > { %4436 = vst [vmem:[#allocation1 + $0x20] sm:$0xff] %v14736_v11  ;;  %v3962_v11 = vpop.f32.mrf.mxu2 }
 0x7fe   : > { %v12063_v43 = vld [vmem:[#allocation1] ss:$4 sm:$0xff]  ;;  %v12065_v31 = vld [vmem:[#allocation1 + $0x1] ss:$4 sm:$0xff] }
 0x7ff   : > { %4435 = vst [vmem:[#allocation1] sm:$0xff] %v14738_v0 }
 0x804   : > { %v12068_v30 = vld [vmem:[#allocation1 + $0x20] ss:$4 sm:$0xff]  ;;  %v12070_v21 = vld [vmem:[#allocation1 + $0x21] ss:$4 sm:$0xff] }
 0x805   : > { %14739 = vst [vmem:[#allocation186_spill] sm:$0xff] %v12068_v30 }
 0x806   : > { %14740 = vst [vmem:[#allocation187_spill] sm:$0xff] %v12070_v21  ;;  %v12073_v40 = vld [vmem:[#allocation1] ss:$4 sm:$0xff]  ;;  %v12075_v47 = vld [vmem:[#allocation1 + $0x1] ss:$4 sm:$0xff] }
 0x807   : > { %4444 = vst [vmem:[#allocation1 + $0x20] sm:$0xff] %v14741_v50  ;;  %v12077_v61 = vld [vmem:[#allocation1 + $0x2] ss:$4 sm:$0xff]  ;;  %v12079_v16 = vld [vmem:[#allocation1 + $0x3] ss:$4 sm:$0xff] }
 0x808   : > { %14742 = vst [vmem:[#allocation20_spill] sm:$0xff] %v12073_v40  ;;  %v14751_v50 = vld [vmem:[#allocation234_spill] sm:$0xff] }
 0x809   : > { %14743 = vst [vmem:[#allocation188_spill] sm:$0xff] %v12075_v47 }
 0x80a   : > { %14744 = vst [vmem:[#allocation197_spill] sm:$0xff] %v12077_v61  ;;  %v14753_v61 = vld [vmem:[#allocation208_spill] sm:$0xff] }
 0x80b   : > { %14745 = vst [vmem:[#allocation9_spill] sm:$0xff] %v12079_v16 }
 0x80c   : > { %4443 = vst [vmem:[#allocation1] sm:$0xff] %v14746_v2 }
 0x80e   : > { %v12082_v9 = vld [vmem:[#allocation1 + $0x20] ss:$4 sm:$0xff]  ;;  %v12084_v0 = vld [vmem:[#allocation1 + $0x21] ss:$4 sm:$0xff]  ;;  %v12086_v30 = vld [vmem:[#allocation1 + $0x22] ss:$4 sm:$0xff] }
 0x80f   : > { %14747 = vst [vmem:[#allocation200_spill] sm:$0xff] %v12082_v9  ;;  %v12088_v21 = vld [vmem:[#allocation1 + $0x23] ss:$4 sm:$0xff] }
 0x810   : > { %14748 = vst [vmem:[#allocation201_spill] sm:$0xff] %v12084_v0  ;;  %v8271_v0 = vld [vmem:[%s13387_s3 + $0x30] sm:$0xff] }
 0x811   : > { %14749 = vst [vmem:[#allocation209_spill] sm:$0xff] %v12086_v30  ;;  %v12105_v30 = vpop.f32.mrf.mxu3  ;;  %5726 = vmatpush.bf16.msra.mxu2 %v8271_v0 }
 0x812   : > { %14750 = vst [vmem:[#allocation210_spill] sm:$0xff] %v12088_v21 }
 0x813   : > { %4455 = vst [vmem:[#allocation1 + $0x20] sm:$0xff] %v14751_v50  ;;  %v12091_v11 = vld [vmem:[#allocation1 + $0x1] ss:$4 sm:$0xff]  ;;  %v12093_v40 = vld [vmem:[#allocation1 + $0x2] ss:$4 sm:$0xff] }
 0x814   : > { %v12095_v47 = vld [vmem:[#allocation1 + $0x3] ss:$4 sm:$0xff]  ;;  %14757 = vst [vmem:[#allocation44_spill] sm:$0xff] %v12105_v30 }
 0x815   : > { %14752 = vst [vmem:[#allocation206_spill] sm:$0xff] %v12095_v47  ;;  %v14760_v47 = vld [vmem:[#allocation245_spill] sm:$0xff] }
 0x816   : > { %4452 = vst [vmem:[#allocation1] sm:$0xff] %v14753_v61  ;;  %v8279_v61 = vld [vmem:[%s13387_s3 + $0x70] sm:$0xff] }
 0x817   : > { %5581 = vmatpush.bf16.msra.mxu1 %v8279_v61 }
 0x81a   : > { %v12098_v16 = vld [vmem:[#allocation1 + $0x21] ss:$4 sm:$0xff]  ;;  %v12100_v2 = vld [vmem:[#allocation1 + $0x22] ss:$4 sm:$0xff]  ;;  %v12102_v9 = vld [vmem:[#allocation1 + $0x23] ss:$4 sm:$0xff] }
 0x81b   : > { %14754 = vst [vmem:[#allocation207_spill] sm:$0xff] %v12098_v16 }
 0x81c   : > { %14755 = vst [vmem:[#allocation213_spill] sm:$0xff] %v12100_v2 }
 0x81d   : > { %14756 = vst [vmem:[#allocation214_spill] sm:$0xff] %v12102_v9  ;;  %v12107_v21 = vld [vmem:[#allocation1] ss:$4 sm:$0xff]  ;;  %v12109_v50 = vld [vmem:[#allocation1 + $0x1] ss:$4 sm:$0xff]  ;;  %v4288_v9 = vpop.f32.mrf.mxu3 }
 0x81e   : > { %4460 = vst [vmem:[#allocation1 + $0x20] sm:$0xff] %v14673_v15  ;;  %v12119_v15 = vadd.f32 %v4288_v9, %v11867_v46 }
 0x81f   : > { %14758 = vst [vmem:[#allocation45_spill] sm:$0xff] %v12107_v21 }
 0x820   : > { %14759 = vst [vmem:[#allocation46_spill] sm:$0xff] %v12109_v50 }
 0x821   : > { %4459 = vst [vmem:[#allocation1] sm:$0xff] %v14760_v47 }
 0x825   : > { %v12121_v30 = vld [vmem:[#allocation1 + $0x20] ss:$4 sm:$0xff]  ;;  %v12123_v2 = vld [vmem:[#allocation1 + $0x21] ss:$4 sm:$0xff]  ;;  %v12136_v46 = vpop.f32.mrf.mxu3 }
 0x828   : > { %v12125_v16 = vld [vmem:[#allocation1] ss:$4 sm:$0xff]  ;;  %v12127_v50 = vld [vmem:[#allocation1 + $0x1] ss:$4 sm:$0xff]  ;;  %v12129_v21 = vld [vmem:[#allocation1 + $0x2] ss:$4 sm:$0xff] }
 0x829   : > { %v12131_v47 = vld [vmem:[#allocation1 + $0x3] ss:$4 sm:$0xff] }
 0x82a   : > { %4484 = vst [vmem:[#allocation1] ss:$9 sm:$0xff] %v11852_v6 }
 0x82b   : > { %4486 = vst [vmem:[#allocation1 + $0x1] ss:$9 sm:$0xff] %v11854_v55 }
 0x82c   : > { %4488 = vst [vmem:[#allocation1 + $0x2] ss:$9 sm:$0xff] %v11856_v18 }
 0x82d   : > { %4490 = vst [vmem:[#allocation1 + $0x3] ss:$9 sm:$0xff] %v11839_v49  ;;  %v4293_v9 = vpop.f32.mrf.mxu3 }
 0x82e   : > { %4492 = vst [vmem:[#allocation1 + $0x4] ss:$9 sm:$0xff] %v11841_v62  ;;  %v12144_v0 = vadd.f32 %v4293_v9, %v11907_v20  ;;  %v8270_v62 = vld [vmem:[%s13387_s3 + $0x28] sm:$0xff]  ;;  %v14766_v20 = vld [vmem:[#allocation160_spill] sm:$0xff] }
 0x82f   : > { %4494 = vst [vmem:[#allocation1 + $0x5] ss:$9 sm:$0xff] %v11843_v33  ;;  %v8278_v33 = vld [vmem:[%s13387_s3 + $0x68] sm:$0xff]  ;;  %5727 = vmatpush.bf16.msra.mxu2 %v8270_v62 }
 0x830   : > { %4496 = vst [vmem:[#allocation1 + $0x6] ss:$9 sm:$0xff] %v11845_v26  ;;  %5582 = vmatpush.bf16.msra.mxu1 %v8278_v33  ;;  %v14779_v9 = vld [vmem:[#allocation183_spill] sm:$0xff]  ;;  %v14783_v33 = vld [vmem:[#allocation197_spill] sm:$0xff] }
 0x831   : > { %4498 = vst [vmem:[#allocation1 + $0x7] ss:$9 sm:$0xff] %v11879_v28  ;;  %v8274_v62 = vld [vmem:[%s13387_s3 + $0x48] sm:$0xff] }
 0x835   : > { %v12150_v49 = vpop.f32.mrf.mxu3 }
 0x838   : > { %v4499_v6 = vld [vmem:[#allocation1] sm:$0xff] }
 0x839   : > { %4661 = vmatmul.bf16.vlgmr.msra.gmra.mxu0 %v4499_v6  ;;  %4500 = vst [vmem:[#allocation1] ss:$9 sm:$0xff] %v11881_v34  ;;  %v14780_v6 = vld [vmem:[#allocation185_spill] sm:$0xff] }
 0x83a   : > { %4501 = vst [vmem:[#allocation1 + $0x1] ss:$9 sm:$0xff] %v11858_v35 }
 0x83b   : > { %4502 = vst [vmem:[#allocation1 + $0x2] ss:$9 sm:$0xff] %v11860_v60  ;;  %v8277_v60 = vld [vmem:[%s13387_s3 + $0x60] sm:$0xff] }
 0x83c   : > { %4503 = vst [vmem:[#allocation1 + $0x3] ss:$9 sm:$0xff] %v11862_v54  ;;  %5583 = vmatpush.bf16.msra.mxu1 %v8277_v60  ;;  %v14787_v60 = vld [vmem:[#allocation26_spill] sm:$0xff] }
 0x83d   : > { %4504 = vst [vmem:[#allocation1 + $0x4] ss:$9 sm:$0xff] %v11896_v41  ;;  %v4298_v26 = vpop.f32.mrf.mxu3  ;;  %v8288_v41 = vld [vmem:[%s13387_s3 + $0xb8] sm:$0xff] }
 0x83e   : > { %4505 = vst [vmem:[#allocation1 + $0x5] ss:$9 sm:$0xff] %v11898_v22  ;;  %v12163_v55 = vadd.f32 %v4298_v26, %v11941_v7  ;;  %v8269_v7 = vld [vmem:[%s13387_s3 + $0x20] sm:$0xff]  ;;  %5938 = vmatpush.bf16.msra.mxu3 %v8288_v41  ;;  %v14784_v26 = vld [vmem:[#allocation9_spill] sm:$0xff] }
 0x83f   : > { %4506 = vst [vmem:[#allocation1 + $0x6] ss:$9 sm:$0xff] %v11900_v8  ;;  %5728 = vmatpush.bf16.msra.mxu2 %v8269_v7  ;;  %v14765_v22 = vld [vmem:[#allocation146_spill] sm:$0xff]  ;;  %v14786_v7 = vld [vmem:[#allocation187_spill] sm:$0xff]  ;;  %v8284_v41 = vld [vmem:[%s13387_s3 + $0x98] sm:$0xff] }
 0x840   : > { %4507 = vst [vmem:[#allocation1 + $0x7] ss:$9 sm:$0xff] %v11902_v58 }
 0x845   : > { %v12170_v35 = vpop.f32.mrf.mxu3 }
 0x847   : > { %v4508_v18 = vld [vmem:[#allocation1] sm:$0xff] }
 0x848   : > { %4509 = vst [vmem:[#allocation1] ss:$9 sm:$0xff] %v11875_v27 }
 0x849   : > { %4666 = vmatmul.bf16.gmra.mxu0 %v4508_v18  ;;  %4510 = vst [vmem:[#allocation1 + $0x1] ss:$9 sm:$0xff] %v11877_v25  ;;  %v8276_v25 = vld [vmem:[%s13387_s3 + $0x58] sm:$0xff]  ;;  %v14785_v18 = vld [vmem:[#allocation186_spill] sm:$0xff] }
 0x84a   : > { %4511 = vst [vmem:[#allocation1 + $0x2] ss:$9 sm:$0xff] %v11918_v17  ;;  %5584 = vmatpush.bf16.msra.mxu1 %v8276_v25 }
 0x84b   : > { %4512 = vst [vmem:[#allocation1 + $0x3] ss:$9 sm:$0xff] %v11920_v4 }
 0x84c   : > { %4513 = vst [vmem:[#allocation1 + $0x4] ss:$9 sm:$0xff] %v11922_v36 }
 0x84d   : > { %4514 = vst [vmem:[#allocation1 + $0x5] ss:$9 sm:$0xff] %v11890_v45  ;;  %v4303_v17 = vpop.f32.mrf.mxu3  ;;  %v14762_v45 = vld [vmem:[#allocation220_spill] sm:$0xff] }
 0x84e   : > { %4515 = vst [vmem:[#allocation1 + $0x6] ss:$9 sm:$0xff] %v11892_v52  ;;  %v12182_v36 = vadd.f32 %v4303_v17, %v11982_v56  ;;  %v14763_v52 = vld [vmem:[#allocation142_spill] sm:$0xff] }
 0x84f   : > { %4516 = vst [vmem:[#allocation1 + $0x7] ss:$9 sm:$0xff] %v11894_v1  ;;  %v8267_v1 = vld [vmem:[%s13387_s3 + $0x10] sm:$0xff]  ;;  %v14788_v17 = vld [vmem:[#allocation42_spill] sm:$0xff] }
 0x855   : > { %v12190_v54 = vpop.f32.mrf.mxu3 }
 0x856   : > { %v4517_v4 = vld [vmem:[#allocation1] sm:$0xff] }
 0x857   : > { %4518 = vst [vmem:[#allocation1] ss:$9 sm:$0xff] %v11904_v51 }
 0x858   : > { %4519 = vst [vmem:[#allocation1 + $0x1] ss:$9 sm:$0xff] %v11936_v12  ;;  %v8268_v12 = vld [vmem:[%s13387_s3 + $0x18] sm:$0xff] }
 0x859   : > { %4671 = vmatmul.bf16.gmra.mxu0 %v4517_v4  ;;  %4520 = vst [vmem:[#allocation1 + $0x2] ss:$9 sm:$0xff] %v11938_v38  ;;  %5729 = vmatpush.bf16.msra.mxu2 %v8268_v12  ;;  %v14770_v38 = vld [vmem:[#allocation151_spill] sm:$0xff]  ;;  %v2138_v4 = vadd.f32 %v14788_v17, %v14787_v60  ;;  %v14789_v12 = vld [vmem:[#allocation229_spill] sm:$0xff]  ;;  %v14810_v60 = vld [vmem:[#allocation240_spill] sm:$0xff] }
 0x85a   : > { %4521 = vst [vmem:[#allocation1 + $0x3] ss:$9 sm:$0xff] %v11928_v32  ;;  %v14767_v32 = vld [vmem:[#allocation163_spill] sm:$0xff]  ;;  %v14811_v17 = vld [vmem:[#allocation25_spill] sm:$0xff] }
 0x85b   : > { %4522 = vst [vmem:[#allocation1 + $0x4] ss:$9 sm:$0xff] %v11930_v14  ;;  %v14768_v14 = vld [vmem:[#allocation164_spill] sm:$0xff]  ;;  %v2576_v25 = vadd.f32 %v14789_v12, %v2138_v4  ;;  %v2148_v4 = vadd.f32 %v14811_v17, %v14810_v60 }
 0x85c   : > { %4523 = vst [vmem:[#allocation1 + $0x5] ss:$9 sm:$0xff] %v11932_v3  ;;  %v14769_v3 = vld [vmem:[#allocation149_spill] sm:$0xff] }
 0x85d   : > { %4524 = vst [vmem:[#allocation1 + $0x6] ss:$9 sm:$0xff] %v11959_v57  ;;  %v4308_v56 = vpop.f32.mrf.mxu3  ;;  %5730 = vmatpush.bf16.msra.mxu2 %v8267_v1  ;;  %v14793_v1 = vld [vmem:[#allocation201_spill] sm:$0xff] }
 0x85e   : > { %4525 = vst [vmem:[#allocation1 + $0x7] ss:$9 sm:$0xff] %v11961_v10  ;;  %v12195_v51 = vadd.f32 %v4308_v56, %v12016_v13  ;;  %v14773_v10 = vld [vmem:[#allocation180_spill] sm:$0xff]  ;;  %v8266_v13 = vld [vmem:[%s13387_s3 + $0x8] sm:$0xff] }
 0x85f   : > { %v8286_v56 = vld [vmem:[%s13387_s3 + $0xa8] sm:$0xff] }
 0x861   : > { %5731 = vmatpush.bf16.msra.mxu2 %v8266_v13  ;;  %v14804_v13 = vld [vmem:[#allocation46_spill] sm:$0xff] }
 0x865   : > { %v4526_v27 = vld [vmem:[#allocation1] sm:$0xff] }
 0x866   : > { %4527 = vst [vmem:[#allocation1] ss:$9 sm:$0xff] %v11963_v53  ;;  %v14774_v53 = vld [vmem:[#allocation165_spill] sm:$0xff] }
 0x867   : > { %4528 = vst [vmem:[#allocation1 + $0x1] ss:$9 sm:$0xff] %v11968_v24  ;;  %v12210_v24 = vpop.f32.mrf.mxu3 }
 0x868   : > { %4529 = vst [vmem:[#allocation1 + $0x2] ss:$9 sm:$0xff] %v11950_v42  ;;  %v14771_v42 = vld [vmem:[#allocation171_spill] sm:$0xff] }
 0x869   : > { %4676 = vmatmul.bf16.gmra.mxu0 %v4526_v27  ;;  %4530 = vst [vmem:[#allocation1 + $0x3] ss:$9 sm:$0xff] %v11952_v39  ;;  %v14772_v39 = vld [vmem:[#allocation181_spill] sm:$0xff]  ;;  %v8285_v27 = vld [vmem:[%s13387_s3 + $0xa0] sm:$0xff] }
 0x86a   : > { %4531 = vst [vmem:[#allocation1 + $0x4] ss:$9 sm:$0xff] %v11987_v44  ;;  %v14761_v44 = vld [vmem:[#allocation148_spill] sm:$0xff] }
 0x86b   : > { %4532 = vst [vmem:[#allocation1 + $0x5] ss:$9 sm:$0xff] %v11989_v48 }
 0x86c   : > { %4533 = vst [vmem:[#allocation1 + $0x6] ss:$9 sm:$0xff] %v11991_v59  ;;  %v14777_v59 = vld [vmem:[#allocation168_spill] sm:$0xff] }
 0x86d   : > { %4534 = vst [vmem:[#allocation1 + $0x7] ss:$9 sm:$0xff] %v11971_v23  ;;  %v14775_v23 = vld [vmem:[#allocation215_spill] sm:$0xff] }
 0x86f   : > { %v4313_v34 = vpop.f32.mrf.mxu3 }
 0x870   : > { %v12215_v48 = vadd.f32 %v4313_v34, %v12058_v63  ;;  %v8287_v63 = vld [vmem:[%s13387_s3 + $0xb0] sm:$0xff]  ;;  %v14790_v34 = vld [vmem:[#allocation206_spill] sm:$0xff] }
 0x871   : > { %5939 = vmatpush.bf16.msra.mxu3 %v8287_v63  ;;  %v14805_v63 = vld [vmem:[#allocation207_spill] sm:$0xff] }
 0x874   : > { %v4535_v28 = vld [vmem:[#allocation1] sm:$0xff] }
 0x875   : > { %4536 = vst [vmem:[#allocation1] ss:$9 sm:$0xff] %v11973_v5  ;;  %v14776_v5 = vld [vmem:[#allocation166_spill] sm:$0xff]  ;;  %5940 = vmatpush.bf16.msra.mxu3 %v8286_v56  ;;  %v14812_v56 = vld [vmem:[#allocation124_spill] sm:$0xff] }
 0x876   : > { %4537 = vst [vmem:[#allocation1 + $0x1] ss:$9 sm:$0xff] %v11975_v37  ;;  %v8275_v37 = vld [vmem:[%s13387_s3 + $0x50] sm:$0xff] }
 0x877   : > { %4538 = vst [vmem:[#allocation1 + $0x2] ss:$9 sm:$0xff] %v11977_v29  ;;  %v14764_v29 = vld [vmem:[#allocation144_spill] sm:$0xff]  ;;  %v4315_v8 = vpop.f32.mrf.mxu3  ;;  %5585 = vmatpush.bf16.msra.mxu1 %v8275_v37  ;;  %v8265_v37 = vld [vmem:[%s13387_s3] sm:$0xff] }
 0x878   : > { %4539 = vst [vmem:[#allocation1 + $0x3] ss:$9 sm:$0xff] %v14761_v44  ;;  %v14791_v44 = vld [vmem:[#allocation236_spill] sm:$0xff]  ;;  %5732 = vmatpush.bf16.msra.mxu2 %v8265_v37  ;;  %v14796_v8 = vld [vmem:[#allocation238_spill] sm:$0xff] }
 0x879   : > { %4681 = vmatmul.bf16.gmra.mxu0 %v4535_v28  ;;  %4540 = vst [vmem:[#allocation1 + $0x4] ss:$9 sm:$0xff] %v14762_v45  ;;  %5941 = vmatpush.bf16.msra.mxu3 %v8285_v27  ;;  %v2892_v45 = vadd.f32 %v14791_v44, %v2576_v25  ;;  %v14815_v44 = vld [vmem:[#allocation33_spill] sm:$0xff] }
 0x87a   : > { %4541 = vst [vmem:[#allocation1 + $0x5] ss:$9 sm:$0xff] %v14763_v52  ;;  %v14792_v52 = vld [vmem:[#allocation200_spill] sm:$0xff] }
 0x87b   : > { %4542 = vst [vmem:[#allocation1 + $0x6] ss:$9 sm:$0xff] %v14764_v29  ;;  %5586 = vmatpush.bf16.msra.mxu1 %v8274_v62  ;;  %v14794_v29 = vld [vmem:[#allocation209_spill] sm:$0xff]  ;;  %v12308_v62 = vld [vmem:[%s13386_s2] ss:$0 sm:$0xff] }
 0x87c   : > { %4543 = vst [vmem:[#allocation1 + $0x7] ss:$9 sm:$0xff] %v14765_v22  ;;  %v8283_v22 = vld [vmem:[%s13387_s3 + $0x90] sm:$0xff] }
 0x87d   : > { %5942 = vmatpush.bf16.msra.mxu3 %v8284_v41 }
 0x881   : > { %5943 = vmatpush.bf16.msra.mxu3 %v8283_v22  ;;  %v14817_v22 = vld [vmem:[#allocation217_spill] sm:$0xff] }
 0x883   : > { %v4544_v58 = vld [vmem:[#allocation1] sm:$0xff] }
 0x884   : > { %4545 = vst [vmem:[#allocation1] ss:$9 sm:$0xff] %v12021_v19  ;;  %v14778_v19 = vld [vmem:[#allocation182_spill] sm:$0xff] }
 0x885   : > { %4546 = vst [vmem:[#allocation1 + $0x1] ss:$9 sm:$0xff] %v14766_v20  ;;  %v14797_v20 = vld [vmem:[#allocation45_spill] sm:$0xff] }
 0x886   : > { %4547 = vst [vmem:[#allocation1 + $0x2] ss:$9 sm:$0xff] %v14767_v32  ;;  %v14798_v32 = vld [vmem:[#allocation230_spill] sm:$0xff] }
 0x887   : > { %4548 = vst [vmem:[#allocation1 + $0x3] ss:$9 sm:$0xff] %v14768_v14  ;;  %v14799_v14 = vld [vmem:[#allocation22_spill] sm:$0xff] }
 0x888   : > { %4549 = vst [vmem:[#allocation1 + $0x4] ss:$9 sm:$0xff] %v14769_v3  ;;  %v2143_v3 = vadd.f32 %v14799_v14, %v14798_v32  ;;  %v14818_v32 = vld [vmem:[#allocation38_spill] sm:$0xff] }
 0x889   : > { %4686 = vmatmul.bf16.gmra.mxu0 %v4544_v58  ;;  %4550 = vst [vmem:[#allocation1 + $0x5] ss:$9 sm:$0xff] %v14770_v38  ;;  %v3245_v58 = vadd.f32 %v14796_v8, %v2892_v45  ;;  %v14800_v38 = vld [vmem:[#allocation36_spill] sm:$0xff]  ;;  %v2580_v45 = vadd.f32 %v14815_v44, %v2148_v4  ;;  %v14824_v4 = vld [vmem:[#allocation50_spill] sm:$0xff] }
 0x88a   : > { %4551 = vst [vmem:[#allocation1 + $0x6] ss:$9 sm:$0xff] %v14771_v42 }
 0x88b   : > { %4552 = vst [vmem:[#allocation1 + $0x7] ss:$9 sm:$0xff] %v14772_v39  ;;  %v3649_v42 = vadd.f32 %v14800_v38, %v3245_v58  ;;  %v14801_v39 = vld [vmem:[#allocation94_spill] sm:$0xff]  ;;  %v2896_v14 = vadd.f32 %v14818_v32, %v2580_v45  ;;  %v14828_v45 = vld [vmem:[#allocation133_spill] sm:$0xff] }
 0x88c   : > { %v8317_v32 = vld [vmem:[%s13387_s3 + $0x1a0] sm:$0xff] }
 0x892   : > { %v4553_v57 = vld [vmem:[#allocation1] sm:$0xff] }
 0x893   : > { %4554 = vst [vmem:[#allocation1] ss:$9 sm:$0xff] %v14773_v10 }
 0x894   : > { %4555 = vst [vmem:[#allocation1 + $0x1] ss:$9 sm:$0xff] %v14774_v53 }
 0x895   : > { %4556 = vst [vmem:[#allocation1 + $0x2] ss:$9 sm:$0xff] %v14775_v23  ;;  %v14802_v23 = vld [vmem:[#allocation239_spill] sm:$0xff] }
 0x896   : > { %4557 = vst [vmem:[#allocation1 + $0x3] ss:$9 sm:$0xff] %v14776_v5  ;;  %v2578_v5 = vadd.f32 %v14802_v23, %v2143_v3  ;;  %v14820_v23 = vld [vmem:[#allocation249_spill] sm:$0xff] }
 0x897   : > { %4558 = vst [vmem:[#allocation1 + $0x4] ss:$9 sm:$0xff] %v14777_v59  ;;  %v14803_v59 = vld [vmem:[#allocation203_spill] sm:$0xff] }
 0x898   : > { %4559 = vst [vmem:[#allocation1 + $0x5] ss:$9 sm:$0xff] %v12063_v43  ;;  %v14781_v43 = vld [vmem:[#allocation20_spill] sm:$0xff] }
 0x899   : > { %4691 = vmatmul.bf16.gmra.mxu0 %v4553_v57  ;;  %4560 = vst [vmem:[#allocation1 + $0x6] ss:$9 sm:$0xff] %v12065_v31  ;;  %v14782_v31 = vld [vmem:[#allocation188_spill] sm:$0xff]  ;;  %v3965_v57 = vadd.f32 %v14801_v39, %v3649_v42 }
 0x89a   : > { %4561 = vst [vmem:[#allocation1 + $0x7] ss:$9 sm:$0xff] %v14778_v19 }
 0x89b   : > { %v4318_v19 = vadd.f32 %v14803_v59, %v3965_v57 }
 0x8a1   : > { %v4562_v61 = vld [vmem:[#allocation1] sm:$0xff] }
 0x8a2   : > { %4563 = vst [vmem:[#allocation1] ss:$9 sm:$0xff] %v14779_v9  ;;  %v14806_v9 = vld [vmem:[#allocation213_spill] sm:$0xff] }
 0x8a3   : > { %4564 = vst [vmem:[#allocation1 + $0x1] ss:$9 sm:$0xff] %v14780_v6  ;;  %v14807_v6 = vld [vmem:[#allocation214_spill] sm:$0xff] }
 0x8a4   : > { %4565 = vst [vmem:[#allocation1 + $0x2] ss:$9 sm:$0xff] %v14781_v43  ;;  %v14808_v43 = vld [vmem:[#allocation248_spill] sm:$0xff] }
 0x8a5   : > { %4566 = vst [vmem:[#allocation1 + $0x3] ss:$9 sm:$0xff] %v14782_v31  ;;  %v2894_v31 = vadd.f32 %v14808_v43, %v2578_v5  ;;  %v14821_v5 = vld [vmem:[#allocation41_spill] sm:$0xff] }
 0x8a6   : > { %4567 = vst [vmem:[#allocation1 + $0x4] ss:$9 sm:$0xff] %v14783_v33  ;;  %v2153_v59 = vadd.f32 %v14821_v5, %v14820_v23 }
 0x8a7   : > { %4568 = vst [vmem:[#allocation1 + $0x5] ss:$9 sm:$0xff] %v14784_v26 }
 0x8a8   : > { %4569 = vst [vmem:[#allocation1 + $0x6] ss:$9 sm:$0xff] %v14785_v18  ;;  %v14809_v18 = vld [vmem:[#allocation32_spill] sm:$0xff] }
 0x8a9   : > { %4696 = vmatmul.bf16.gmra.mxu0 %v4562_v61  ;;  %4570 = vst [vmem:[#allocation1 + $0x7] ss:$9 sm:$0xff] %v14786_v7  ;;  %v3247_v7 = vadd.f32 %v14809_v18, %v2894_v31  ;;  %v8319_v31 = vld [vmem:[%s13387_s3 + $0x1b0] sm:$0xff]  ;;  %v14823_v18 = vld [vmem:[#allocation54_spill] sm:$0xff] }
 0x8b0   : > { %v4571_v28 = vld [vmem:[#allocation1] sm:$0xff] }
 0x8b1   : > { %4572 = vst [vmem:[#allocation1] ss:$9 sm:$0xff] %v12091_v11 }
 0x8b2   : > { %4573 = vst [vmem:[#allocation1 + $0x1] ss:$9 sm:$0xff] %v12093_v40  ;;  %v14795_v40 = vld [vmem:[#allocation210_spill] sm:$0xff] }
 0x8b3   : > { %4574 = vst [vmem:[#allocation1 + $0x2] ss:$9 sm:$0xff] %v14790_v34  ;;  %v8281_v34 = vld [vmem:[%s13387_s3 + $0x80] sm:$0xff] }
 0x8b4   : > { %4575 = vst [vmem:[#allocation1 + $0x3] ss:$9 sm:$0xff] %v14792_v52 }
 0x8b5   : > { %4576 = vst [vmem:[#allocation1 + $0x4] ss:$9 sm:$0xff] %v14793_v1  ;;  %v14816_v1 = vld [vmem:[#allocation97_spill] sm:$0xff] }
 0x8b6   : > { %v4662_v11 = vpop.f32.mrf.mxu0  ;;  %4577 = vst [vmem:[#allocation1 + $0x5] ss:$9 sm:$0xff] %v14794_v29 }
 0x8b7   : > { %4578 = vst [vmem:[#allocation1 + $0x6] ss:$9 sm:$0xff] %v14795_v40  ;;  %v4721_v27 = vadd.f32 %v4662_v11, %v14812_v56  ;;  %v2582_v56 = vadd.f32 %v14824_v4, %v2153_v59  ;;  %v14838_v4 = vld [vmem:[#allocation69_spill] sm:$0xff] }
 0x8b8   : > { %4579 = vst [vmem:[#allocation1 + $0x7] ss:$9 sm:$0xff] %v14797_v20 }
 0x8b9   : > { %4701 = vmatmul.bf16.gmra.mxu0 %v4571_v28  ;;  %v4748_v52 = vadd.f32 %v12308_v62, %v4721_v27 }
 0x8bb   : > { %v4771_v3 = vmax.f32 %v4748_v52, 0.0 }
 0x8bd   : > { %v4817_v57 = vrot.slane %v4771_v3, 2 }
 0x8be   : > { %v4664_v10 = vpop.f32.mrf.mxu0 }
 0x8bf   : > { %v4580_v53 = vld [vmem:[#allocation1] sm:$0xff]  ;;  %v4722_v61 = vadd.f32 %v4664_v10, %v4318_v19  ;;  %v4884_v10 = vlaneseq  ;;  %v4818_v19 = vrot.slane %v4771_v3, 4 }
 0x8c0   : > { %4581 = vst [vmem:[#allocation1] ss:$9 sm:$0xff] %v14804_v13 }
 0x8c1   : > { %4582 = vst [vmem:[#allocation1 + $0x1] ss:$9 sm:$0xff] %v14805_v63  ;;  %v4749_v33 = vadd.f32 %v12308_v62, %v4722_v61  ;;  %v4819_v61 = vrot.slane %v4771_v3, 6  ;;  %v12364_v17 = vshrl.u32 %v4884_v10, 7 }
 0x8c2   : > { %4583 = vst [vmem:[#allocation1 + $0x2] ss:$9 sm:$0xff] %v14806_v9  ;;  %v14822_v9 = vld [vmem:[#allocation129_spill] sm:$0xff] }
 0x8c3   : > { %4584 = vst [vmem:[#allocation1 + $0x3] ss:$9 sm:$0xff] %v14807_v6  ;;  %v4772_v12 = vmax.f32 %v4749_v33, 0.0  ;;  %vm4929_vm6 = vcmp.ge.s32.totalorder %v12364_v17, 1 }
 0x8c4   : > { %4585 = vst [vmem:[#allocation1 + $0x4] ss:$9 sm:$0xff] %v12125_v16  ;;  %v8273_v16 = vld [vmem:[%s13387_s3 + $0x40] sm:$0xff] }
 0x8c5   : > { %4586 = vst [vmem:[#allocation1 + $0x5] ss:$9 sm:$0xff] %v12127_v50  ;;  %v8282_v50 = vld [vmem:[%s13387_s3 + $0x88] sm:$0xff]  ;;  %5587 = vmatpush.bf16.msra.mxu1 %v8273_v16  ;;  %v4820_v37 = vrot.slane %v4772_v12, 2  ;;  %v4821_v40 = vrot.slane %v4772_v12, 4  ;;  %v4822_v58 = vrot.slane %v4772_v12, 6 }
 0x8c6   : > { %v4667_v26 = vpop.f32.mrf.mxu0  ;;  %4587 = vst [vmem:[#allocation1 + $0x6] ss:$9 sm:$0xff] %v12129_v21  ;;  %v14813_v21 = vld [vmem:[#allocation211_spill] sm:$0xff]  ;;  %5944 = vmatpush.bf16.msra.mxu3 %v8282_v50  ;;  %v14825_v50 = vld [vmem:[#allocation106_spill] sm:$0xff] }
 0x8c7   : > { %4588 = vst [vmem:[#allocation1 + $0x7] ss:$9 sm:$0xff] %v12131_v47  ;;  %v3651_v25 = vadd.f32 %v14813_v21, %v3247_v7  ;;  %v14814_v47 = vld [vmem:[#allocation127_spill] sm:$0xff] }
 0x8c8   : > { %v4723_v28 = vadd.f32 %v4667_v26, %v14814_v47  ;;  %v8304_v26 = vld [vmem:[%s13387_s3 + $0x138] sm:$0xff]  ;;  %v14842_v47 = vld [vmem:[#allocation55_spill] sm:$0xff] }
 0x8c9   : > { %4706 = vmatmul.bf16.gmra.mxu0 %v4580_v53  ;;  %v3967_v41 = vadd.f32 %v14816_v1, %v3651_v25  ;;  %v12342_v53 = vstv %s7762_s11  ;;  %6232 = vmatpush.bf16.msrb.mxu2 %v8304_v26 }
 0x8ca   : > { %v4750_v20 = vadd.f32 %v12308_v62, %v4723_v28  ;;  %5945 = vmatpush.bf16.msra.mxu3 %v8281_v34  ;;  %vm4899_vm1 = vcmp.ge.s32.totalorder %v12342_v53, 0  ;;  %vm4909_vm2 = vcmp.lt.s32.totalorder %v12342_v53, 16  ;;  %v4890_v16 = vadd.s32 1, %v12342_v53  ;;  %v8318_v34 = vld [vmem:[%s13387_s3 + $0x1a8] sm:$0xff] }
 0x8cb   : > { %v4320_v8 = vadd.f32 %v14817_v22, %v3967_v41  ;;  %vm12377_vm4 = vmand %vm4899_vm1, %vm4909_vm2  ;;  %v8296_v41 = vld [vmem:[%s13387_s3 + $0xf8] sm:$0xff] }
 0x8cc   : > { %v12339_v42 = vmax.f32 %v4750_v20, 0.0  ;;  %vm4900_vm7 = vcmp.ge.s32.totalorder %v4890_v16, 0  ;;  %vm4910_vm8 = vcmp.lt.s32.totalorder %v4890_v16, 16  ;;  %6074 = vmatpush.bf16.msrb.mxu1 %v8296_v41  ;;  %vm4932_vm9 = vmand %vm12377_vm4, %vm4929_vm6 }
 0x8cd   : > { %vm12412_vm10 = vmand %vm4900_vm7, %vm4910_vm8 }
 0x8ce   : > { %v4669_v11 = vpop.f32.mrf.mxu0  ;;  %v4589_v29 = vld [vmem:[#allocation1] sm:$0xff]  ;;  %v4823_v33 = vrot.slane %v12339_v42, 2  ;;  %v4824_v60 = vrot.slane %v12339_v42, 4  ;;  %v4825_v27 = vrot.slane %v12339_v42, 6  ;;  %vm12431_vm15 = vmand %vm12412_vm10, %vm4929_vm6 }
 0x8cf   : > { %4590 = vst [vmem:[#allocation1] ss:$9 sm:$0xff] %v12121_v30  ;;  %v4724_v38 = vadd.f32 %v4669_v11, %v4320_v8  ;;  %v14819_v30 = vld [vmem:[#allocation39_spill] sm:$0xff]  ;;  %v14830_v11 = vld [vmem:[#allocation232_spill] sm:$0xff]  ;;  %vm12486_vm1 = vmor %vm5288_vm14, %vm5289_vm3 }
 0x8d0   : > { %4591 = vst [vmem:[#allocation1 + $0x1] ss:$9 sm:$0xff] %v12123_v2  ;;  %v3249_v39 = vadd.f32 %v14819_v30, %v2896_v14  ;;  %v8320_v2 = vld [vmem:[%s13387_s3 + $0x1b8] sm:$0xff]  ;;  %v12407_v14 = vadd.s32 16, %v12364_v17  ;;  %v8335_v17 = vld [vmem:[%s13387_s3 + $0x230] sm:$0xff] }
 0x8d1   : > { %5063 = vst [vmem:[#allocation1 + $0x20] ss:$4 sm:$0xff] %v4772_v12  ;;  %v4751_v13 = vadd.f32 %v12308_v62, %v4724_v38  ;;  %6510 = vmatpush.bf16.msrb.mxu0 %v8320_v2  ;;  %v14832_v30 = vld [vmem:[#allocation53_spill] sm:$0xff]  ;;  %v14835_v2 = vld [vmem:[#allocation52_spill] sm:$0xff] }
 0x8d2   : > { %5065 = vst [vmem:[#allocation1 + $0x21] ss:$4 sm:$0xff] %v4820_v37  ;;  %v3653_v7 = vadd.f32 %v14823_v18, %v3249_v39  ;;  %v14829_v37 = vld [vmem:[#allocation21_spill] sm:$0xff]  ;;  %vm4964_vm11 = vcmp.le.s32.totalorder %v12407_v14, 16 }
 0x8d3   : > { %5067 = vst [vmem:[#allocation1 + $0x22] ss:$4 sm:$0xff] %v4821_v40  ;;  %v12368_v12 = vmax.f32 %v4751_v13, 0.0  ;;  %v14831_v40 = vld [vmem:[#allocation51_spill] sm:$0xff]  ;;  %v8316_v13 = vld [vmem:[%s13387_s3 + $0x198] sm:$0xff]  ;;  %vm12451_vm0 = vmand %vm12377_vm4, %vm4964_vm11 }
 0x8d4   : > { %5069 = vst [vmem:[#allocation1 + $0x23] ss:$4 sm:$0xff] %v4822_v58  ;;  %v3969_v21 = vadd.f32 %v14825_v50, %v3653_v7  ;;  %v2898_v22 = vadd.f32 %v14831_v40, %v2582_v56  ;;  %v14839_v50 = vld [vmem:[#allocation132_spill] sm:$0xff]  ;;  %vm12497_vm2 = vmand %vm12412_vm10, %vm4964_vm11 }
 0x8d5   : > { %6511 = vmatpush.bf16.msrb.mxu0 %v8319_v31  ;;  %v4826_v31 = vrot.slane %v12368_v12, 2 }
 0x8d6   : > { %v4672_v63 = vpop.f32.mrf.mxu0  ;;  %v4322_v52 = vadd.f32 %v14828_v45, %v3969_v21  ;;  %v3251_v39 = vadd.f32 %v14832_v30, %v2898_v22  ;;  %v8314_v30 = vld [vmem:[%s13387_s3 + $0x188] sm:$0xff] }
 0x8d7   : > { %v4725_v6 = vadd.f32 %v4672_v63, %v14822_v9  ;;  %v12351_v43 = vld [vmem:[#allocation1] sm:$0xff] }
 0x8d8   : > { %5055 = vst [vmem:[#allocation1] ss:$4 sm:$0xff] %v4771_v3  ;;  %v3655_v56 = vadd.f32 %v14838_v4, %v3251_v39  ;;  %v14846_v39 = vld [vmem:[#allocation12_spill] sm:$0xff] }
 0x8d9   : > { %5057 = vst [vmem:[#allocation1 + $0x1] ss:$4 sm:$0xff] %v4817_v57  ;;  %4711 = vmatmul.bf16.gmra.mxu0 %v4589_v29  ;;  %v4752_v25 = vadd.f32 %v12308_v62, %v4725_v6  ;;  %v2158_v29 = vadd.f32 %v14830_v11, %v14829_v37  ;;  %v4828_v37 = vrot.slane %v12368_v12, 6  ;;  %v8295_v4 = vld [vmem:[%s13387_s3 + $0xf0] sm:$0xff] }
 0x8da   : > { %5059 = vst [vmem:[#allocation1 + $0x2] ss:$4 sm:$0xff] %v4818_v19  ;;  %6512 = vmatpush.bf16.msrb.mxu0 %v8318_v34  ;;  %6075 = vmatpush.bf16.msrb.mxu1 %v8295_v4  ;;  %v8302_v4 = vld [vmem:[%s13387_s3 + $0x128] sm:$0xff] }
 0x8db   : > { %5061 = vst [vmem:[#allocation1 + $0x3] ss:$4 sm:$0xff] %v4819_v61  ;;  %v5071_v28 = vld.sshfl [vmem:[#allocation1 + $0x20] sm:$0xff pattern:$0x73625140]  ;;  %v12396_v58 = vmax.f32 %v4752_v25, 0.0  ;;  %v2584_v23 = vadd.f32 %v14835_v2, %v2158_v29 }
 0x8dc   : > { %v5213_v44 = vsel %vm12377_vm4, %v5071_v28, 0.0  ;;  %5074 = vst [vmem:[#allocation1 + $0x20] ss:$4 sm:$0xff] %v4823_v33  ;;  %v8315_v25 = vld [vmem:[%s13387_s3 + $0x190] sm:$0xff] }
 0x8dd   : > { %v12388_v1 = vpack.c.bf16 %v5213_v44, %v5213_v44  ;;  %5075 = vst [vmem:[#allocation1 + $0x21] ss:$4 sm:$0xff] %v4824_v60  ;;  %v4829_v5 = vrot.slane %v12396_v58, 2  ;;  %v8303_v28 = vld [vmem:[%s13387_s3 + $0x130] sm:$0xff]  ;;  %v2900_v22 = vadd.f32 %v14842_v47, %v2584_v23  ;;  %v14854_v47 = vld [vmem:[#allocation57_spill] sm:$0xff] }
 0x8de   : > { %5076 = vst [vmem:[#allocation1 + $0x22] ss:$4 sm:$0xff] %v4825_v27  ;;  %v4674_v8 = vpop.f32.mrf.mxu0  ;;  %6513 = vmatpush.bf16.msrb.mxu0 %v8317_v32  ;;  %v4827_v27 = vrot.slane %v12368_v12, 4  ;;  %6233 = vmatpush.bf16.msrb.mxu2 %v8303_v28  ;;  %v14843_v32 = vld [vmem:[#allocation110_spill] sm:$0xff] }
 0x8df   : > { %5077 = vst [vmem:[#allocation1 + $0x23] ss:$4 sm:$0xff] %v12368_v12  ;;  %v4726_v20 = vadd.f32 %v4674_v8, %v4322_v52  ;;  %v5301_v3 = vshll.u32 %v12388_v1, 16  ;;  %v5305_v38 = vshrl.u32 %v12388_v1, 16  ;;  %v5646_v61 = vunpack.c.l.b16 %v12388_v1 }
 0x8e0   : > { %v5787_v11 = vrot.slane %v12388_v1, 5  ;;  %v8326_v1 = vld [vmem:[%s13387_s3 + $0x1e8] sm:$0xff] }
 0x8e1   : > { %v4753_v19 = vadd.f32 %v12308_v62, %v4726_v20  ;;  %v12425_v9 = vrot.slane %v5301_v3, 5  ;;  %v5307_v6 = vrot.slane %v5305_v38, 4  ;;  %v3971_v3 = vadd.f32 %v14843_v32, %v3655_v56  ;;  %v14853_v56 = vld [vmem:[#allocation56_spill] sm:$0xff] }
 0x8e2   : > { %v5070_v57 = vld.sshfl [vmem:[#allocation1] sm:$0xff pattern:$0x73625140]  ;;  %6514 = vmatpush.bf16.msrb.mxu0 %v8316_v13  ;;  %6234 = vmatpush.bf16.msrb.mxu2 %v8302_v4 }
 0x8e3   : > { %v5212_v59 = vsel %vm4932_vm9, %v5070_v57, 0.0  ;;  %5072 = vst [vmem:[#allocation1] ss:$4 sm:$0xff] %v12339_v42  ;;  %v12438_v16 = vmax.f32 %v4753_v19, 0.0  ;;  %v5308_v29 = vor.u32 %v5307_v6, %v12425_v9  ;;  %v14847_v57 = vld [vmem:[#allocation13_spill] sm:$0xff]  ;;  %v14848_v19 = vld [vmem:[#allocation147_spill] sm:$0xff] }
 0x8e4   : > { %v5242_v63 = vpack.c.bf16 %v5212_v59, %v5212_v59  ;;  %v2163_v2 = vadd.f32 %v14847_v57, %v14846_v39  ;;  %v4324_v13 = vadd.f32 %v14848_v19, %v3971_v3  ;;  %v5789_v6 = vrot.slane %v5787_v11, 4  ;;  %v8333_v42 = vld [vmem:[%s13387_s3 + $0x220] sm:$0xff] }
 0x8e5   : > { %v4833_v23 = vrot.slane %v12438_v16, 4  ;;  %v4832_v19 = vrot.slane %v12438_v16, 2 }
 0x8e6   : > { %v5645_v33 = vunpack.c.l.b16 %v5242_v63  ;;  %v5292_v26 = vshrl.u32 %v5242_v63, 16  ;;  %v5295_v18 = vshll.u32 %v5242_v63, 16  ;;  %v4677_v7 = vpop.f32.mrf.mxu0  ;;  %v5078_v60 = vld.sshfl [vmem:[#allocation1 + $0x20] sm:$0xff pattern:$0x73625140]  ;;  %6515 = vmatpush.bf16.msrb.mxu0 %v8315_v25  ;;  %v7843_v59 = vrot.slane %v5242_v63, 9 }
 0x8e7   : > { %v4727_v21 = vadd.f32 %v4677_v7, %v14839_v50  ;;  %5083 = vst [vmem:[#allocation1 + $0x20] ss:$4 sm:$0xff] %v4829_v5  ;;  %v5215_v41 = vsel %vm12431_vm15, %v5078_v60, 0.0 }
 0x8e8   : > { %v5661_v34 = vpack.c.b16 %v5646_v61, %v5645_v33  ;;  %v5294_v45 = vrot.slane %v5292_v26, 4  ;;  %v5297_v52 = vrot.slane %v5295_v18, 5  ;;  %v12474_v38 = vpack.c.bf16 %v5215_v41, %v5215_v41 }
 0x8e9   : > { %v4754_v40 = vadd.f32 %v12308_v62, %v4727_v21  ;;  %4716 = vmatmul.bf16.gmra.mxu0 %v12351_v43  ;;  %v4834_v61 = vrot.slane %v12438_v16, 6  ;;  %v5788_v33 = vsel %vm12468_vm5, %v7843_v59, %v5787_v11  ;;  %v4831_v59 = vrot.slane %v12396_v58, 6 }
 0x8ea   : > { %5733 = vmatmul.bf16.vlgmr.msra.gmra.mxu2 %v5661_v34  ;;  %v5073_v8 = vld.sshfl [vmem:[#allocation1] sm:$0xff pattern:$0x73625140]  ;;  %v5298_v20 = vor.u32 %v5297_v52, %v5294_v45  ;;  %v5316_v28 = vshrl.u32 %v12474_v38, 16  ;;  %6516 = vmatpush.bf16.msrb.mxu0 %v8314_v30  ;;  %v5319_v41 = vshll.u32 %v12474_v38, 16 }
 0x8eb   : > { %v5214_v12 = vsel %vm12451_vm0, %v5073_v8, 0.0  ;;  %5079 = vst [vmem:[#allocation1] ss:$4 sm:$0xff] %v4826_v31  ;;  %v12472_v43 = vmax.f32 %v4754_v40, 0.0  ;;  %v5309_v31 = vrot.slane %v5308_v29, 4  ;;  %v8313_v34 = vld [vmem:[%s13387_s3 + $0x180] sm:$0xff] }
 0x8ec   : > { %v5244_v5 = vpack.c.bf16 %v5214_v12, %v5214_v12  ;;  %5080 = vst [vmem:[#allocation1 + $0x1] ss:$4 sm:$0xff] %v4827_v27  ;;  %v5299_v63 = vrot.slane %v5298_v20, 4  ;;  %v3253_v27 = vadd.f32 %v14853_v56, %v2900_v22  ;;  %v2586_v22 = vadd.f32 %v14854_v47, %v2163_v2 }
 0x8ed   : > { %5081 = vst [vmem:[#allocation1 + $0x2] ss:$4 sm:$0xff] %v4828_v37  ;;  %v4835_v50 = vrot.slane %v12472_v43, 2  ;;  %v5858_v37 = vunpack.c.l.b16 %v5788_v33  ;;  %v4830_v8 = vrot.slane %v12396_v58, 4  ;;  %v4891_v12 = vadd.s32 2, %v12342_v53 }
 0x8ee   : > { %v5790_v26 = vrot.slane %v5244_v5, 5  ;;  %5082 = vst [vmem:[#allocation1 + $0x3] ss:$4 sm:$0xff] %v12396_v58  ;;  %v5311_v18 = vshll.u32 %v5244_v5, 16  ;;  %v4679_v7 = vpop.f32.mrf.mxu0  ;;  %v5304_v45 = vsel %vm12486_vm1, %v5299_v63, %v12425_v9  ;;  %6517 = vmatpush.bf16.msrb.mxu0 %v8313_v34  ;;  %v5318_v57 = vrot.slane %v5316_v28, 4  ;;  %v14857_v58 = vld [vmem:[#allocation162_spill] sm:$0xff] }
 0x8ef   : > { %v4728_v21 = vadd.f32 %v4679_v7, %v4324_v13  ;;  %v5085_v25 = vld.sshfl [vmem:[#allocation1 + $0x20] sm:$0xff pattern:$0x73625140]  ;;  %v5500_v32 = vunpack.c.l.b16 %v5304_v45  ;;  %v5321_v2 = vrot.slane %v5319_v41, 5  ;;  %v4837_v33 = vrot.slane %v12472_v43, 6  ;;  %v14859_v45 = vld [vmem:[#allocation228_spill] sm:$0xff] }
 0x8f0   : > { %v5791_v44 = vsel %vm12468_vm5, %v5789_v6, %v5790_v26  ;;  %v5313_v52 = vrot.slane %v5311_v18, 5  ;;  %5090 = vst [vmem:[#allocation1 + $0x20] ss:$4 sm:$0xff] %v4833_v23  ;;  %v5217_v40 = vsel %vm12497_vm2, %v5085_v25, 0.0  ;;  %v14855_v23 = vld [vmem:[#allocation73_spill] sm:$0xff]  ;;  %v14856_v6 = vld [vmem:[#allocation212_spill] sm:$0xff]  ;;  %v5647_v63 = vunpack.c.l.b16 %v12474_v38 }
 0x8f1   : > { %v5859_v11 = vunpack.c.l.b16 %v5791_v44  ;;  %v4755_v29 = vadd.f32 %v12308_v62, %v4728_v21  ;;  %5091 = vst [vmem:[#allocation1 + $0x21] ss:$4 sm:$0xff] %v4834_v61  ;;  %v12527_v39 = vpack.c.bf16 %v5217_v40, %v5217_v40  ;;  %v3657_v5 = vadd.f32 %v14855_v23, %v3253_v27  ;;  %v14858_v44 = vld [vmem:[#allocation24_spill] sm:$0xff] }
 0x8f2   : > { %v5314_v9 = vsel %vm12486_vm1, %v5309_v31, %v5313_v52  ;;  %5092 = vst [vmem:[#allocation1 + $0x22] ss:$4 sm:$0xff] %v12472_v43  ;;  %v2902_v31 = vadd.f32 %v14856_v6, %v2586_v22  ;;  %vm4901_vm4 = vcmp.ge.s32.totalorder %v4891_v12, 0  ;;  %vm4911_vm7 = vcmp.lt.s32.totalorder %v4891_v12, 16 }
 0x8f3   : > { %v5874_v20 = vpack.c.b16 %v5859_v11, %v5858_v37  ;;  %v5501_v3 = vunpack.c.l.b16 %v5314_v9  ;;  %5093 = vst [vmem:[#allocation1 + $0x23] ss:$4 sm:$0xff] %v4835_v50  ;;  %v12525_v30 = vmax.f32 %v4755_v29, 0.0  ;;  %v5797_v56 = vrot.slane %v12527_v39, 5  ;;  %vm12555_vm8 = vmand %vm4901_vm4, %vm4911_vm7 }
 0x8f4   : > { %v5322_v27 = vor.u32 %v5321_v2, %v5318_v57  ;;  %v4892_v50 = vadd.s32 3, %v12342_v53  ;;  %v2168_v52 = vadd.f32 %v14859_v45, %v14858_v44  ;;  %v4836_v29 = vrot.slane %v12472_v43, 4  ;;  %v8294_v57 = vld [vmem:[%s13387_s3 + $0xe8] sm:$0xff]  ;;  %vm12621_vm15 = vmand %vm12555_vm8, %vm4964_vm11 }
 0x8f5   : > { %5946 = vmatmul.bf16.vlgmr.msra.gmra.mxu3 %v5874_v20  ;;  %v5516_v13 = vpack.c.b16 %v5501_v3, %v5500_v32  ;;  %v5084_v61 = vld.sshfl [vmem:[#allocation1] sm:$0xff pattern:$0x73625140]  ;;  %v4838_v10 = vrot.slane %v12525_v30, 2  ;;  %v4839_v41 = vrot.slane %v12525_v30, 4  ;;  %v5335_v20 = vshll.u32 %v12527_v39, 16  ;;  %6076 = vmatpush.bf16.msrb.mxu1 %v8294_v57 }
 0x8f6   : > { %v5216_v26 = vsel %vm12412_vm10, %v5084_v61, 0.0  ;;  %5086 = vst [vmem:[#allocation1] ss:$4 sm:$0xff] %v4830_v8  ;;  %v4682_v18 = vpop.f32.mrf.mxu0  ;;  %v5323_v3 = vrot.slane %v5322_v27, 4  ;;  %vm4902_vm9 = vcmp.ge.s32.totalorder %v4892_v50, 0  ;;  %vm4938_vm10 = vmand %vm12555_vm8, %vm4929_vm6  ;;  %vm4912_vm12 = vcmp.lt.s32.totalorder %v4892_v50, 16 }
 0x8f7   : > { %5588 = vmatmul.bf16.vlgmr.msra.gmra.mxu1 %v5516_v13  ;;  %v5246_v7 = vpack.c.bf16 %v5216_v26, %v5216_v26  ;;  %5087 = vst [vmem:[#allocation1 + $0x1] ss:$4 sm:$0xff] %v4831_v59  ;;  %v4729_v60 = vadd.f32 %v4682_v18, %v14857_v58  ;;  %v14863_v61 = vld [vmem:[#allocation71_spill] sm:$0xff]  ;;  %v5337_v58 = vrot.slane %v5335_v20, 5  ;;  %vm12591_vm13 = vmand %vm4902_vm9, %vm4912_vm12 }
 0x8f8   : > { %5088 = vst [vmem:[#allocation1 + $0x2] ss:$4 sm:$0xff] %v12438_v16  ;;  %v7844_v16 = vrot.slane %v12474_v38, 9  ;;  %v2588_v6 = vadd.f32 %v14863_v61, %v2168_v52  ;;  %vm12605_vm14 = vmand %vm12591_vm13, %vm4929_vm6 }
 0x8f9   : > { %v5648_v21 = vunpack.c.l.b16 %v5246_v7  ;;  %5089 = vst [vmem:[#allocation1 + $0x3] ss:$4 sm:$0xff] %v4832_v19  ;;  %v5794_v25 = vrot.slane %v5246_v7, 5  ;;  %v5325_v28 = vshll.u32 %v5246_v7, 16  ;;  %v5329_v34 = vshrl.u32 %v5246_v7, 16  ;;  %v14862_v19 = vld [vmem:[#allocation70_spill] sm:$0xff]  ;;  %vm12661_vm0 = vmand %vm12591_vm13, %vm4964_vm11 }
 0x8fa   : > { %v4756_v37 = vadd.f32 %v12308_v62, %v4729_v60  ;;  %v5095_v11 = vld.sshfl [vmem:[#allocation1 + $0x20] sm:$0xff pattern:$0x73625140]  ;;  %v3255_v13 = vadd.f32 %v14862_v19, %v2902_v31 }
 0x8fb   : > { %v12551_v40 = vpack.c.b16 %v5648_v21, %v5647_v63  ;;  %v5796_v47 = vrot.slane %v5794_v25, 4  ;;  %v5327_v22 = vrot.slane %v5325_v28, 5  ;;  %5098 = vst [vmem:[#allocation1 + $0x20] ss:$4 sm:$0xff] %v4837_v33  ;;  %v5795_v9 = vsel %vm12468_vm5, %v7844_v16, %v5794_v25  ;;  %v14864_v33 = vld [vmem:[#allocation112_spill] sm:$0xff] }
 0x8fc   : > { %v5331_v38 = vrot.slane %v5329_v34, 4  ;;  %v5219_v43 = vsel %vm12555_vm8, %v5095_v11, 0.0  ;;  %5099 = vst [vmem:[#allocation1 + $0x21] ss:$4 sm:$0xff] %v12525_v30  ;;  %v12573_v23 = vmax.f32 %v4756_v37, 0.0  ;;  %v3973_v26 = vadd.f32 %v14864_v33, %v3657_v5 }
 0x8fd   : > { %5738 = vmatmul.bf16.gmra.mxu2 %v12551_v40  ;;  %v5798_v32 = vsel %vm12468_vm5, %v5796_v47, %v5797_v56  ;;  %v12568_v12 = vpack.c.bf16 %v5219_v43, %v5219_v43  ;;  %5100 = vst [vmem:[#allocation1 + $0x22] ss:$4 sm:$0xff] %v4838_v10  ;;  %v5860_v63 = vunpack.c.l.b16 %v5795_v9  ;;  %v5328_v18 = vsel %vm12486_vm1, %v5323_v3, %v5327_v22  ;;  %v14865_v10 = vld [vmem:[#allocation169_spill] sm:$0xff] }
 0x8fe   : > { %v5861_v39 = vunpack.c.l.b16 %v5798_v32  ;;  %v5332_v2 = vor.u32 %v5331_v38, %v5327_v22  ;;  %v4684_v59 = vpop.f32.mrf.mxu0  ;;  %5101 = vst [vmem:[#allocation1 + $0x23] ss:$4 sm:$0xff] %v4839_v41  ;;  %v4326_v56 = vadd.f32 %v14865_v10, %v3973_v26  ;;  %v4843_v28 = vrot.slane %v12573_v23, 6  ;;  %v14870_v22 = vld [vmem:[#allocation72_spill] sm:$0xff]  ;;  %v8301_v26 = vld [vmem:[%s13387_s3 + $0x120] sm:$0xff] }
 0x8ff   : > { %v5349_v4 = vshll.u32 %v12568_v12, 16  ;;  %v5353_v31 = vshrl.u32 %v12568_v12, 16  ;;  %v5650_v44 = vunpack.c.l.b16 %v12568_v12  ;;  %v5502_v45 = vunpack.c.l.b16 %v5328_v18  ;;  %v14871_v38 = vld [vmem:[#allocation76_spill] sm:$0xff]  ;;  %6235 = vmatpush.bf16.msrb.mxu2 %v8301_v26 }
 0x900   : > { %v5333_v7 = vrot.slane %v5332_v2, 4  ;;  %v5094_v60 = vld.sshfl [vmem:[#allocation1] sm:$0xff pattern:$0x73625140]  ;;  %v12586_v27 = vpack.c.b16 %v5861_v39, %v5860_v63  ;;  %v4730_v41 = vadd.f32 %v4684_v59, %v4326_v56  ;;  %v2904_v9 = vadd.f32 %v14870_v22, %v2588_v6  ;;  %v14874_v6 = vld [vmem:[#allocation216_spill] sm:$0xff] }
 0x901   : > { %v5218_v21 = vsel %vm4938_vm10, %v5094_v60, 0.0  ;;  %5096 = vst [vmem:[#allocation1] ss:$4 sm:$0xff] %v4836_v29  ;;  %v12599_v16 = vrot.slane %v5349_v4, 5  ;;  %v5355_v29 = vrot.slane %v5353_v31, 4  ;;  %v3659_v20 = vadd.f32 %v14871_v38, %v3255_v13  ;;  %v14876_v4 = vld [vmem:[#allocation114_spill] sm:$0xff] }
 0x902   : > { %v5338_v25 = vsel %vm12486_vm1, %v5333_v7, %v5337_v58  ;;  %v5248_v34 = vpack.c.bf16 %v5218_v21, %v5218_v21  ;;  %v4840_v43 = vrot.slane %v12525_v30, 6  ;;  %v5801_v2 = vrot.slane %v12568_v12, 5  ;;  %v14875_v58 = vld [vmem:[#allocation74_spill] sm:$0xff] }
 0x903   : > { %v5503_v52 = vunpack.c.l.b16 %v5338_v25  ;;  %v4841_v13 = vrot.slane %v12573_v23, 2  ;;  %v4757_v61 = vadd.f32 %v12308_v62, %v4730_v41  ;;  %v4842_v12 = vrot.slane %v12573_v23, 4 }
 0x904   : > { %v5649_v37 = vunpack.c.l.b16 %v5248_v34  ;;  %v5340_v11 = vshrl.u32 %v5248_v34, 16  ;;  %v5343_v50 = vshll.u32 %v5248_v34, 16  ;;  %v5356_v7 = vor.u32 %v5355_v29, %v12599_v16 }
 0x905   : > { %5951 = vmatmul.bf16.gmra.mxu3 %v12586_v27  ;;  %v12613_v32 = vpack.c.b16 %v5503_v52, %v5502_v45  ;;  %v5102_v3 = vld.sshfl [vmem:[#allocation1 + $0x20] sm:$0xff pattern:$0x73625140]  ;;  %v3257_v60 = vadd.f32 %v14875_v58, %v2904_v9  ;;  %v3975_v10 = vadd.f32 %v14876_v4, %v3659_v20  ;;  %v7845_v25 = vrot.slane %v5248_v34, 9  ;;  %v14877_v45 = vld [vmem:[#allocation44_spill] sm:$0xff] }
 0x906   : > { %v12615_v57 = vpack.c.b16 %v5650_v44, %v5649_v37  ;;  %v4687_v59 = vpop.f32.mrf.mxu0  ;;  %v5342_v19 = vrot.slane %v5340_v11, 4  ;;  %v5345_v30 = vrot.slane %v5343_v50, 5  ;;  %5107 = vst [vmem:[#allocation1 + $0x20] ss:$4 sm:$0xff] %v4843_v28  ;;  %v5221_v8 = vsel %vm12605_vm14, %v5102_v3, 0.0 }
 0x907   : > { %5593 = vmatmul.bf16.gmra.mxu1 %v12613_v32  ;;  %v4731_v33 = vadd.f32 %v4687_v59, %v14874_v6  ;;  %v5803_v28 = vrot.slane %v5801_v2, 4  ;;  %v12644_v44 = vpack.c.bf16 %v5221_v8, %v5221_v8  ;;  %v4328_v52 = vadd.f32 %v14877_v45, %v3975_v10 }
 0x908   : > { %6518 = vmatmul.bf16.vlgmr.msrb.gmra.mxu0 %v12615_v57  ;;  %v5097_v63 = vld.sshfl [vmem:[#allocation1] sm:$0xff pattern:$0x73625140]  ;;  %v5346_v18 = vor.u32 %v5345_v30, %v5342_v19  ;;  %v12647_v41 = vmax.f32 %v4757_v61, 0.0  ;;  %v5802_v50 = vsel %vm12468_vm5, %v7845_v25, %v5801_v2  ;;  %v5357_v47 = vrot.slane %v5356_v7, 4  ;;  %v14882_v25 = vld [vmem:[#allocation221_spill] sm:$0xff] }
 0x909   : > { %v5220_v56 = vsel %vm12621_vm15, %v5097_v63, 0.0  ;;  %5103 = vst [vmem:[#allocation1] ss:$4 sm:$0xff] %v4840_v43  ;;  %v4758_v21 = vadd.f32 %v12308_v62, %v4731_v33  ;;  %v5364_v59 = vshrl.u32 %v12644_v44, 16  ;;  %v5367_v19 = vshll.u32 %v12644_v44, 16  ;;  %v14880_v30 = vld [vmem:[#allocation30_spill] sm:$0xff] }
 0x90a   : > { %v5250_v31 = vpack.c.bf16 %v5220_v56, %v5220_v56  ;;  %5104 = vst [vmem:[#allocation1 + $0x1] ss:$4 sm:$0xff] %v12573_v23  ;;  %v5347_v11 = vrot.slane %v5346_v18, 4  ;;  %v5862_v6 = vunpack.c.l.b16 %v5802_v50  ;;  %v4844_v26 = vrot.slane %v12647_v41, 2  ;;  %v14883_v50 = vld [vmem:[#allocation75_spill] sm:$0xff] }
 0x90b   : > { %5105 = vst [vmem:[#allocation1 + $0x2] ss:$4 sm:$0xff] %v4841_v13  ;;  %v4781_v37 = vmax.f32 %v4758_v21, 0.0  ;;  %v14881_v13 = vld [vmem:[#allocation235_spill] sm:$0xff]  ;;  %v4893_v18 = vadd.s32 4, %v12342_v53  ;;  %v4845_v56 = vrot.slane %v12647_v41, 4 }
 0x90c   : > { %v5804_v29 = vrot.slane %v5250_v31, 5  ;;  %5106 = vst [vmem:[#allocation1 + $0x3] ss:$4 sm:$0xff] %v4842_v12  ;;  %v5359_v22 = vshll.u32 %v5250_v31, 16  ;;  %v5352_v38 = vsel %vm12486_vm1, %v5347_v11, %v12599_v16  ;;  %v8293_v16 = vld [vmem:[%s13387_s3 + $0xe0] sm:$0xff]  ;;  %v2173_v61 = vadd.f32 %v14881_v13, %v14880_v30 }
 0x90d   : > { %5743 = vmatmul.bf16.gmra.mxu2 %v12615_v57  ;;  %v4847_v34 = vrot.slane %v4781_v37, 2  ;;  %v4848_v23 = vrot.slane %v4781_v37, 4  ;;  %v4849_v9 = vrot.slane %v4781_v37, 6  ;;  %v5109_v20 = vld.sshfl [vmem:[#allocation1 + $0x20] sm:$0xff pattern:$0x73625140]  ;;  %v5504_v63 = vunpack.c.l.b16 %v5352_v38  ;;  %6077 = vmatpush.bf16.msrb.mxu1 %v8293_v16 }
 0x90e   : > { %v5805_v43 = vsel %vm12468_vm5, %v5803_v28, %v5804_v29  ;;  %v5361_v3 = vrot.slane %v5359_v22, 5  ;;  %v4689_v39 = vpop.f32.mrf.mxu0  ;;  %5114 = vst [vmem:[#allocation1 + $0x20] ss:$4 sm:$0xff] %v4781_v37  ;;  %v5223_v10 = vsel %vm12661_vm0, %v5109_v20, 0.0  ;;  %v5366_v21 = vrot.slane %v5364_v59, 4  ;;  %v8292_v59 = vld [vmem:[%s13387_s3 + $0xd8] sm:$0xff] }
 0x90f   : > { %v5863_v33 = vunpack.c.l.b16 %v5805_v43  ;;  %v4732_v8 = vadd.f32 %v4689_v39, %v4328_v52  ;;  %5115 = vst [vmem:[#allocation1 + $0x21] ss:$4 sm:$0xff] %v4847_v34  ;;  %v5369_v31 = vrot.slane %v5367_v19, 5  ;;  %v3661_v28 = vadd.f32 %v14882_v25, %v3257_v60  ;;  %v14884_v19 = vld [vmem:[#allocation126_spill] sm:$0xff] }
 0x910   : > { %v5362_v12 = vsel %vm12486_vm1, %v5357_v47, %v5361_v3  ;;  %5116 = vst [vmem:[#allocation1 + $0x22] ss:$4 sm:$0xff] %v4848_v23  ;;  %v4846_v45 = vrot.slane %v12647_v41, 6  ;;  %v2590_v29 = vadd.f32 %v14883_v50, %v2173_v61  ;;  %v5651_v22 = vunpack.c.l.b16 %v12644_v44  ;;  %v14887_v50 = vld [vmem:[#allocation89_spill] sm:$0xff] }
 0x911   : > { %v12676_v7 = vpack.c.b16 %v5863_v33, %v5862_v6  ;;  %v5505_v58 = vunpack.c.l.b16 %v5362_v12  ;;  %v4759_v4 = vadd.f32 %v12308_v62, %v4732_v8  ;;  %5117 = vst [vmem:[#allocation1 + $0x23] ss:$4 sm:$0xff] %v4849_v9  ;;  %v5253_v34 = vpack.c.bf16 %v5223_v10, %v5223_v10  ;;  %6078 = vmatpush.bf16.msrb.mxu1 %v8292_v59 }
 0x912   : > { %v7846_v9 = vrot.slane %v12644_v44, 9  ;;  %vm4903_vm3 = vcmp.ge.s32.totalorder %v4893_v18, 0  ;;  %v5370_v43 = vor.u32 %v5369_v31, %v5366_v21  ;;  %vm4913_vm2 = vcmp.lt.s32.totalorder %v4893_v18, 16  ;;  %v8300_v44 = vld [vmem:[%s13387_s3 + $0x118] sm:$0xff] }
 0x913   : > { %v12684_v52 = vpack.c.b16 %v5505_v58, %v5504_v63  ;;  %v12686_v37 = vmax.f32 %v4759_v4, 0.0  ;;  %v5108_v11 = vld.sshfl [vmem:[#allocation1] sm:$0xff pattern:$0x73625140]  ;;  %v3977_v16 = vadd.f32 %v14884_v19, %v3661_v28  ;;  %v5811_v30 = vrot.slane %v5253_v34, 5  ;;  %vm12712_vm4 = vmand %vm4903_vm3, %vm4913_vm2  ;;  %6236 = vmatpush.bf16.msrb.mxu2 %v8300_v44 }
 0x914   : > { %v5222_v47 = vsel %vm12591_vm13, %v5108_v11, 0.0  ;;  %5110 = vst [vmem:[#allocation1] ss:$4 sm:$0xff] %v12647_v41  ;;  %v5383_v61 = vshll.u32 %v5253_v34, 16  ;;  %v4894_v12 = vadd.s32 5, %v12342_v53  ;;  %v5371_v63 = vrot.slane %v5370_v43, 4  ;;  %vm4944_vm7 = vmand %vm12712_vm4, %vm4929_vm6 }
 0x915   : > { %5956 = vmatmul.bf16.gmra.mxu3 %v12676_v7  ;;  %v4850_v60 = vrot.slane %v12686_v37, 2  ;;  %v5252_v23 = vpack.c.bf16 %v5222_v47, %v5222_v47  ;;  %5111 = vst [vmem:[#allocation1 + $0x1] ss:$4 sm:$0xff] %v4844_v26  ;;  %v4851_v38 = vrot.slane %v12686_v37, 4  ;;  %v4852_v20 = vrot.slane %v12686_v37, 6  ;;  %vm12774_vm13 = vmand %vm12712_vm4, %vm4964_vm11  ;;  %v8299_v26 = vld [vmem:[%s13387_s3 + $0x110] sm:$0xff] }
 0x916   : > { %5112 = vst [vmem:[#allocation1 + $0x2] ss:$4 sm:$0xff] %v4845_v56  ;;  %v4692_v5 = vpop.f32.mrf.mxu0  ;;  %v4330_v25 = vadd.f32 %v12136_v46, %v3977_v16  ;;  %vm4904_vm8 = vcmp.ge.s32.totalorder %v4894_v12, 0  ;;  %vm4914_vm9 = vcmp.lt.s32.totalorder %v4894_v12, 16  ;;  %v2906_v47 = vadd.f32 %v14887_v50, %v2590_v29 }
 0x917   : > { %5598 = vmatmul.bf16.gmra.mxu1 %v12684_v52  ;;  %v5652_v41 = vunpack.c.l.b16 %v5252_v23  ;;  %5113 = vst [vmem:[#allocation1 + $0x3] ss:$4 sm:$0xff] %v4846_v45  ;;  %v5808_v3 = vrot.slane %v5252_v23, 5  ;;  %v4733_v39 = vadd.f32 %v4692_v5, %v12119_v15  ;;  %v5373_v2 = vshll.u32 %v5252_v23, 16  ;;  %vm12745_vm10 = vmand %vm4904_vm8, %vm4914_vm9  ;;  %6237 = vmatpush.bf16.msrb.mxu2 %v8299_v26 }
 0x918   : > { %v5377_v13 = vshrl.u32 %v5252_v23, 16  ;;  %v5119_v6 = vld.sshfl [vmem:[#allocation1 + $0x20] sm:$0xff pattern:$0x73625140]  ;;  %v5385_v34 = vrot.slane %v5383_v61, 5  ;;  %vm12765_vm12 = vmand %vm12745_vm10, %vm4929_vm6 }
 0x919   : > { %v12707_v33 = vpack.c.b16 %v5652_v41, %v5651_v22  ;;  %v5810_v8 = vrot.slane %v5808_v3, 4  ;;  %v4760_v15 = vadd.f32 %v12308_v62, %v4733_v39  ;;  %5122 = vst [vmem:[#allocation1 + $0x20] ss:$4 sm:$0xff] %v4850_v60  ;;  %v5375_v58 = vrot.slane %v5373_v2, 5  ;;  %vm12827_vm14 = vmand %vm12745_vm10, %vm4964_vm11 }
 0x91a   : > { %v5379_v4 = vrot.slane %v5377_v13, 4  ;;  %v5225_v10 = vsel %vm12712_vm4, %v5119_v6, 0.0  ;;  %5123 = vst [vmem:[#allocation1 + $0x21] ss:$4 sm:$0xff] %v4851_v38  ;;  %v5809_v18 = vsel %vm12468_vm5, %v7846_v9, %v5808_v3  ;;  %v14890_v13 = vld [vmem:[#allocation8_spill] sm:$0xff] }
 0x91b   : > { %6523 = vmatmul.bf16.gmra.mxu0 %v12707_v33  ;;  %v5812_v56 = vsel %vm12468_vm5, %v5810_v8, %v5811_v30  ;;  %v12724_v21 = vmax.f32 %v4760_v15, 0.0  ;;  %v12726_v31 = vpack.c.bf16 %v5225_v10, %v5225_v10  ;;  %5124 = vst [vmem:[#allocation1 + $0x22] ss:$4 sm:$0xff] %v4852_v20  ;;  %v5376_v11 = vsel %vm12486_vm1, %v5371_v63, %v5375_v58 }
 0x91c   : > { %v5380_v28 = vor.u32 %v5379_v4, %v5375_v58  ;;  %v5865_v45 = vunpack.c.l.b16 %v5812_v56  ;;  %v5864_v22 = vunpack.c.l.b16 %v5809_v18  ;;  %v5506_v41 = vunpack.c.l.b16 %v5376_v11 }
 0x91d   : > { %5748 = vmatmul.bf16.gmra.mxu2 %v12707_v33  ;;  %5125 = vst [vmem:[#allocation1 + $0x23] ss:$4 sm:$0xff] %v12724_v21  ;;  %v5397_v20 = vshll.u32 %v12726_v31, 16  ;;  %v5401_v5 = vshrl.u32 %v12726_v31, 16  ;;  %v5654_v44 = vunpack.c.l.b16 %v12726_v31  ;;  %v3259_v61 = vadd.f32 %v14890_v13, %v2906_v47 }
 0x91e   : > { %v5381_v46 = vrot.slane %v5380_v28, 4  ;;  %v4694_v60 = vpop.f32.mrf.mxu0  ;;  %v5118_v23 = vld.sshfl [vmem:[#allocation1] sm:$0xff pattern:$0x73625140]  ;;  %v12749_v39 = vpack.c.b16 %v5865_v45, %v5864_v22  ;;  %v4853_v6 = vrot.slane %v12724_v21, 2  ;;  %v4854_v63 = vrot.slane %v12724_v21, 4 }
 0x91f   : > { %v4734_v9 = vadd.f32 %v4694_v60, %v4330_v25  ;;  %v5224_v38 = vsel %vm4944_vm7, %v5118_v23, 0.0  ;;  %5120 = vst [vmem:[#allocation1] ss:$4 sm:$0xff] %v12686_v37  ;;  %v12753_v16 = vrot.slane %v5397_v20, 5  ;;  %v5403_v30 = vrot.slane %v5401_v5, 4  ;;  %v14895_v25 = vld [vmem:[#allocation231_spill] sm:$0xff] }
 0x920   : > { %v5386_v43 = vsel %vm12486_vm1, %v5381_v46, %v5385_v34  ;;  %v5254_v3 = vpack.c.bf16 %v5224_v38, %v5224_v38  ;;  %v14896_v28 = vld [vmem:[#allocation244_spill] sm:$0xff]  ;;  %v4855_v11 = vrot.slane %v12724_v21, 6  ;;  %v5815_v50 = vrot.slane %v12726_v31, 5  ;;  %v14897_v5 = vld [vmem:[#allocation95_spill] sm:$0xff] }
 0x921   : > { %v5507_v2 = vunpack.c.l.b16 %v5386_v43  ;;  %v4761_v37 = vadd.f32 %v12308_v62, %v4734_v9  ;;  %v2178_v45 = vadd.f32 %v14896_v28, %v14895_v25  ;;  %v5404_v60 = vor.u32 %v5403_v30, %v12753_v16  ;;  %v8291_v20 = vld [vmem:[%s13387_s3 + $0xd0] sm:$0xff] }
 0x922   : > { %v5388_v59 = vshrl.u32 %v5254_v3, 16  ;;  %v5391_v19 = vshll.u32 %v5254_v3, 16  ;;  %v5653_v58 = vunpack.c.l.b16 %v5254_v3  ;;  %v3663_v43 = vadd.f32 %v14897_v5, %v3259_v61  ;;  %6079 = vmatpush.bf16.msrb.mxu1 %v8291_v20  ;;  %v14900_v28 = vld [vmem:[#allocation92_spill] sm:$0xff]  ;;  %v12838_v5 = vld [vmem:[%s13386_s2] ss:$0 sm:$0xff] }
 0x923   : > { %v12757_v8 = vpack.c.b16 %v5507_v2, %v5506_v41  ;;  %v12759_v15 = vmax.f32 %v4761_v37, 0.0  ;;  %v14898_v2 = vld [vmem:[#allocation90_spill] sm:$0xff]  ;;  %v5817_v13 = vrot.slane %v5815_v50, 4 }
 0x924   : > { %v5390_v10 = vrot.slane %v5388_v59, 4  ;;  %v5393_v18 = vrot.slane %v5391_v19, 5  ;;  %v5126_v56 = vld.sshfl [vmem:[#allocation1 + $0x20] sm:$0xff pattern:$0x73625140]  ;;  %v12786_v47 = vpack.c.b16 %v5654_v44, %v5653_v58  ;;  %v2592_v37 = vadd.f32 %v14898_v2, %v2178_v45  ;;  %v14899_v19 = vld [vmem:[#allocation128_spill] sm:$0xff] }
 0x925   : > { %5961 = vmatmul.bf16.gmra.mxu3 %v12749_v39  ;;  %v5227_v23 = vsel %vm12765_vm12, %v5126_v56, 0.0  ;;  %v4856_v21 = vrot.slane %v12759_v15, 2  ;;  %v3979_v30 = vadd.f32 %v14899_v19, %v3663_v43  ;;  %v4895_v2 = vadd.s32 6, %v12342_v53 }
 0x926   : > { %v4697_v22 = vpop.f32.mrf.mxu0  ;;  %v5121_v46 = vld.sshfl [vmem:[#allocation1] sm:$0xff pattern:$0x73625140]  ;;  %v5394_v34 = vor.u32 %v5393_v18, %v5390_v10  ;;  %v12796_v38 = vpack.c.bf16 %v5227_v23, %v5227_v23  ;;  %v2908_v45 = vadd.f32 %v14900_v28, %v2592_v37 }
 0x927   : > { %5603 = vmatmul.bf16.gmra.mxu1 %v12757_v8  ;;  %v4735_v31 = vadd.f32 %v4697_v22, %v12144_v0  ;;  %v5226_v9 = vsel %vm12774_vm13, %v5121_v46, 0.0  ;;  %5127 = vst [vmem:[#allocation1] ss:$4 sm:$0xff] %v4853_v6  ;;  %v7847_v0 = vrot.slane %v5254_v3, 9  ;;  %v5405_v3 = vrot.slane %v5404_v60, 4 }
 0x928   : > { %v5256_v41 = vpack.c.bf16 %v5226_v9, %v5226_v9  ;;  %5128 = vst [vmem:[#allocation1 + $0x1] ss:$4 sm:$0xff] %v4854_v63  ;;  %v5395_v59 = vrot.slane %v5394_v34, 4  ;;  %v5412_v63 = vshrl.u32 %v12796_v38, 16  ;;  %v5415_v18 = vshll.u32 %v12796_v38, 16 }
 0x929   : > { %v4762_v44 = vadd.f32 %v12308_v62, %v4735_v31  ;;  %5129 = vst [vmem:[#allocation1 + $0x2] ss:$4 sm:$0xff] %v4855_v11  ;;  %v5816_v61 = vsel %vm12468_vm5, %v7847_v0, %v5815_v50  ;;  %v4332_v56 = vadd.f32 %v12150_v49, %v3979_v30  ;;  %v4858_v11 = vrot.slane %v12759_v15, 6 }
 0x92a   : > { %v5818_v6 = vrot.slane %v5256_v41, 5  ;;  %5130 = vst [vmem:[#allocation1 + $0x3] ss:$4 sm:$0xff] %v12759_v15  ;;  %v5407_v12 = vshll.u32 %v5256_v41, 16  ;;  %v5400_v62 = vsel %vm12486_vm1, %v5395_v59, %v12753_v16  ;;  %v4857_v16 = vrot.slane %v12759_v15, 4 }
 0x92b   : > { %6528 = vmatmul.bf16.gmra.mxu0 %v12786_v47  ;;  %5131 = vst [vmem:[#allocation1 + $0x20] ss:$4 sm:$0xff] %v4856_v21  ;;  %v4785_v58 = vmax.f32 %v4762_v44, 0.0  ;;  %v5866_v22 = vunpack.c.l.b16 %v5816_v61  ;;  %v5508_v46 = vunpack.c.l.b16 %v5400_v62  ;;  %v12831_v31 = vrot.slane %v5412_v63, 4  ;;  %v14905_v61 = vld [vmem:[#allocation93_spill] sm:$0xff] }
 0x92c   : > { %v5819_v4 = vsel %vm12468_vm5, %v5817_v13, %v5818_v6  ;;  %v5409_v10 = vrot.slane %v5407_v12, 5  ;;  %v5417_v15 = vrot.slane %v5415_v18, 5  ;;  %v14903_v13 = vld [vmem:[#allocation11_spill] sm:$0xff]  ;;  %v3261_v62 = vadd.f32 %v14905_v61, %v2908_v45 }
 0x92d   : > { %5753 = vmatmul.bf16.gmra.mxu2 %v12786_v47  ;;  %v5867_v25 = vunpack.c.l.b16 %v5819_v4  ;;  %v4859_v23 = vrot.slane %v4785_v58, 2  ;;  %v4860_v21 = vrot.slane %v4785_v58, 4  ;;  %v4861_v9 = vrot.slane %v4785_v58, 6  ;;  %v14904_v6 = vld [vmem:[#allocation23_spill] sm:$0xff] }
 0x92e   : > { %v5410_v50 = vsel %vm12486_vm1, %v5405_v3, %v5409_v10  ;;  %v4699_v26 = vpop.f32.mrf.mxu0  ;;  %v2183_v12 = vadd.f32 %v14904_v6, %v14903_v13  ;;  %v5655_v3 = vunpack.c.l.b16 %v12796_v38  ;;  %vm4905_vm15 = vcmp.ge.s32.totalorder %v4895_v2, 0  ;;  %v8298_v10 = vld [vmem:[%s13387_s3 + $0x108] sm:$0xff]  ;;  %v14912_v13 = vld [vmem:[#allocation233_spill] sm:$0xff] }
 0x92f   : > { %v5509_v34 = vunpack.c.l.b16 %v5410_v50  ;;  %v4736_v60 = vadd.f32 %v4699_v26, %v4332_v56  ;;  %v12833_v20 = vpack.c.b16 %v5867_v25, %v5866_v22  ;;  %vm4915_vm0 = vcmp.lt.s32.totalorder %v4895_v2, 16  ;;  %6238 = vmatpush.bf16.msrb.mxu2 %v8298_v10  ;;  %v8312_v50 = vld [vmem:[%s13387_s3 + $0x178] sm:$0xff]  ;;  %v8290_v26 = vld [vmem:[%s13387_s3 + $0xc8] sm:$0xff]  ;;  %v14909_v2 = vld [vmem:[#allocation130_spill] sm:$0xff] }
 0x930   : > { %vm12873_vm3 = vmand %vm4905_vm15, %vm4915_vm0  ;;  %6374 = vmatpush.bf16.msrb.mxu3 %v8312_v50  ;;  %6080 = vmatpush.bf16.msrb.mxu1 %v8290_v26  ;;  %v2594_v6 = vadd.f32 %v14912_v13, %v2183_v12  ;;  %v14913_v50 = vld [vmem:[#allocation96_spill] sm:$0xff] }
 0x931   : > { %v4763_v43 = vadd.f32 %v12838_v5, %v4736_v60  ;;  %v5132_v41 = vld.sshfl [vmem:[#allocation1] sm:$0xff pattern:$0x73625140]  ;;  %v12844_v0 = vpack.c.b16 %v5509_v34, %v5508_v46  ;;  %vm12894_vm2 = vmand %vm12873_vm3, %vm4929_vm6 }
 0x932   : > { %v5228_v37 = vsel %vm12745_vm10, %v5132_v41, 0.0  ;;  %5134 = vst [vmem:[#allocation1] ss:$4 sm:$0xff] %v4857_v16  ;;  %v5133_v44 = vld.sshfl [vmem:[#allocation1 + $0x20] sm:$0xff pattern:$0x73625140]  ;;  %v2910_v26 = vadd.f32 %v14913_v50, %v2594_v6  ;;  %vm12922_vm4 = vmand %vm12873_vm3, %vm4964_vm11 }
 0x933   : > { %v12846_v59 = vmax.f32 %v4763_v43, 0.0  ;;  %v5258_v19 = vpack.c.bf16 %v5228_v37, %v5228_v37  ;;  %5135 = vst [vmem:[#allocation1 + $0x1] ss:$4 sm:$0xff] %v4858_v11  ;;  %v5229_v30 = vsel %vm12827_vm14, %v5133_v44, 0.0  ;;  %v5418_v11 = vor.u32 %v5417_v15, %v12831_v31 }
 0x934   : > { %5136 = vst [vmem:[#allocation1 + $0x2] ss:$4 sm:$0xff] %v4785_v58  ;;  %v5259_v29 = vpack.c.bf16 %v5229_v30, %v5229_v30  ;;  %v7848_v15 = vrot.slane %v12796_v38, 9 }
 0x935   : > { %5966 = vmatmul.bf16.gmra.mxu3 %v12833_v20  ;;  %v4862_v63 = vrot.slane %v12846_v59, 2  ;;  %v5656_v4 = vunpack.c.l.b16 %v5258_v19  ;;  %5137 = vst [vmem:[#allocation1 + $0x3] ss:$4 sm:$0xff] %v4859_v23  ;;  %v5822_v56 = vrot.slane %v5258_v19, 5  ;;  %v5421_v28 = vshll.u32 %v5258_v19, 16  ;;  %v14908_v23 = vld [vmem:[#allocation7_spill] sm:$0xff] }
 0x936   : > { %v4702_v18 = vpop.f32.mrf.mxu0  ;;  %v5825_v25 = vrot.slane %v5259_v29, 5  ;;  %5138 = vst [vmem:[#allocation1 + $0x20] ss:$4 sm:$0xff] %v4860_v21  ;;  %v5425_v45 = vshrl.u32 %v5258_v19, 16  ;;  %v5431_v60 = vshll.u32 %v5259_v29, 16  ;;  %v3665_v21 = vadd.f32 %v14908_v23, %v3261_v62 }
 0x937   : > { %5608 = vmatmul.bf16.gmra.mxu1 %v12844_v0  ;;  %v12860_v58 = vpack.c.b16 %v5656_v4, %v5655_v3  ;;  %v4737_v16 = vadd.f32 %v4702_v18, %v12163_v55  ;;  %5139 = vst [vmem:[#allocation1 + $0x21] ss:$4 sm:$0xff] %v4861_v9  ;;  %v5824_v22 = vrot.slane %v5822_v56, 4  ;;  %v5423_v46 = vrot.slane %v5421_v28, 5  ;;  %v8311_v9 = vld [vmem:[%s13387_s3 + $0x170] sm:$0xff]  ;;  %v8310_v18 = vld [vmem:[%s13387_s3 + $0x168] sm:$0xff] }
 0x938   : > { %5140 = vst [vmem:[#allocation1 + $0x22] ss:$4 sm:$0xff] %v12846_v59  ;;  %v5427_v34 = vrot.slane %v5425_v45, 4  ;;  %v4863_v49 = vrot.slane %v12846_v59, 4  ;;  %v3981_v37 = vadd.f32 %v14909_v2, %v3665_v21  ;;  %v5823_v19 = vsel %vm12468_vm5, %v7848_v15, %v5822_v56  ;;  %6375 = vmatpush.bf16.msrb.mxu3 %v8311_v9  ;;  %v8309_v9 = vld [vmem:[%s13387_s3 + $0x160] sm:$0xff]  ;;  %v14918_v55 = vld [vmem:[#allocation105_spill] sm:$0xff] }
 0x939   : > { %v4764_v31 = vadd.f32 %v12838_v5, %v4737_v16  ;;  %5141 = vst [vmem:[#allocation1 + $0x23] ss:$4 sm:$0xff] %v4862_v63  ;;  %v5826_v43 = vsel %vm12468_vm5, %v5824_v22, %v5825_v25  ;;  %v5419_v38 = vrot.slane %v5418_v11, 4  ;;  %v5433_v62 = vrot.slane %v5431_v60, 5 }
 0x93a   : > { %v5428_v41 = vor.u32 %v5427_v34, %v5423_v46  ;;  %v4334_v29 = vadd.f32 %v12170_v35, %v3981_v37  ;;  %v4864_v63 = vrot.slane %v12846_v59, 6  ;;  %v5869_v4 = vunpack.c.l.b16 %v5826_v43 }
 0x93b   : > { %6533 = vmatmul.bf16.gmra.mxu0 %v12860_v58  ;;  %v4787_v44 = vmax.f32 %v4764_v31, 0.0  ;;  %v5424_v10 = vsel %vm12486_vm1, %v5419_v38, %v5423_v46  ;;  %v5868_v12 = vunpack.c.l.b16 %v5823_v19  ;;  %v4896_v59 = vadd.s32 7, %v12342_v53  ;;  %v14917_v19 = vld [vmem:[#allocation28_spill] sm:$0xff] }
 0x93c   : > { %v5429_v61 = vrot.slane %v5428_v41, 4  ;;  %v5142_v3 = vld.sshfl [vmem:[#allocation1] sm:$0xff pattern:$0x73625140]  ;;  %v5510_v46 = vunpack.c.l.b16 %v5424_v10  ;;  %6376 = vmatpush.bf16.msrb.mxu3 %v8310_v18  ;;  %v3263_v30 = vadd.f32 %v14918_v55, %v2910_v26 }
 0x93d   : > { %5758 = vmatmul.bf16.gmra.mxu2 %v12860_v58  ;;  %5144 = vst [vmem:[#allocation1] ss:$4 sm:$0xff] %v4863_v49  ;;  %v5230_v35 = vsel %vm12894_vm2, %v5142_v3, 0.0  ;;  %v4865_v28 = vrot.slane %v4787_v44, 2  ;;  %v4866_v22 = vrot.slane %v4787_v44, 4  ;;  %v4867_v60 = vrot.slane %v4787_v44, 6 }
 0x93e   : > { %v5434_v56 = vsel %vm12486_vm1, %v5429_v61, %v5433_v62  ;;  %v4704_v25 = vpop.f32.mrf.mxu0  ;;  %v5260_v11 = vpack.c.bf16 %v5230_v35, %v5230_v35  ;;  %v12913_v23 = vpack.c.b16 %v5869_v4, %v5868_v12  ;;  %vm4906_vm7 = vcmp.ge.s32.totalorder %v4896_v59, 0  ;;  %v14919_v4 = vld [vmem:[#allocation109_spill] sm:$0xff] }
 0x93f   : > { %v5511_v45 = vunpack.c.l.b16 %v5434_v56  ;;  %v4738_v16 = vadd.f32 %v4704_v25, %v4334_v29  ;;  %vm4916_vm8 = vcmp.lt.s32.totalorder %v4896_v59, 16  ;;  %v3667_v10 = vadd.f32 %v14919_v4, %v3263_v30  ;;  %v14922_v59 = vld [vmem:[#allocation202_spill] sm:$0xff] }
 0x940   : > { %v5143_v34 = vld.sshfl [vmem:[#allocation1 + $0x20] sm:$0xff pattern:$0x73625140]  ;;  %v5436_v2 = vshrl.u32 %v5260_v11, 16  ;;  %v5439_v37 = vshll.u32 %v5260_v11, 16  ;;  %v5657_v29 = vunpack.c.l.b16 %v5260_v11  ;;  %v7849_v56 = vrot.slane %v5260_v11, 9  ;;  %vm12940_vm9 = vmand %vm4906_vm7, %vm4916_vm8  ;;  %6377 = vmatpush.bf16.msrb.mxu3 %v8309_v9 }
 0x941   : > { %v4765_v21 = vadd.f32 %v12838_v5, %v4738_v16  ;;  %v5231_v49 = vsel %vm12873_vm3, %v5143_v34, 0.0  ;;  %5146 = vst [vmem:[#allocation1 + $0x20] ss:$4 sm:$0xff] %v4864_v63  ;;  %v12929_v43 = vpack.c.b16 %v5511_v45, %v5510_v46  ;;  %v3983_v34 = vadd.f32 %v14922_v59, %v3667_v10  ;;  %vm4953_vm10 = vmand %vm12940_vm9, %vm4929_vm6 }
 0x942   : > { %v5261_v31 = vpack.c.bf16 %v5231_v49, %v5231_v49  ;;  %5147 = vst [vmem:[#allocation1 + $0x21] ss:$4 sm:$0xff] %v4787_v44  ;;  %v14916_v44 = vld [vmem:[#allocation227_spill] sm:$0xff]  ;;  %v5438_v16 = vrot.slane %v5436_v2, 4  ;;  %v5441_v50 = vrot.slane %v5439_v37, 5  ;;  %vm4988_vm12 = vmand %vm12940_vm9, %vm4964_vm11 }
 0x943   : > { %v4788_v41 = vmax.f32 %v4765_v21, 0.0  ;;  %5148 = vst [vmem:[#allocation1 + $0x22] ss:$4 sm:$0xff] %v4865_v28  ;;  %v2188_v38 = vadd.f32 %v14917_v19, %v14916_v44  ;;  %v4336_v37 = vadd.f32 %v12190_v54, %v3983_v34  ;;  %v8308_v54 = vld [vmem:[%s13387_s3 + $0x158] sm:$0xff] }
 0x944   : > { %v5658_v13 = vunpack.c.l.b16 %v5261_v31  ;;  %5149 = vst [vmem:[#allocation1 + $0x23] ss:$4 sm:$0xff] %v4866_v22  ;;  %v5145_v6 = vld.sshfl [vmem:[#allocation1] sm:$0xff pattern:$0x73625140]  ;;  %v5829_v61 = vrot.slane %v5261_v31, 5  ;;  %v5442_v21 = vor.u32 %v5441_v50, %v5438_v16  ;;  %6378 = vmatpush.bf16.msrb.mxu3 %v8308_v54 }
 0x945   : > { %5971 = vmatmul.bf16.gmra.mxu3 %v12913_v23  ;;  %v4868_v62 = vrot.slane %v4788_v41, 2  ;;  %v4869_v3 = vrot.slane %v4788_v41, 4  ;;  %v5232_v63 = vsel %vm12922_vm4, %v5145_v6, 0.0  ;;  %5151 = vst [vmem:[#allocation1] ss:$4 sm:$0xff] %v4867_v60  ;;  %v4870_v26 = vrot.slane %v4788_v41, 6 }
 0x946   : > { %v4707_v18 = vpop.f32.mrf.mxu0  ;;  %v5262_v12 = vpack.c.bf16 %v5232_v63, %v5232_v63  ;;  %v5831_v25 = vrot.slane %v5829_v61, 4  ;;  %5152 = vst [vmem:[#allocation1 + $0x1] ss:$4 sm:$0xff] %v4788_v41  ;;  %v12946_v45 = vpack.c.b16 %v5658_v13, %v5657_v29  ;;  %v5445_v22 = vshll.u32 %v5261_v31, 16  ;;  %v8307_v54 = vld [vmem:[%s13387_s3 + $0x150] sm:$0xff] }
 0x947   : > { %5613 = vmatmul.bf16.gmra.mxu1 %v12929_v43  ;;  %v4739_v28 = vadd.f32 %v4707_v18, %v12182_v36  ;;  %5153 = vst [vmem:[#allocation1 + $0x2] ss:$4 sm:$0xff] %v4868_v62  ;;  %v5449_v46 = vshrl.u32 %v5261_v31, 16  ;;  %v5830_v36 = vsel %vm12468_vm5, %v7849_v56, %v5829_v61  ;;  %v14923_v31 = vld [vmem:[#allocation226_spill] sm:$0xff]  ;;  %v5443_v30 = vrot.slane %v5442_v21, 4 }
 0x948   : > { %v5832_v11 = vrot.slane %v5262_v12, 5  ;;  %5154 = vst [vmem:[#allocation1 + $0x3] ss:$4 sm:$0xff] %v4869_v3  ;;  %v5455_v49 = vshll.u32 %v5262_v12, 16  ;;  %v5447_v9 = vrot.slane %v5445_v22, 5  ;;  %v2596_v2 = vadd.f32 %v14923_v31, %v2188_v38  ;;  %v8297_v38 = vld [vmem:[%s13387_s3 + $0x100] sm:$0xff]  ;;  %6379 = vmatpush.bf16.msrb.mxu3 %v8307_v54 }
 0x949   : > { %v4766_v60 = vadd.f32 %v12838_v5, %v4739_v28  ;;  %v5451_v41 = vrot.slane %v5449_v46, 4  ;;  %v5870_v3 = vunpack.c.l.b16 %v5830_v36  ;;  %v4897_v12 = vadd.s32 8, %v12342_v53  ;;  %6239 = vmatpush.bf16.msrb.mxu2 %v8297_v38 }
 0x94a   : > { %v5833_v15 = vsel %vm12468_vm5, %v5831_v25, %v5832_v11  ;;  %v5457_v29 = vrot.slane %v5455_v49, 5  ;;  %v5448_v4 = vsel %vm12486_vm1, %v5443_v30, %v5447_v9 }
 0x94b   : > { %v4789_v44 = vmax.f32 %v4766_v60, 0.0  ;;  %6538 = vmatmul.bf16.gmra.mxu0 %v12946_v45  ;;  %v5150_v19 = vld.sshfl [vmem:[#allocation1 + $0x20] sm:$0xff pattern:$0x73625140]  ;;  %v5871_v55 = vunpack.c.l.b16 %v5833_v15  ;;  %v5452_v13 = vor.u32 %v5451_v41, %v5447_v9  ;;  %v14924_v60 = vld [vmem:[#allocation108_spill] sm:$0xff]  ;;  %vm4907_vm13 = vcmp.ge.s32.totalorder %v4897_v12, 0 }
 0x94c   : > { %v5233_v6 = vsel %vm4953_vm10, %v5150_v19, 0.0  ;;  %5155 = vst [vmem:[#allocation1 + $0x20] ss:$4 sm:$0xff] %v4870_v26  ;;  %v5512_v26 = vunpack.c.l.b16 %v5448_v4  ;;  %v2912_v21 = vadd.f32 %v14924_v60, %v2596_v2  ;;  %vm4917_vm14 = vcmp.lt.s32.totalorder %v4897_v12, 16 }
 0x94d   : > { %v4871_v62 = vrot.slane %v4789_v44, 2  ;;  %v4872_v61 = vrot.slane %v4789_v44, 4  ;;  %5763 = vmatmul.bf16.gmra.mxu2 %v12946_v45  ;;  %v5453_v10 = vrot.slane %v5452_v13, 4  ;;  %v12970_v18 = vpack.c.bf16 %v5233_v6, %v5233_v6  ;;  %v8289_v13 = vld [vmem:[%s13387_s3 + $0xc0] sm:$0xff]  ;;  %vm13002_vm15 = vmand %vm4907_vm13, %vm4917_vm14 }
 0x94e   : > { %v4709_v63 = vpop.f32.mrf.mxu0  ;;  %v4873_v56 = vrot.slane %v4789_v44, 6  ;;  %v12973_v16 = vpack.c.b16 %v5871_v55, %v5870_v3  ;;  %v14925_v6 = vld [vmem:[#allocation222_spill] sm:$0xff]  ;;  %6081 = vmatpush.bf16.msrb.mxu1 %v8289_v13  ;;  %vm4956_vm0 = vmand %vm13002_vm15, %vm4929_vm6 }
 0x94f   : > { %v4740_v25 = vadd.f32 %v4709_v63, %v4336_v37  ;;  %v5156_v28 = vld.sshfl [vmem:[#allocation1] sm:$0xff pattern:$0x73625140]  ;;  %v5458_v50 = vsel %vm12486_vm1, %v5453_v10, %v5457_v29  ;;  %v5460_v34 = vshrl.u32 %v12970_v18, 16  ;;  %v5463_v49 = vshll.u32 %v12970_v18, 16  ;;  %vm13052_vm3 = vmand %vm13002_vm15, %vm4964_vm11 }
 0x950   : > { %v5234_v11 = vsel %vm12940_vm9, %v5156_v28, 0.0  ;;  %5158 = vst [vmem:[#allocation1] ss:$4 sm:$0xff] %v4789_v44  ;;  %v5513_v46 = vunpack.c.l.b16 %v5458_v50  ;;  %v5659_v9 = vunpack.c.l.b16 %v12970_v18  ;;  %v14928_v50 = vld [vmem:[#allocation113_spill] sm:$0xff] }
 0x951   : > { %v4767_v22 = vadd.f32 %v12838_v5, %v4740_v25  ;;  %v5264_v59 = vpack.c.bf16 %v5234_v11, %v5234_v11  ;;  %5159 = vst [vmem:[#allocation1 + $0x1] ss:$4 sm:$0xff] %v4871_v62  ;;  %v5462_v44 = vrot.slane %v5460_v34, 4  ;;  %v5465_v19 = vrot.slane %v5463_v49, 5 }
 0x952   : > { %5160 = vst [vmem:[#allocation1 + $0x2] ss:$4 sm:$0xff] %v4872_v61  ;;  %v12987_v15 = vpack.c.b16 %v5513_v46, %v5512_v26  ;;  %v3265_v62 = vadd.f32 %v14925_v6, %v2912_v21  ;;  %v8306_v46 = vld [vmem:[%s13387_s3 + $0x148] sm:$0xff] }
 0x953   : > { %v4790_v36 = vmax.f32 %v4767_v22, 0.0  ;;  %v5660_v41 = vunpack.c.l.b16 %v5264_v59  ;;  %5161 = vst [vmem:[#allocation1 + $0x3] ss:$4 sm:$0xff] %v4873_v56  ;;  %v5157_v31 = vld.sshfl [vmem:[#allocation1 + $0x20] sm:$0xff pattern:$0x73625140]  ;;  %v5466_v10 = vor.u32 %v5465_v19, %v5462_v44  ;;  %6380 = vmatpush.bf16.msrb.mxu3 %v8306_v46 }
 0x954   : > { %v5235_v37 = vsel %vm4988_vm12, %v5157_v31, 0.0  ;;  %v5836_v35 = vrot.slane %v5264_v59, 5  ;;  %v5469_v56 = vshll.u32 %v5264_v59, 16  ;;  %v5473_v25 = vshrl.u32 %v5264_v59, 16  ;;  %v14929_v21 = vld [vmem:[#allocation19_spill] sm:$0xff] }
 0x955   : > { %5976 = vmatmul.bf16.gmra.mxu3 %v12973_v16  ;;  %v4874_v2 = vrot.slane %v4790_v36, 2  ;;  %v4875_v55 = vrot.slane %v4790_v36, 4  ;;  %v4876_v30 = vrot.slane %v4790_v36, 6  ;;  %5162 = vst [vmem:[#allocation1 + $0x20] ss:$4 sm:$0xff] %v4790_v36  ;;  %v12995_v3 = vpack.c.b16 %v5660_v41, %v5659_v9 }
 0x956   : > { %v4712_v61 = vpop.f32.mrf.mxu0  ;;  %v5265_v29 = vpack.c.bf16 %v5235_v37, %v5235_v37  ;;  %v5838_v38 = vrot.slane %v5836_v35, 4  ;;  %v3669_v26 = vadd.f32 %v14928_v50, %v3265_v62  ;;  %v5471_v11 = vrot.slane %v5469_v56, 5 }
 0x957   : > { %5618 = vmatmul.bf16.gmra.mxu1 %v12987_v15  ;;  %v4741_v4 = vadd.f32 %v4712_v61, %v12195_v51  ;;  %5163 = vst [vmem:[#allocation1 + $0x21] ss:$4 sm:$0xff] %v4874_v2  ;;  %v5475_v22 = vrot.slane %v5473_v25, 4  ;;  %v7850_v51 = vrot.slane %v12970_v18, 9  ;;  %v5467_v9 = vrot.slane %v5466_v10, 4 }
 0x958   : > { %v5839_v28 = vrot.slane %v5265_v29, 5  ;;  %5164 = vst [vmem:[#allocation1 + $0x22] ss:$4 sm:$0xff] %v4875_v55  ;;  %v5479_v34 = vshll.u32 %v5265_v29, 16  ;;  %v3985_v49 = vadd.f32 %v14929_v21, %v3669_v26  ;;  %v8305_v55 = vld [vmem:[%s13387_s3 + $0x140] sm:$0xff] }
 0x959   : > { %v4768_v12 = vadd.f32 %v12838_v5, %v4741_v4  ;;  %5165 = vst [vmem:[#allocation1 + $0x23] ss:$4 sm:$0xff] %v4876_v30  ;;  %v5476_v41 = vor.u32 %v5475_v22, %v5471_v11  ;;  %v5837_v31 = vsel %vm12468_vm5, %v7850_v51, %v5836_v35  ;;  %v5472_v2 = vsel %vm12486_vm1, %v5467_v9, %v5471_v11  ;;  %v8328_v11 = vld [vmem:[%s13387_s3 + $0x1f8] sm:$0xff] }
 0x95a   : > { %v5840_v59 = vsel %vm12468_vm5, %v5838_v38, %v5839_v28  ;;  %v5166_v60 = vld.sshfl [vmem:[#allocation1] sm:$0xff pattern:$0x73625140]  ;;  %v4338_v44 = vadd.f32 %v12210_v24, %v3985_v49  ;;  %v5481_v35 = vrot.slane %v5479_v34, 5  ;;  %v5872_v24 = vunpack.c.l.b16 %v5837_v31  ;;  %6381 = vmatpush.bf16.msrb.mxu3 %v8305_v55  ;;  %6668 = vmatpush.bf16.msra.mxu1 %v8328_v11 }
 0x95b   : > { %v4791_v36 = vmax.f32 %v4768_v12, 0.0  ;;  %6543 = vmatmul.bf16.gmra.mxu0 %v12995_v3  ;;  %v5236_v37 = vsel %vm4956_vm0, %v5166_v60, 0.0  ;;  %v5873_v19 = vunpack.c.l.b16 %v5840_v59  ;;  %v5477_v6 = vrot.slane %v5476_v41, 4  ;;  %v8336_v12 = vld [vmem:[%s13387_s3 + $0x238] sm:$0xff] }
 0x95c   : > { %v13031_v62 = vpack.c.bf16 %v5236_v37, %v5236_v37  ;;  %v5514_v54 = vunpack.c.l.b16 %v5472_v2  ;;  %6810 = vmatpush.bf16.msra.mxu2 %v8336_v12  ;;  %v4898_v9 = vadd.s32 9, %v12342_v53 }
 0x95d   : > { %v4877_v18 = vrot.slane %v4791_v36, 2  ;;  %5768 = vmatmul.bf16.gmra.mxu2 %v12995_v3  ;;  %5168 = vst [vmem:[#allocation1] ss:$4 sm:$0xff] %v4791_v36  ;;  %v4878_v30 = vrot.slane %v4791_v36, 4  ;;  %v4879_v61 = vrot.slane %v4791_v36, 6  ;;  %v5482_v38 = vsel %vm12486_vm1, %v5477_v6, %v5481_v35 }
 0x95e   : > { %v4714_v13 = vpop.f32.mrf.mxu0  ;;  %v6140_v10 = vshrl.u32 %v13031_v62, 16  ;;  %v6143_v56 = vshll.u32 %v13031_v62, 16  ;;  %v13037_v25 = vpack.c.b16 %v5873_v19, %v5872_v24  ;;  %v5515_v50 = vunpack.c.l.b16 %v5482_v38 }
 0x95f   : > { %v4742_v29 = vadd.f32 %v4714_v13, %v4338_v44  ;;  %v6022_v21 = vunpack.c.l.b16 %v13031_v62  ;;  %vm4908_vm2 = vcmp.ge.s32.totalorder %v4898_v9, 0  ;;  %vm4918_vm4 = vcmp.lt.s32.totalorder %v4898_v9, 16 }
 0x960   : > { %v5167_v4 = vld.sshfl [vmem:[#allocation1 + $0x20] sm:$0xff pattern:$0x73625140]  ;;  %v6142_v51 = vrot.slane %v6140_v10, 4  ;;  %v6145_v59 = vrot.slane %v6143_v56, 5  ;;  %v13056_v60 = vpack.c.b16 %v5515_v50, %v5514_v54  ;;  %vm13067_vm7 = vmand %vm4908_vm2, %vm4918_vm4  ;;  %v7995_v24 = vrot.slane %v13031_v62, 9  ;;  %6811 = vmatpush.bf16.msra.mxu2 %v8335_v17 }
 0x961   : > { %v4769_v28 = vadd.f32 %v12838_v5, %v4742_v29  ;;  %v5237_v26 = vsel %vm13002_vm15, %v5167_v4, 0.0  ;;  %5170 = vst [vmem:[#allocation1 + $0x20] ss:$4 sm:$0xff] %v4877_v18  ;;  %vm4959_vm8 = vmand %vm13067_vm7, %vm4929_vm6 }
 0x962   : > { %v5267_v22 = vpack.c.bf16 %v5237_v26, %v5237_v26  ;;  %5171 = vst [vmem:[#allocation1 + $0x21] ss:$4 sm:$0xff] %v4878_v30  ;;  %v6146_v41 = vor.u32 %v6145_v59, %v6142_v51  ;;  %vm4994_vm6 = vmand %vm13067_vm7, %vm4964_vm11  ;;  %vm6899_vm11 = vcmask 1045504  }
 0x963   : > { %v4792_v34 = vmax.f32 %v4769_v28, 0.0  ;;  %5172 = vst [vmem:[#allocation1 + $0x22] ss:$4 sm:$0xff] %v4879_v61 }
 0x964   : > { %v5169_v49 = vld.sshfl [vmem:[#allocation1] sm:$0xff pattern:$0x73625140]  ;;  %v6023_v36 = vunpack.c.l.b16 %v5267_v22  ;;  %v6149_v63 = vshll.u32 %v5267_v22, 16  ;;  %v6147_v13 = vrot.slane %v6146_v41, 4  ;;  %v6153_v35 = vshrl.u32 %v5267_v22, 16 }
 0x965   : > { %5981 = vmatmul.bf16.gmra.mxu3 %v13037_v25  ;;  %v4880_v31 = vrot.slane %v4792_v34, 2  ;;  %v4881_v37 = vrot.slane %v4792_v34, 4  ;;  %v4882_v44 = vrot.slane %v4792_v34, 6  ;;  %5173 = vst [vmem:[#allocation1 + $0x23] ss:$4 sm:$0xff] %v4792_v34  ;;  %v5238_v18 = vsel %vm13052_vm3, %v5169_v49, 0.0 }
 0x966   : > { %v4717_v19 = vpop.f32.mrf.mxu0  ;;  %v13063_v2 = vpack.c.b16 %v6023_v36, %v6022_v21  ;;  %v5268_v55 = vpack.c.bf16 %v5238_v18, %v5238_v18  ;;  %v6151_v6 = vrot.slane %v6149_v63, 5  ;;  %v6300_v29 = vrot.slane %v5267_v22, 5  ;;  %v8327_v63 = vld [vmem:[%s13387_s3 + $0x1f0] sm:$0xff] }
 0x967   : > { %5623 = vmatmul.bf16.gmra.mxu1 %v13056_v60  ;;  %v4743_v53 = vadd.f32 %v4717_v19, %v12215_v48  ;;  %5175 = vst [vmem:[#allocation1] ss:$4 sm:$0xff] %v4880_v31  ;;  %v6155_v4 = vrot.slane %v6153_v35, 4 }
 0x968   : > { %5176 = vst [vmem:[#allocation1 + $0x1] ss:$4 sm:$0xff] %v4881_v37  ;;  %v6159_v61 = vshll.u32 %v5268_v55, 16  ;;  %v6303_v38 = vrot.slane %v5268_v55, 5  ;;  %v6152_v48 = vsel %vm12486_vm1, %v6147_v13, %v6151_v6  ;;  %v6301_v10 = vsel %vm12468_vm5, %v7995_v24, %v6300_v29  ;;  %6669 = vmatpush.bf16.msra.mxu1 %v8327_v63 }
 0x969   : > { %v4770_v54 = vadd.f32 %v12838_v5, %v4743_v53  ;;  %5177 = vst [vmem:[#allocation1 + $0x2] ss:$4 sm:$0xff] %v4882_v44  ;;  %v6302_v56 = vrot.slane %v6300_v29, 4  ;;  %v6156_v62 = vor.u32 %v6155_v4, %v6151_v6  ;;  %v6322_v12 = vunpack.c.l.b16 %v6301_v10 }
 0x96a   : > { %v6161_v50 = vrot.slane %v6159_v61, 5  ;;  %v6180_v9 = vunpack.c.l.b16 %v6152_v48 }
 0x96b   : > { %v4793_v28 = vmax.f32 %v4770_v54, 0.0  ;;  %6548 = vmatmul.bf16.gmra.mxu0 %v13063_v2  ;;  %v6304_v26 = vsel %vm12468_vm5, %v6302_v56, %v6303_v38  ;;  %v6157_v46 = vrot.slane %v6156_v62, 4 }
 0x96c   : > { %v5174_v5 = vld.sshfl [vmem:[#allocation1 + $0x20] sm:$0xff pattern:$0x73625140]  ;;  %v6323_v51 = vunpack.c.l.b16 %v6304_v26  ;;  %6670 = vmatpush.bf16.msra.mxu1 %v8326_v1  ;;  %v8330_v1 = vld [vmem:[%s13387_s3 + $0x208] sm:$0xff] }
 0x96d   : > { %v4883_v11 = vrot.slane %v4793_v28, 2  ;;  %6240 = vmatmul.bf16.vlgmr.msrb.gmra.mxu2 %v12613_v32  ;;  %5178 = vst [vmem:[#allocation1 + $0x3] ss:$4 sm:$0xff] %v4793_v28  ;;  %v5239_v22 = vsel %vm4959_vm8, %v5174_v5, 0.0  ;;  %v5734_v59 = vpop.f32.mrf.mxu2  ;;  %v6162_v49 = vsel %vm12486_vm1, %v6157_v46, %v6161_v50 }
 0x96e   : > { %v4719_v34 = vpop.f32.mrf.mxu0  ;;  %v5269_v21 = vpack.c.bf16 %v5239_v22, %v5239_v22  ;;  %v13090_v36 = vpack.c.b16 %v6323_v51, %v6322_v12  ;;  %v6181_v32 = vunpack.c.l.b16 %v6162_v49 }
 0x96f   : > { %5179 = vst [vmem:[#allocation1 + $0x20] ss:$4 sm:$0xff] %v4883_v11 }
 0x970   : > { %v6576_v41 = vshrl.u32 %v5269_v21, 16  ;;  %v6579_v31 = vshll.u32 %v5269_v21, 16  ;;  %v13095_v37 = vpack.c.b16 %v6181_v32, %v6180_v9  ;;  %v6458_v61 = vunpack.c.l.b16 %v5269_v21 }
 0x971   : > { %v8140_v29 = vrot.slane %v5269_v21, 9 }
 0x972   : > { %v6578_v44 = vrot.slane %v6576_v41, 4  ;;  %v6581_v18 = vrot.slane %v6579_v31, 5 }
 0x974   : > { %v5589_v19 = vpop.f32.mrf.mxu1  ;;  %v5180_v55 = vld.sshfl [vmem:[#allocation1] sm:$0xff pattern:$0x73625140]  ;;  %v6582_v38 = vor.u32 %v6581_v18, %v6578_v44 }
 0x975   : > { %v5735_v53 = vadd.f32 %v5734_v59, %v5589_v19  ;;  %6382 = vmatmul.bf16.vlgmr.msrb.gmra.mxu3 %v12586_v27  ;;  %v5240_v13 = vsel %vm13067_vm7, %v5180_v55, 0.0  ;;  %v5736_v54 = vpop.f32.mrf.mxu2  ;;  %v8334_v27 = vld [vmem:[%s13387_s3 + $0x228] sm:$0xff] }
 0x976   : > { %v5270_v6 = vpack.c.bf16 %v5240_v13, %v5240_v13  ;;  %v5181_v35 = vld.sshfl [vmem:[#allocation1 + $0x20] sm:$0xff pattern:$0x73625140]  ;;  %6812 = vmatpush.bf16.msra.mxu2 %v8334_v27  ;;  %v6583_v26 = vrot.slane %v6582_v38, 4 }
 0x977   : > { %6082 = vmatmul.bf16.vlgmr.msrb.gmra.mxu1 %v12551_v40  ;;  %v5241_v24 = vsel %vm4994_vm6, %v5181_v35, 0.0 }
 0x978   : > { %v5947_v48 = vpop.f32.mrf.mxu3  ;;  %v6459_v14 = vunpack.c.l.b16 %v5270_v6  ;;  %v5271_v4 = vpack.c.bf16 %v5241_v24, %v5241_v24  ;;  %v6736_v10 = vrot.slane %v5270_v6, 5  ;;  %v6585_v56 = vshll.u32 %v5270_v6, 16 }
 0x979   : > { %v13105_v28 = vadd.f32 %v5947_v48, %v5735_v53  ;;  %v6589_v30 = vshrl.u32 %v5270_v6, 16 }
 0x97a   : > { %v6460_v62 = vpack.c.b16 %v6459_v14, %v6458_v61  ;;  %v6737_v40 = vsel %vm12468_vm5, %v8140_v29, %v6736_v10  ;;  %v6738_v50 = vrot.slane %v6736_v10, 4  ;;  %v6739_v5 = vrot.slane %v5271_v4, 5  ;;  %6813 = vmatpush.bf16.msra.mxu2 %v8333_v42 }
 0x97b   : > { %v6587_v12 = vrot.slane %v6585_v56, 5  ;;  %v6591_v11 = vrot.slane %v6589_v30, 4  ;;  %v6595_v17 = vshll.u32 %v5271_v4, 16  ;;  %v6758_v51 = vunpack.c.l.b16 %v6737_v40 }
 0x97c   : > { %v5591_v22 = vpop.f32.mrf.mxu1  ;;  %6553 = vmatmul.bf16.gmra.mxu0 %v6460_v62  ;;  %v6740_v46 = vsel %vm12468_vm5, %v6738_v50, %v6739_v5  ;;  %v8332_v62 = vld [vmem:[%s13387_s3 + $0x218] sm:$0xff] }
 0x97d   : > { %v5737_v59 = vadd.f32 %v5736_v54, %v5591_v22  ;;  %6245 = vmatmul.bf16.gmra.mxu2 %v12684_v52  ;;  %v6759_v34 = vunpack.c.l.b16 %v6740_v46  ;;  %v6588_v21 = vsel %vm12486_vm1, %v6583_v26, %v6587_v12  ;;  %v6592_v49 = vor.u32 %v6591_v11, %v6587_v12  ;;  %v8324_v5 = vld [vmem:[%s13387_s3 + $0x1d8] sm:$0xff]  ;;  %v8331_v22 = vld [vmem:[%s13387_s3 + $0x210] sm:$0xff] }
 0x97e   : > { %v6597_v41 = vrot.slane %v6595_v17, 5  ;;  %v13126_v19 = vunpack.c.l.b16 %v6588_v21  ;;  %6814 = vmatpush.bf16.msra.mxu2 %v8332_v62 }
 0x97f   : > { %v13117_v9 = vpack.c.b16 %v6759_v34, %v6758_v51  ;;  %v6593_v32 = vrot.slane %v6592_v49, 4  ;;  %v8323_v34 = vld [vmem:[%s13387_s3 + $0x1d0] sm:$0xff] }
 0x980   : > { %v5949_v63 = vpop.f32.mrf.mxu3  ;;  %v5739_v31 = vpop.f32.mrf.mxu2 }
 0x981   : > { %v13119_v44 = vadd.f32 %v5949_v63, %v5737_v59  ;;  %v6598_v18 = vsel %vm12486_vm1, %v6593_v32, %v6597_v41 }
 0x982   : > { %v13128_v55 = vunpack.c.l.b16 %v6598_v18  ;;  %6815 = vmatpush.bf16.msra.mxu2 %v8331_v22 }
 0x984   : > { %v5594_v53 = vpop.f32.mrf.mxu1  ;;  %v6618_v13 = vpack.c.b16 %v13128_v55, %v13126_v19  ;;  %v13282_v55 = vld [vmem:[%s13388_s4] ss:$0 sm:$0xff] }
 0x985   : > { %v5740_v6 = vadd.f32 %v5739_v31, %v5594_v53  ;;  %6387 = vmatmul.bf16.gmra.mxu3 %v12676_v7 }
 0x986   : > { %6816 = vmatpush.bf16.msra.mxu2 %v8330_v1 }
 0x987   : > { %6087 = vmatmul.bf16.gmra.mxu1 %v12615_v57  ;;  %v8325_v57 = vld [vmem:[%s13387_s3 + $0x1e0] sm:$0xff] }
 0x988   : > { %v5952_v35 = vpop.f32.mrf.mxu3  ;;  %v5741_v61 = vpop.f32.mrf.mxu2  ;;  %6671 = vmatpush.bf16.msra.mxu1 %v8325_v57  ;;  %v8329_v57 = vld [vmem:[%s13387_s3 + $0x200] sm:$0xff] }
 0x989   : > { %v13134_v24 = vadd.f32 %v5952_v35, %v5740_v6  ;;  %v8322_v35 = vld [vmem:[%s13387_s3 + $0x1c8] sm:$0xff] }
 0x98a   : > { %6817 = vmatpush.bf16.msra.mxu2 %v8329_v57 }
 0x98c   : > { %v5596_v29 = vpop.f32.mrf.mxu1  ;;  %6672 = vmatpush.bf16.msra.mxu1 %v8324_v5 }
 0x98d   : > { %v5742_v38 = vadd.f32 %v5741_v61, %v5596_v29  ;;  %6250 = vmatmul.bf16.gmra.mxu2 %v12757_v8 }
 0x990   : > { %v5954_v54 = vpop.f32.mrf.mxu3  ;;  %v5744_v48 = vpop.f32.mrf.mxu2  ;;  %6673 = vmatpush.bf16.msra.mxu1 %v8323_v34 }
 0x991   : > { %v13140_v14 = vadd.f32 %v5954_v54, %v5742_v38 }
 0x994   : > { %v5599_v4 = vpop.f32.mrf.mxu1  ;;  %6674 = vmatpush.bf16.msra.mxu1 %v8322_v35 }
 0x995   : > { %v5745_v10 = vadd.f32 %v5744_v48, %v5599_v4  ;;  %6392 = vmatmul.bf16.gmra.mxu3 %v12749_v39 }
 0x997   : > { %6092 = vmatmul.bf16.gmra.mxu1 %v12707_v33 }
 0x998   : > { %v5957_v56 = vpop.f32.mrf.mxu3  ;;  %v5746_v27 = vpop.f32.mrf.mxu2 }
 0x999   : > { %v13147_v30 = vadd.f32 %v5957_v56, %v5745_v10 }
 0x99c   : > { %v5601_v40 = vpop.f32.mrf.mxu1 }
 0x99d   : > { %v5747_v50 = vadd.f32 %v5746_v27, %v5601_v40  ;;  %6255 = vmatmul.bf16.gmra.mxu2 %v12844_v0  ;;  %v8321_v27 = vld [vmem:[%s13387_s3 + $0x1c0] sm:$0xff] }
 0x99e   : > { %6675 = vmatpush.bf16.msra.mxu1 %v8321_v27 }
 0x9a0   : > { %v5959_v26 = vpop.f32.mrf.mxu3  ;;  %v5749_v33 = vpop.f32.mrf.mxu2 }
 0x9a1   : > { %v13156_v12 = vadd.f32 %v5959_v26, %v5747_v50 }
 0x9a4   : > { %v5604_v11 = vpop.f32.mrf.mxu1 }
 0x9a5   : > { %v5750_v17 = vadd.f32 %v5749_v33, %v5604_v11  ;;  %6397 = vmatmul.bf16.gmra.mxu3 %v12833_v20 }
 0x9a7   : > { %6097 = vmatmul.bf16.gmra.mxu1 %v12786_v47 }
 0x9a8   : > { %v5962_v46 = vpop.f32.mrf.mxu3  ;;  %v5751_v51 = vpop.f32.mrf.mxu2 }
 0x9a9   : > { %v13163_v59 = vadd.f32 %v5962_v46, %v5750_v17 }
 0x9ac   : > { %v5606_v21 = vpop.f32.mrf.mxu1 }
 0x9ad   : > { %v5752_v49 = vadd.f32 %v5751_v51, %v5606_v21  ;;  %6260 = vmatmul.bf16.gmra.mxu2 %v12929_v43 }
 0x9b0   : > { %v5964_v32 = vpop.f32.mrf.mxu3  ;;  %v5754_v41 = vpop.f32.mrf.mxu2 }
 0x9b1   : > { %v13169_v63 = vadd.f32 %v5964_v32, %v5752_v49 }
 0x9b4   : > { %v5609_v31 = vpop.f32.mrf.mxu1 }
 0x9b5   : > { %v5755_v47 = vadd.f32 %v5754_v41, %v5609_v31  ;;  %6402 = vmatmul.bf16.gmra.mxu3 %v12913_v23 }
 0x9b7   : > { %6102 = vmatmul.bf16.gmra.mxu1 %v12860_v58 }
 0x9b8   : > { %v5756_v18 = vpop.f32.mrf.mxu2  ;;  %v5967_v53 = vpop.f32.mrf.mxu3 }
 0x9b9   : > { %v13176_v6 = vadd.f32 %v5967_v53, %v5755_v47 }
 0x9bc   : > { %v5611_v61 = vpop.f32.mrf.mxu1 }
 0x9bd   : > { %v5757_v42 = vadd.f32 %v5756_v18, %v5611_v61  ;;  %6265 = vmatmul.bf16.gmra.mxu2 %v12987_v15 }
 0x9c0   : > { %v5969_v29 = vpop.f32.mrf.mxu3  ;;  %v5759_v38 = vpop.f32.mrf.mxu2 }
 0x9c1   : > { %v13182_v54 = vadd.f32 %v5969_v29, %v5757_v42 }
 0x9c4   : > { %v5614_v48 = vpop.f32.mrf.mxu1 }
 0x9c5   : > { %v5760_v58 = vadd.f32 %v5759_v38, %v5614_v48  ;;  %6407 = vmatmul.bf16.gmra.mxu3 %v12973_v16 }
 0x9c7   : > { %6107 = vmatmul.bf16.gmra.mxu1 %v12946_v45 }
 0x9c8   : > { %v5972_v4 = vpop.f32.mrf.mxu3  ;;  %v5761_v10 = vpop.f32.mrf.mxu2 }
 0x9c9   : > { %v13189_v56 = vadd.f32 %v5972_v4, %v5760_v58 }
 0x9cc   : > { %v5616_v62 = vpop.f32.mrf.mxu1 }
 0x9cd   : > { %v5762_v40 = vadd.f32 %v5761_v10, %v5616_v62  ;;  %6270 = vmatmul.bf16.gmra.mxu2 %v13056_v60 }
 0x9d0   : > { %v5974_v50 = vpop.f32.mrf.mxu3  ;;  %v5764_v5 = vpop.f32.mrf.mxu2 }
 0x9d1   : > { %v13195_v26 = vadd.f32 %v5974_v50, %v5762_v40 }
 0x9d4   : > { %v5619_v33 = vpop.f32.mrf.mxu1 }
 0x9d5   : > { %6412 = vmatmul.bf16.gmra.mxu3 %v13037_v25  ;;  %v5765_v45 = vadd.f32 %v5764_v5, %v5619_v33 }
 0x9d7   : > { %6112 = vmatmul.bf16.gmra.mxu1 %v12995_v3 }
 0x9d8   : > { %v5977_v11 = vpop.f32.mrf.mxu3  ;;  %v5766_v17 = vpop.f32.mrf.mxu2 }
 0x9d9   : > { %v13199_v22 = vadd.f32 %v5977_v11, %v5765_v45 }
 0x9dc   : > { %v5621_v46 = vpop.f32.mrf.mxu1 }
 0x9dd   : > { %v5767_v51 = vadd.f32 %v5766_v17, %v5621_v46  ;;  %6275 = vmatmul.bf16.gmra.mxu2 %v13095_v37 }
 0x9e0   : > { %v5979_v34 = vpop.f32.mrf.mxu3  ;;  %v5769_v21 = vpop.f32.mrf.mxu2 }
 0x9e1   : > { %v13202_v49 = vadd.f32 %v5979_v34, %v5767_v51 }
 0x9e4   : > { %v5624_v32 = vpop.f32.mrf.mxu1 }
 0x9e5   : > { %6417 = vmatmul.bf16.gmra.mxu3 %v13090_v36  ;;  %v5770_v41 = vadd.f32 %v5769_v21, %v5624_v32 }
 0x9e7   : > { %6117 = vmatmul.bf16.gmra.mxu1 %v13063_v2 }
 0x9e8   : > { %v5982_v31 = vpop.f32.mrf.mxu3  ;;  %v5771_v3 = vpop.f32.mrf.mxu2 }
 0x9e9   : > { %v13206_v47 = vadd.f32 %v5982_v31, %v5770_v41 }
 0x9ec   : > { %v5626_v1 = vpop.f32.mrf.mxu1 }
 0x9ed   : > { %v5772_v18 = vadd.f32 %v5771_v3, %v5626_v1  ;;  %6818 = vmatmul.bf16.vlgmr.msra.gmra.mxu2 %v12676_v7 }
 0x9f0   : > { %v5984_v53 = vpop.f32.mrf.mxu3  ;;  %v6241_v35 = vpop.f32.mrf.mxu2 }
 0x9f1   : > { %v13209_v61 = vadd.f32 %v5984_v53, %v5772_v18 }
 0x9f4   : > { %v6083_v42 = vpop.f32.mrf.mxu1 }
 0x9f5   : > { %v6123_v29 = vadd.f32 %v6083_v42, %v13105_v28 }
 0x9f7   : > { %v13212_v38 = vadd.f32 %v6241_v35, %v6123_v29  ;;  %6676 = vmatmul.bf16.vlgmr.msra.gmra.mxu1 %v12684_v52  ;;  %v6519_v29 = vpop.f32.mrf.mxu0 }
 0x9f8   : > { %v6243_v2 = vpop.f32.mrf.mxu2 }
 0x9fc   : > { %v6085_v48 = vpop.f32.mrf.mxu1 }
 0x9fd   : > { %v6124_v58 = vadd.f32 %v6085_v48, %v13119_v44  ;;  %6823 = vmatmul.bf16.gmra.mxu2 %v12749_v39 }
 0x9ff   : > { %v13217_v57 = vadd.f32 %v6243_v2, %v6124_v58  ;;  %v6521_v58 = vpop.f32.mrf.mxu0 }
 0xa00   : > { %v6246_v7 = vpop.f32.mrf.mxu2 }
 0xa04   : > { %v6088_v4 = vpop.f32.mrf.mxu1 }
 0xa05   : > { %v6125_v10 = vadd.f32 %v6088_v4, %v13134_v24 }
 0xa07   : > { %v13220_v27 = vadd.f32 %v6246_v7, %v6125_v10  ;;  %6681 = vmatmul.bf16.gmra.mxu1 %v12757_v8 }
 0xa08   : > { %v6248_v28 = vpop.f32.mrf.mxu2 }
 0xa0c   : > { %v6090_v62 = vpop.f32.mrf.mxu1 }
 0xa0d   : > { %v6126_v52 = vadd.f32 %v6090_v62, %v13140_v14  ;;  %6828 = vmatmul.bf16.gmra.mxu2 %v12833_v20 }
 0xa0f   : > { %v13225_v40 = vadd.f32 %v6248_v28, %v6126_v52  ;;  %v6524_v28 = vpop.f32.mrf.mxu0 }
 0xa10   : > { %v6251_v44 = vpop.f32.mrf.mxu2 }
 0xa14   : > { %v6093_v39 = vpop.f32.mrf.mxu1 }
 0xa15   : > { %v6127_v50 = vadd.f32 %v6093_v39, %v13147_v30 }
 0xa17   : > { %v13228_v5 = vadd.f32 %v6251_v44, %v6127_v50  ;;  %6686 = vmatmul.bf16.gmra.mxu1 %v12844_v0 }
 0xa18   : > { %v6253_v24 = vpop.f32.mrf.mxu2 }
 0xa1c   : > { %v6095_v33 = vpop.f32.mrf.mxu1 }
 0xa1d   : > { %v6128_v8 = vadd.f32 %v6095_v33, %v13156_v12  ;;  %6833 = vmatmul.bf16.gmra.mxu2 %v12913_v23 }
 0xa1f   : > { %v13233_v45 = vadd.f32 %v6253_v24, %v6128_v8  ;;  %v8397_v8 = vld [vmem:[%s8628_s8 + $0x38] sm:$0xff] }
 0xa20   : > { %v6256_v14 = vpop.f32.mrf.mxu2 }
 0xa24   : > { %v6098_v20 = vpop.f32.mrf.mxu1 }
 0xa25   : > { %v6129_v11 = vadd.f32 %v6098_v20, %v13163_v59 }
 0xa27   : > { %v13236_v17 = vadd.f32 %v6256_v14, %v6129_v11  ;;  %6691 = vmatmul.bf16.gmra.mxu1 %v12929_v43  ;;  %v6901_v14 = vrot.slane %v8397_v8, 2 }
 0xa28   : > { %v6258_v30 = vpop.f32.mrf.mxu2 }
 0xa2c   : > { %v6100_v46 = vpop.f32.mrf.mxu1 }
 0xa2d   : > { %v6130_v0 = vadd.f32 %v6100_v46, %v13169_v63  ;;  %6838 = vmatmul.bf16.gmra.mxu2 %v12973_v16 }
 0xa2f   : > { %v13241_v51 = vadd.f32 %v6258_v30, %v6130_v0 }
 0xa30   : > { %v6261_v12 = vpop.f32.mrf.mxu2 }
 0xa34   : > { %v6103_v23 = vpop.f32.mrf.mxu1 }
 0xa35   : > { %v6131_v34 = vadd.f32 %v6103_v23, %v13176_v6 }
 0xa37   : > { %v13244_v21 = vadd.f32 %v6261_v12, %v6131_v34  ;;  %6696 = vmatmul.bf16.gmra.mxu1 %v12987_v15  ;;  %v8398_v34 = vld [vmem:[%s8628_s8 + $0x40] sm:$0xf] }
 0xa38   : > { %v6263_v59 = vpop.f32.mrf.mxu2 }
 0xa3c   : > { %v6105_v32 = vpop.f32.mrf.mxu1 }
 0xa3d   : > { %v6132_v43 = vadd.f32 %v6105_v32, %v13182_v54  ;;  %6843 = vmatmul.bf16.gmra.mxu2 %v13037_v25  ;;  %v6383_v54 = vpop.f32.mrf.mxu3 }
 0xa3e   : > { %v6423_v52 = vadd.f32 %v6383_v54, %v13212_v38 }
 0xa3f   : > { %v13249_v41 = vadd.f32 %v6263_v59, %v6132_v43  ;;  %v6903_v59 = vrot.slane %v8398_v34, 2 }
 0xa40   : > { %v6266_v63 = vpop.f32.mrf.mxu2  ;;  %v6559_v50 = vadd.f32 %v6519_v29, %v6423_v52  ;;  %v8400_v29 = vld [vmem:[%s8628_s8 + $0x50] sm:$0xff]  ;;  %v8401_v52 = vld [vmem:[%s8628_s8 + $0x58] sm:$0xf] }
 0xa44   : > { %v6108_v16 = vpop.f32.mrf.mxu1 }
 0xa45   : > { %v6133_v31 = vadd.f32 %v6108_v16, %v13189_v56  ;;  %v6904_v16 = vsel %vm6899_vm11, %v6901_v14, %v6903_v59 }
 0xa47   : > { %v13252_v3 = vadd.f32 %v6266_v63, %v6133_v31  ;;  %6701 = vmatmul.bf16.gmra.mxu1 %v13056_v60  ;;  %v6385_v60 = vpop.f32.mrf.mxu3 }
 0xa48   : > { %v6268_v6 = vpop.f32.mrf.mxu2 }
 0xa4c   : > { %v6110_v1 = vpop.f32.mrf.mxu1 }
 0xa4d   : > { %v6134_v15 = vadd.f32 %v6110_v1, %v13195_v26  ;;  %6848 = vmatmul.bf16.gmra.mxu2 %v13090_v36 }
 0xa4f   : > { %v13257_v18 = vadd.f32 %v6268_v6, %v6134_v15  ;;  %v6388_v7 = vpop.f32.mrf.mxu3 }
 0xa50   : > { %v6271_v25 = vpop.f32.mrf.mxu2  ;;  %v6425_v63 = vadd.f32 %v6388_v7, %v13220_v27 }
 0xa54   : > { %v6113_v53 = vpop.f32.mrf.mxu1 }
 0xa55   : > { %v6135_v35 = vadd.f32 %v6113_v53, %v13199_v22 }
 0xa57   : > { %v13260_v42 = vadd.f32 %v6271_v25, %v6135_v35  ;;  %6706 = vmatmul.bf16.gmra.mxu1 %v13095_v37  ;;  %v6390_v62 = vpop.f32.mrf.mxu3  ;;  %v6561_v25 = vadd.f32 %v6524_v28, %v6425_v63  ;;  %v8399_v35 = vld [vmem:[%s8628_s8 + $0x48] sm:$0xff] }
 0xa58   : > { %v6273_v56 = vpop.f32.mrf.mxu2 }
 0xa5c   : > { %v6115_v2 = vpop.f32.mrf.mxu1 }
 0xa5d   : > { %v6136_v48 = vadd.f32 %v6115_v2, %v13202_v49  ;;  %6853 = vmatmul.bf16.gmra.mxu2 %v13117_v9 }
 0xa5f   : > { %v13265_v36 = vadd.f32 %v6273_v56, %v6136_v48  ;;  %v6393_v20 = vpop.f32.mrf.mxu3  ;;  %v6905_v56 = vrot.slane %v8399_v35, 2  ;;  %v6426_v48 = vadd.f32 %v6390_v62, %v13225_v40 }
 0xa60   : > { %v6276_v26 = vpop.f32.mrf.mxu2  ;;  %v6427_v40 = vadd.f32 %v6393_v20, %v13228_v5 }
 0xa64   : > { %v6118_v4 = vpop.f32.mrf.mxu1 }
 0xa65   : > { %v6137_v22 = vadd.f32 %v6118_v4, %v13206_v47  ;;  %v8396_v47 = vld [vmem:[%s8628_s8 + $0x30] sm:$0xff] }
 0xa66   : > { %v6900_v33 = vrot.slane %v8396_v47, 2 }
 0xa67   : > { %v13268_v10 = vadd.f32 %v6276_v26, %v6137_v22  ;;  %6711 = vmatmul.bf16.gmra.mxu1 %v6618_v13  ;;  %v6526_v13 = vpop.f32.mrf.mxu0  ;;  %v6395_v15 = vpop.f32.mrf.mxu3 }
 0xa68   : > { %v6278_v37 = vpop.f32.mrf.mxu2  ;;  %v6902_v11 = vsel %vm6899_vm11, %v6900_v33, %v6901_v14  ;;  %v6428_v20 = vadd.f32 %v6395_v15, %v13233_v45 }
 0xa6c   : > { %v6120_v49 = vpop.f32.mrf.mxu1 }
 0xa6d   : > { %v6138_v9 = vadd.f32 %v6120_v49, %v13209_v61  ;;  %v6424_v61 = vadd.f32 %v6385_v60, %v13217_v57  ;;  %v6906_v60 = vrot.slane %v8400_v29, 2  ;;  %v6562_v49 = vadd.f32 %v6526_v13, %v6426_v48 }
 0xa6f   : > { %v13275_v44 = vadd.f32 %v6278_v37, %v6138_v9  ;;  %v6560_v12 = vadd.f32 %v6521_v58, %v6424_v61  ;;  %v6529_v6 = vpop.f32.mrf.mxu0  ;;  %v6907_v58 = vsel %vm6899_vm11, %v6905_v56, %v6906_v60  ;;  %v6398_v28 = vpop.f32.mrf.mxu3 }
 0xa70   : > { %v6819_v39 = vpop.f32.mrf.mxu2 }
 0xa74   : > { %v6677_v24 = vpop.f32.mrf.mxu1 }
 0xa75   : > { %v6717_v19 = vadd.f32 %v6677_v24, %v6559_v50 }
 0xa77   : > { %v6859_v38 = vadd.f32 %v6819_v39, %v6717_v19  ;;  %v6531_v22 = vpop.f32.mrf.mxu0  ;;  %v6908_v39 = vrot.slane %v8401_v52, 2  ;;  %v6563_v19 = vadd.f32 %v6529_v6, %v6427_v40  ;;  %v6400_v5 = vpop.f32.mrf.mxu3  ;;  %v8407_v40 = vld [vmem:[%s8628_s8 + $0x88] sm:$0xf] }
 0xa78   : > { %v6821_v30 = vpop.f32.mrf.mxu2  ;;  %v6564_v63 = vadd.f32 %v6531_v22, %v6428_v20  ;;  %v6430_v22 = vadd.f32 %v6400_v5, %v13241_v51  ;;  %v8409_v5 = vld [vmem:[%s8628_s8 + $0x98] sm:$0xff] }
 0xa79   : > { %v6960_v46 = vadd.f32 %v13282_v55, %v6859_v38  ;;  %v6909_v47 = vsel %vm6899_vm11, %v6906_v60, %v6908_v39  ;;  %v8402_v38 = vld [vmem:[%s8628_s8 + $0x60] sm:$0xff]  ;;  %v6921_v20 = vrot.slane %v8409_v5, 2 }
 0xa7b   : > { %v6976_v0 = vadd.f32 %v6960_v46, %v6902_v11  ;;  %v6910_v11 = vrot.slane %v8402_v38, 2 }
 0xa7c   : > { %v6679_v23 = vpop.f32.mrf.mxu1 }
 0xa7d   : > { %v6992_v32 = vmax.f32 %v6976_v0, 0.0  ;;  %v6718_v43 = vadd.f32 %v6679_v23, %v6560_v12 }
 0xa7f   : > { %7008 = vst [vmem:[%s8539_s13] sm:$0xff] %v6992_v32  ;;  %v6860_v57 = vadd.f32 %v6821_v30, %v6718_v43  ;;  %v6534_v13 = vpop.f32.mrf.mxu0  ;;  %v8403_v30 = vld [vmem:[%s8628_s8 + $0x68] sm:$0xff]  ;;  %v6403_v15 = vpop.f32.mrf.mxu3 }
 0xa80   : > { %v6824_v31 = vpop.f32.mrf.mxu2  ;;  %v6911_v46 = vrot.slane %v8403_v30, 2 }
 0xa81   : > { %v6961_v1 = vadd.f32 %v13282_v55, %v6860_v57 }
 0xa82   : > { %v6912_v34 = vsel %vm6899_vm11, %v6910_v11, %v6911_v46 }
 0xa83   : > { %v6977_v54 = vadd.f32 %v6961_v1, %v6904_v16  ;;  %v8404_v16 = vld [vmem:[%s8628_s8 + $0x70] sm:$0xf] }
 0xa84   : > { %v6682_v53 = vpop.f32.mrf.mxu1 }
 0xa85   : > { %v6993_v2 = vmax.f32 %v6977_v54, 0.0  ;;  %v6719_v27 = vadd.f32 %v6682_v53, %v6561_v25  ;;  %v6429_v25 = vadd.f32 %v6398_v28, %v13236_v17 }
 0xa87   : > { %7009 = vst [vmem:[%s8539_s13 + $0x8] sm:$0xff] %v6993_v2  ;;  %v6861_v26 = vadd.f32 %v6824_v31, %v6719_v27  ;;  %v6913_v31 = vrot.slane %v8404_v16, 2  ;;  %v6536_v54 = vpop.f32.mrf.mxu0  ;;  %v6565_v60 = vadd.f32 %v6534_v13, %v6429_v25  ;;  %v8405_v27 = vld [vmem:[%s8628_s8 + $0x78] sm:$0xff]  ;;  %v6405_v52 = vpop.f32.mrf.mxu3 }
 0xa88   : > { %v6826_v7 = vpop.f32.mrf.mxu2  ;;  %v6915_v48 = vrot.slane %v8405_v27, 2 }
 0xa89   : > { %v6962_v4 = vadd.f32 %v13282_v55, %v6861_v26  ;;  %v6914_v53 = vsel %vm6899_vm11, %v6911_v46, %v6913_v31  ;;  %v8406_v26 = vld [vmem:[%s8628_s8 + $0x80] sm:$0xff] }
 0xa8b   : > { %v6978_v37 = vadd.f32 %v6962_v4, %v6907_v58  ;;  %v6916_v58 = vrot.slane %v8406_v26, 2  ;;  %v8411_v26 = vld [vmem:[%s8628_s8 + $0xa8] sm:$0xff] }
 0xa8c   : > { %v6684_v9 = vpop.f32.mrf.mxu1 }
 0xa8d   : > { %v6994_v50 = vmax.f32 %v6978_v37, 0.0  ;;  %v6720_v24 = vadd.f32 %v6684_v9, %v6562_v49  ;;  %v6917_v49 = vsel %vm6899_vm11, %v6915_v48, %v6916_v58 }
 0xa8f   : > { %7010 = vst [vmem:[%s8539_s13 + $0x10] sm:$0xff] %v6994_v50  ;;  %v6862_v62 = vadd.f32 %v6826_v7, %v6720_v24  ;;  %v6539_v17 = vpop.f32.mrf.mxu0  ;;  %v6566_v50 = vadd.f32 %v6536_v54, %v6430_v22  ;;  %v6408_v30 = vpop.f32.mrf.mxu3 }
 0xa90   : > { %v6829_v33 = vpop.f32.mrf.mxu2 }
 0xa91   : > { %v6963_v8 = vadd.f32 %v13282_v55, %v6862_v62  ;;  %v6918_v62 = vrot.slane %v8407_v40, 2  ;;  %v8413_v40 = vld [vmem:[%s8628_s8 + $0xb8] sm:$0xf] }
 0xa93   : > { %v6979_v14 = vadd.f32 %v6963_v8, %v6909_v47  ;;  %v6431_v8 = vadd.f32 %v6403_v15, %v13244_v21 }
 0xa94   : > { %v6687_v61 = vpop.f32.mrf.mxu1 }
 0xa95   : > { %v6995_v0 = vmax.f32 %v6979_v14, 0.0  ;;  %v6721_v12 = vadd.f32 %v6687_v61, %v6563_v19  ;;  %v6919_v19 = vsel %vm6899_vm11, %v6916_v58, %v6918_v62  ;;  %v6567_v11 = vadd.f32 %v6539_v17, %v6431_v8 }
 0xa96   : > { %v6925_v58 = vrot.slane %v8411_v26, 2  ;;  %v6928_v62 = vrot.slane %v8413_v40, 2 }
 0xa97   : > { %7011 = vst [vmem:[%s8539_s13 + $0x18] sm:$0xff] %v6995_v0  ;;  %v6863_v23 = vadd.f32 %v6829_v33, %v6721_v12  ;;  %v6541_v14 = vpop.f32.mrf.mxu0  ;;  %v8408_v0 = vld [vmem:[%s8628_s8 + $0x90] sm:$0xff]  ;;  %v6410_v15 = vpop.f32.mrf.mxu3 }
 0xa98   : > { %v6831_v59 = vpop.f32.mrf.mxu2  ;;  %v6920_v12 = vrot.slane %v8408_v0, 2 }
 0xa99   : > { %v6964_v32 = vadd.f32 %v13282_v55, %v6863_v23 }
 0xa9b   : > { %v6980_v43 = vadd.f32 %v6964_v32, %v6912_v34  ;;  %v6432_v34 = vadd.f32 %v6405_v52, %v13249_v41  ;;  %v6922_v32 = vsel %vm6899_vm11, %v6920_v12, %v6921_v20  ;;  %v6433_v41 = vadd.f32 %v6408_v30, %v13252_v3  ;;  %v8415_v12 = vld [vmem:[%s8628_s8 + $0xc8] sm:$0xff] }
 0xa9c   : > { %v6689_v57 = vpop.f32.mrf.mxu1  ;;  %v6434_v3 = vadd.f32 %v6410_v15, %v13257_v18  ;;  %v6931_v5 = vrot.slane %v8415_v12, 2 }
 0xa9d   : > { %v6996_v6 = vmax.f32 %v6980_v43, 0.0  ;;  %v6722_v1 = vadd.f32 %v6689_v57, %v6564_v63  ;;  %v6568_v31 = vadd.f32 %v6541_v14, %v6432_v34 }
 0xa9f   : > { %7012 = vst [vmem:[%s8539_s13 + $0x20] sm:$0xff] %v6996_v6  ;;  %v6864_v45 = vadd.f32 %v6831_v59, %v6722_v1  ;;  %v6544_v57 = vpop.f32.mrf.mxu0  ;;  %v8410_v1 = vld [vmem:[%s8628_s8 + $0xa0] sm:$0xf] }
 0xaa0   : > { %v6834_v35 = vpop.f32.mrf.mxu2  ;;  %v6923_v54 = vrot.slane %v8410_v1, 2 }
 0xaa1   : > { %v6965_v56 = vadd.f32 %v13282_v55, %v6864_v45 }
 0xaa3   : > { %v6981_v29 = vadd.f32 %v6965_v56, %v6914_v53 }
 0xaa4   : > { %v6692_v2 = vpop.f32.mrf.mxu1 }
 0xaa5   : > { %v6997_v7 = vmax.f32 %v6981_v29, 0.0  ;;  %v6723_v4 = vadd.f32 %v6692_v2, %v6565_v60  ;;  %v6569_v2 = vadd.f32 %v6544_v57, %v6433_v41 }
 0xaa7   : > { %7013 = vst [vmem:[%s8539_s13 + $0x28] sm:$0xff] %v6997_v7  ;;  %v6865_v37 = vadd.f32 %v6834_v35, %v6723_v4  ;;  %v6924_v35 = vsel %vm6899_vm11, %v6921_v20, %v6923_v54  ;;  %v6546_v27 = vpop.f32.mrf.mxu0  ;;  %v8412_v7 = vld [vmem:[%s8628_s8 + $0xb0] sm:$0xff] }
 0xaa8   : > { %v6836_v28 = vpop.f32.mrf.mxu2  ;;  %v6926_v4 = vrot.slane %v8412_v7, 2 }
 0xaa9   : > { %v6966_v9 = vadd.f32 %v13282_v55, %v6865_v37 }
 0xaaa   : > { %v6929_v14 = vsel %vm6899_vm11, %v6926_v4, %v6928_v62 }
 0xaab   : > { %v6982_v39 = vadd.f32 %v6966_v9, %v6917_v49  ;;  %v6413_v49 = vpop.f32.mrf.mxu3 }
 0xaac   : > { %v6694_v24 = vpop.f32.mrf.mxu1  ;;  %v6435_v18 = vadd.f32 %v6413_v49, %v13260_v42 }
 0xaad   : > { %v6998_v47 = vmax.f32 %v6982_v39, 0.0  ;;  %v6724_v33 = vadd.f32 %v6694_v24, %v6566_v50  ;;  %v6570_v50 = vadd.f32 %v6546_v27, %v6434_v3 }
 0xaaf   : > { %7014 = vst [vmem:[%s8539_s13 + $0x30] sm:$0xff] %v6998_v47  ;;  %v6866_v51 = vadd.f32 %v6836_v28, %v6724_v33  ;;  %v6927_v28 = vsel %vm6899_vm11, %v6925_v58, %v6926_v4  ;;  %v6549_v8 = vpop.f32.mrf.mxu0 }
 0xab0   : > { %v6839_v13 = vpop.f32.mrf.mxu2 }
 0xab1   : > { %v6967_v61 = vadd.f32 %v13282_v55, %v6866_v51 }
 0xab3   : > { %v6983_v38 = vadd.f32 %v6967_v61, %v6919_v19  ;;  %v6415_v61 = vpop.f32.mrf.mxu3 }
 0xab4   : > { %v6697_v46 = vpop.f32.mrf.mxu1  ;;  %v6436_v42 = vadd.f32 %v6415_v61, %v13265_v36 }
 0xab5   : > { %v6999_v23 = vmax.f32 %v6983_v38, 0.0  ;;  %v6725_v21 = vadd.f32 %v6697_v46, %v6567_v11  ;;  %v6571_v11 = vadd.f32 %v6549_v8, %v6435_v18  ;;  %v8414_v46 = vld [vmem:[%s8628_s8 + $0xc0] sm:$0xff] }
 0xab6   : > { %v6930_v0 = vrot.slane %v8414_v46, 2 }
 0xab7   : > { %7015 = vst [vmem:[%s8539_s13 + $0x38] sm:$0xff] %v6999_v23  ;;  %v6867_v59 = vadd.f32 %v6839_v13, %v6725_v21  ;;  %v6551_v34 = vpop.f32.mrf.mxu0 }
 0xab8   : > { %v6841_v43 = vpop.f32.mrf.mxu2  ;;  %v6572_v57 = vadd.f32 %v6551_v34, %v6436_v42 }
 0xab9   : > { %v6968_v63 = vadd.f32 %v13282_v55, %v6867_v59  ;;  %v6932_v59 = vsel %vm6899_vm11, %v6930_v0, %v6931_v5 }
 0xabb   : > { %v6984_v16 = vadd.f32 %v6968_v63, %v6922_v32 }
 0xabc   : > { %v6699_v6 = vpop.f32.mrf.mxu1 }
 0xabd   : > { %v7000_v25 = vmax.f32 %v6984_v16, 0.0  ;;  %v6726_v45 = vadd.f32 %v6699_v6, %v6568_v31  ;;  %v6418_v16 = vpop.f32.mrf.mxu3  ;;  %v8416_v6 = vld [vmem:[%s8628_s8 + $0xd0] sm:$0xf] }
 0xabe   : > { %v6933_v1 = vrot.slane %v8416_v6, 2  ;;  %v6437_v36 = vadd.f32 %v6418_v16, %v13268_v10 }
 0xabf   : > { %7016 = vst [vmem:[%s8539_s13 + $0x40] sm:$0xff] %v7000_v25  ;;  %v6868_v53 = vadd.f32 %v6841_v43, %v6726_v45  ;;  %v6554_v15 = vpop.f32.mrf.mxu0 }
 0xac0   : > { %v6844_v56 = vpop.f32.mrf.mxu2  ;;  %v6934_v41 = vsel %vm6899_vm11, %v6931_v5, %v6933_v1 }
 0xac1   : > { %v6969_v29 = vadd.f32 %v13282_v55, %v6868_v53 }
 0xac3   : > { %v6985_v60 = vadd.f32 %v6969_v29, %v6924_v35 }
 0xac4   : > { %v6702_v48 = vpop.f32.mrf.mxu1 }
 0xac5   : > { %v7001_v17 = vmax.f32 %v6985_v60, 0.0  ;;  %v6727_v22 = vadd.f32 %v6702_v48, %v6569_v2  ;;  %v8417_v2 = vld [vmem:[%s8628_s8 + $0xd8] sm:$0xff]  ;;  %v8418_v48 = vld [vmem:[%s8628_s8 + $0xe0] sm:$0xff]  ;;  %v6420_v10 = vpop.f32.mrf.mxu3 }
 0xac6   : > { %v6935_v27 = vrot.slane %v8417_v2, 2  ;;  %v6936_v26 = vrot.slane %v8418_v48, 2  ;;  %v6438_v4 = vadd.f32 %v6420_v10, %v13275_v44 }
 0xac7   : > { %7017 = vst [vmem:[%s8539_s13 + $0x48] sm:$0xff] %v7001_v17  ;;  %v6869_v37 = vadd.f32 %v6844_v56, %v6727_v22  ;;  %v6573_v56 = vadd.f32 %v6554_v15, %v6437_v36 }
 0xac8   : > { %v6846_v9 = vpop.f32.mrf.mxu2  ;;  %v6937_v22 = vsel %vm6899_vm11, %v6935_v27, %v6936_v26 }
 0xac9   : > { %v6970_v52 = vadd.f32 %v13282_v55, %v6869_v37  ;;  %v6556_v37 = vpop.f32.mrf.mxu0 }
 0xacb   : > { %v6986_v39 = vadd.f32 %v6970_v52, %v6927_v28  ;;  %v6574_v28 = vadd.f32 %v6556_v37, %v6438_v4  ;;  %v8419_v52 = vld [vmem:[%s8628_s8 + $0xe8] sm:$0xf] }
 0xacc   : > { %v6704_v24 = vpop.f32.mrf.mxu1 }
 0xacd   : > { %v7002_v47 = vmax.f32 %v6986_v39, 0.0  ;;  %v6728_v33 = vadd.f32 %v6704_v24, %v6570_v50  ;;  %v6938_v39 = vrot.slane %v8419_v52, 2 }
 0xacf   : > { %7018 = vst [vmem:[%s8539_s13 + $0x50] sm:$0xff] %v7002_v47  ;;  %v6870_v51 = vadd.f32 %v6846_v9, %v6728_v33  ;;  %v6939_v44 = vsel %vm6899_vm11, %v6936_v26, %v6938_v39 }
 0xad0   : > { %v6849_v19 = vpop.f32.mrf.mxu2 }
 0xad1   : > { %v6971_v13 = vadd.f32 %v13282_v55, %v6870_v51 }
 0xad3   : > { %v6987_v38 = vadd.f32 %v6971_v13, %v6929_v14 }
 0xad4   : > { %v6707_v30 = vpop.f32.mrf.mxu1 }
 0xad5   : > { %v7003_v20 = vmax.f32 %v6987_v38, 0.0  ;;  %v6729_v23 = vadd.f32 %v6707_v30, %v6571_v11 }
 0xad7   : > { %7019 = vst [vmem:[%s8539_s13 + $0x58] sm:$0xff] %v7003_v20  ;;  %v6871_v21 = vadd.f32 %v6849_v19, %v6729_v23 }
 0xad8   : > { %v6851_v43 = vpop.f32.mrf.mxu2 }
 0xad9   : > { %v6972_v32 = vadd.f32 %v13282_v55, %v6871_v21 }
 0xadb   : > { %v6988_v63 = vadd.f32 %v6972_v32, %v6932_v59 }
 0xadc   : > { %v6709_v31 = vpop.f32.mrf.mxu1 }
 0xadd   : > { %v7004_v54 = vmax.f32 %v6988_v63, 0.0  ;;  %v6730_v25 = vadd.f32 %v6709_v31, %v6572_v57 }
 0xadf   : > { %7020 = vst [vmem:[%s8539_s13 + $0x60] sm:$0xff] %v7004_v54  ;;  %v6872_v45 = vadd.f32 %v6851_v43, %v6730_v25 }
 0xae0   : > { %v6854_v29 = vpop.f32.mrf.mxu2 }
 0xae1   : > { %v6973_v53 = vadd.f32 %v13282_v55, %v6872_v45 }
 0xae3   : > { %v6989_v35 = vadd.f32 %v6973_v53, %v6934_v41 }
 0xae4   : > { %v6712_v60 = vpop.f32.mrf.mxu1 }
 0xae5   : > { %v7005_v58 = vmax.f32 %v6989_v35, 0.0  ;;  %v6731_v7 = vadd.f32 %v6712_v60, %v6573_v56 }
 0xae7   : > { %7021 = vst [vmem:[%s8539_s13 + $0x68] sm:$0xff] %v7005_v58  ;;  %v6873_v17 = vadd.f32 %v6854_v29, %v6731_v7 }
 0xae8   : > { %v6856_v40 = vpop.f32.mrf.mxu2 }
 0xae9   : > { %v6974_v3 = vadd.f32 %v13282_v55, %v6873_v17 }
 0xaeb   : > { %v6990_v49 = vadd.f32 %v6974_v3, %v6937_v22 }
 0xaec   : > { %v6714_v9 = vpop.f32.mrf.mxu1 }
 0xaed   : > { %v7006_v50 = vmax.f32 %v6990_v49, 0.0  ;;  %v6732_v24 = vadd.f32 %v6714_v9, %v6574_v28 }
 0xaef   : > { %7022 = vst [vmem:[%s8539_s13 + $0x70] sm:$0xff] %v7006_v50  ;;  %v6874_v62 = vadd.f32 %v6856_v40, %v6732_v24 }
 0xaf1   : > { %v6975_v47 = vadd.f32 %v13282_v55, %v6874_v62 }
 0xaf3   : > { %v6991_v33 = vadd.f32 %v6975_v47, %v6939_v44 }
 0xaf5   : > { %v7007_v8 = vmax.f32 %v6991_v33, 0.0 }
 0xaf7   : > { %7023 = vst [vmem:[%s8539_s13 + $0x78] sm:$0xff] %v7007_v8 }
 0xaf8 PF: > { %s15_s22 = sadd.s32 1, %s8460_s22   ;;  %s14934_s18 = smov %s8452_s20 }
 0xaf9   : > { %p12_p11 = scmp.ge.s32.totalorder %s15_s22, 6   ;;  %s14935_s19 = smov %s8456_s21 }
 0xafa   : > { %s14936_s20 = smov %s14939_s23  ;;  %s14937_s21 = smov %s14943_s24 }
 0xafb   :  { %14 = sbr.rel (!%p12_p11) target bundleno = 3 (0x3), region = 251 }
 0xb00   :  { %7056 = vsyncmov [#allocation3] }
 0xb03   :  { %s7057_s13 = vpop.sfrf %7056 }
 0xb04   :  { %p8191_p12 = scmp.ne.s32.totalorder %s7057_s13, 0 }
 0xb06   :  { %7061 = shalt.err (%p8191_p12)  }
 0xb07   :  { %7063 = vsyncmov [#allocation3 + $0x1] }
 0xb0a   :  { %s7064_s8 = vpop.sfrf %7063 }
 0xb0b   :  { %p8192_p13 = scmp.ne.s32.totalorder %s7064_s8, 0 }
 0xb0d   :  { %7068 = shalt.err (%p8192_p13)  }

</bundles_post_ra>
